<compile_context>
chip_gen: v7x
topology: tpu7x:2x2x1
jax: 0.10.0
libtpu: 0.0.40
codegen_flags: <defaults>
</compile_context>

<pallas_src>
import jax
import jax.numpy as jnp
from jax.experimental import pallas as pl
from jax.experimental.pallas import tpu as pltpu

_VAL_PAD = 128  # lane-dense width for the (B,1) validity output


def vaegan_kernel(
    # inputs
    x_ref, eps_ref,
    # encoder params (mu|logvar head fused into wmulv/bmulv)
    ew1, eb1, ew2, eb2, wmulv, bmulv,
    # decoder params
    dw1, db1, dw2, db2, dw3, db3,
    # discriminator params (gw3/gb3 zero-padded to 128 lanes)
    gw1, gb1, gw2, gb2, gw3, gb3,
    # outputs
    recon_ref, mu_ref, logvar_ref, val_ref,
):
    latent = mu_ref.shape[-1]

    def mm(a_bf16, w_ref, b_ref):
        # bf16 x bf16 MXU matmul, f32 accumulation, f32 bias add.
        return jnp.dot(a_bf16, w_ref[...],
                       preferred_element_type=jnp.float32) + b_ref[...]

    def relu_bf16(t):
        # Keep inter-layer activations bf16: halves spill / ld-st traffic.
        return jnp.maximum(t, 0.0).astype(jnp.bfloat16)

    x = x_ref[...].astype(jnp.bfloat16)

    # ---- Encoder ----
    h = relu_bf16(mm(x, ew1, eb1))                      # (TB, 1024) bf16
    h = relu_bf16(mm(h, ew2, eb2))                      # (TB, 512)  bf16
    ml = mm(h, wmulv, bmulv)                            # (TB, 2*latent) f32, one N=256 pass
    mu = ml[:, :latent]
    logvar = ml[:, latent:]
    mu_ref[...] = mu
    logvar_ref[...] = logvar

    # ---- Reparameterize (f32): z = mu + eps * exp(0.5 * logvar) ----
    # TODO(synk): eps is an explicit input; pltpu.prng_seed/prng_random_bits
    # could generate it on-chip if host-RNG reproducibility is not required.
    z = mu + eps_ref[...] * jnp.exp(0.5 * logvar)

    # ---- Decoder ----
    h = relu_bf16(mm(z.astype(jnp.bfloat16), dw1, db1))  # (TB, 512)
    h = relu_bf16(mm(h, dw2, db2))                       # (TB, 1024)
    recon = jnp.tanh(mm(h, dw3, db3))                    # (TB, input_dim) f32
    recon_ref[...] = recon

    # ---- Discriminator (lane-dense padded head) ----
    h = relu_bf16(mm(recon.astype(jnp.bfloat16), gw1, gb1))  # (TB, 512)
    h = relu_bf16(mm(h, gw2, gb2))                           # (TB, 256)
    val_ref[...] = jax.nn.sigmoid(mm(h, gw3, gb3))           # (TB, 128); col 0 = real logit


_PARAM_ORDER = [
    "ew1", "eb1", "ew2", "eb2", "wmulv", "bmulv",
    "dw1", "db1", "dw2", "db2", "dw3", "db3",
    "gw1", "gb1", "gw2", "gb2", "gw3", "gb3",
]


def make_params(key, input_dim, latent_dim):
    """Deterministic synthetic parameters. Weights (in,out) in bf16, biases (1,out) in f32."""
    layer_dims = {
        "ew1": (input_dim, 1024), "ew2": (1024, 512),
        "wmu": (512, latent_dim), "wlv": (512, latent_dim),
        "dw1": (latent_dim, 512), "dw2": (512, 1024), "dw3": (1024, input_dim),
        "gw1": (input_dim, 512),  "gw2": (512, 256),  "gw3": (256, 1),
    }
    bias_of = {"ew1": "eb1", "ew2": "eb2", "wmu": "bmu", "wlv": "blv",
               "dw1": "db1", "dw2": "db2", "dw3": "db3",
               "gw1": "gb1", "gw2": "gb2", "gw3": "gb3"}
    params = {}
    for i, (wname, (fan_in, fan_out)) in enumerate(layer_dims.items()):
        kw = jax.random.fold_in(key, 2 * i)
        kb = jax.random.fold_in(key, 2 * i + 1)
        scale = 1.0 / float(fan_in) ** 0.5
        w = jax.random.normal(kw, (fan_in, fan_out), jnp.float32) * scale
        b = jax.random.normal(kb, (1, fan_out), jnp.float32) * scale
        params[wname] = w.astype(jnp.bfloat16)   # bf16 weights: halve DMA bytes
        params[bias_of[wname]] = b               # f32 biases
    return params


def prep_params(params):
    """One-time kernel-ready packing: fuse mu|logvar head, pad discriminator head to 128 lanes."""
    p = dict(params)
    wmulv = jnp.concatenate([p.pop("wmu"), p.pop("wlv")], axis=1)   # (512, 2*latent) bf16
    bmulv = jnp.concatenate([p.pop("bmu"), p.pop("blv")], axis=1)   # (1, 2*latent)   f32
    gw3 = p.pop("gw3")                                              # (256, 1) bf16
    gb3 = p.pop("gb3")                                              # (1, 1)   f32
    gw3_p = jnp.zeros((gw3.shape[0], _VAL_PAD), gw3.dtype).at[:, :1].set(gw3)
    gb3_p = jnp.zeros((1, _VAL_PAD), gb3.dtype).at[:, :1].set(gb3)
    p.update(wmulv=wmulv, bmulv=bmulv, gw3=gw3_p, gb3=gb3_p)
    return p


def vaegan_forward(x, eps, kparams, *, batch_tile=256):
    """kparams must come from prep_params()."""
    B, input_dim = x.shape
    latent_dim = eps.shape[1]

    TB = min(B, batch_tile)
    assert B % TB == 0 and TB % 16 == 0, "batch must tile in bf16-sublane-aligned blocks"
    nb = B // TB

    args = [x, eps] + [kparams[n] for n in _PARAM_ORDER]

    def row_spec(width):
        # Batch-tiled activation/output blocks (default double-buffered).
        return pl.BlockSpec((TB, width), lambda i: (i, 0))

    def const_spec(arr):
        # Full-array block, constant index -> DMA'd once, VMEM-resident across
        # batch tiles. Single-buffered: the second pipeline buffer would be
        # pure VMEM waste for never-changing blocks.
        return pl.BlockSpec(arr.shape, lambda i: (0, 0),
                            pipeline_mode=pl.Buffered(1))

    in_specs = [row_spec(input_dim), row_spec(latent_dim)] + \
               [const_spec(kparams[n]) for n in _PARAM_ORDER]
    out_specs = [row_spec(input_dim), row_spec(latent_dim),
                 row_spec(latent_dim), row_spec(_VAL_PAD)]
    out_shape = (
        jax.ShapeDtypeStruct((B, input_dim), jnp.float32),   # recon
        jax.ShapeDtypeStruct((B, latent_dim), jnp.float32),  # mu
        jax.ShapeDtypeStruct((B, latent_dim), jnp.float32),  # logvar
        jax.ShapeDtypeStruct((B, _VAL_PAD), jnp.float32),    # validity (padded)
    )

    fn = pl.pallas_call(
        vaegan_kernel,
        out_shape=out_shape,
        grid_spec=pltpu.PrefetchScalarGridSpec(
            num_scalar_prefetch=0,
            grid=(nb,),
            in_specs=in_specs,
            out_specs=out_specs,
        ),
        compiler_params=pltpu.CompilerParams(
            dimension_semantics=("parallel",),    # independent batch tiles -> v7x 2-TC split
            vmem_limit_bytes=32 * 1024 * 1024,    # legal on v5e/v6e/v7x; footprint ~8 MiB
        ),
    )
    recon, mu, logvar, val_pad = fn(*args)
    return recon, mu, logvar, val_pad[:, :1]


if __name__ == "__main__":
    B = 64            # multiple of 16 (bf16 sublane packing)
    INPUT_DIM = 256
    LATENT_DIM = 128

    key = jax.random.PRNGKey(0)
    kx, keps, kp = jax.random.split(key, 3)

    x = jax.random.normal(kx, (B, INPUT_DIM), jnp.float32)
    eps = jax.random.normal(keps, (B, LATENT_DIM), jnp.float32)
    raw_params = make_params(kp, INPUT_DIM, LATENT_DIM)
    kparams = prep_params(raw_params)   # one-time packing, reused across calls

    # batch_tile=32 so the demo exercises nb=2 grid tiles with VMEM-resident weights.
    recon, mu, logvar, validity = vaegan_forward(x, eps, kparams, batch_tile=32)
    jax.block_until_ready((recon, mu, logvar, validity))

    # Plain-JAX reference mirroring the kernel's bf16-weight / bf16-activation /
    # f32-accumulate math (reparameterize and heads in f32).
    def ref_forward(x, eps, p):
        def mm(a, w, b):
            return jnp.dot(a.astype(jnp.bfloat16), w,
                           preferred_element_type=jnp.float32) + b

        def relu_bf16(t):
            return jnp.maximum(t, 0.0).astype(jnp.bfloat16)

        h = relu_bf16(mm(x, p["ew1"], p["eb1"]))
        h = relu_bf16(mm(h, p["ew2"], p["eb2"]))
        mu_r = mm(h, p["wmu"], p["bmu"])
        lv_r = mm(h, p["wlv"], p["blv"])
        z = mu_r + eps * jnp.exp(0.5 * lv_r)
        h = relu_bf16(mm(z, p["dw1"], p["db1"]))
        h = relu_bf16(mm(h, p["dw2"], p["db2"]))
        rec = jnp.tanh(mm(h, p["dw3"], p["db3"]))
        h = relu_bf16(mm(rec, p["gw1"], p["gb1"]))
        h = relu_bf16(mm(h, p["gw2"], p["gb2"]))
        val = jax.nn.sigmoid(mm(h, p["gw3"], p["gb3"]))
        return rec, mu_r, lv_r, val

    rr, rmu, rlv, rv = ref_forward(x, eps, raw_params)
    assert jnp.allclose(recon, rr, atol=2e-2, rtol=2e-2)
    assert jnp.allclose(mu, rmu, atol=2e-2, rtol=2e-2)
    assert jnp.allclose(logvar, rlv, atol=2e-2, rtol=2e-2)
    assert jnp.allclose(validity, rv, atol=2e-2, rtol=2e-2)

    print("KERNEL_OK")
</pallas_src>

<mosaic_0001>
module attributes {stable_mosaic.version = 11 : i64} {
  func.func @vaegan_kernel(%arg0: i32, %arg1: memref<32x256xf32, #tpu.memory_space<vmem>>, %arg2: memref<32x128xf32, #tpu.memory_space<vmem>>, %arg3: memref<256x1024xbf16, #tpu.memory_space<vmem>>, %arg4: memref<1x1024xf32, #tpu.memory_space<vmem>>, %arg5: memref<1024x512xbf16, #tpu.memory_space<vmem>>, %arg6: memref<1x512xf32, #tpu.memory_space<vmem>>, %arg7: memref<512x256xbf16, #tpu.memory_space<vmem>>, %arg8: memref<1x256xf32, #tpu.memory_space<vmem>>, %arg9: memref<128x512xbf16, #tpu.memory_space<vmem>>, %arg10: memref<1x512xf32, #tpu.memory_space<vmem>>, %arg11: memref<512x1024xbf16, #tpu.memory_space<vmem>>, %arg12: memref<1x1024xf32, #tpu.memory_space<vmem>>, %arg13: memref<1024x256xbf16, #tpu.memory_space<vmem>>, %arg14: memref<1x256xf32, #tpu.memory_space<vmem>>, %arg15: memref<256x512xbf16, #tpu.memory_space<vmem>>, %arg16: memref<1x512xf32, #tpu.memory_space<vmem>>, %arg17: memref<512x256xbf16, #tpu.memory_space<vmem>>, %arg18: memref<1x256xf32, #tpu.memory_space<vmem>>, %arg19: memref<256x128xbf16, #tpu.memory_space<vmem>>, %arg20: memref<1x128xf32, #tpu.memory_space<vmem>>, %arg21: memref<32x256xf32, #tpu.memory_space<vmem>>, %arg22: memref<32x128xf32, #tpu.memory_space<vmem>>, %arg23: memref<32x128xf32, #tpu.memory_space<vmem>>, %arg24: memref<32x128xf32, #tpu.memory_space<vmem>>) attributes {dimension_semantics = [#tpu.dimension_semantics<parallel>], iteration_bounds = array<i64: 2>, scalar_prefetch = 0 : i64, scratch_operands = 0 : i64, tpu.core_type = #tpu.core_type<tc>, window_params = [{transform_indices = @transform_0, window_bounds = array<i64: 32, 256>}, {transform_indices = @transform_1, window_bounds = array<i64: 32, 128>}, {pipeline_mode = #tpu.pipeline_mode<synchronous>, transform_indices = @transform_2, window_bounds = array<i64: 256, 1024>}, {pipeline_mode = #tpu.pipeline_mode<synchronous>, transform_indices = @transform_3, window_bounds = array<i64: 1, 1024>}, {pipeline_mode = #tpu.pipeline_mode<synchronous>, transform_indices = @transform_4, window_bounds = array<i64: 1024, 512>}, {pipeline_mode = #tpu.pipeline_mode<synchronous>, transform_indices = @transform_5, window_bounds = array<i64: 1, 512>}, {pipeline_mode = #tpu.pipeline_mode<synchronous>, transform_indices = @transform_6, window_bounds = array<i64: 512, 256>}, {pipeline_mode = #tpu.pipeline_mode<synchronous>, transform_indices = @transform_7, window_bounds = array<i64: 1, 256>}, {pipeline_mode = #tpu.pipeline_mode<synchronous>, transform_indices = @transform_8, window_bounds = array<i64: 128, 512>}, {pipeline_mode = #tpu.pipeline_mode<synchronous>, transform_indices = @transform_9, window_bounds = array<i64: 1, 512>}, {pipeline_mode = #tpu.pipeline_mode<synchronous>, transform_indices = @transform_10, window_bounds = array<i64: 512, 1024>}, {pipeline_mode = #tpu.pipeline_mode<synchronous>, transform_indices = @transform_11, window_bounds = array<i64: 1, 1024>}, {pipeline_mode = #tpu.pipeline_mode<synchronous>, transform_indices = @transform_12, window_bounds = array<i64: 1024, 256>}, {pipeline_mode = #tpu.pipeline_mode<synchronous>, transform_indices = @transform_13, window_bounds = array<i64: 1, 256>}, {pipeline_mode = #tpu.pipeline_mode<synchronous>, transform_indices = @transform_14, window_bounds = array<i64: 256, 512>}, {pipeline_mode = #tpu.pipeline_mode<synchronous>, transform_indices = @transform_15, window_bounds = array<i64: 1, 512>}, {pipeline_mode = #tpu.pipeline_mode<synchronous>, transform_indices = @transform_16, window_bounds = array<i64: 512, 256>}, {pipeline_mode = #tpu.pipeline_mode<synchronous>, transform_indices = @transform_17, window_bounds = array<i64: 1, 256>}, {pipeline_mode = #tpu.pipeline_mode<synchronous>, transform_indices = @transform_18, window_bounds = array<i64: 256, 128>}, {pipeline_mode = #tpu.pipeline_mode<synchronous>, transform_indices = @transform_19, window_bounds = array<i64: 1, 128>}, {transform_indices = @transform_20, window_bounds = array<i64: 32, 256>}, {transform_indices = @transform_21, window_bounds = array<i64: 32, 128>}, {transform_indices = @transform_22, window_bounds = array<i64: 32, 128>}, {transform_indices = @transform_23, window_bounds = array<i64: 32, 128>}]} {
    %c0 = arith.constant 0 : index
    %c0_0 = arith.constant 0 : index
    %0 = vector.load %arg1[%c0, %c0_0] : memref<32x256xf32, #tpu.memory_space<vmem>>, vector<32x256xf32>
    %1 = arith.truncf %0 : vector<32x256xf32> to vector<32x256xbf16>
    %c0_1 = arith.constant 0 : index
    %c0_2 = arith.constant 0 : index
    %2 = vector.load %arg3[%c0_1, %c0_2] : memref<256x1024xbf16, #tpu.memory_space<vmem>>, vector<256x1024xbf16>
    %cst = arith.constant dense<0.000000e+00> : vector<32x1024xf32>
    %3 = tpu.matmul %1, %2, %cst {dimension_numbers = #tpu.dot_dimension_numbers<[1], [0], [0], [1], [0, 0, 1, 1], [], []>} : vector<32x256xbf16>, vector<256x1024xbf16>, vector<32x1024xf32> -> vector<32x1024xf32>
    %c0_3 = arith.constant 0 : index
    %c0_4 = arith.constant 0 : index
    %4 = vector.load %arg4[%c0_3, %c0_4] : memref<1x1024xf32, #tpu.memory_space<vmem>>, vector<1x1024xf32>
    %5 = vector.broadcast %4 : vector<1x1024xf32> to vector<32x1024xf32>
    %6 = arith.addf %3, %5 : vector<32x1024xf32>
    %cst_5 = arith.constant 0.000000e+00 : f32
    %7 = vector.broadcast %cst_5 : f32 to vector<32x1024xf32>
    %8 = arith.maximumf %6, %7 : vector<32x1024xf32>
    %9 = arith.truncf %8 : vector<32x1024xf32> to vector<32x1024xbf16>
    %c0_6 = arith.constant 0 : index
    %c0_7 = arith.constant 0 : index
    %10 = vector.load %arg5[%c0_6, %c0_7] : memref<1024x512xbf16, #tpu.memory_space<vmem>>, vector<1024x512xbf16>
    %cst_8 = arith.constant dense<0.000000e+00> : vector<32x512xf32>
    %11 = tpu.matmul %9, %10, %cst_8 {dimension_numbers = #tpu.dot_dimension_numbers<[1], [0], [0], [1], [0, 0, 1, 1], [], []>} : vector<32x1024xbf16>, vector<1024x512xbf16>, vector<32x512xf32> -> vector<32x512xf32>
    %c0_9 = arith.constant 0 : index
    %c0_10 = arith.constant 0 : index
    %12 = vector.load %arg6[%c0_9, %c0_10] : memref<1x512xf32, #tpu.memory_space<vmem>>, vector<1x512xf32>
    %13 = vector.broadcast %12 : vector<1x512xf32> to vector<32x512xf32>
    %14 = arith.addf %11, %13 : vector<32x512xf32>
    %cst_11 = arith.constant 0.000000e+00 : f32
    %15 = vector.broadcast %cst_11 : f32 to vector<32x512xf32>
    %16 = arith.maximumf %14, %15 : vector<32x512xf32>
    %17 = arith.truncf %16 : vector<32x512xf32> to vector<32x512xbf16>
    %c0_12 = arith.constant 0 : index
    %c0_13 = arith.constant 0 : index
    %18 = vector.load %arg7[%c0_12, %c0_13] : memref<512x256xbf16, #tpu.memory_space<vmem>>, vector<512x256xbf16>
    %cst_14 = arith.constant dense<0.000000e+00> : vector<32x256xf32>
    %19 = tpu.matmul %17, %18, %cst_14 {dimension_numbers = #tpu.dot_dimension_numbers<[1], [0], [0], [1], [0, 0, 1, 1], [], []>} : vector<32x512xbf16>, vector<512x256xbf16>, vector<32x256xf32> -> vector<32x256xf32>
    %c0_15 = arith.constant 0 : index
    %c0_16 = arith.constant 0 : index
    %20 = vector.load %arg8[%c0_15, %c0_16] : memref<1x256xf32, #tpu.memory_space<vmem>>, vector<1x256xf32>
    %21 = vector.broadcast %20 : vector<1x256xf32> to vector<32x256xf32>
    %22 = arith.addf %19, %21 : vector<32x256xf32>
    %23 = vector.extract_strided_slice %22 {offsets = [0, 0], sizes = [32, 128], strides = [1, 1]} : vector<32x256xf32> to vector<32x128xf32>
    %24 = vector.extract_strided_slice %22 {offsets = [0, 128], sizes = [32, 128], strides = [1, 1]} : vector<32x256xf32> to vector<32x128xf32>
    %c0_17 = arith.constant 0 : index
    %c0_18 = arith.constant 0 : index
    %25 = vector.load %arg22[%c0_17, %c0_18] : memref<32x128xf32, #tpu.memory_space<vmem>>, vector<32x128xf32>
    tpu.vector_store %arg22[%c0_17, %c0_18], %23 {strides = array<i32>} : memref<32x128xf32, #tpu.memory_space<vmem>>, vector<32x128xf32>,
    %c0_19 = arith.constant 0 : index
    %c0_20 = arith.constant 0 : index
    %26 = vector.load %arg23[%c0_19, %c0_20] : memref<32x128xf32, #tpu.memory_space<vmem>>, vector<32x128xf32>
    tpu.vector_store %arg23[%c0_19, %c0_20], %24 {strides = array<i32>} : memref<32x128xf32, #tpu.memory_space<vmem>>, vector<32x128xf32>,
    %c0_21 = arith.constant 0 : index
    %c0_22 = arith.constant 0 : index
    %27 = vector.load %arg2[%c0_21, %c0_22] : memref<32x128xf32, #tpu.memory_space<vmem>>, vector<32x128xf32>
    %cst_23 = arith.constant 5.000000e-01 : f32
    %28 = vector.broadcast %cst_23 : f32 to vector<32x128xf32>
    %29 = arith.mulf %28, %24 : vector<32x128xf32>
    %30 = math.exp %29 : vector<32x128xf32>
    %31 = arith.mulf %27, %30 : vector<32x128xf32>
    %32 = arith.addf %23, %31 : vector<32x128xf32>
    %33 = arith.truncf %32 : vector<32x128xf32> to vector<32x128xbf16>
    %c0_24 = arith.constant 0 : index
    %c0_25 = arith.constant 0 : index
    %34 = vector.load %arg9[%c0_24, %c0_25] : memref<128x512xbf16, #tpu.memory_space<vmem>>, vector<128x512xbf16>
    %cst_26 = arith.constant dense<0.000000e+00> : vector<32x512xf32>
    %35 = tpu.matmul %33, %34, %cst_26 {dimension_numbers = #tpu.dot_dimension_numbers<[1], [0], [0], [1], [0, 0, 1, 1], [], []>} : vector<32x128xbf16>, vector<128x512xbf16>, vector<32x512xf32> -> vector<32x512xf32>
    %c0_27 = arith.constant 0 : index
    %c0_28 = arith.constant 0 : index
    %36 = vector.load %arg10[%c0_27, %c0_28] : memref<1x512xf32, #tpu.memory_space<vmem>>, vector<1x512xf32>
    %37 = vector.broadcast %36 : vector<1x512xf32> to vector<32x512xf32>
    %38 = arith.addf %35, %37 : vector<32x512xf32>
    %cst_29 = arith.constant 0.000000e+00 : f32
    %39 = vector.broadcast %cst_29 : f32 to vector<32x512xf32>
    %40 = arith.maximumf %38, %39 : vector<32x512xf32>
    %41 = arith.truncf %40 : vector<32x512xf32> to vector<32x512xbf16>
    %c0_30 = arith.constant 0 : index
    %c0_31 = arith.constant 0 : index
    %42 = vector.load %arg11[%c0_30, %c0_31] : memref<512x1024xbf16, #tpu.memory_space<vmem>>, vector<512x1024xbf16>
    %cst_32 = arith.constant dense<0.000000e+00> : vector<32x1024xf32>
    %43 = tpu.matmul %41, %42, %cst_32 {dimension_numbers = #tpu.dot_dimension_numbers<[1], [0], [0], [1], [0, 0, 1, 1], [], []>} : vector<32x512xbf16>, vector<512x1024xbf16>, vector<32x1024xf32> -> vector<32x1024xf32>
    %c0_33 = arith.constant 0 : index
    %c0_34 = arith.constant 0 : index
    %44 = vector.load %arg12[%c0_33, %c0_34] : memref<1x1024xf32, #tpu.memory_space<vmem>>, vector<1x1024xf32>
    %45 = vector.broadcast %44 : vector<1x1024xf32> to vector<32x1024xf32>
    %46 = arith.addf %43, %45 : vector<32x1024xf32>
    %cst_35 = arith.constant 0.000000e+00 : f32
    %47 = vector.broadcast %cst_35 : f32 to vector<32x1024xf32>
    %48 = arith.maximumf %46, %47 : vector<32x1024xf32>
    %49 = arith.truncf %48 : vector<32x1024xf32> to vector<32x1024xbf16>
    %c0_36 = arith.constant 0 : index
    %c0_37 = arith.constant 0 : index
    %50 = vector.load %arg13[%c0_36, %c0_37] : memref<1024x256xbf16, #tpu.memory_space<vmem>>, vector<1024x256xbf16>
    %cst_38 = arith.constant dense<0.000000e+00> : vector<32x256xf32>
    %51 = tpu.matmul %49, %50, %cst_38 {dimension_numbers = #tpu.dot_dimension_numbers<[1], [0], [0], [1], [0, 0, 1, 1], [], []>} : vector<32x1024xbf16>, vector<1024x256xbf16>, vector<32x256xf32> -> vector<32x256xf32>
    %c0_39 = arith.constant 0 : index
    %c0_40 = arith.constant 0 : index
    %52 = vector.load %arg14[%c0_39, %c0_40] : memref<1x256xf32, #tpu.memory_space<vmem>>, vector<1x256xf32>
    %53 = vector.broadcast %52 : vector<1x256xf32> to vector<32x256xf32>
    %54 = arith.addf %51, %53 : vector<32x256xf32>
    %55 = math.tanh %54 : vector<32x256xf32>
    %c0_41 = arith.constant 0 : index
    %c0_42 = arith.constant 0 : index
    %56 = vector.load %arg21[%c0_41, %c0_42] : memref<32x256xf32, #tpu.memory_space<vmem>>, vector<32x256xf32>
    tpu.vector_store %arg21[%c0_41, %c0_42], %55 {strides = array<i32>} : memref<32x256xf32, #tpu.memory_space<vmem>>, vector<32x256xf32>,
    %57 = arith.truncf %55 : vector<32x256xf32> to vector<32x256xbf16>
    %c0_43 = arith.constant 0 : index
    %c0_44 = arith.constant 0 : index
    %58 = vector.load %arg15[%c0_43, %c0_44] : memref<256x512xbf16, #tpu.memory_space<vmem>>, vector<256x512xbf16>
    %cst_45 = arith.constant dense<0.000000e+00> : vector<32x512xf32>
    %59 = tpu.matmul %57, %58, %cst_45 {dimension_numbers = #tpu.dot_dimension_numbers<[1], [0], [0], [1], [0, 0, 1, 1], [], []>} : vector<32x256xbf16>, vector<256x512xbf16>, vector<32x512xf32> -> vector<32x512xf32>
    %c0_46 = arith.constant 0 : index
    %c0_47 = arith.constant 0 : index
    %60 = vector.load %arg16[%c0_46, %c0_47] : memref<1x512xf32, #tpu.memory_space<vmem>>, vector<1x512xf32>
    %61 = vector.broadcast %60 : vector<1x512xf32> to vector<32x512xf32>
    %62 = arith.addf %59, %61 : vector<32x512xf32>
    %cst_48 = arith.constant 0.000000e+00 : f32
    %63 = vector.broadcast %cst_48 : f32 to vector<32x512xf32>
    %64 = arith.maximumf %62, %63 : vector<32x512xf32>
    %65 = arith.truncf %64 : vector<32x512xf32> to vector<32x512xbf16>
    %c0_49 = arith.constant 0 : index
    %c0_50 = arith.constant 0 : index
    %66 = vector.load %arg17[%c0_49, %c0_50] : memref<512x256xbf16, #tpu.memory_space<vmem>>, vector<512x256xbf16>
    %cst_51 = arith.constant dense<0.000000e+00> : vector<32x256xf32>
    %67 = tpu.matmul %65, %66, %cst_51 {dimension_numbers = #tpu.dot_dimension_numbers<[1], [0], [0], [1], [0, 0, 1, 1], [], []>} : vector<32x512xbf16>, vector<512x256xbf16>, vector<32x256xf32> -> vector<32x256xf32>
    %c0_52 = arith.constant 0 : index
    %c0_53 = arith.constant 0 : index
    %68 = vector.load %arg18[%c0_52, %c0_53] : memref<1x256xf32, #tpu.memory_space<vmem>>, vector<1x256xf32>
    %69 = vector.broadcast %68 : vector<1x256xf32> to vector<32x256xf32>
    %70 = arith.addf %67, %69 : vector<32x256xf32>
    %cst_54 = arith.constant 0.000000e+00 : f32
    %71 = vector.broadcast %cst_54 : f32 to vector<32x256xf32>
    %72 = arith.maximumf %70, %71 : vector<32x256xf32>
    %73 = arith.truncf %72 : vector<32x256xf32> to vector<32x256xbf16>
    %c0_55 = arith.constant 0 : index
    %c0_56 = arith.constant 0 : index
    %74 = vector.load %arg19[%c0_55, %c0_56] : memref<256x128xbf16, #tpu.memory_space<vmem>>, vector<256x128xbf16>
    %cst_57 = arith.constant dense<0.000000e+00> : vector<32x128xf32>
    %75 = tpu.matmul %73, %74, %cst_57 {dimension_numbers = #tpu.dot_dimension_numbers<[1], [0], [0], [1], [0, 0, 1, 1], [], []>} : vector<32x256xbf16>, vector<256x128xbf16>, vector<32x128xf32> -> vector<32x128xf32>
    %c0_58 = arith.constant 0 : index
    %c0_59 = arith.constant 0 : index
    %76 = vector.load %arg20[%c0_58, %c0_59] : memref<1x128xf32, #tpu.memory_space<vmem>>, vector<1x128xf32>
    %77 = vector.broadcast %76 : vector<1x128xf32> to vector<32x128xf32>
    %78 = arith.addf %75, %77 : vector<32x128xf32>
    %79 = arith.negf %78 : vector<32x128xf32>
    %80 = math.exp %79 : vector<32x128xf32>
    %cst_60 = arith.constant 1.000000e+00 : f32
    %81 = vector.broadcast %cst_60 : f32 to vector<32x128xf32>
    %82 = arith.addf %81, %80 : vector<32x128xf32>
    %83 = arith.divf %81, %82 : vector<32x128xf32>
    %c0_61 = arith.constant 0 : index
    %c0_62 = arith.constant 0 : index
    %84 = vector.load %arg24[%c0_61, %c0_62] : memref<32x128xf32, #tpu.memory_space<vmem>>, vector<32x128xf32>
    tpu.vector_store %arg24[%c0_61, %c0_62], %83 {strides = array<i32>} : memref<32x128xf32, #tpu.memory_space<vmem>>, vector<32x128xf32>,
    return
  }
  func.func @transform_0(%arg0: i32) -> (i32, i32) {
    %c0_i32 = arith.constant 0 : i32
    %c0_i32_0 = arith.constant 0 : i32
    return %arg0, %c0_i32 : i32, i32
  }
  func.func @transform_1(%arg0: i32) -> (i32, i32) {
    %c0_i32 = arith.constant 0 : i32
    %c0_i32_0 = arith.constant 0 : i32
    return %arg0, %c0_i32 : i32, i32
  }
  func.func @transform_2(%arg0: i32) -> (i32, i32) {
    %c0_i32 = arith.constant 0 : i32
    %c0_i32_0 = arith.constant 0 : i32
    %c0_i32_1 = arith.constant 0 : i32
    return %c0_i32, %c0_i32_0 : i32, i32
  }
  func.func @transform_3(%arg0: i32) -> (i32, i32) {
    %c0_i32 = arith.constant 0 : i32
    %c0_i32_0 = arith.constant 0 : i32
    %c0_i32_1 = arith.constant 0 : i32
    return %c0_i32, %c0_i32_0 : i32, i32
  }
  func.func @transform_4(%arg0: i32) -> (i32, i32) {
    %c0_i32 = arith.constant 0 : i32
    %c0_i32_0 = arith.constant 0 : i32
    %c0_i32_1 = arith.constant 0 : i32
    return %c0_i32, %c0_i32_0 : i32, i32
  }
  func.func @transform_5(%arg0: i32) -> (i32, i32) {
    %c0_i32 = arith.constant 0 : i32
    %c0_i32_0 = arith.constant 0 : i32
    %c0_i32_1 = arith.constant 0 : i32
    return %c0_i32, %c0_i32_0 : i32, i32
  }
  func.func @transform_6(%arg0: i32) -> (i32, i32) {
    %c0_i32 = arith.constant 0 : i32
    %c0_i32_0 = arith.constant 0 : i32
    %c0_i32_1 = arith.constant 0 : i32
    return %c0_i32, %c0_i32_0 : i32, i32
  }
  func.func @transform_7(%arg0: i32) -> (i32, i32) {
    %c0_i32 = arith.constant 0 : i32
    %c0_i32_0 = arith.constant 0 : i32
    %c0_i32_1 = arith.constant 0 : i32
    return %c0_i32, %c0_i32_0 : i32, i32
  }
  func.func @transform_8(%arg0: i32) -> (i32, i32) {
    %c0_i32 = arith.constant 0 : i32
    %c0_i32_0 = arith.constant 0 : i32
    %c0_i32_1 = arith.constant 0 : i32
    return %c0_i32, %c0_i32_0 : i32, i32
  }
  func.func @transform_9(%arg0: i32) -> (i32, i32) {
    %c0_i32 = arith.constant 0 : i32
    %c0_i32_0 = arith.constant 0 : i32
    %c0_i32_1 = arith.constant 0 : i32
    return %c0_i32, %c0_i32_0 : i32, i32
  }
  func.func @transform_10(%arg0: i32) -> (i32, i32) {
    %c0_i32 = arith.constant 0 : i32
    %c0_i32_0 = arith.constant 0 : i32
    %c0_i32_1 = arith.constant 0 : i32
    return %c0_i32, %c0_i32_0 : i32, i32
  }
  func.func @transform_11(%arg0: i32) -> (i32, i32) {
    %c0_i32 = arith.constant 0 : i32
    %c0_i32_0 = arith.constant 0 : i32
    %c0_i32_1 = arith.constant 0 : i32
    return %c0_i32, %c0_i32_0 : i32, i32
  }
  func.func @transform_12(%arg0: i32) -> (i32, i32) {
    %c0_i32 = arith.constant 0 : i32
    %c0_i32_0 = arith.constant 0 : i32
    %c0_i32_1 = arith.constant 0 : i32
    return %c0_i32, %c0_i32_0 : i32, i32
  }
  func.func @transform_13(%arg0: i32) -> (i32, i32) {
    %c0_i32 = arith.constant 0 : i32
    %c0_i32_0 = arith.constant 0 : i32
    %c0_i32_1 = arith.constant 0 : i32
    return %c0_i32, %c0_i32_0 : i32, i32
  }
  func.func @transform_14(%arg0: i32) -> (i32, i32) {
    %c0_i32 = arith.constant 0 : i32
    %c0_i32_0 = arith.constant 0 : i32
    %c0_i32_1 = arith.constant 0 : i32
    return %c0_i32, %c0_i32_0 : i32, i32
  }
  func.func @transform_15(%arg0: i32) -> (i32, i32) {
    %c0_i32 = arith.constant 0 : i32
    %c0_i32_0 = arith.constant 0 : i32
    %c0_i32_1 = arith.constant 0 : i32
    return %c0_i32, %c0_i32_0 : i32, i32
  }
  func.func @transform_16(%arg0: i32) -> (i32, i32) {
    %c0_i32 = arith.constant 0 : i32
    %c0_i32_0 = arith.constant 0 : i32
    %c0_i32_1 = arith.constant 0 : i32
    return %c0_i32, %c0_i32_0 : i32, i32
  }
  func.func @transform_17(%arg0: i32) -> (i32, i32) {
    %c0_i32 = arith.constant 0 : i32
    %c0_i32_0 = arith.constant 0 : i32
    %c0_i32_1 = arith.constant 0 : i32
    return %c0_i32, %c0_i32_0 : i32, i32
  }
  func.func @transform_18(%arg0: i32) -> (i32, i32) {
    %c0_i32 = arith.constant 0 : i32
    %c0_i32_0 = arith.constant 0 : i32
    %c0_i32_1 = arith.constant 0 : i32
    return %c0_i32, %c0_i32_0 : i32, i32
  }
  func.func @transform_19(%arg0: i32) -> (i32, i32) {
    %c0_i32 = arith.constant 0 : i32
    %c0_i32_0 = arith.constant 0 : i32
    %c0_i32_1 = arith.constant 0 : i32
    return %c0_i32, %c0_i32_0 : i32, i32
  }
  func.func @transform_20(%arg0: i32) -> (i32, i32) {
    %c0_i32 = arith.constant 0 : i32
    %c0_i32_0 = arith.constant 0 : i32
    return %arg0, %c0_i32 : i32, i32
  }
  func.func @transform_21(%arg0: i32) -> (i32, i32) {
    %c0_i32 = arith.constant 0 : i32
    %c0_i32_0 = arith.constant 0 : i32
    return %arg0, %c0_i32 : i32, i32
  }
  func.func @transform_22(%arg0: i32) -> (i32, i32) {
    %c0_i32 = arith.constant 0 : i32
    %c0_i32_0 = arith.constant 0 : i32
    return %arg0, %c0_i32 : i32, i32
  }
  func.func @transform_23(%arg0: i32) -> (i32, i32) {
    %c0_i32 = arith.constant 0 : i32
    %c0_i32_0 = arith.constant 0 : i32
    return %arg0, %c0_i32 : i32, i32
  }
}

</mosaic_0001>

<bundles_post_ra>
// kernel: tpu_custom_call.1
= control target key start
LH: loop header
LB: loop body
LE: loop exit
PB: predicated region body
PF: predicated region fallthrough
CT: control target
= control target key end

     0   :  { %s13686_s0 = inlined_call_operand.hbm [shape: f32[64,256], index: 0, kind: input, shape index: {}]   ;;  %s13687_s1 = inlined_call_operand.hbm [shape: f32[64,128], index: 1, kind: input, shape index: {}]   ;;  %s13688_s2 = inlined_call_operand.hbm [shape: bf16[256,1024], index: 2, kind: input, shape index: {}]   ;;  %s13689_s3 = inlined_call_operand.vmem [shape: f32[1,1024], index: 3, kind: input, shape index: {}]   ;;  %s13690_s4 = inlined_call_operand.hbm [shape: bf16[1024,512], index: 4, kind: input, shape index: {}]   ;;  %s13691_s5 = inlined_call_operand.hbm [shape: f32[1,512], index: 5, kind: input, shape index: {}]   ;;  %s13692_s6 = inlined_call_operand.hbm [shape: bf16[512,256], index: 6, kind: input, shape index: {}]   ;;  %s13693_s7 = inlined_call_operand.vmem [shape: f32[1,256], index: 7, kind: input, shape index: {}]   ;;  %s13694_s8 = inlined_call_operand.hbm [shape: bf16[128,512], index: 8, kind: input, shape index: {}]   ;;  %s13695_s9 = inlined_call_operand.vmem [shape: f32[1,512], index: 9, kind: input, shape index: {}]   ;;  %s13696_s10 = inlined_call_operand.hbm [shape: bf16[512,1024], index: 10, kind: input, shape index: {}]   ;;  %s13697_s11 = inlined_call_operand.vmem [shape: f32[1,1024], index: 11, kind: input, shape index: {}]   ;;  %s13698_s12 = inlined_call_operand.hbm [shape: bf16[1024,256], index: 12, kind: input, shape index: {}]   ;;  %s13699_s13 = inlined_call_operand.vmem [shape: f32[1,256], index: 13, kind: input, shape index: {}]   ;;  %s13700_s14 = inlined_call_operand.hbm [shape: bf16[256,512], index: 14, kind: input, shape index: {}]   ;;  %s13701_s15 = inlined_call_operand.vmem [shape: f32[1,512], index: 15, kind: input, shape index: {}]   ;;  %s13702_s16 = inlined_call_operand.hbm [shape: bf16[512,256], index: 16, kind: input, shape index: {}]   ;;  %s13703_s17 = inlined_call_operand.vmem [shape: f32[1,256], index: 17, kind: input, shape index: {}]   ;;  %s13704_s18 = inlined_call_operand.hbm [shape: bf16[256,128], index: 18, kind: input, shape index: {}]   ;;  %s13705_s19 = inlined_call_operand.vmem [shape: f32[1,128], index: 19, kind: input, shape index: {}]   ;;  %s13706_s20 = inlined_call_operand.hbm [shape: f32[64,256], index: 20, kind: output, shape index: {0}]   ;;  %s13707_s21 = inlined_call_operand.hbm [shape: f32[64,128], index: 21, kind: output, shape index: {1}]   ;;  %s13708_s22 = inlined_call_operand.hbm [shape: f32[64,128], index: 22, kind: output, shape index: {2}]   ;;  %s13709_s23 = inlined_call_operand.hbm [shape: f32[64,128], index: 23, kind: output, shape index: {3}]  }
   0x1   :  { %13740 = sst [smem:[#allocation39_spill]] %s13686_s0 }
   0x2   :  { %13741 = sst [smem:[#allocation40_spill]] %s13687_s1 }
   0x3   :  { %13742 = sst [smem:[#allocation41_spill]] %s13688_s2 }
   0x4   :  { %13743 = sst [smem:[#allocation42_spill]] %s13689_s3 }
   0x5   :  { %13744 = sst [smem:[#allocation43_spill]] %s13690_s4 }
   0x6   :  { %13745 = sst [smem:[#allocation44_spill]] %s13691_s5 }
   0x7   :  { %13746 = sst [smem:[#allocation45_spill]] %s13692_s6 }
   0x8   :  { %13747 = sst [smem:[#allocation46_spill]] %s13693_s7 }
   0x9   :  { %13748 = sst [smem:[#allocation47_spill]] %s13694_s8 }
   0xa   :  { %13749 = sst [smem:[#allocation48_spill]] %s13695_s9 }
   0xb   :  { %13750 = sst [smem:[#allocation49_spill]] %s13696_s10 }
   0xc   :  { %13751 = sst [smem:[#allocation50_spill]] %s13697_s11 }
   0xd   :  { %13752 = sst [smem:[#allocation51_spill]] %s13698_s12 }
   0xe   :  { %13753 = sst [smem:[#allocation52_spill]] %s13699_s13 }
   0xf   :  { %13754 = sst [smem:[#allocation53_spill]] %s13700_s14 }
  0x10   :  { %13755 = sst [smem:[#allocation54_spill]] %s13701_s15 }
  0x11   :  { %13756 = sst [smem:[#allocation55_spill]] %s13702_s16 }
  0x12   :  { %13757 = sst [smem:[#allocation56_spill]] %s13703_s17 }
  0x13   :  { %13758 = sst [smem:[#allocation57_spill]] %s13704_s18 }
  0x14   :  { %13759 = sst [smem:[#allocation58_spill]] %s13705_s19 }
  0x15   :  { %13760 = sst [smem:[#allocation59_spill]] %s13706_s20 }
  0x16   :  { %13761 = sst [smem:[#allocation60_spill]] %s13707_s21 }
  0x17   :  { %13762 = sst [smem:[#allocation61_spill]] %s13708_s22 }
  0x18   :  { %13763 = sst [smem:[#allocation62_spill]] %s13709_s23 }
  0x19   :  { %29 = vsyncpa [#allocation3], 0 }
  0x1a   :  { %31 = vsyncpa [#allocation3 + $0x1], 0 }
  0x1b   :  { %32 = vsyncpa [#allocation6], 0 }
  0x1c   :  { %34 = vsyncpa [#allocation6 + $0x1], 0 }
  0x1d   :  { %35 = vsyncpa [#allocation9], 0 }
  0x1e   :  { %36 = vsyncpa [#allocation12], 0 }
  0x1f   :  { %37 = vsyncpa [#allocation15], 0 }
  0x20   :  { %38 = vsyncpa [#allocation18], 0 }
  0x21   :  { %39 = vsyncpa [#allocation21], 0 }
  0x22   :  { %40 = vsyncpa [#allocation4], 0 }
  0x23   :  { %42 = vsyncpa [#allocation4 + $0x1], 0 }
  0x24   :  { %43 = vsyncpa [#allocation24], 0 }
  0x25   :  { %45 = vsyncpa [#allocation24 + $0x1], 0 }
  0x26   :  { %46 = vsyncpa [#allocation27], 0 }
  0x27   :  { %48 = vsyncpa [#allocation27 + $0x1], 0  ;;  %s12720_s4 = smov 0   ;;  %s12722_s30 = smov 0  }
  0x28   :  { %s12724_s24 = smov 0   ;;  %s12726_s25 = smov 0  }
  0x29 LB: > { %s12571_s5 = smov [#allocation7]   ;;  %s12741_s26 = sadd.s32 4294967295, %s12569_s25   ;;  %s12569_s25 = sphi %s12726_s25, %s13824_s25   ;;  %s12565_s24 = sphi %s12724_s24, %s13823_s24   ;;  %s12561_s30 = sphi %s12722_s30, %s13822_s30   ;;  %s12557_s4 = sphi %s12720_s4, %s13821_s4  }
  0x2a   : > { %s605_s1 = sshll.u32 %s12571_s5, 4  ;;  %p9603_p0 = scmp.ge.s32.totalorder %s12569_s25, 1  ;;  %s12746_s1 = int_to_ptr.vmem [resolvable:$true] %s605_s1 }
  0x2b   : > { %p13722_p1 = scmp.eq.s32.totalorder %s12741_s26, 0  ;;  %p593_p2 = scmp.lt.s32.totalorder %s12569_s25, 3 }
  0x2c   : > { %s12572_s6 = smov [#allocation8]   ;;  %s12573_s28 = smov [#allocation11]  }
  0x2d   : > { %p12748_p3 = pnand %p9603_p0, %p593_p2  ;;  %s621_s27 = sshll.u32 %s12572_s6, 4  ;;  %s12761_s27 = int_to_ptr.vmem [resolvable:$true] %s621_s27 }
  0x2e   : > { %s12763_s29 = sshll.u32 %s12573_s28, 4  ;;  %s13766_s5 = sld [smem:[#allocation41_spill]]  ;;  %s646_s29 = int_to_ptr.vmem [resolvable:$true] %s12763_s29 }
  0x2f   : > { %s13764_s2 = scalar_select %p12748_p3, 1, 0 }
  0x30   : > { %p10947_p5 = pneg %p12748_p3 }
  0x32   : > { %p12757_p6 = pnand %p10947_p5, %p13722_p1 }
  0x34   : > { %s12043_s23 = scalar_lea.hbm %s13766_s5, 16384  ;;  %p12773_p8 = pneg %p12757_p6 }
  0x35   : > { %p12044_p7 = scmp.ne.s32.totalorder %s13766_s5, %s12043_s23  ;;  %p12050_p11 = scmp.lt.u32.totalorder %s12043_s23, %s13766_s5 }
  0x37   : > { %p12046_p9 = pnand %p12773_p8, %p12044_p7 }
  0x39   : > { %p12047_p10 = pneg %p12046_p9 }
  0x3b   : > { %p12052_p12 = pnand %p12050_p11, %p12047_p10 }
  0x3d   : > { %12055 = shalt.err (!%p12052_p12)
}
  0x3e   : > { %s12056_s19 = scalar_lea.vmem %s12746_s1, 16384  ;;  %p12064_p5 = scmp.lt.s32.totalorder %s12746_s1, %s12746_s1 }
  0x3f   : > { %p12057_p13 = scmp.ne.s32.totalorder %s12746_s1, %s12056_s19  ;;  %p12065_p4 = scmp.lt.s32.totalorder %s12056_s19, %s12056_s19 }
  0x41   : > { %p12059_p0 = pnand %p12057_p13, %p12773_p8  ;;  %p12066_p7 = por %p12065_p4, %p12064_p5 }
  0x43   : > { %p12060_p2 = pneg %p12059_p0 }
  0x45   : > { %p12067_p9 = pnand %p12066_p7, %p12060_p2 }
  0x47   : > { %12070 = shalt.err (!%p12067_p9)
}
  0x48   : > { %s13720_s20 = smov 512   ;;  %s13721_s22 = smov 32  }
  0x49   : > { %10950 = dma.hbm_to_vmem [thread:$0]  (!%p12757_p6), %s13766_s5, 16384, %s12746_s1, [#allocation6], %s13720_s20, %s13720_s20, %s13721_s22  }
  0x4a   : > { %s13768_s21 = sld [smem:[#allocation43_spill]] }
  0x50   : > { %s12071_s19 = scalar_lea.hbm %s13768_s21, 32768 }
  0x51   : > { %p12072_p4 = scmp.ne.s32.totalorder %s13768_s21, %s12071_s19  ;;  %p12078_p12 = scmp.lt.u32.totalorder %s12071_s19, %s13768_s21 }
  0x53   : > { %p12074_p10 = pnand %p12072_p4, %p12773_p8 }
  0x55   : > { %p12075_p11 = pneg %p12074_p10 }
  0x57   : > { %p12080_p13 = pnand %p12078_p12, %p12075_p11 }
  0x59   : > { %12083 = shalt.err (!%p12080_p13)
}
  0x5a   : > { %s12084_s1 = scalar_lea.vmem %s12761_s27, 32768  ;;  %p12092_p7 = scmp.lt.s32.totalorder %s12761_s27, %s12761_s27 }
  0x5b   : > { %p12085_p0 = scmp.ne.s32.totalorder %s12761_s27, %s12084_s1  ;;  %p12093_p9 = scmp.lt.s32.totalorder %s12084_s1, %s12084_s1 }
  0x5d   : > { %p12087_p2 = pnand %p12085_p0, %p12773_p8  ;;  %p12094_p4 = por %p12093_p9, %p12092_p7 }
  0x5f   : > { %p12088_p5 = pneg %p12087_p2 }
  0x61   : > { %p12095_p10 = pnand %p12094_p4, %p12088_p5 }
  0x63   : > { %12098 = shalt.err (!%p12095_p10)
}
  0x64   : > { %s13724_s15 = smov 256   ;;  %s13726_s11 = smov 16  }
  0x65   : > { %10953 = dma.hbm_to_vmem [thread:$0]  (!%p12757_p6), %s13768_s21, 32768, %s12761_s27, [#allocation9], %s13724_s15, %s13724_s15, %s13726_s11  }
  0x66   : > { %s13769_s0 = sld [smem:[#allocation45_spill]] }
  0x6c   : > { %s12099_s28 = scalar_lea.hbm %s13769_s0, 8192 }
  0x6d   : > { %p12100_p11 = scmp.ne.s32.totalorder %s13769_s0, %s12099_s28  ;;  %p12106_p0 = scmp.lt.u32.totalorder %s12099_s28, %s13769_s0 }
  0x6f   : > { %p12102_p12 = pnand %p12100_p11, %p12773_p8 }
  0x71   : > { %p12103_p13 = pneg %p12102_p12 }
  0x73   : > { %p12108_p2 = pnand %p12106_p0, %p12103_p13 }
  0x75   : > { %12111 = shalt.err (!%p12108_p2)
}
  0x76   : > { %s12112_s13 = scalar_lea.vmem %s646_s29, 8192  ;;  %p12120_p4 = scmp.lt.s32.totalorder %s646_s29, %s646_s29 }
  0x77   : > { %p12113_p5 = scmp.ne.s32.totalorder %s646_s29, %s12112_s13  ;;  %p12121_p10 = scmp.lt.s32.totalorder %s12112_s13, %s12112_s13 }
  0x79   : > { %p12115_p7 = pnand %p12113_p5, %p12773_p8  ;;  %p12122_p1 = por %p12121_p10, %p12120_p4 }
  0x7b   : > { %p12116_p9 = pneg %p12115_p7 }
  0x7d   : > { %p12123_p3 = pnand %p12122_p1, %p12116_p9 }
  0x7f   : > { %12126 = shalt.err (!%p12123_p3)
}
  0x80   : > { %s13730_s27 = smov 128   ;;  %s13732_s17 = smov 8  }
  0x81   : > { %10959 = dma.hbm_to_vmem [thread:$0]  (!%p12757_p6), %s13769_s0, 8192, %s646_s29, [#allocation12], %s13730_s27, %s13730_s27, %s13732_s17  }
  0x82   : > { %s12580_s23 = smov [#allocation14]   ;;  %s12581_s28 = smov [#allocation17]  }
  0x83   : > { %s677_s3 = sshll.u32 %s12580_s23, 4  ;;  %s709_s19 = sshll.u32 %s12581_s28, 4  ;;  %s678_s3 = int_to_ptr.vmem [resolvable:$true] %s677_s3  ;;  %s710_s19 = int_to_ptr.vmem [resolvable:$true] %s709_s19 }
  0x84   : > { %s13770_s10 = sld [smem:[#allocation49_spill]] }
  0x8a   : > { %s12127_s15 = scalar_lea.hbm %s13770_s10, 32768 }
  0x8b   : > { %p12128_p1 = scmp.ne.s32.totalorder %s13770_s10, %s12127_s15  ;;  %p12134_p12 = scmp.lt.u32.totalorder %s12127_s15, %s13770_s10 }
  0x8d   : > { %p12130_p3 = pnand %p12128_p1, %p12773_p8 }
  0x8f   : > { %p12131_p11 = pneg %p12130_p3 }
  0x91   : > { %p12136_p13 = pnand %p12134_p12, %p12131_p11 }
  0x93   : > { %12139 = shalt.err (!%p12136_p13)
}
  0x94   : > { %s12140_s29 = scalar_lea.vmem %s678_s3, 32768  ;;  %p12148_p7 = scmp.lt.s32.totalorder %s678_s3, %s678_s3 }
  0x95   : > { %p12141_p0 = scmp.ne.s32.totalorder %s678_s3, %s12140_s29  ;;  %p12149_p9 = scmp.lt.s32.totalorder %s12140_s29, %s12140_s29 }
  0x97   : > { %p12143_p2 = pnand %p12141_p0, %p12773_p8  ;;  %p12150_p4 = por %p12149_p9, %p12148_p7 }
  0x99   : > { %p12144_p5 = pneg %p12143_p2 }
  0x9b   : > { %p12151_p10 = pnand %p12150_p4, %p12144_p5 }
  0x9d   : > { %12154 = shalt.err (!%p12151_p10)
}
  0x9e   : > { %s13771_s5 = smov 32   ;;  %s13772_s11 = smov 512  }
  0x9f   : > { %10965 = dma.hbm_to_vmem [thread:$0]  (!%p12757_p6), %s13770_s10, 32768, %s678_s3, [#allocation15], %s13772_s11, %s13772_s11, %s13771_s5  }
  0xa0   : > { %s13773_s14 = sld [smem:[#allocation53_spill]] }
  0xa6   : > { %s12155_s22 = scalar_lea.hbm %s13773_s14, 8192 }
  0xa7   : > { %p12156_p1 = scmp.ne.s32.totalorder %s13773_s14, %s12155_s22  ;;  %p12162_p12 = scmp.lt.u32.totalorder %s12155_s22, %s13773_s14 }
  0xa9   : > { %p12158_p3 = pnand %p12156_p1, %p12773_p8 }
  0xab   : > { %p12159_p11 = pneg %p12158_p3 }
  0xad   : > { %p12164_p13 = pnand %p12162_p12, %p12159_p11 }
  0xaf   : > { %12167 = shalt.err (!%p12164_p13)
}
  0xb0   : > { %s12168_s29 = scalar_lea.vmem %s710_s19, 8192  ;;  %p12176_p7 = scmp.lt.s32.totalorder %s710_s19, %s710_s19 }
  0xb1   : > { %p12169_p0 = scmp.ne.s32.totalorder %s710_s19, %s12168_s29  ;;  %p12177_p9 = scmp.lt.s32.totalorder %s12168_s29, %s12168_s29 }
  0xb3   : > { %p12171_p2 = pnand %p12169_p0, %p12773_p8  ;;  %p12178_p4 = por %p12177_p9, %p12176_p7 }
  0xb5   : > { %p12172_p5 = pneg %p12171_p2 }
  0xb7   : > { %p12179_p10 = pnand %p12178_p4, %p12172_p5 }
  0xb9   : > { %12182 = shalt.err (!%p12179_p10)
}
  0xba   : > { %s13774_s3 = smov 16   ;;  %s13775_s5 = smov 256  }
  0xbb   : > { %10971 = dma.hbm_to_vmem [thread:$0]  (!%p12757_p6), %s13773_s14, 8192, %s710_s19, [#allocation18], %s13775_s5, %s13775_s5, %s13774_s3  }
  0xbc   : > { %s12582_s21 = smov [#allocation10]   ;;  %s12583_s20 = smov [#allocation13]  }
  0xbd   : > { %s635_s15 = sshll.u32 %s12582_s21, 4  ;;  %s661_s22 = sshll.u32 %s12583_s20, 4  ;;  %s636_s15 = int_to_ptr.vmem [resolvable:$true] %s635_s15  ;;  %s662_s22 = int_to_ptr.vmem [resolvable:$true] %s661_s22 }
  0xbe   : > { %s13776_s1 = sld [smem:[#allocation44_spill]] }
  0xc4   : > { %s12183_s13 = scalar_lea.hbm %s13776_s1, 64 }
  0xc5   : > { %p12184_p1 = scmp.ne.s32.totalorder %s13776_s1, %s12183_s13  ;;  %p12190_p12 = scmp.lt.u32.totalorder %s12183_s13, %s13776_s1 }
  0xc7   : > { %p12186_p3 = pnand %p12184_p1, %p12773_p8 }
  0xc9   : > { %p12187_p11 = pneg %p12186_p3 }
  0xcb   : > { %p12192_p13 = pnand %p12190_p12, %p12187_p11 }
  0xcd   : > { %12195 = shalt.err (!%p12192_p13)
}
  0xce   : > { %s12196_s19 = scalar_lea.vmem %s636_s15, 64  ;;  %p12204_p7 = scmp.lt.s32.totalorder %s636_s15, %s636_s15 }
  0xcf   : > { %p12197_p0 = scmp.ne.s32.totalorder %s636_s15, %s12196_s19  ;;  %p12205_p9 = scmp.lt.s32.totalorder %s12196_s19, %s12196_s19 }
  0xd1   : > { %p12199_p2 = pnand %p12197_p0, %p12773_p8  ;;  %p12206_p4 = por %p12205_p9, %p12204_p7 }
  0xd3   : > { %p12200_p5 = pneg %p12199_p2 }
  0xd5   : > { %p12207_p10 = pnand %p12206_p4, %p12200_p5 }
  0xd7   : > { %12210 = shalt.err (!%p12207_p10)
}
  0xd8   : > { %10956 = dma.hbm_to_vmem [thread:$0]  (!%p12757_p6), %s13776_s1, 64, %s636_s15, [#allocation9]  }
  0xd9   : > { %s13777_s8 = sld [smem:[#allocation47_spill]] }
  0xdf   : > { %s12211_s20 = scalar_lea.hbm %s13777_s8, 4096 }
  0xe0   : > { %p12212_p1 = scmp.ne.s32.totalorder %s13777_s8, %s12211_s20  ;;  %p12218_p12 = scmp.lt.u32.totalorder %s12211_s20, %s13777_s8 }
  0xe2   : > { %p12214_p3 = pnand %p12212_p1, %p12773_p8 }
  0xe4   : > { %p12215_p11 = pneg %p12214_p3 }
  0xe6   : > { %p12220_p13 = pnand %p12218_p12, %p12215_p11 }
  0xe8   : > { %12223 = shalt.err (!%p12220_p13)
}
  0xe9   : > { %s12224_s11 = scalar_lea.vmem %s662_s22, 4096  ;;  %p12232_p7 = scmp.lt.s32.totalorder %s662_s22, %s662_s22 }
  0xea   : > { %p12225_p0 = scmp.ne.s32.totalorder %s662_s22, %s12224_s11  ;;  %p12233_p9 = scmp.lt.s32.totalorder %s12224_s11, %s12224_s11 }
  0xec   : > { %p12227_p2 = pnand %p12225_p0, %p12773_p8  ;;  %p12234_p4 = por %p12233_p9, %p12232_p7 }
  0xee   : > { %p12228_p5 = pneg %p12227_p2 }
  0xf0   : > { %p12235_p10 = pnand %p12234_p4, %p12228_p5 }
  0xf2   : > { %12238 = shalt.err (!%p12235_p10)
}
  0xf3   : > { %10962 = dma.hbm_to_vmem [thread:$0]  (!%p12757_p6), %s13777_s8, 4096, %s662_s22, [#allocation12], %s13775_s5, %s13775_s5, %s13774_s3  }
  0xf4   : > { %s12584_s27 = smov [#allocation16]   ;;  %s12585_s17 = smov [#allocation19]  }
  0xf5   : > { %s693_s9 = sshll.u32 %s12584_s27, 4  ;;  %s725_s21 = sshll.u32 %s12585_s17, 4  ;;  %s694_s9 = int_to_ptr.vmem [resolvable:$true] %s693_s9  ;;  %s726_s21 = int_to_ptr.vmem [resolvable:$true] %s725_s21 }
  0xf6   : > { %s13778_s12 = sld [smem:[#allocation51_spill]] }
  0xfc   : > { %s12239_s28 = scalar_lea.hbm %s13778_s12, 16384 }
  0xfd   : > { %p12240_p1 = scmp.ne.s32.totalorder %s13778_s12, %s12239_s28  ;;  %p12246_p12 = scmp.lt.u32.totalorder %s12239_s28, %s13778_s12 }
  0xff   : > { %p12242_p3 = pnand %p12240_p1, %p12773_p8 }
 0x101   : > { %p12243_p11 = pneg %p12242_p3 }
 0x103   : > { %p12248_p13 = pnand %p12246_p12, %p12243_p11 }
 0x105   : > { %12251 = shalt.err (!%p12248_p13)
}
 0x106   : > { %s12252_s22 = scalar_lea.vmem %s694_s9, 16384  ;;  %p12260_p7 = scmp.lt.s32.totalorder %s694_s9, %s694_s9 }
 0x107   : > { %p12253_p0 = scmp.ne.s32.totalorder %s694_s9, %s12252_s22  ;;  %p12261_p9 = scmp.lt.s32.totalorder %s12252_s22, %s12252_s22 }
 0x109   : > { %p12255_p2 = pnand %p12253_p0, %p12773_p8  ;;  %p12262_p4 = por %p12261_p9, %p12260_p7 }
 0x10b   : > { %p12256_p5 = pneg %p12255_p2 }
 0x10d   : > { %p12263_p10 = pnand %p12262_p4, %p12256_p5 }
 0x10f   : > { %12266 = shalt.err (!%p12263_p10)
}
 0x110   : > { %s13779_s19 = smov 8   ;;  %s13780_s27 = smov 128  }
 0x111   : > { %10968 = dma.hbm_to_vmem [thread:$0]  (!%p12757_p6), %s13778_s12, 16384, %s694_s9, [#allocation15], %s13780_s27, %s13780_s27, %s13779_s19  }
 0x112   : > { %s13781_s16 = sld [smem:[#allocation55_spill]] }
 0x118   : > { %s12267_s13 = scalar_lea.hbm %s13781_s16, 8192 }
 0x119   : > { %p12268_p1 = scmp.ne.s32.totalorder %s13781_s16, %s12267_s13  ;;  %p12274_p12 = scmp.lt.u32.totalorder %s12267_s13, %s13781_s16 }
 0x11b   : > { %p12270_p3 = pnand %p12268_p1, %p12773_p8 }
 0x11d   : > { %p12271_p11 = pneg %p12270_p3 }
 0x11f   : > { %p12276_p13 = pnand %p12274_p12, %p12271_p11 }
 0x121   : > { %12279 = shalt.err (!%p12276_p13)
}
 0x122   : > { %s12280_s17 = scalar_lea.vmem %s726_s21, 8192  ;;  %p12288_p7 = scmp.lt.s32.totalorder %s726_s21, %s726_s21 }
 0x123   : > { %p12281_p0 = scmp.ne.s32.totalorder %s726_s21, %s12280_s17  ;;  %p12289_p9 = scmp.lt.s32.totalorder %s12280_s17, %s12280_s17 }
 0x125   : > { %p12283_p2 = pnand %p12281_p0, %p12773_p8  ;;  %p12290_p4 = por %p12289_p9, %p12288_p7 }
 0x127   : > { %p12284_p5 = pneg %p12283_p2 }
 0x129   : > { %p12291_p10 = pnand %p12290_p4, %p12284_p5 }
 0x12b   : > { %12294 = shalt.err (!%p12291_p10)
}
 0x12c   : > { %10974 = dma.hbm_to_vmem [thread:$0]  (!%p12757_p6), %s13781_s16, 8192, %s726_s21, [#allocation18], %s13780_s27, %s13780_s27, %s13779_s19  }
 0x12d   : > { %s12586_s23 = smov [#allocation20]   ;;  %s13782_s18 = sld [smem:[#allocation57_spill]] }
 0x12e   : > { %s741_s28 = sshll.u32 %s12586_s23, 4  ;;  %s742_s28 = int_to_ptr.vmem [resolvable:$true] %s741_s28 }
 0x133   : > { %s12295_s11 = scalar_lea.hbm %s13782_s18, 2048 }
 0x134   : > { %p12296_p1 = scmp.ne.s32.totalorder %s13782_s18, %s12295_s11  ;;  %p12302_p12 = scmp.lt.u32.totalorder %s12295_s11, %s13782_s18 }
 0x136   : > { %p12298_p3 = pnand %p12296_p1, %p12773_p8 }
 0x138   : > { %p12299_p11 = pneg %p12298_p3 }
 0x13a   : > { %p12304_p13 = pnand %p12302_p12, %p12299_p11 }
 0x13c   : > { %12307 = shalt.err (!%p12304_p13)
}
 0x13d   : > { %s12308_s21 = scalar_lea.vmem %s742_s28, 2048  ;;  %p12316_p7 = scmp.lt.s32.totalorder %s742_s28, %s742_s28 }
 0x13e   : > { %p12309_p0 = scmp.ne.s32.totalorder %s742_s28, %s12308_s21  ;;  %p12317_p9 = scmp.lt.s32.totalorder %s12308_s21, %s12308_s21 }
 0x140   : > { %p12311_p2 = pnand %p12309_p0, %p12773_p8  ;;  %p12318_p4 = por %p12317_p9, %p12316_p7 }
 0x142   : > { %p12312_p5 = pneg %p12311_p2 }
 0x144   : > { %p12319_p10 = pnand %p12318_p4, %p12312_p5 }
 0x146   : > { %12322 = shalt.err (!%p12319_p10)
}
 0x147   : > { %s12587_s9 = smov 64   ;;  %s12588_s6 = smov 4  }
 0x148   : > { %10977 = dma.hbm_to_vmem [thread:$0]  (!%p12757_p6), %s13782_s18, 2048, %s742_s28, [#allocation21], %s12587_s9, %s12587_s9, %s12588_s6  }
 0x149   : > { %s13735_s23 = sadd.s32 4294967294, %s12569_s25   ;;  %s12988_s13 = sadd.s32 1, %s12569_s25  }
 0x14a   : > { %s58_s29 = ssub.s32 %s12569_s25, %s12988_s13  ;;  %s61_s11 = sadd.s32 1, %s12565_s24 }
 0x14b   : > { %p59_p8 = scmp.eq.s32.totalorder %s58_s29, 0  ;;  %p68_p1 = scmp.ne.s32.totalorder %s12565_s24, %s12561_s30 }
 0x14c   : > { %p69_p3 = scmp.eq.s32.totalorder %s12569_s25, 0  ;;  %p74_p11 = scmp.ne.s32.totalorder %s12561_s30, %s12557_s4 }
 0x14d   : > { %s12999_s15 = scalar_select %p59_p8, %s12565_s24, %s61_s11  }
 0x14e   : > { %p13001_p12 = por %p69_p3, %p68_p1  ;;  %p13784_p13 = scmp.eq.s32.totalorder %s12741_s26, 0 }
 0x14f   : > { %p502_p0 = scmp.eq.s32.totalorder %s12741_s26, 1  ;;  %p508_p2 = scmp.eq.s32.totalorder %s13735_s23, 1 }
 0x150   : > { %p13007_p6 = por %p13784_p13, %p74_p11  ;;  %p11008_p5 = scmp.lt.s32.totalorder %s12569_s25, 2 }
 0x151   : > { %s13016_s22 = sand.u32 1, %s12565_s24   ;;  %p13018_p7 = por %p502_p0, %p68_p1 }
 0x152   : > { %p13022_p9 = por %p508_p2, %p74_p11  ;;  %s9615_s9 = sshll.u32 %s13016_s22, 6 }
 0x153   : > { %s13786_s17 = scalar_select %p13018_p7, 1, 0 }
 0x154   : > { %s13787_s21 = scalar_select %p13022_p9, 1, 0 }
 0x155   : > { %s10668_s6 = sshll.u32 %s12569_s25, 10  ;;  %s13788_s29 = sld [smem:[#allocation39_spill]] }
 0x156   : > { %s762_s23 = scalar_lea.vmem [#allocation2], %s9615_s9  ;;  %p13037_p4 = pnand %p11008_p5, %p13001_p12 }
 0x157   : > { %s770_s1 = sshll.u32 %s762_s23, 4  ;;  %s9619_s12 = sshll.u32 %s13016_s22, 5  ;;  %s13033_s1 = int_to_ptr.vmem [resolvable:$true] %s770_s1 }
 0x158   : > { %s759_s0 = scalar_lea.sflag [#allocation3], %s13016_s22  ;;  %p12325_p8 = pneg %p13037_p4 }
 0x15b   : > { %s13031_s11 = scalar_lea.hbm %s13788_s29, %s10668_s6  ;;  %s12328_s7 = scalar_lea.hbm %s13788_s29, 2048 }
 0x15c   : > { %s12323_s6 = scalar_lea.hbm %s13031_s11, 1024  ;;  %p12329_p11 = scmp.lt.u32.totalorder %s13031_s11, %s13788_s29 }
 0x15d   : > { %p12324_p10 = scmp.ne.s32.totalorder %s13031_s11, %s12323_s6  ;;  %p12330_p12 = scmp.lt.u32.totalorder %s12328_s7, %s12323_s6 }
 0x15e   : > { %p12332_p0 = scmp.lt.u32.totalorder %s12323_s6, %s13031_s11 }
 0x15f   : > { %p12326_p1 = pnand %p12325_p8, %p12324_p10  ;;  %p12331_p13 = por %p12330_p12, %p12329_p11 }
 0x161   : > { %p12327_p3 = pneg %p12326_p1  ;;  %p12333_p2 = por %p12332_p0, %p12331_p13 }
 0x163   : > { %p12334_p5 = pnand %p12333_p2, %p12327_p3 }
 0x165   : > { %12337 = shalt.err (!%p12334_p5)
}
 0x166   : > { %s12338_s10 = scalar_lea.vmem %s13033_s1, 1024  ;;  %s12589_s23 = smov [#allocation2]  }
 0x167   : > { %p12339_p10 = scmp.ne.s32.totalorder %s13033_s1, %s12338_s10  ;;  %s12343_s9 = sshll.u32 %s12589_s23, 4  ;;  %s12344_s9 = int_to_ptr.vmem [resolvable:$false] %s12343_s9 }
 0x168   : > { %s12345_s14 = scalar_lea.vmem %s12344_s9, 2048  ;;  %p12346_p7 = scmp.lt.s32.totalorder %s13033_s1, %s12344_s9 }
 0x169   : > { %p12341_p1 = pnand %p12339_p10, %p12325_p8  ;;  %p12347_p11 = scmp.lt.s32.totalorder %s12345_s14, %s12338_s10 }
 0x16b   : > { %p12342_p9 = pneg %p12341_p1  ;;  %p12348_p12 = por %p12347_p11, %p12346_p7 }
 0x16d   : > { %p12349_p13 = pnand %p12348_p12, %p12342_p9 }
 0x16f   : > { %12352 = shalt.err (!%p12349_p13)
}
 0x170   : > { %10981 = dma.hbm_to_vmem [thread:$0]  (!%p13037_p4), %s13031_s11, 1024, %s13033_s1, %s759_s0, %s13775_s5, %s13775_s5, %s13774_s3  }
 0x171   : > { %s10669_s6 = sshll.u32 %s12569_s25, 9  ;;  %s13790_s20 = sld [smem:[#allocation40_spill]] }
 0x172   : > { %s784_s9 = scalar_lea.vmem [#allocation5], %s9619_s12  ;;  %s13791_s16 = sand.u32 1, %s12569_s25  }
 0x173   : > { %s791_s14 = sshll.u32 %s784_s9, 4  ;;  %s13086_s18 = scalar_lea.sflag [#allocation6], %s13791_s16  ;;  %s13082_s14 = int_to_ptr.vmem [resolvable:$true] %s791_s14 }
 0x177   : > { %s13078_s23 = scalar_lea.hbm %s13790_s20, %s10669_s6  ;;  %s12358_s1 = scalar_lea.hbm %s13790_s20, 1024 }
 0x178   : > { %s12353_s29 = scalar_lea.hbm %s13078_s23, 512  ;;  %p12359_p0 = scmp.lt.u32.totalorder %s13078_s23, %s13790_s20 }
 0x179   : > { %p12354_p7 = scmp.ne.s32.totalorder %s13078_s23, %s12353_s29  ;;  %p12360_p2 = scmp.lt.u32.totalorder %s12358_s1, %s12353_s29 }
 0x17a   : > { %p12362_p10 = scmp.lt.u32.totalorder %s12353_s29, %s13078_s23 }
 0x17b   : > { %p12356_p9 = pnand %p12354_p7, %p12325_p8  ;;  %p12361_p5 = por %p12360_p2, %p12359_p0 }
 0x17d   : > { %p12357_p3 = pneg %p12356_p9  ;;  %p12363_p1 = por %p12362_p10, %p12361_p5 }
 0x17f   : > { %p12364_p11 = pnand %p12363_p1, %p12357_p3 }
 0x181   : > { %12367 = shalt.err (!%p12364_p11)
}
 0x182   : > { %s12368_s12 = scalar_lea.vmem %s13082_s14, 512  ;;  %s12590_s16 = smov [#allocation5]  }
 0x183   : > { %p12369_p12 = scmp.ne.s32.totalorder %s13082_s14, %s12368_s12  ;;  %s12373_s0 = sshll.u32 %s12590_s16, 4  ;;  %s12374_s0 = int_to_ptr.vmem [resolvable:$false] %s12373_s0 }
 0x184   : > { %s12375_s6 = scalar_lea.vmem %s12374_s0, 1024  ;;  %p12376_p9 = scmp.lt.s32.totalorder %s13082_s14, %s12374_s0 }
 0x185   : > { %p12371_p13 = pnand %p12369_p12, %p12325_p8  ;;  %p12377_p0 = scmp.lt.s32.totalorder %s12375_s6, %s12368_s12 }
 0x187   : > { %p12372_p7 = pneg %p12371_p13  ;;  %p12378_p2 = por %p12377_p0, %p12376_p9 }
 0x189   : > { %p12379_p5 = pnand %p12378_p2, %p12372_p7 }
 0x18b   : > { %12382 = shalt.err (!%p12379_p5)
}
 0x18c   : > { %10984 = dma.hbm_to_vmem [thread:$0]  (!%p13037_p4), %s13078_s23, 512, %s13082_s14, %s13086_s18, %s13780_s27, %s13780_s27, %s13779_s19  }
 0x18d   : > { %p13792_p8 = scmp.ne.s32.totalorder %s13764_s2, 0 }
 0x18e   : > { %s13118_s29 = sand.u32 (!%p13792_p8), 1, %s12561_s30  }
 0x18f   : > { %803 = sbr.rel (%p13792_p8) target bundleno = 3142 (0xc46), region = 100  ;;  %s9623_s7 = sshll.u32 (!%p13792_p8), %s13118_s29, 6 }
 0x190   : > { %s806_s10 = scalar_lea.sflag (!%p13792_p8), [#allocation3], %s13118_s29  ;;  %s13124_s8 = scalar_lea.vmem (!%p13792_p8), [#allocation2], %s9623_s7 }
 0x196   : > { %12512 = dma.done.wait (%p13007_p6), %s806_s10, 1024  }
 0x197   : > { %12514 = vsyncadd (%p13007_p6), %s806_s10, 4294966272  ;;  %s814_s18 = sand.u32 1, %s12741_s26   ;;  %s13132_s2 = sshll.u32 %s13118_s29, 5 }
 0x198   : > { %s815_s19 = scalar_lea.sflag [#allocation6], %s814_s18  ;;  %s13137_s27 = scalar_lea.vmem [#allocation5], %s13132_s2 }
 0x199   : > { %12516 = dma.done.wait (%p13007_p6), %s815_s19, 512  }
 0x19a   : > { %12518 = vsyncadd (%p13007_p6), %s815_s19, 4294966784  ;;  %p13793_p4 = scmp.eq.s32.totalorder %s12741_s26, 0 }
 0x19c   : > { %12520 = dma.done.wait (%p13793_p4), [#allocation6], 16384   ;;  %p13794_p3 = pmov %p13793_p4 }
 0x19e   : > { %12522 = vsyncadd (%p13794_p3), [#allocation6], 4294950912  ;;  %p13795_p10 = pmov %p13794_p3 }
 0x19f   : > { %p13796_p1 = pmov %p13794_p3 }
 0x1a0   : > { %12524 = dma.done.wait (%p13795_p10), [#allocation9], 32832  }
 0x1a1   : > { %12526 = vsyncadd (%p13796_p1), [#allocation9], 4294934464  ;;  %p13797_p11 = pmov %p13796_p1 }
 0x1a2   : > { %p13798_p12 = pmov %p13796_p1 }
 0x1a3   : > { %12528 = dma.done.wait (%p13797_p11), [#allocation12], 12288  }
 0x1a4   : > { %12530 = vsyncadd (%p13798_p12), [#allocation12], 4294955008  ;;  %p13799_p6 = pmov %p13796_p1 }
 0x1a5   : > { %p13800_p13 = pmov %p13796_p1 }
 0x1a6   : > { %12532 = dma.done.wait (%p13799_p6), [#allocation15], 49152  }
 0x1a7   : > { %12534 = vsyncadd (%p13800_p13), [#allocation15], 4294918144  ;;  %p13801_p7 = pmov %p13796_p1 }
 0x1a8   : > { %p13802_p9 = pmov %p13796_p1 }
 0x1a9   : > { %12536 = dma.done.wait (%p13801_p7), [#allocation18], 16384  }
 0x1aa   : > { %12538 = vsyncadd (%p13802_p9), [#allocation18], 4294950912  ;;  %p13803_p0 = pmov %p13796_p1 }
 0x1ac   : > { %12540 = dma.done.wait (%p13803_p0), [#allocation21], 2048   ;;  %p13804_p2 = pmov %p13803_p0 }
 0x1ad   : > { %v960_v0 = vld [vmem:[#allocation7] sm:$0xff]  ;;  %v961_v17 = vld [vmem:[#allocation7 + $0x8] sm:$0xff]  ;;  %v951_v20 = vld [vmem:[%s13124_s8 + $0x18] sm:$0xff]  ;;  %s13805_s9 = sld [smem:[#allocation42_spill]]  ;;  %s13806_s5 = sld [smem:[#allocation46_spill]] }
 0x1ae   : > { %12542 = vsyncadd (%p13804_p2), [#allocation21], 4294965248  ;;  %v964_v1 = vld [vmem:[#allocation7 + $0x20] sm:$0xff]  ;;  %v965_v18 = vld [vmem:[#allocation7 + $0x28] sm:$0xff]  ;;  %s13333_s1 = scalar_lea.vmem [#allocation23], %s13132_s2  ;;  %s13337_s22 = scalar_lea.vmem [#allocation25], %s13132_s2 }
 0x1af   : > { %v968_v2 = vld [vmem:[#allocation7 + $0x40] sm:$0xff]  ;;  %v9640_v3 = vcombine.high %v960_v0, %v964_v1  ;;  %v9639_v4 = vcombine.low %v960_v0, %v964_v1  ;;  %v949_v19 = vld [vmem:[%s13124_s8 + $0x8] sm:$0xff]  ;;  %v9642_v22 = vcombine.high %v961_v17, %v965_v18  ;;  %v9641_v23 = vcombine.low %v961_v17, %v965_v18  ;;  %s13807_s16 = sld [smem:[#allocation48_spill]]  ;;  %s13808_s10 = sld [smem:[#allocation50_spill]] }
 0x1b0   : > { %v972_v5 = vld [vmem:[#allocation7 + $0x60] sm:$0xff]  ;;  %v13169_v24 = vpack.c.bf16 %v951_v20, %v949_v19  ;;  %v969_v25 = vld [vmem:[#allocation7 + $0x48] sm:$0xff]  ;;  %s13479_s28 = scalar_lea.vmem [#allocation22], %s9623_s7  ;;  %s9286_s11 = sshll.u32 %s13333_s1, 4  ;;  %s13521_s11 = int_to_ptr.vmem [resolvable:$true] %s9286_s11 }
 0x1b1   : > { %v9648_v6 = vcombine.high %v968_v2, %v972_v5  ;;  %v976_v7 = vld [vmem:[#allocation7 + $0x80] sm:$0xff]  ;;  %1770 = vmatprep.subr.bf16.mxu0 %v9640_v3  ;;  %v9647_v9 = vcombine.low %v968_v2, %v972_v5  ;;  %v973_v27 = vld [vmem:[#allocation7 + $0x68] sm:$0xff]  ;;  %1823 = vmatprep.subr.bf16.mxu1 %v9642_v22  ;;  %s9302_s12 = sshll.u32 %s13337_s22, 4  ;;  %s13542_s7 = scalar_lea.sflag [#allocation24], %s814_s18  ;;  %s13523_s12 = int_to_ptr.vmem [resolvable:$true] %s9302_s12 }
 0x1b2   : > { %v980_v8 = vld [vmem:[#allocation7 + $0xa0] sm:$0xff]  ;;  %1771 = vmatpush1.bf16.msra.mxu0 %v9639_v4  ;;  %v977_v28 = vld [vmem:[#allocation7 + $0x88] sm:$0xff]  ;;  %1802 = vmatprep.mubr.bf16.mxu0 %v13169_v24  ;;  %v9650_v32 = vcombine.high %v969_v25, %v973_v27  ;;  %v9649_v33 = vcombine.low %v969_v25, %v973_v27  ;;  %s12383_s23 = scalar_lea.vmem %s13521_s11, 512  ;;  %p13814_p8 = scmp.ne.s32.totalorder %s13786_s17, 0 }
 0x1b3   : > { %1772 = vmatprep.subr.bf16.mxu0 %v9648_v6  ;;  %v9656_v10 = vcombine.high %v976_v7, %v980_v8  ;;  %v984_v11 = vld [vmem:[#allocation7 + $0xc0] sm:$0xff]  ;;  %v9655_v13 = vcombine.low %v976_v7, %v980_v8  ;;  %v981_v29 = vld [vmem:[#allocation7 + $0xa8] sm:$0xff]  ;;  %1824 = vmatpush1.bf16.msra.mxu1 %v9641_v23  ;;  %p12384_p5 = scmp.ne.s32.totalorder %s13521_s11, %s12383_s23 }
 0x1b4   : > { %v988_v12 = vld [vmem:[#allocation7 + $0xe0] sm:$0xff]  ;;  %1855 = vmatprep.mubr.bf16.mxu1 %v13169_v24  ;;  %1825 = vmatprep.subr.bf16.mxu1 %v9650_v32  ;;  %v9658_v35 = vcombine.high %v977_v28, %v981_v29  ;;  %v985_v37 = vld [vmem:[#allocation7 + $0xc8] sm:$0xff]  ;;  %v9657_v41 = vcombine.low %v977_v28, %v981_v29 }
 0x1b5   : > { %v9664_v14 = vcombine.high %v984_v11, %v988_v12  ;;  %v992_v15 = vld [vmem:[#allocation7 + $0x100] sm:$0xff]  ;;  %v9663_v21 = vcombine.low %v984_v11, %v988_v12  ;;  %v989_v38 = vld [vmem:[#allocation7 + $0xe8] sm:$0xff]  ;;  %p12385_p4 = pnand %p12384_p5, %p13814_p8 }
 0x1b6   : > { %1773 = vmatpush1.bf16.msra.mxu0 %v9647_v9  ;;  %v996_v16 = vld [vmem:[#allocation7 + $0x120] sm:$0xff]  ;;  %v9666_v43 = vcombine.high %v985_v37, %v989_v38  ;;  %v993_v45 = vld [vmem:[#allocation7 + $0x108] sm:$0xff]  ;;  %v9665_v49 = vcombine.low %v985_v37, %v989_v38 }
 0x1b7   : > { %1774 = vmatprep.subr.bf16.mxu0 %v9656_v10  ;;  %v9672_v26 = vcombine.high %v992_v15, %v996_v16  ;;  %v1000_v30 = vld [vmem:[#allocation7 + $0x140] sm:$0xff]  ;;  %v9671_v34 = vcombine.low %v992_v15, %v996_v16  ;;  %1826 = vmatpush1.bf16.msra.mxu1 %v9649_v33  ;;  %v997_v46 = vld [vmem:[#allocation7 + $0x128] sm:$0xff]  ;;  %p12386_p3 = pneg %p12385_p4 }
 0x1b8   : > { %v1004_v31 = vld [vmem:[#allocation7 + $0x160] sm:$0xff]  ;;  %1827 = vmatprep.subr.bf16.mxu1 %v9658_v35  ;;  %v9674_v51 = vcombine.high %v993_v45, %v997_v46  ;;  %v1001_v53 = vld [vmem:[#allocation7 + $0x148] sm:$0xff]  ;;  %v9673_v57 = vcombine.low %v993_v45, %v997_v46 }
 0x1b9   : > { %v9680_v36 = vcombine.high %v1000_v30, %v1004_v31  ;;  %v1008_v39 = vld [vmem:[#allocation7 + $0x180] sm:$0xff]  ;;  %v9679_v42 = vcombine.low %v1000_v30, %v1004_v31  ;;  %v1005_v54 = vld [vmem:[#allocation7 + $0x168] sm:$0xff] }
 0x1ba   : > { %1775 = vmatpush1.bf16.msra.mxu0 %v9655_v13  ;;  %v1012_v40 = vld [vmem:[#allocation7 + $0x1a0] sm:$0xff]  ;;  %v9682_v59 = vcombine.high %v1001_v53, %v1005_v54  ;;  %v1009_v61 = vld [vmem:[#allocation7 + $0x188] sm:$0xff]  ;;  %v9681_v1 = vcombine.low %v1001_v53, %v1005_v54 }
 0x1bb   : > { %1776 = vmatprep.subr.bf16.mxu0 %v9664_v14  ;;  %v9688_v44 = vcombine.high %v1008_v39, %v1012_v40  ;;  %v1016_v47 = vld [vmem:[#allocation7 + $0x1c0] sm:$0xff]  ;;  %1828 = vmatpush1.bf16.msra.mxu1 %v9657_v41  ;;  %v9687_v50 = vcombine.low %v1008_v39, %v1012_v40  ;;  %v1013_v62 = vld [vmem:[#allocation7 + $0x1a8] sm:$0xff] }
 0x1bc   : > { %v1020_v48 = vld [vmem:[#allocation7 + $0x1e0] sm:$0xff]  ;;  %1829 = vmatprep.subr.bf16.mxu1 %v9666_v43  ;;  %v9690_v3 = vcombine.high %v1009_v61, %v1013_v62  ;;  %v1017_v5 = vld [vmem:[#allocation7 + $0x1c8] sm:$0xff]  ;;  %v9689_v9 = vcombine.low %v1009_v61, %v1013_v62  ;;  %v955_v62 = vld [vmem:[%s13124_s8 + $0x38] sm:$0xff] }
 0x1bd   : > { %v9696_v52 = vcombine.high %v1016_v47, %v1020_v48  ;;  %v1024_v55 = vld [vmem:[#allocation7 + $0x200] sm:$0xff]  ;;  %v9695_v58 = vcombine.low %v1016_v47, %v1020_v48  ;;  %v1021_v6 = vld [vmem:[#allocation7 + $0x1e8] sm:$0xff] }
 0x1be   : > { %1777 = vmatpush1.bf16.msra.mxu0 %v9663_v21  ;;  %v1028_v56 = vld [vmem:[#allocation7 + $0x220] sm:$0xff]  ;;  %v9698_v11 = vcombine.high %v1017_v5, %v1021_v6  ;;  %v1025_v13 = vld [vmem:[#allocation7 + $0x208] sm:$0xff]  ;;  %v9697_v17 = vcombine.low %v1017_v5, %v1021_v6  ;;  %v970_v6 = vld [vmem:[#allocation7 + $0x50] sm:$0xff] }
 0x1bf   : > { %1778 = vmatprep.subr.bf16.mxu0 %v9672_v26  ;;  %1830 = vmatpush1.bf16.msra.mxu1 %v9665_v49  ;;  %v9704_v60 = vcombine.high %v1024_v55, %v1028_v56  ;;  %v1032_v63 = vld [vmem:[#allocation7 + $0x240] sm:$0xff]  ;;  %v9703_v2 = vcombine.low %v1024_v55, %v1028_v56  ;;  %v1029_v14 = vld [vmem:[#allocation7 + $0x228] sm:$0xff] }
 0x1c0   : > { %1831 = vmatprep.subr.bf16.mxu1 %v9674_v51  ;;  %v1036_v0 = vld [vmem:[#allocation7 + $0x260] sm:$0xff]  ;;  %v9706_v19 = vcombine.high %v1025_v13, %v1029_v14  ;;  %v1033_v21 = vld [vmem:[#allocation7 + $0x248] sm:$0xff]  ;;  %v9705_v26 = vcombine.low %v1025_v13, %v1029_v14  ;;  %v954_v14 = vld [vmem:[%s13124_s8 + $0x30] sm:$0xff] }
 0x1c1   : > { %v9712_v4 = vcombine.high %v1032_v63, %v1036_v0  ;;  %v1040_v7 = vld [vmem:[#allocation7 + $0x280] sm:$0xff]  ;;  %v9711_v10 = vcombine.low %v1032_v63, %v1036_v0  ;;  %v1037_v22 = vld [vmem:[#allocation7 + $0x268] sm:$0xff] }
 0x1c2   : > { %1779 = vmatpush1.bf16.msra.mxu0 %v9671_v34  ;;  %v1044_v8 = vld [vmem:[#allocation7 + $0x2a0] sm:$0xff]  ;;  %v9714_v28 = vcombine.high %v1033_v21, %v1037_v22  ;;  %v1041_v29 = vld [vmem:[#allocation7 + $0x288] sm:$0xff]  ;;  %v9713_v34 = vcombine.low %v1033_v21, %v1037_v22  ;;  %v967_v22 = vld [vmem:[#allocation7 + $0x38] sm:$0xff] }
 0x1c3   : > { %1780 = vmatprep.subr.bf16.mxu0 %v9680_v36  ;;  %1832 = vmatpush1.bf16.msra.mxu1 %v9673_v57  ;;  %v9720_v12 = vcombine.high %v1040_v7, %v1044_v8  ;;  %v1048_v15 = vld [vmem:[#allocation7 + $0x2c0] sm:$0xff]  ;;  %v9719_v18 = vcombine.low %v1040_v7, %v1044_v8  ;;  %v1045_v31 = vld [vmem:[#allocation7 + $0x2a8] sm:$0xff]  ;;  %v950_v57 = vld [vmem:[%s13124_s8 + $0x10] sm:$0xff] }
 0x1c4   : > { %1833 = vmatprep.subr.bf16.mxu1 %v9682_v59  ;;  %v1052_v16 = vld [vmem:[#allocation7 + $0x2e0] sm:$0xff]  ;;  %v9722_v36 = vcombine.high %v1041_v29, %v1045_v31  ;;  %v1049_v37 = vld [vmem:[#allocation7 + $0x2c8] sm:$0xff]  ;;  %v966_v59 = vld [vmem:[#allocation7 + $0x30] sm:$0xff] }
 0x1c5   : > { %v9728_v20 = vcombine.high %v1048_v15, %v1052_v16  ;;  %v1056_v23 = vld [vmem:[#allocation7 + $0x300] sm:$0xff]  ;;  %v9727_v27 = vcombine.low %v1048_v15, %v1052_v16  ;;  %v1053_v39 = vld [vmem:[#allocation7 + $0x2e8] sm:$0xff]  ;;  %v974_v7 = vld [vmem:[#allocation7 + $0x70] sm:$0xff] }
 0x1c6   : > { %1781 = vmatpush1.bf16.msra.mxu0 %v9679_v42  ;;  %v1060_v25 = vld [vmem:[#allocation7 + $0x320] sm:$0xff]  ;;  %v9721_v42 = vcombine.low %v1041_v29, %v1045_v31  ;;  %v1057_v45 = vld [vmem:[#allocation7 + $0x308] sm:$0xff]  ;;  %v9652_v15 = vcombine.high %v970_v6, %v974_v7  ;;  %v9651_v21 = vcombine.low %v970_v6, %v974_v7  ;;  %v1011_v6 = vld [vmem:[#allocation7 + $0x198] sm:$0xff] }
 0x1c7   : > { %1782 = vmatprep.subr.bf16.mxu0 %v9688_v44  ;;  %1834 = vmatpush1.bf16.msra.mxu1 %v9681_v1  ;;  %v9736_v30 = vcombine.high %v1056_v23, %v1060_v25  ;;  %v1064_v32 = vld [vmem:[#allocation7 + $0x340] sm:$0xff]  ;;  %v9735_v35 = vcombine.low %v1056_v23, %v1060_v25  ;;  %v9730_v44 = vcombine.high %v1049_v37, %v1053_v39  ;;  %v1061_v47 = vld [vmem:[#allocation7 + $0x328] sm:$0xff]  ;;  %v1015_v7 = vld [vmem:[#allocation7 + $0x1b8] sm:$0xff] }
 0x1c8   : > { %1835 = vmatprep.subr.bf16.mxu1 %v9690_v3  ;;  %v1068_v33 = vld [vmem:[#allocation7 + $0x360] sm:$0xff]  ;;  %v1065_v53 = vld [vmem:[#allocation7 + $0x348] sm:$0xff] }
 0x1c9   : > { %v9744_v38 = vcombine.high %v1064_v32, %v1068_v33  ;;  %v1072_v40 = vld [vmem:[#allocation7 + $0x380] sm:$0xff]  ;;  %v9743_v43 = vcombine.low %v1064_v32, %v1068_v33  ;;  %v1069_v55 = vld [vmem:[#allocation7 + $0x368] sm:$0xff]  ;;  %v975_v32 = vld [vmem:[#allocation7 + $0x78] sm:$0xff] }
 0x1ca   : > { %1783 = vmatpush1.bf16.msra.mxu0 %v9687_v50  ;;  %v1076_v41 = vld [vmem:[#allocation7 + $0x3a0] sm:$0xff]  ;;  %v9729_v50 = vcombine.low %v1049_v37, %v1053_v39  ;;  %v953_v61 = vld [vmem:[%s13124_s8 + $0x28] sm:$0xff]  ;;  %v9746_v0 = vcombine.high %v1065_v53, %v1069_v55  ;;  %v9745_v5 = vcombine.low %v1065_v53, %v1069_v55  ;;  %v995_v53 = vld [vmem:[#allocation7 + $0x118] sm:$0xff] }
 0x1cb   : > { %1784 = vmatprep.subr.bf16.mxu0 %v9696_v52  ;;  %1836 = vmatpush1.bf16.msra.mxu1 %v9689_v9  ;;  %v9752_v46 = vcombine.high %v1072_v40, %v1076_v41  ;;  %v1080_v48 = vld [vmem:[#allocation7 + $0x3c0] sm:$0xff]  ;;  %v9751_v51 = vcombine.low %v1072_v40, %v1076_v41  ;;  %v9738_v52 = vcombine.high %v1057_v45, %v1061_v47  ;;  %v1073_v1 = vld [vmem:[#allocation7 + $0x388] sm:$0xff]  ;;  %v983_v40 = vld [vmem:[#allocation7 + $0xb8] sm:$0xff] }
 0x1cc   : > { %1837 = vmatprep.subr.bf16.mxu1 %v9698_v11  ;;  %v1084_v49 = vld [vmem:[#allocation7 + $0x3e0] sm:$0xff]  ;;  %v13179_v8 = vpack.c.bf16 %v955_v62, %v953_v61  ;;  %v1085_v11 = vld [vmem:[#allocation7 + $0x3e8] sm:$0xff]  ;;  %v1003_v61 = vld [vmem:[#allocation7 + $0x158] sm:$0xff] }
 0x1cd   : > { %v9760_v54 = vcombine.high %v1080_v48, %v1084_v49  ;;  %v948_v56 = vld [vmem:[%s13124_s8] sm:$0xff]  ;;  %v9759_v63 = vcombine.low %v1080_v48, %v1084_v49  ;;  %v991_v48 = vld [vmem:[#allocation7 + $0xf8] sm:$0xff] }
 0x1ce   : > { %1785 = vmatpush1.bf16.msra.mxu0 %v9695_v58  ;;  %v962_v58 = vld [vmem:[#allocation7 + $0x10] sm:$0xff]  ;;  %v952_v13 = vld [vmem:[%s13124_s8 + $0x20] sm:$0xff]  ;;  %v1007_v62 = vld [vmem:[#allocation7 + $0x178] sm:$0xff] }
 0x1cf   : > { %1786 = vmatprep.subr.bf16.mxu0 %v9704_v60  ;;  %1838 = vmatpush1.bf16.msra.mxu1 %v9697_v17  ;;  %v9737_v60 = vcombine.low %v1057_v45, %v1061_v47  ;;  %v9644_v3 = vcombine.high %v962_v58, %v966_v59  ;;  %v978_v17 = vld [vmem:[#allocation7 + $0x90] sm:$0xff]  ;;  %v13185_v25 = vpack.c.bf16 %v954_v14, %v952_v13  ;;  %v1019_v14 = vld [vmem:[#allocation7 + $0x1d8] sm:$0xff] }
 0x1d0   : > { %1839 = vmatprep.subr.bf16.mxu1 %v9706_v19  ;;  %v9685_v13 = vcombine.low %v1003_v61, %v1007_v62 }
 0x1d2   : > { %1787 = vmatpush1.bf16.msra.mxu0 %v9703_v2  ;;  %v1077_v2 = vld [vmem:[#allocation7 + $0x3a8] sm:$0xff] }
 0x1d3   : > { %1788 = vmatprep.subr.bf16.mxu0 %v9712_v4  ;;  %1840 = vmatpush1.bf16.msra.mxu1 %v9705_v26  ;;  %v13177_v4 = vpack.c.bf16 %v950_v57, %v948_v56  ;;  %v9754_v9 = vcombine.high %v1073_v1, %v1077_v2  ;;  %v9753_v16 = vcombine.low %v1073_v1, %v1077_v2  ;;  %v1018_v57 = vld [vmem:[#allocation7 + $0x1d0] sm:$0xff] }
 0x1d4   : > { %1841 = vmatprep.subr.bf16.mxu1 %v9714_v28  ;;  %v990_v28 = vld [vmem:[#allocation7 + $0xf0] sm:$0xff] }
 0x1d5   : > { %v1026_v1 = vld [vmem:[#allocation7 + $0x210] sm:$0xff] }
 0x1d6   : > { %1789 = vmatpush1.bf16.msra.mxu0 %v9711_v10  ;;  %v1081_v10 = vld [vmem:[#allocation7 + $0x3c8] sm:$0xff]  ;;  %v1030_v2 = vld [vmem:[#allocation7 + $0x230] sm:$0xff] }
 0x1d7   : > { %1790 = vmatprep.subr.bf16.mxu0 %v9720_v12  ;;  %1842 = vmatpush1.bf16.msra.mxu1 %v9713_v34  ;;  %v9643_v12 = vcombine.low %v962_v58, %v966_v59  ;;  %v9762_v19 = vcombine.high %v1081_v10, %v1085_v11  ;;  %v9761_v26 = vcombine.low %v1081_v10, %v1085_v11  ;;  %v994_v34 = vld [vmem:[#allocation7 + $0x110] sm:$0xff] }
 0x1d8   : > { %1843 = vmatprep.subr.bf16.mxu1 %v9722_v36  ;;  %v1022_v58 = vld [vmem:[#allocation7 + $0x1f0] sm:$0xff] }
 0x1d9   : > { %v9699_v10 = vcombine.low %v1018_v57, %v1022_v58  ;;  %v1034_v11 = vld [vmem:[#allocation7 + $0x250] sm:$0xff] }
 0x1da   : > { %1791 = vmatpush1.bf16.msra.mxu0 %v9719_v18  ;;  %v982_v18 = vld [vmem:[#allocation7 + $0xb0] sm:$0xff] }
 0x1db   : > { %1792 = vmatprep.subr.bf16.mxu0 %v9728_v20  ;;  %1844 = vmatpush1.bf16.msra.mxu1 %v9721_v42  ;;  %v963_v20 = vld [vmem:[#allocation7 + $0x18] sm:$0xff]  ;;  %v9660_v23 = vcombine.high %v978_v17, %v982_v18  ;;  %v9659_v31 = vcombine.low %v978_v17, %v982_v18  ;;  %v1002_v42 = vld [vmem:[#allocation7 + $0x150] sm:$0xff]  ;;  %v9707_v17 = vcombine.low %v1026_v1, %v1030_v2 }
 0x1dc   : > { %1845 = vmatprep.subr.bf16.mxu1 %v9730_v44  ;;  %v9646_v29 = vcombine.high %v963_v20, %v967_v22  ;;  %v9645_v36 = vcombine.low %v963_v20, %v967_v22  ;;  %v1042_v18 = vld [vmem:[#allocation7 + $0x290] sm:$0xff]  ;;  %v1027_v22 = vld [vmem:[#allocation7 + $0x218] sm:$0xff] }
 0x1de   : > { %1793 = vmatpush1.bf16.msra.mxu0 %v9727_v27  ;;  %v986_v27 = vld [vmem:[#allocation7 + $0xd0] sm:$0xff] }
 0x1df   : > { %1794 = vmatprep.subr.bf16.mxu0 %v9736_v30  ;;  %1846 = vmatpush1.bf16.msra.mxu1 %v9729_v50  ;;  %v971_v30 = vld [vmem:[#allocation7 + $0x58] sm:$0xff]  ;;  %v9668_v33 = vcombine.high %v986_v27, %v990_v28  ;;  %v9667_v39 = vcombine.low %v986_v27, %v990_v28  ;;  %v1010_v50 = vld [vmem:[#allocation7 + $0x190] sm:$0xff] }
 0x1e0   : > { %1847 = vmatprep.subr.bf16.mxu1 %v9738_v52  ;;  %v9654_v37 = vcombine.high %v971_v30, %v975_v32  ;;  %v9653_v44 = vcombine.low %v971_v30, %v975_v32  ;;  %v1050_v28 = vld [vmem:[#allocation7 + $0x2d0] sm:$0xff]  ;;  %v1035_v32 = vld [vmem:[#allocation7 + $0x258] sm:$0xff] }
 0x1e2   : > { %1795 = vmatpush1.bf16.msra.mxu0 %v9735_v35  ;;  %v998_v35 = vld [vmem:[#allocation7 + $0x130] sm:$0xff] }
 0x1e3   : > { %1796 = vmatprep.subr.bf16.mxu0 %v9744_v38  ;;  %1848 = vmatpush1.bf16.msra.mxu1 %v9737_v60  ;;  %v979_v38 = vld [vmem:[#allocation7 + $0x98] sm:$0xff]  ;;  %v9676_v41 = vcombine.high %v994_v34, %v998_v35  ;;  %v9675_v47 = vcombine.low %v994_v34, %v998_v35 }
 0x1e4   : > { %1849 = vmatprep.subr.bf16.mxu1 %v9746_v0  ;;  %v9662_v45 = vcombine.high %v979_v38, %v983_v40  ;;  %v9661_v52 = vcombine.low %v979_v38, %v983_v40  ;;  %v1043_v40 = vld [vmem:[#allocation7 + $0x298] sm:$0xff] }
 0x1e6   : > { %1797 = vmatpush1.bf16.msra.mxu0 %v9743_v43  ;;  %v1006_v43 = vld [vmem:[#allocation7 + $0x170] sm:$0xff] }
 0x1e7   : > { %1798 = vmatprep.subr.bf16.mxu0 %v9752_v46  ;;  %1850 = vmatpush1.bf16.msra.mxu1 %v9745_v5  ;;  %v987_v46 = vld [vmem:[#allocation7 + $0xd8] sm:$0xff]  ;;  %v9684_v49 = vcombine.high %v1002_v42, %v1006_v43  ;;  %v9683_v56 = vcombine.low %v1002_v42, %v1006_v43 }
 0x1e8   : > { %1851 = vmatprep.subr.bf16.mxu1 %v9754_v9  ;;  %v9670_v55 = vcombine.high %v987_v46, %v991_v48  ;;  %v9669_v60 = vcombine.low %v987_v46, %v991_v48  ;;  %v9686_v9 = vcombine.high %v1003_v61, %v1007_v62  ;;  %v1051_v48 = vld [vmem:[#allocation7 + $0x2d8] sm:$0xff]  ;;  %v1086_v61 = vld [vmem:[#allocation7 + $0x3f0] sm:$0xff] }
 0x1ea   : > { %1799 = vmatpush1.bf16.msra.mxu0 %v9751_v51  ;;  %v1014_v51 = vld [vmem:[#allocation7 + $0x1b0] sm:$0xff] }
 0x1eb   : > { %1800 = vmatprep.subr.bf16.mxu0 %v9760_v54  ;;  %1852 = vmatpush1.bf16.msra.mxu1 %v9753_v16  ;;  %v999_v54 = vld [vmem:[#allocation7 + $0x138] sm:$0xff]  ;;  %v9692_v59 = vcombine.high %v1010_v50, %v1014_v51  ;;  %v9691_v0 = vcombine.low %v1010_v50, %v1014_v51  ;;  %v9694_v16 = vcombine.high %v1011_v6, %v1015_v7 }
 0x1ec   : > { %1853 = vmatprep.subr.bf16.mxu1 %v9762_v19  ;;  %v9677_v5 = vcombine.low %v995_v53, %v999_v54  ;;  %v1046_v19 = vld [vmem:[#allocation7 + $0x2b0] sm:$0xff] }
 0x1ed   : > { %v9724_v30 = vcombine.high %v1042_v18, %v1046_v19  ;;  %v9723_v35 = vcombine.low %v1042_v18, %v1046_v19  ;;  %v11081_v19 = vld [vmem:[#allocation8 + $0x20] ss:$16 sps:$4 sm:$0xff]  }
 0x1ee   : > { %1801 = vmatpush1.bf16.msra.mxu0 %v9759_v63  ;;  %v9678_v63 = vcombine.high %v995_v53, %v999_v54  ;;  %v1078_v53 = vld [vmem:[#allocation7 + $0x3b0] sm:$0xff] }
 0x1ef   : > { %1876 = vmatprep.subr.bf16.mxu0 %v9644_v3  ;;  %1854 = vmatpush1.bf16.msra.mxu1 %v9761_v26  ;;  %v9700_v3 = vcombine.high %v1018_v57, %v1022_v58  ;;  %v1063_v57 = vld [vmem:[#allocation7 + $0x338] sm:$0xff] }
 0x1f0   : > { %1929 = vmatprep.subr.bf16.mxu1 %v9646_v29  ;;  %v1054_v29 = vld [vmem:[#allocation7 + $0x2f0] sm:$0xff] }
 0x1f1   : > { %1803 = vmatmul.mubr.bf16.vlgmr.msra.gmra.mrb[0].mxu0 %v13177_v4  ;;  %v9732_v38 = vcombine.high %v1050_v28, %v1054_v29  ;;  %v9731_v43 = vcombine.low %v1050_v28, %v1054_v29  ;;  %v11078_v28 = vld [vmem:[#allocation8 + $0x8] ss:$16 sps:$4 sm:$0xff]   ;;  %v11086_v29 = vld [vmem:[#allocation8 + $0x2c] ss:$16 sps:$4 sm:$0xff]  }
 0x1f2   : > { %1812 = vmatprep.mubr.bf16.mxu0 %v13179_v8  ;;  %1877 = vmatpush1.bf16.msra.mxu0 %v9643_v12  ;;  %v1038_v12 = vld [vmem:[#allocation7 + $0x270] sm:$0xff] }
 0x1f3   : > { %1878 = vmatprep.subr.bf16.mxu0 %v9652_v15  ;;  %1856 = vmatmul.mubr.bf16.vlgmr.msra.gmra.mrb[0].mxu1 %v13177_v4  ;;  %v1023_v15 = vld [vmem:[#allocation7 + $0x1f8] sm:$0xff]  ;;  %v9716_v20 = vcombine.high %v1034_v11, %v1038_v12  ;;  %v9715_v27 = vcombine.low %v1034_v11, %v1038_v12  ;;  %v11077_v11 = vld [vmem:[#allocation8 + $0x4] ss:$16 sps:$4 sm:$0xff]  }
 0x1f4   : > { %1930 = vmatpush1.bf16.msra.mxu1 %v9645_v36  ;;  %1865 = vmatprep.mubr.bf16.mxu1 %v13179_v8  ;;  %v9702_v26 = vcombine.high %v1019_v14, %v1023_v15  ;;  %v1058_v36 = vld [vmem:[#allocation7 + $0x310] sm:$0xff] }
 0x1f5   : > { %1931 = vmatprep.subr.bf16.mxu1 %v9654_v37  ;;  %v1062_v37 = vld [vmem:[#allocation7 + $0x330] sm:$0xff] }
 0x1f6   : > { %1879 = vmatpush1.bf16.msra.mxu0 %v9651_v21  ;;  %v9693_v21 = vcombine.low %v1011_v6, %v1015_v7  ;;  %v9740_v46 = vcombine.high %v1058_v36, %v1062_v37  ;;  %v9739_v51 = vcombine.low %v1058_v36, %v1062_v37  ;;  %v1075_v7 = vld [vmem:[#allocation7 + $0x398] sm:$0xff] }
 0x1f7   : > { %1880 = vmatprep.subr.bf16.mxu0 %v9660_v23  ;;  %v1031_v23 = vld [vmem:[#allocation7 + $0x238] sm:$0xff] }
 0x1f8   : > { %1932 = vmatpush1.bf16.msra.mxu1 %v9653_v44  ;;  %v9710_v34 = vcombine.high %v1027_v22, %v1031_v23  ;;  %v1066_v44 = vld [vmem:[#allocation7 + $0x350] sm:$0xff]  ;;  %v11090_v36 = vld [vmem:[#allocation8 + $0x48] ss:$16 sps:$4 sm:$0xff]   ;;  %v11098_v37 = vld [vmem:[#allocation8 + $0x6c] ss:$16 sps:$4 sm:$0xff]  }
 0x1f9   : > { %1813 = vmatmul.mubr.bf16.gmra.mrb[4].mxu0 %v13185_v25  ;;  %1933 = vmatprep.subr.bf16.mxu1 %v9662_v45  ;;  %v1070_v45 = vld [vmem:[#allocation7 + $0x370] sm:$0xff] }
 0x1fa   : > { %1908 = vmatprep.mubr.bf16.mxu0 %v13169_v24  ;;  %1881 = vmatpush1.bf16.msra.mxu0 %v9659_v31  ;;  %v9701_v31 = vcombine.low %v1019_v14, %v1023_v15  ;;  %v9748_v54 = vcombine.high %v1066_v44, %v1070_v45  ;;  %v1087_v14 = vld [vmem:[#allocation7 + $0x3f8] sm:$0xff]  ;;  %v11075_v15 = vld [vmem:[#allocation8] ss:$16 sps:$4 sm:$0xff]  }
 0x1fb   : > { %1882 = vmatprep.subr.bf16.mxu0 %v9668_v33  ;;  %1866 = vmatmul.mubr.bf16.gmra.mrb[4].mxu1 %v13185_v25  ;;  %v1039_v33 = vld [vmem:[#allocation7 + $0x278] sm:$0xff] }
 0x1fc   : > { %1934 = vmatpush1.bf16.msra.mxu1 %v9661_v52  ;;  %1961 = vmatprep.mubr.bf16.mxu1 %v13169_v24  ;;  %v9708_v24 = vcombine.high %v1026_v1, %v1030_v2  ;;  %v9718_v42 = vcombine.high %v1035_v32, %v1039_v33  ;;  %v1074_v52 = vld [vmem:[#allocation7 + $0x390] sm:$0xff]  ;;  %v1071_v1 = vld [vmem:[#allocation7 + $0x378] sm:$0xff] }
 0x1fd   : > { %1935 = vmatprep.subr.bf16.mxu1 %v9670_v55  ;;  %v9756_v62 = vcombine.high %v1074_v52, %v1078_v53 }
 0x1fe   : > { %1883 = vmatpush1.bf16.msra.mxu0 %v9667_v39  ;;  %v9709_v39 = vcombine.low %v1027_v22, %v1031_v23  ;;  %v11080_v22 = vld [vmem:[#allocation8 + $0xc] ss:$16 sps:$4 sm:$0xff]  }
 0x1ff   : > { %1884 = vmatprep.subr.bf16.mxu0 %v9676_v41  ;;  %v1047_v41 = vld [vmem:[#allocation7 + $0x2b8] sm:$0xff] }
 0x200   : > { %1936 = vmatpush1.bf16.msra.mxu1 %v9669_v60  ;;  %v9726_v50 = vcombine.high %v1043_v40, %v1047_v41  ;;  %v9725_v55 = vcombine.low %v1043_v40, %v1047_v41  ;;  %v1082_v60 = vld [vmem:[#allocation7 + $0x3d0] sm:$0xff] }
 0x201   : > { %1937 = vmatprep.subr.bf16.mxu1 %v9678_v63  ;;  %v9763_v12 = vcombine.low %v1082_v60, %v1086_v61  ;;  %v11113_v40 = vld [vmem:[#allocation8 + $0xc4] ss:$16 sps:$4 sm:$0xff]   ;;  %v11111_v41 = vld [vmem:[#allocation8 + $0xc0] ss:$16 sps:$4 sm:$0xff]  }
 0x202   : > { %1885 = vmatpush1.bf16.msra.mxu0 %v9675_v47  ;;  %v9717_v47 = vcombine.low %v1035_v32, %v1039_v33  ;;  %v11084_v32 = vld [vmem:[#allocation8 + $0x28] ss:$16 sps:$4 sm:$0xff]   ;;  %v11092_v33 = vld [vmem:[#allocation8 + $0x4c] ss:$16 sps:$4 sm:$0xff]  }
 0x203   : > { %1886 = vmatprep.subr.bf16.mxu0 %v9684_v49  ;;  %v1055_v49 = vld [vmem:[#allocation7 + $0x2f8] sm:$0xff] }
 0x204   : > { %1938 = vmatpush1.bf16.msra.mxu1 %v9677_v5  ;;  %v9734_v58 = vcombine.high %v1051_v48, %v1055_v49  ;;  %v9733_v63 = vcombine.low %v1051_v48, %v1055_v49  ;;  %v9764_v5 = vcombine.high %v1082_v60, %v1086_v61  ;;  %v11123_v48 = vld [vmem:[#allocation8 + $0x100] ss:$16 sps:$4 sm:$0xff]   ;;  %v11131_v49 = vld [vmem:[#allocation8 + $0x124] ss:$16 sps:$4 sm:$0xff]   ;;  %v11132_v60 = vld [vmem:[#allocation8 + $0x128] ss:$16 sps:$4 sm:$0xff]  }
 0x205   : > { %1939 = vmatprep.subr.bf16.mxu1 %v9686_v9  ;;  %v1079_v9 = vld [vmem:[#allocation7 + $0x3b8] sm:$0xff]  ;;  %v11149_v61 = vld [vmem:[#allocation8 + $0x184] ss:$16 sps:$4 sm:$0xff]  }
 0x206   : > { %1887 = vmatpush1.bf16.msra.mxu0 %v9683_v56  ;;  %v1059_v56 = vld [vmem:[#allocation7 + $0x318] sm:$0xff]  ;;  %v9757_v18 = vcombine.low %v1075_v7, %v1079_v9 }
 0x207   : > { %1888 = vmatprep.subr.bf16.mxu0 %v9692_v59  ;;  %v9747_v59 = vcombine.low %v1066_v44, %v1070_v45  ;;  %v9742_v2 = vcombine.high %v1059_v56, %v1063_v57  ;;  %v9741_v6 = vcombine.low %v1059_v56, %v1063_v57  ;;  %v11117_v44 = vld [vmem:[#allocation8 + $0xe0] ss:$16 sps:$4 sm:$0xff]   ;;  %v11108_v45 = vld [vmem:[#allocation8 + $0xa8] ss:$16 sps:$4 sm:$0xff]   ;;  %v11143_v57 = vld [vmem:[#allocation8 + $0x164] ss:$16 sps:$4 sm:$0xff]  }
 0x208   : > { %1940 = vmatpush1.bf16.msra.mxu1 %v9685_v13  ;;  %v1083_v13 = vld [vmem:[#allocation7 + $0x3d8] sm:$0xff] }
 0x209   : > { %1941 = vmatprep.subr.bf16.mxu1 %v9694_v16  ;;  %v9758_v16 = vcombine.high %v1075_v7, %v1079_v9  ;;  %v9765_v23 = vcombine.low %v1083_v13, %v1087_v14  ;;  %v11126_v56 = vld [vmem:[#allocation8 + $0x108] ss:$16 sps:$4 sm:$0xff]   ;;  %v11152_v7 = vld [vmem:[#allocation8 + $0x18c] ss:$16 sps:$4 sm:$0xff]   ;;  %v11159_v9 = vld [vmem:[#allocation8 + $0x1c0] ss:$16 sps:$4 sm:$0xff]  }
 0x20a   : > { %1889 = vmatpush1.bf16.msra.mxu0 %v9691_v0  ;;  %v1067_v0 = vld [vmem:[#allocation7 + $0x358] sm:$0xff] }
 0x20b   : > { %1890 = vmatprep.subr.bf16.mxu0 %v9700_v3  ;;  %v9755_v3 = vcombine.low %v1074_v52, %v1078_v53  ;;  %v11120_v52 = vld [vmem:[#allocation8 + $0xe8] ss:$16 sps:$4 sm:$0xff]   ;;  %v11137_v53 = vld [vmem:[#allocation8 + $0x144] ss:$16 sps:$4 sm:$0xff]  }
 0x20c   : > { %1942 = vmatpush1.bf16.msra.mxu1 %v9693_v21  ;;  %v11089_v21 = vld [vmem:[#allocation8 + $0x44] ss:$16 sps:$4 sm:$0xff]  }
 0x20d   : > { %1943 = vmatprep.subr.bf16.mxu1 %v9702_v26  ;;  %v11087_v26 = vld [vmem:[#allocation8 + $0x40] ss:$16 sps:$4 sm:$0xff]  }
 0x20e   : > { %1891 = vmatpush1.bf16.msra.mxu0 %v9699_v10  ;;  %v9750_v10 = vcombine.high %v1067_v0, %v1071_v1 }
 0x20f   : > { %1892 = vmatprep.subr.bf16.mxu0 %v9708_v24  ;;  %v9749_v24 = vcombine.low %v1067_v0, %v1071_v1  ;;  %v11138_v0 = vld [vmem:[#allocation8 + $0x148] ss:$16 sps:$4 sm:$0xff]   ;;  %v11155_v1 = vld [vmem:[#allocation8 + $0x1a4] ss:$16 sps:$4 sm:$0xff]  }
 0x210   : > { %1944 = vmatpush1.bf16.msra.mxu1 %v9701_v31  ;;  %v11101_v31 = vld [vmem:[#allocation8 + $0x84] ss:$16 sps:$4 sm:$0xff]  }
 0x211   : > { %1945 = vmatprep.subr.bf16.mxu1 %v9710_v34  ;;  %v11099_v34 = vld [vmem:[#allocation8 + $0x80] ss:$16 sps:$4 sm:$0xff]  }
 0x212   : > { %1893 = vmatpush1.bf16.msra.mxu0 %v9707_v17  ;;  %v11083_v17 = vld [vmem:[#allocation8 + $0x24] ss:$16 sps:$4 sm:$0xff]  }
 0x213   : > { %1894 = vmatprep.subr.bf16.mxu0 %v9716_v20  ;;  %v9766_v20 = vcombine.high %v1083_v13, %v1087_v14  ;;  %v11173_v13 = vld [vmem:[#allocation8 + $0x204] ss:$16 sps:$4 sm:$0xff]   ;;  %v11156_v14 = vld [vmem:[#allocation8 + $0x1a8] ss:$16 sps:$4 sm:$0xff]  }
 0x214   : > { %1946 = vmatpush1.bf16.msra.mxu1 %v9709_v39  ;;  %v11096_v39 = vld [vmem:[#allocation8 + $0x68] ss:$16 sps:$4 sm:$0xff]  }
 0x215   : > { %1947 = vmatprep.subr.bf16.mxu1 %v9718_v42  ;;  %v11119_v42 = vld [vmem:[#allocation8 + $0xe4] ss:$16 sps:$4 sm:$0xff]  }
 0x216   : > { %1895 = vmatpush1.bf16.msra.mxu0 %v9715_v27  ;;  %v11095_v27 = vld [vmem:[#allocation8 + $0x64] ss:$16 sps:$4 sm:$0xff]  }
 0x217   : > { %1896 = vmatprep.subr.bf16.mxu0 %v9724_v30  ;;  %v11093_v30 = vld [vmem:[#allocation8 + $0x60] ss:$16 sps:$4 sm:$0xff]  }
 0x218   : > { %1948 = vmatpush1.bf16.msra.mxu1 %v9717_v47  ;;  %v11116_v47 = vld [vmem:[#allocation8 + $0xcc] ss:$16 sps:$4 sm:$0xff]  }
 0x219   : > { %1949 = vmatprep.subr.bf16.mxu1 %v9726_v50  ;;  %v11122_v50 = vld [vmem:[#allocation8 + $0xec] ss:$16 sps:$4 sm:$0xff]  }
 0x21a   : > { %1897 = vmatpush1.bf16.msra.mxu0 %v9723_v35  ;;  %v11107_v35 = vld [vmem:[#allocation8 + $0xa4] ss:$16 sps:$4 sm:$0xff]  }
 0x21b   : > { %1898 = vmatprep.subr.bf16.mxu0 %v9732_v38  ;;  %v11105_v38 = vld [vmem:[#allocation8 + $0xa0] ss:$16 sps:$4 sm:$0xff]  }
 0x21c   : > { %1950 = vmatpush1.bf16.msra.mxu1 %v9725_v55  ;;  %v11135_v55 = vld [vmem:[#allocation8 + $0x140] ss:$16 sps:$4 sm:$0xff]  }
 0x21d   : > { %1951 = vmatprep.subr.bf16.mxu1 %v9734_v58  ;;  %v11134_v58 = vld [vmem:[#allocation8 + $0x12c] ss:$16 sps:$4 sm:$0xff]  }
 0x21e   : > { %1899 = vmatpush1.bf16.msra.mxu0 %v9731_v43  ;;  %v11110_v43 = vld [vmem:[#allocation8 + $0xac] ss:$16 sps:$4 sm:$0xff]  }
 0x21f   : > { %1900 = vmatprep.subr.bf16.mxu0 %v9740_v46  ;;  %v11125_v46 = vld [vmem:[#allocation8 + $0x104] ss:$16 sps:$4 sm:$0xff]  }
 0x220   : > { %1952 = vmatpush1.bf16.msra.mxu1 %v9733_v63  ;;  %v11147_v63 = vld [vmem:[#allocation8 + $0x180] ss:$16 sps:$4 sm:$0xff]  }
 0x221   : > { %1953 = vmatprep.subr.bf16.mxu1 %v9742_v2  ;;  %v11146_v2 = vld [vmem:[#allocation8 + $0x16c] ss:$16 sps:$4 sm:$0xff]  }
 0x222   : > { %1901 = vmatpush1.bf16.msra.mxu0 %v9739_v51  ;;  %v11129_v51 = vld [vmem:[#allocation8 + $0x120] ss:$16 sps:$4 sm:$0xff]  }
 0x223   : > { %1902 = vmatprep.subr.bf16.mxu0 %v9748_v54  ;;  %v11128_v54 = vld [vmem:[#allocation8 + $0x10c] ss:$16 sps:$4 sm:$0xff]  }
 0x224   : > { %1954 = vmatpush1.bf16.msra.mxu1 %v9741_v6  ;;  %v11161_v6 = vld [vmem:[#allocation8 + $0x1c4] ss:$16 sps:$4 sm:$0xff]  }
 0x225   : > { %1955 = vmatprep.subr.bf16.mxu1 %v9750_v10  ;;  %v11150_v10 = vld [vmem:[#allocation8 + $0x188] ss:$16 sps:$4 sm:$0xff]  }
 0x226   : > { %1903 = vmatpush1.bf16.msra.mxu0 %v9747_v59  ;;  %v11141_v59 = vld [vmem:[#allocation8 + $0x160] ss:$16 sps:$4 sm:$0xff]  }
 0x227   : > { %1904 = vmatprep.subr.bf16.mxu0 %v9756_v62  ;;  %v11140_v62 = vld [vmem:[#allocation8 + $0x14c] ss:$16 sps:$4 sm:$0xff]  }
 0x228   : > { %1956 = vmatpush1.bf16.msra.mxu1 %v9749_v24  ;;  %v11165_v24 = vld [vmem:[#allocation8 + $0x1e0] ss:$16 sps:$4 sm:$0xff]  }
 0x229   : > { %1957 = vmatprep.subr.bf16.mxu1 %v9758_v16  ;;  %v11162_v16 = vld [vmem:[#allocation8 + $0x1c8] ss:$16 sps:$4 sm:$0xff]  }
 0x22a   : > { %1905 = vmatpush1.bf16.msra.mxu0 %v9755_v3  ;;  %v11153_v3 = vld [vmem:[#allocation8 + $0x1a0] ss:$16 sps:$4 sm:$0xff]  }
 0x22b   : > { %1906 = vmatprep.subr.bf16.mxu0 %v9764_v5  ;;  %v11144_v5 = vld [vmem:[#allocation8 + $0x168] ss:$16 sps:$4 sm:$0xff]  }
 0x22c   : > { %1958 = vmatpush1.bf16.msra.mxu1 %v9757_v18  ;;  %v11168_v18 = vld [vmem:[#allocation8 + $0x1e8] ss:$16 sps:$4 sm:$0xff]  }
 0x22d   : > { %1959 = vmatprep.subr.bf16.mxu1 %v9766_v20  ;;  %v1090_v20 = vlaneseq }
 0x22e   : > { %1907 = vmatpush1.bf16.msra.mxu0 %v9763_v12  ;;  %v11158_v12 = vld [vmem:[#allocation8 + $0x1ac] ss:$16 sps:$4 sm:$0xff]  }
 0x22f   : > { %3588 = vmatprep.subr.bf16.mxu0 %v11077_v11  ;;  %v11167_v11 = vld [vmem:[#allocation8 + $0x1e4] ss:$16 sps:$4 sm:$0xff]  }
 0x230   : > { %1960 = vmatpush1.bf16.msra.mxu1 %v9765_v23 }
 0x231   : > { %1909 = vmatmul.mubr.bf16.vlgmr.msra.gmra.mrb[8].mxu0 %v13177_v4  ;;  %3800 = vmatprep.subr.bf16.mxu1 %v11080_v22  ;;  %v13204_v22 = vld [vmem:[%s13805_s9] sm:$0xff]  ;;  %s13810_s9 = sld [smem:[#allocation54_spill]] }
 0x232   : > { %3589 = vmatpush1.bf16.msra.mxu0 %v11075_v15  ;;  %1918 = vmatprep.mubr.bf16.mxu0 %v13179_v8  ;;  %v11164_v15 = vld [vmem:[#allocation8 + $0x1cc] ss:$16 sps:$4 sm:$0xff]  }
 0x233   : > { %3590 = vmatprep.subr.bf16.mxu0 %v11083_v17  ;;  %1962 = vmatmul.mubr.bf16.vlgmr.msra.gmra.mrb[8].mxu1 %v13177_v4  ;;  %v11104_v4 = vld [vmem:[#allocation8 + $0x8c] ss:$16 sps:$4 sm:$0xff]  }
 0x234   : > { %3801 = vmatpush1.bf16.msra.mxu1 %v11078_v28  ;;  %1971 = vmatprep.mubr.bf16.mxu1 %v13179_v8  ;;  %v11102_v8 = vld [vmem:[#allocation8 + $0x88] ss:$16 sps:$4 sm:$0xff]   ;;  %v11170_v17 = vld [vmem:[#allocation8 + $0x1ec] ss:$16 sps:$4 sm:$0xff]  }
 0x235   : > { %3802 = vmatprep.subr.bf16.mxu1 %v11086_v29 }
 0x236   : > { %3591 = vmatpush1.bf16.msra.mxu0 %v11081_v19  ;;  %v11176_v19 = vld [vmem:[#allocation8 + $0x20c] ss:$16 sps:$4 sm:$0xff]  }
 0x237   : > { %3592 = vmatprep.subr.bf16.mxu0 %v11089_v21  ;;  %v13199_v21 = vshrl.u32 %v1090_v20, 7 }
 0x238   : > { %3803 = vmatpush1.bf16.msra.mxu1 %v11084_v32 }
 0x239   : > { %1919 = vmatmul.mubr.bf16.gmra.mrb[12].mxu0 %v13185_v25  ;;  %3804 = vmatprep.subr.bf16.mxu1 %v11092_v33  ;;  %v13207_v23 = vsub.s32 0, %v13199_v21 }
 0x23a   : > { %3593 = vmatpush1.bf16.msra.mxu0 %v11087_v26  ;;  %v13210_v26 = vsub.s32 1, %v13199_v21 }
 0x23b   : > { %3594 = vmatprep.subr.bf16.mxu0 %v11095_v27  ;;  %1972 = vmatmul.mubr.bf16.gmra.mrb[12].mxu1 %v13185_v25  ;;  %v11114_v25 = vld [vmem:[#allocation8 + $0xc8] ss:$16 sps:$4 sm:$0xff]   ;;  %v1093_v27 = vrot.slane %v13204_v22, %v13207_v23 }
 0x23c   : > { %3805 = vmatpush1.bf16.msra.mxu1 %v11090_v36  ;;  %v1097_v28 = vrot.slane %v13204_v22, %v13210_v26 }
 0x23d   : > { %3806 = vmatprep.subr.bf16.mxu1 %v11098_v37  ;;  %v13217_v37 = vsub.s32 2, %v13199_v21 }
 0x23e   : > { %3595 = vmatpush1.bf16.msra.mxu0 %v11093_v30 }
 0x23f   : > { %3596 = vmatprep.subr.bf16.mxu0 %v11101_v31 }
 0x240   : > { %3807 = vmatpush1.bf16.msra.mxu1 %v11096_v39 }
 0x241   : > { %3808 = vmatprep.subr.bf16.mxu1 %v11104_v4 }
 0x242   : > { %3597 = vmatpush1.bf16.msra.mxu0 %v11099_v34 }
 0x243   : > { %3598 = vmatprep.subr.bf16.mxu0 %v11107_v35 }
 0x244   : > { %3809 = vmatpush1.bf16.msra.mxu1 %v11102_v8  ;;  %v11171_v8 = vld [vmem:[#allocation8 + $0x200] ss:$16 sps:$4 sm:$0xff]  }
 0x245   : > { %3810 = vmatprep.subr.bf16.mxu1 %v11110_v43 }
 0x246   : > { %3599 = vmatpush1.bf16.msra.mxu0 %v11105_v38 }
 0x247   : > { %3600 = vmatprep.subr.bf16.mxu0 %v11113_v40  ;;  %v13220_v40 = vsub.s32 3, %v13199_v21 }
 0x248   : > { %3811 = vmatpush1.bf16.msra.mxu1 %v11108_v45 }
 0x249   : > { %3812 = vmatprep.subr.bf16.mxu1 %v11116_v47  ;;  %v11179_v47 = vld [vmem:[#allocation8 + $0x224] ss:$16 sps:$4 sm:$0xff]  }
 0x24a   : > { %3601 = vmatpush1.bf16.msra.mxu0 %v11111_v41 }
 0x24b   : > { %3602 = vmatprep.subr.bf16.mxu0 %v11119_v42  ;;  %v11174_v42 = vld [vmem:[#allocation8 + $0x208] ss:$16 sps:$4 sm:$0xff]  }
 0x24c   : > { %3813 = vmatpush1.bf16.msra.mxu1 %v11114_v25 }
 0x24d   : > { %3814 = vmatprep.subr.bf16.mxu1 %v11122_v50  ;;  %v13228_v50 = vrot.slane %v13204_v22, %v13220_v40 }
 0x24e   : > { %3603 = vmatpush1.bf16.msra.mxu0 %v11117_v44 }
 0x24f   : > { %3604 = vmatprep.subr.bf16.mxu0 %v11125_v46  ;;  %v13224_v46 = vrot.slane %v13204_v22, %v13217_v37 }
 0x250   : > { %3815 = vmatpush1.bf16.msra.mxu1 %v11120_v52 }
 0x251   : > { %3816 = vmatprep.subr.bf16.mxu1 %v11128_v54 }
 0x252   : > { %3605 = vmatpush1.bf16.msra.mxu0 %v11123_v48  ;;  %v11182_v48 = vld [vmem:[#allocation8 + $0x22c] ss:$16 sps:$4 sm:$0xff]  }
 0x253   : > { %3606 = vmatprep.subr.bf16.mxu0 %v11131_v49 }
 0x254   : > { %3817 = vmatpush1.bf16.msra.mxu1 %v11126_v56 }
 0x255   : > { %3818 = vmatprep.subr.bf16.mxu1 %v11134_v58  ;;  %v11180_v58 = vld [vmem:[#allocation8 + $0x228] ss:$16 sps:$4 sm:$0xff]  }
 0x256   : > { %3607 = vmatpush1.bf16.msra.mxu0 %v11129_v51 }
 0x257   : > { %3608 = vmatprep.subr.bf16.mxu0 %v11137_v53 }
 0x258   : > { %3819 = vmatpush1.bf16.msra.mxu1 %v11132_v60 }
 0x259   : > { %3820 = vmatprep.subr.bf16.mxu1 %v11140_v62 }
 0x25a   : > { %3609 = vmatpush1.bf16.msra.mxu0 %v11135_v55 }
 0x25b   : > { %3610 = vmatprep.subr.bf16.mxu0 %v11143_v57  ;;  %v11177_v57 = vld [vmem:[#allocation8 + $0x220] ss:$16 sps:$4 sm:$0xff]  }
 0x25c   : > { %3821 = vmatpush1.bf16.msra.mxu1 %v11138_v0  ;;  %v11188_v0 = vld [vmem:[#allocation8 + $0x24c] ss:$16 sps:$4 sm:$0xff]  }
 0x25d   : > { %3822 = vmatprep.subr.bf16.mxu1 %v11146_v2 }
 0x25e   : > { %3611 = vmatpush1.bf16.msra.mxu0 %v11141_v59 }
 0x25f   : > { %3612 = vmatprep.subr.bf16.mxu0 %v11149_v61 }
 0x260   : > { %3823 = vmatpush1.bf16.msra.mxu1 %v11144_v5 }
 0x261   : > { %3824 = vmatprep.subr.bf16.mxu1 %v11152_v7 }
 0x262   : > { %3613 = vmatpush1.bf16.msra.mxu0 %v11147_v63  ;;  %v11185_v63 = vld [vmem:[#allocation8 + $0x244] ss:$16 sps:$4 sm:$0xff]  }
 0x263   : > { %3614 = vmatprep.subr.bf16.mxu0 %v11155_v1 }
 0x264   : > { %3825 = vmatpush1.bf16.msra.mxu1 %v11150_v10 }
 0x265   : > { %3826 = vmatprep.subr.bf16.mxu1 %v11158_v12 }
 0x266   : > { %3615 = vmatpush1.bf16.msra.mxu0 %v11153_v3 }
 0x267   : > { %3616 = vmatprep.subr.bf16.mxu0 %v11161_v6 }
 0x268   : > { %3827 = vmatpush1.bf16.msra.mxu1 %v11156_v14 }
 0x269   : > { %3828 = vmatprep.subr.bf16.mxu1 %v11164_v15 }
 0x26a   : > { %3617 = vmatpush1.bf16.msra.mxu0 %v11159_v9 }
 0x26b   : > { %3618 = vmatprep.subr.bf16.mxu0 %v11167_v11 }
 0x26c   : > { %3829 = vmatpush1.bf16.msra.mxu1 %v11162_v16  ;;  %v11191_v16 = vld [vmem:[#allocation8 + $0x264] ss:$16 sps:$4 sm:$0xff]  }
 0x26d   : > { %3830 = vmatprep.subr.bf16.mxu1 %v11170_v17  ;;  %v11194_v17 = vld [vmem:[#allocation8 + $0x26c] ss:$16 sps:$4 sm:$0xff]  }
 0x26e   : > { %3619 = vmatpush1.bf16.msra.mxu0 %v11165_v24  ;;  %v11183_v24 = vld [vmem:[#allocation8 + $0x240] ss:$16 sps:$4 sm:$0xff]  }
 0x26f   : > { %3641 = vmatprep.subr.bf16.mxu0 %v11173_v13  ;;  %v11186_v13 = vld [vmem:[#allocation8 + $0x248] ss:$16 sps:$4 sm:$0xff]  }
 0x270   : > { %3831 = vmatpush1.bf16.msra.mxu1 %v11168_v18 }
 0x271   : > { %3853 = vmatprep.subr.bf16.mxu1 %v11176_v19 }
 0x2c4   : > { %v1804_v29 = vpop.f32.mrb[0].mxu0 }
 0x2c5   : > { %v1805_v30 = vadd.f32 %v1804_v29, %v1093_v27  ;;  %v1806_v31 = vpop.f32.mrb[1].mxu0  ;;  %v11192_v29 = vld [vmem:[#allocation8 + $0x268] ss:$16 sps:$4 sm:$0xff]  }
 0x2c6   : > { %v1807_v32 = vadd.f32 %v1806_v31, %v1097_v28  ;;  %v1808_v33 = vpop.f32.mrb[2].mxu0  ;;  %v1857_v56 = vpop.f32.mrb[0].mxu1 }
 0x2c7   : > { %v1809_v34 = vadd.f32 %v1808_v33, %v1093_v27  ;;  %v1810_v35 = vpop.f32.mrb[3].mxu0  ;;  %v1982_v38 = vmax.f32 %v1805_v30, 0.0  ;;  %v1858_v61 = vadd.f32 %v1857_v56, %v13224_v46  ;;  %v1859_v62 = vpop.f32.mrb[1].mxu1  ;;  %v11200_v33 = vld [vmem:[#allocation8 + $0x28c] ss:$16 sps:$4 sm:$0xff]  }
 0x2c8   : > { %v1811_v36 = vadd.f32 %v1810_v35, %v1097_v28  ;;  %v1983_v4 = vmax.f32 %v1807_v32, 0.0  ;;  %v1860_v2 = vadd.f32 %v1859_v62, %v13228_v50  ;;  %v1861_v3 = vpop.f32.mrb[2].mxu1  ;;  %v11197_v32 = vld [vmem:[#allocation8 + $0x284] ss:$16 sps:$4 sm:$0xff]   ;;  %v11213_v56 = vld [vmem:[#allocation8 + $0x2e0] ss:$16 sps:$4 sm:$0xff]  }
 0x2c9   : > { %v1990_v39 = vmax.f32 %v1809_v34, 0.0  ;;  %v1984_v6 = vmax.f32 %v1858_v61, 0.0  ;;  %v1862_v7 = vadd.f32 %v1861_v3, %v13224_v46  ;;  %v1863_v9 = vpop.f32.mrb[3].mxu1  ;;  %v11222_v61 = vld [vmem:[#allocation8 + $0x308] ss:$16 sps:$4 sm:$0xff]  }
 0x2ca   : > { %v1991_v41 = vmax.f32 %v1811_v36, 0.0  ;;  %v1985_v11 = vmax.f32 %v1860_v2, 0.0  ;;  %v1864_v12 = vadd.f32 %v1863_v9, %v13228_v50  ;;  %v11227_v62 = vld [vmem:[#allocation8 + $0x324] ss:$16 sps:$4 sm:$0xff]   ;;  %v11236_v3 = vld [vmem:[#allocation8 + $0x34c] ss:$16 sps:$4 sm:$0xff]  }
 0x2cb   : > { %v2014_v43 = vpack.c.bf16 %v1990_v39, %v1982_v38  ;;  %v1992_v15 = vmax.f32 %v1862_v7, 0.0  ;;  %v11233_v2 = vld [vmem:[#allocation8 + $0x344] ss:$16 sps:$4 sm:$0xff]   ;;  %v11242_v9 = vld [vmem:[#allocation8 + $0x36c] ss:$16 sps:$4 sm:$0xff]  }
 0x2cc   : > { %v2015_v44 = vpack.c.bf16 %v1991_v41, %v1983_v4  ;;  %v1814_v45 = vpop.f32.mrb[4].mxu0  ;;  %v1993_v18 = vmax.f32 %v1864_v12, 0.0  ;;  %v11239_v7 = vld [vmem:[#allocation8 + $0x364] ss:$16 sps:$4 sm:$0xff]  }
 0x2cd   : > { %v1815_v25 = vadd.f32 %v1814_v45, %v1093_v27  ;;  %v1816_v49 = vpop.f32.mrb[5].mxu0  ;;  %v13234_v19 = vpack.c.bf16 %v1992_v15, %v1984_v6  ;;  %v11206_v45 = vld [vmem:[#allocation8 + $0x2ac] ss:$16 sps:$4 sm:$0xff]   ;;  %v11234_v6 = vld [vmem:[#allocation8 + $0x348] ss:$16 sps:$4 sm:$0xff]  }
 0x2ce   : > { %3620 = vmatprep.mubr.bf16.mxu0 %v2015_v44  ;;  %3832 = vmatprep.mubr.bf16.mxu1 %v2015_v44  ;;  %v1817_v51 = vadd.f32 %v1816_v49, %v1097_v28  ;;  %v1818_v52 = vpop.f32.mrb[6].mxu0  ;;  %v2017_v20 = vpack.c.bf16 %v1993_v18, %v1985_v11  ;;  %v11203_v44 = vld [vmem:[#allocation8 + $0x2a4] ss:$16 sps:$4 sm:$0xff]   ;;  %v11204_v49 = vld [vmem:[#allocation8 + $0x2a8] ss:$16 sps:$4 sm:$0xff]   ;;  %v1112_v18 = vsub.s32 5, %v13199_v21 }
 0x2cf   : > { %3621 = vmatmul.mubr.bf16.vlgmr.msra.gmra.mrb[16].mxu0 %v2014_v43  ;;  %3833 = vmatmul.mubr.bf16.vlgmr.msra.gmra.mrb[16].mxu1 %v2014_v43  ;;  %v1998_v53 = vmax.f32 %v1815_v25, 0.0  ;;  %v1819_v54 = vadd.f32 %v1818_v52, %v1093_v27  ;;  %v1820_v55 = vpop.f32.mrb[7].mxu0  ;;  %v1867_v27 = vpop.f32.mrb[4].mxu1  ;;  %v11207_v52 = vld [vmem:[#allocation8 + $0x2c0] ss:$16 sps:$4 sm:$0xff]  }
 0x2d0   : > { %3642 = vmatpush1.bf16.msra.mxu0 %v11171_v8  ;;  %3854 = vmatpush1.bf16.msra.mxu1 %v11174_v42  ;;  %v1999_v59 = vmax.f32 %v1817_v51, 0.0  ;;  %v1821_v60 = vadd.f32 %v1820_v55, %v1097_v28  ;;  %v11189_v28 = vld [vmem:[#allocation8 + $0x260] ss:$16 sps:$4 sm:$0xff]   ;;  %v1868_v30 = vadd.f32 %v1867_v27, %v13224_v46  ;;  %v1869_v31 = vpop.f32.mrb[5].mxu1  ;;  %v11198_v42 = vld [vmem:[#allocation8 + $0x288] ss:$16 sps:$4 sm:$0xff]  }
 0x2d1   : > { %3643 = vmatprep.subr.bf16.mxu0 %v11179_v47  ;;  %3855 = vmatprep.subr.bf16.mxu1 %v11182_v48  ;;  %v2006_v1 = vmax.f32 %v1819_v54, 0.0  ;;  %v1870_v34 = vadd.f32 %v1869_v31, %v13228_v50  ;;  %v1871_v35 = vpop.f32.mrb[6].mxu1  ;;  %v11195_v8 = vld [vmem:[#allocation8 + $0x280] ss:$16 sps:$4 sm:$0xff]   ;;  %v11212_v51 = vld [vmem:[#allocation8 + $0x2cc] ss:$16 sps:$4 sm:$0xff]   ;;  %v13252_v31 = vrot.slane %v13204_v22, %v1112_v18 }
 0x2d2   : > { %v2007_v5 = vmax.f32 %v1821_v60, 0.0  ;;  %v2000_v36 = vmax.f32 %v1868_v30, 0.0  ;;  %v1872_v38 = vadd.f32 %v1871_v35, %v13224_v46  ;;  %v1873_v39 = vpop.f32.mrb[7].mxu1  ;;  %v11201_v46 = vld [vmem:[#allocation8 + $0x2a0] ss:$16 sps:$4 sm:$0xff]  }
 0x2d3   : > { %v2022_v10 = vpack.c.bf16 %v2006_v1, %v1998_v53  ;;  %v2001_v4 = vmax.f32 %v1870_v34, 0.0  ;;  %v1874_v41 = vadd.f32 %v1873_v39, %v13228_v50  ;;  %v11209_v50 = vld [vmem:[#allocation8 + $0x2c4] ss:$16 sps:$4 sm:$0xff]   ;;  %v11210_v53 = vld [vmem:[#allocation8 + $0x2c8] ss:$16 sps:$4 sm:$0xff]  }
 0x2d4   : > { %3644 = vmatpush1.bf16.msra.mxu0 %v11177_v57  ;;  %3856 = vmatpush1.bf16.msra.mxu1 %v11180_v58  ;;  %v2023_v14 = vpack.c.bf16 %v2007_v5, %v1999_v59  ;;  %v2008_v43 = vmax.f32 %v1872_v38, 0.0  ;;  %v11215_v54 = vld [vmem:[#allocation8 + $0x2e4] ss:$16 sps:$4 sm:$0xff]   ;;  %v11218_v55 = vld [vmem:[#allocation8 + $0x2ec] ss:$16 sps:$4 sm:$0xff]  }
 0x2d5   : > { %3645 = vmatprep.subr.bf16.mxu0 %v11185_v63  ;;  %3857 = vmatprep.subr.bf16.mxu1 %v11188_v0  ;;  %v2009_v47 = vmax.f32 %v1874_v41, 0.0  ;;  %v11216_v57 = vld [vmem:[#allocation8 + $0x2e8] ss:$16 sps:$4 sm:$0xff]   ;;  %v11221_v58 = vld [vmem:[#allocation8 + $0x304] ss:$16 sps:$4 sm:$0xff]  }
 0x2d6   : > { %3630 = vmatprep.mubr.bf16.mxu0 %v2023_v14  ;;  %3842 = vmatprep.mubr.bf16.mxu1 %v2023_v14  ;;  %v13240_v48 = vpack.c.bf16 %v2008_v43, %v2000_v36  ;;  %v11224_v59 = vld [vmem:[#allocation8 + $0x30c] ss:$16 sps:$4 sm:$0xff]   ;;  %v11219_v60 = vld [vmem:[#allocation8 + $0x300] ss:$16 sps:$4 sm:$0xff]   ;;  %v11228_v1 = vld [vmem:[#allocation8 + $0x328] ss:$16 sps:$4 sm:$0xff]  }
 0x2d7   : > { %3631 = vmatmul.mubr.bf16.gmra.mrb[20].mxu0 %v2022_v10  ;;  %3843 = vmatmul.mubr.bf16.gmra.mrb[20].mxu1 %v2022_v10  ;;  %v13242_v25 = vpack.c.bf16 %v2009_v47, %v2001_v4  ;;  %v11230_v63 = vld [vmem:[#allocation8 + $0x32c] ss:$16 sps:$4 sm:$0xff]   ;;  %v11225_v0 = vld [vmem:[#allocation8 + $0x320] ss:$16 sps:$4 sm:$0xff]   ;;  %v11240_v11 = vld [vmem:[#allocation8 + $0x368] ss:$16 sps:$4 sm:$0xff]  }
 0x2d8   : > { %3646 = vmatpush1.bf16.msra.mxu0 %v11183_v24  ;;  %3858 = vmatpush1.bf16.msra.mxu1 %v11186_v13  ;;  %v11231_v5 = vld [vmem:[#allocation8 + $0x340] ss:$16 sps:$4 sm:$0xff]   ;;  %v11245_v12 = vld [vmem:[#allocation8 + $0x384] ss:$16 sps:$4 sm:$0xff]   ;;  %v11248_v24 = vld [vmem:[#allocation8 + $0x38c] ss:$16 sps:$4 sm:$0xff]  }
 0x2d9   : > { %3647 = vmatprep.subr.bf16.mxu0 %v11191_v16  ;;  %3859 = vmatprep.subr.bf16.mxu1 %v11194_v17  ;;  %v11237_v10 = vld [vmem:[#allocation8 + $0x360] ss:$16 sps:$4 sm:$0xff]   ;;  %v11246_v14 = vld [vmem:[#allocation8 + $0x388] ss:$16 sps:$4 sm:$0xff]   ;;  %v11251_v15 = vld [vmem:[#allocation8 + $0x3a4] ss:$16 sps:$4 sm:$0xff]  }
 0x2da   : > { %3673 = vmatprep.mubr.bf16.mxu0 %v2017_v20  ;;  %3885 = vmatprep.mubr.bf16.mxu1 %v2017_v20  ;;  %v11243_v13 = vld [vmem:[#allocation8 + $0x380] ss:$16 sps:$4 sm:$0xff]   ;;  %v11254_v16 = vld [vmem:[#allocation8 + $0x3ac] ss:$16 sps:$4 sm:$0xff]   ;;  %v1108_v17 = vsub.s32 4, %v13199_v21  ;;  %v1116_v47 = vsub.s32 6, %v13199_v21 }
 0x2db   : > { %v11249_v20 = vld [vmem:[#allocation8 + $0x3a0] ss:$16 sps:$4 sm:$0xff]   ;;  %v11252_v27 = vld [vmem:[#allocation8 + $0x3a8] ss:$16 sps:$4 sm:$0xff]   ;;  %v11263_v34 = vld [vmem:[#allocation8 + $0x3e4] ss:$16 sps:$4 sm:$0xff]  }
 0x2dc   : > { %3648 = vmatpush1.bf16.msra.mxu0 %v11189_v28  ;;  %3860 = vmatpush1.bf16.msra.mxu1 %v11192_v29  ;;  %v11257_v28 = vld [vmem:[#allocation8 + $0x3c4] ss:$16 sps:$4 sm:$0xff]   ;;  %v11260_v29 = vld [vmem:[#allocation8 + $0x3cc] ss:$16 sps:$4 sm:$0xff]   ;;  %v1109_v30 = vrot.slane %v13204_v22, %v1108_v17  ;;  %v11261_v4 = vld [vmem:[#allocation8 + $0x3e0] ss:$16 sps:$4 sm:$0xff]  }
 0x2dd   : > { %3649 = vmatprep.subr.bf16.mxu0 %v11197_v32  ;;  %3861 = vmatprep.subr.bf16.mxu1 %v11200_v33  ;;  %v11255_v32 = vld [vmem:[#allocation8 + $0x3c0] ss:$16 sps:$4 sm:$0xff]   ;;  %v11258_v33 = vld [vmem:[#allocation8 + $0x3c8] ss:$16 sps:$4 sm:$0xff]   ;;  %v11266_v35 = vld [vmem:[#allocation8 + $0x3ec] ss:$16 sps:$4 sm:$0xff]  }
 0x2e0   : > { %3650 = vmatpush1.bf16.msra.mxu0 %v11195_v8  ;;  %3862 = vmatpush1.bf16.msra.mxu1 %v11198_v42  ;;  %v11264_v42 = vld [vmem:[#allocation8 + $0x3e8] ss:$16 sps:$4 sm:$0xff]  }
 0x2e1   : > { %3651 = vmatprep.subr.bf16.mxu0 %v11203_v44  ;;  %3863 = vmatprep.subr.bf16.mxu1 %v11206_v45 }
 0x2e4   : > { %3652 = vmatpush1.bf16.msra.mxu0 %v11201_v46  ;;  %3864 = vmatpush1.bf16.msra.mxu1 %v11204_v49  ;;  %v11269_v46 = vld [vmem:[#allocation8 + $0x404] ss:$16 sps:$4 sm:$0xff]   ;;  %v11272_v49 = vld [vmem:[#allocation8 + $0x40c] ss:$16 sps:$4 sm:$0xff]  }
 0x2e5   : > { %3653 = vmatprep.subr.bf16.mxu0 %v11209_v50  ;;  %3865 = vmatprep.subr.bf16.mxu1 %v11212_v51 }
 0x2e8   : > { %3654 = vmatpush1.bf16.msra.mxu0 %v11207_v52  ;;  %3866 = vmatpush1.bf16.msra.mxu1 %v11210_v53  ;;  %v1120_v52 = vsub.s32 7, %v13199_v21 }
 0x2e9   : > { %3655 = vmatprep.subr.bf16.mxu0 %v11215_v54  ;;  %3867 = vmatprep.subr.bf16.mxu1 %v11218_v55  ;;  %v11267_v55 = vld [vmem:[#allocation8 + $0x400] ss:$16 sps:$4 sm:$0xff]  }
 0x2ec   : > { %3656 = vmatpush1.bf16.msra.mxu0 %v11213_v56  ;;  %3868 = vmatpush1.bf16.msra.mxu1 %v11216_v57  ;;  %v11270_v56 = vld [vmem:[#allocation8 + $0x408] ss:$16 sps:$4 sm:$0xff]  }
 0x2ed   : > { %3657 = vmatprep.subr.bf16.mxu0 %v11221_v58  ;;  %3869 = vmatprep.subr.bf16.mxu1 %v11224_v59  ;;  %v13263_v58 = vrot.slane %v13204_v22, %v1116_v47  ;;  %v11275_v59 = vld [vmem:[#allocation8 + $0x424] ss:$16 sps:$4 sm:$0xff]  }
 0x2f0   : > { %3658 = vmatpush1.bf16.msra.mxu0 %v11219_v60  ;;  %3870 = vmatpush1.bf16.msra.mxu1 %v11222_v61  ;;  %v11278_v60 = vld [vmem:[#allocation8 + $0x42c] ss:$16 sps:$4 sm:$0xff]  }
 0x2f1   : > { %3659 = vmatprep.subr.bf16.mxu0 %v11227_v62  ;;  %3871 = vmatprep.subr.bf16.mxu1 %v11230_v63  ;;  %v13270_v63 = vrot.slane %v13204_v22, %v1120_v52 }
 0x2f4   : > { %3660 = vmatpush1.bf16.msra.mxu0 %v11225_v0  ;;  %3872 = vmatpush1.bf16.msra.mxu1 %v11228_v1 }
 0x2f5   : > { %3661 = vmatprep.subr.bf16.mxu0 %v11233_v2  ;;  %3873 = vmatprep.subr.bf16.mxu1 %v11236_v3  ;;  %v11273_v2 = vld [vmem:[#allocation8 + $0x420] ss:$16 sps:$4 sm:$0xff]  }
 0x2f8   : > { %3662 = vmatpush1.bf16.msra.mxu0 %v11231_v5  ;;  %3874 = vmatpush1.bf16.msra.mxu1 %v11234_v6 }
 0x2f9   : > { %3663 = vmatprep.subr.bf16.mxu0 %v11239_v7  ;;  %3875 = vmatprep.subr.bf16.mxu1 %v11242_v9  ;;  %v11276_v7 = vld [vmem:[#allocation8 + $0x428] ss:$16 sps:$4 sm:$0xff]  }
 0x2fc   : > { %3664 = vmatpush1.bf16.msra.mxu0 %v11237_v10  ;;  %3876 = vmatpush1.bf16.msra.mxu1 %v11240_v11 }
 0x2fd   : > { %3665 = vmatprep.subr.bf16.mxu0 %v11245_v12  ;;  %3877 = vmatprep.subr.bf16.mxu1 %v11248_v24  ;;  %v11281_v24 = vld [vmem:[#allocation8 + $0x444] ss:$16 sps:$4 sm:$0xff]  }
 0x300   : > { %3666 = vmatpush1.bf16.msra.mxu0 %v11243_v13  ;;  %3878 = vmatpush1.bf16.msra.mxu1 %v11246_v14  ;;  %v11284_v13 = vld [vmem:[#allocation8 + $0x44c] ss:$16 sps:$4 sm:$0xff]  }
 0x301   : > { %3667 = vmatprep.subr.bf16.mxu0 %v11251_v15  ;;  %3879 = vmatprep.subr.bf16.mxu1 %v11254_v16 }
 0x304   : > { %3668 = vmatpush1.bf16.msra.mxu0 %v11249_v20  ;;  %3880 = vmatpush1.bf16.msra.mxu1 %v11252_v27  ;;  %v1910_v36 = vpop.f32.mrb[8].mxu0 }
 0x305   : > { %3669 = vmatprep.subr.bf16.mxu0 %v11257_v28  ;;  %3881 = vmatprep.subr.bf16.mxu1 %v11260_v29  ;;  %v1911_v38 = vadd.f32 %v1910_v36, %v1109_v30  ;;  %v1912_v39 = vpop.f32.mrb[9].mxu0 }
 0x306   : > { %v1913_v41 = vadd.f32 %v1912_v39, %v13252_v31  ;;  %v1914_v8 = vpop.f32.mrb[10].mxu0  ;;  %v1963_v6 = vpop.f32.mrb[8].mxu1 }
 0x307   : > { %v1986_v43 = vmax.f32 %v1911_v38, 0.0  ;;  %v1915_v44 = vadd.f32 %v1914_v8, %v1109_v30  ;;  %v1916_v45 = vpop.f32.mrb[11].mxu0  ;;  %v1964_v22 = vadd.f32 %v1963_v6, %v13263_v58  ;;  %v1965_v12 = vpop.f32.mrb[9].mxu1  ;;  %v11287_v38 = vld [vmem:[#allocation8 + $0x464] ss:$16 sps:$4 sm:$0xff]  }
 0x308   : > { %3670 = vmatpush1.bf16.msra.mxu0 %v11255_v32  ;;  %3882 = vmatpush1.bf16.msra.mxu1 %v11258_v33  ;;  %v1987_v50 = vmax.f32 %v1913_v41, 0.0  ;;  %v1917_v51 = vadd.f32 %v1916_v45, %v13252_v31  ;;  %v1966_v15 = vadd.f32 %v1965_v12, %v13270_v63  ;;  %v1967_v16 = vpop.f32.mrb[10].mxu1  ;;  %v11300_v6 = vld [vmem:[#allocation8 + $0x4a8] ss:$16 sps:$4 sm:$0xff]   ;;  %v11309_v12 = vld [vmem:[#allocation8 + $0x4e0] ss:$16 sps:$4 sm:$0xff]  }
 0x309   : > { %3671 = vmatprep.subr.bf16.mxu0 %v11263_v34  ;;  %3883 = vmatprep.subr.bf16.mxu1 %v11266_v35  ;;  %v1994_v53 = vmax.f32 %v1915_v44, 0.0  ;;  %v1988_v27 = vmax.f32 %v1964_v22, 0.0  ;;  %v1968_v28 = vadd.f32 %v1967_v16, %v13263_v58  ;;  %v1969_v29 = vpop.f32.mrb[11].mxu1  ;;  %v11279_v34 = vld [vmem:[#allocation8 + $0x440] ss:$16 sps:$4 sm:$0xff]  }
 0x30a   : > { %v1995_v54 = vmax.f32 %v1917_v51, 0.0  ;;  %v1989_v32 = vmax.f32 %v1966_v15, 0.0  ;;  %v1970_v33 = vadd.f32 %v1969_v29, %v13270_v63  ;;  %v11288_v44 = vld [vmem:[#allocation8 + $0x468] ss:$16 sps:$4 sm:$0xff]   ;;  %v11314_v22 = vld [vmem:[#allocation8 + $0x4ec] ss:$16 sps:$4 sm:$0xff]  }
 0x30b   : > { %v13258_v57 = vpack.c.bf16 %v1994_v53, %v1986_v43  ;;  %v1996_v36 = vmax.f32 %v1968_v28, 0.0  ;;  %v11285_v43 = vld [vmem:[#allocation8 + $0x460] ss:$16 sps:$4 sm:$0xff]   ;;  %v11318_v15 = vld [vmem:[#allocation8 + $0x508] ss:$16 sps:$4 sm:$0xff]  }
 0x30c   : > { %3672 = vmatpush1.bf16.msra.mxu0 %v11261_v4  ;;  %3884 = vmatpush1.bf16.msra.mxu1 %v11264_v42  ;;  %v13265_v61 = vpack.c.bf16 %v1995_v54, %v1987_v50  ;;  %v1920_v62 = vpop.f32.mrb[12].mxu0  ;;  %v1997_v4 = vmax.f32 %v1970_v33, 0.0  ;;  %v11296_v50 = vld [vmem:[#allocation8 + $0x48c] ss:$16 sps:$4 sm:$0xff]   ;;  %v11323_v16 = vld [vmem:[#allocation8 + $0x524] ss:$16 sps:$4 sm:$0xff]  }
 0x30d   : > { %3694 = vmatprep.subr.bf16.mxu0 %v11269_v46  ;;  %3906 = vmatprep.subr.bf16.mxu1 %v11272_v49  ;;  %v1921_v0 = vadd.f32 %v1920_v62, %v1109_v30  ;;  %v1922_v1 = vpop.f32.mrb[13].mxu0  ;;  %v13286_v41 = vpack.c.bf16 %v1996_v36, %v1988_v27  ;;  %v11293_v49 = vld [vmem:[#allocation8 + $0x484] ss:$16 sps:$4 sm:$0xff]   ;;  %v11294_v62 = vld [vmem:[#allocation8 + $0x488] ss:$16 sps:$4 sm:$0xff]  }
 0x30e   : > { %v1923_v3 = vadd.f32 %v1922_v1, %v13252_v31  ;;  %v1924_v5 = vpop.f32.mrb[14].mxu0  ;;  %v13290_v8 = vpack.c.bf16 %v1997_v4, %v1989_v32  ;;  %v1973_v42 = vpop.f32.mrb[12].mxu1  ;;  %v11299_v1 = vld [vmem:[#allocation8 + $0x4a4] ss:$16 sps:$4 sm:$0xff]   ;;  %v11321_v27 = vld [vmem:[#allocation8 + $0x520] ss:$16 sps:$4 sm:$0xff]  }
 0x30f   : > { %3674 = vmatmul.mubr.bf16.vlgmr.msra.gmra.mrb[16].mxu0 %v13234_v19  ;;  %3886 = vmatmul.mubr.bf16.vlgmr.msra.gmra.mrb[16].mxu1 %v13234_v19  ;;  %v2002_v9 = vmax.f32 %v1921_v0, 0.0  ;;  %v1925_v10 = vadd.f32 %v1924_v5, %v1109_v30  ;;  %v1926_v11 = vpop.f32.mrb[15].mxu0  ;;  %v1974_v45 = vadd.f32 %v1973_v42, %v13263_v58  ;;  %v1975_v46 = vpop.f32.mrb[13].mxu1  ;;  %v11324_v28 = vld [vmem:[#allocation8 + $0x528] ss:$16 sps:$4 sm:$0xff]  }
 0x310   : > { %3695 = vmatpush1.bf16.msra.mxu0 %v11267_v55  ;;  %3907 = vmatpush1.bf16.msra.mxu1 %v11270_v56  ;;  %v2003_v14 = vmax.f32 %v1923_v3, 0.0  ;;  %v1927_v19 = vadd.f32 %v1926_v11, %v13252_v31  ;;  %v11282_v31 = vld [vmem:[#allocation8 + $0x448] ss:$16 sps:$4 sm:$0xff]   ;;  %v1976_v51 = vadd.f32 %v1975_v46, %v13270_v63  ;;  %v1977_v53 = vpop.f32.mrb[14].mxu1  ;;  %v11311_v11 = vld [vmem:[#allocation8 + $0x4e4] ss:$16 sps:$4 sm:$0xff]  }
 0x311   : > { %3696 = vmatprep.subr.bf16.mxu0 %v11275_v59  ;;  %3908 = vmatprep.subr.bf16.mxu1 %v11278_v60  ;;  %v2010_v20 = vmax.f32 %v1925_v10, 0.0  ;;  %v1978_v54 = vadd.f32 %v1977_v53, %v13263_v58  ;;  %v1979_v55 = vpop.f32.mrb[15].mxu1  ;;  %v11291_v60 = vld [vmem:[#allocation8 + $0x480] ss:$16 sps:$4 sm:$0xff]   ;;  %v11306_v10 = vld [vmem:[#allocation8 + $0x4c8] ss:$16 sps:$4 sm:$0xff]  }
 0x312   : > { %3683 = vmatprep.mubr.bf16.mxu0 %v13242_v25  ;;  %3895 = vmatprep.mubr.bf16.mxu1 %v13242_v25  ;;  %v2011_v30 = vmax.f32 %v1927_v19, 0.0  ;;  %v11290_v25 = vld [vmem:[#allocation8 + $0x46c] ss:$16 sps:$4 sm:$0xff]   ;;  %v2005_v56 = vmax.f32 %v1976_v51, 0.0  ;;  %v1980_v59 = vadd.f32 %v1979_v55, %v13270_v63  ;;  %v11297_v58 = vld [vmem:[#allocation8 + $0x4a0] ss:$16 sps:$4 sm:$0xff]  }
 0x313   : > { %v13282_v35 = vpack.c.bf16 %v2010_v20, %v2002_v9  ;;  %v2012_v0 = vmax.f32 %v1978_v54, 0.0  ;;  %v11305_v63 = vld [vmem:[#allocation8 + $0x4c4] ss:$16 sps:$4 sm:$0xff]   ;;  %v11303_v9 = vld [vmem:[#allocation8 + $0x4c0] ss:$16 sps:$4 sm:$0xff]  }
 0x314   : > { %3697 = vmatpush1.bf16.msra.mxu0 %v11273_v2  ;;  %3909 = vmatpush1.bf16.msra.mxu1 %v11276_v7  ;;  %v13284_v39 = vpack.c.bf16 %v2011_v30, %v2003_v14  ;;  %v11302_v2 = vld [vmem:[#allocation8 + $0x4ac] ss:$16 sps:$4 sm:$0xff]   ;;  %v2013_v3 = vmax.f32 %v1980_v59, 0.0  ;;  %v11315_v19 = vld [vmem:[#allocation8 + $0x500] ss:$16 sps:$4 sm:$0xff]  }
 0x315   : > { %3698 = vmatprep.subr.bf16.mxu0 %v11281_v24  ;;  %3910 = vmatprep.subr.bf16.mxu1 %v11284_v13  ;;  %v11308_v7 = vld [vmem:[#allocation8 + $0x4cc] ss:$16 sps:$4 sm:$0xff]   ;;  %v11312_v24 = vld [vmem:[#allocation8 + $0x4e8] ss:$16 sps:$4 sm:$0xff]   ;;  %v11317_v13 = vld [vmem:[#allocation8 + $0x504] ss:$16 sps:$4 sm:$0xff]  }
 0x316   : > { %v11320_v14 = vld [vmem:[#allocation8 + $0x50c] ss:$16 sps:$4 sm:$0xff]   ;;  %v11329_v29 = vld [vmem:[#allocation8 + $0x544] ss:$16 sps:$4 sm:$0xff]   ;;  %v11327_v32 = vld [vmem:[#allocation8 + $0x540] ss:$16 sps:$4 sm:$0xff]  }
 0x317   : > { %3684 = vmatmul.mubr.bf16.gmra.mrb[20].mxu0 %v13240_v48  ;;  %3896 = vmatmul.mubr.bf16.gmra.mrb[20].mxu1 %v13240_v48  ;;  %v2004_v48 = vmax.f32 %v1974_v45, 0.0  ;;  %v11326_v20 = vld [vmem:[#allocation8 + $0x52c] ss:$16 sps:$4 sm:$0xff]   ;;  %v11330_v33 = vld [vmem:[#allocation8 + $0x548] ss:$16 sps:$4 sm:$0xff]  }
 0x318   : > { %3699 = vmatpush1.bf16.msra.mxu0 %v11279_v34  ;;  %3911 = vmatpush1.bf16.msra.mxu1 %v11282_v31  ;;  %v11332_v30 = vld [vmem:[#allocation8 + $0x54c] ss:$16 sps:$4 sm:$0xff]   ;;  %v11335_v34 = vld [vmem:[#allocation8 + $0x564] ss:$16 sps:$4 sm:$0xff]   ;;  %v11333_v36 = vld [vmem:[#allocation8 + $0x560] ss:$16 sps:$4 sm:$0xff]  }
 0x319   : > { %3700 = vmatprep.subr.bf16.mxu0 %v11287_v38  ;;  %3912 = vmatprep.subr.bf16.mxu1 %v11290_v25  ;;  %v13298_v5 = vpack.c.bf16 %v2012_v0, %v2004_v48  ;;  %v11338_v31 = vld [vmem:[#allocation8 + $0x56c] ss:$16 sps:$4 sm:$0xff]   ;;  %v11336_v38 = vld [vmem:[#allocation8 + $0x568] ss:$16 sps:$4 sm:$0xff]   ;;  %v11341_v25 = vld [vmem:[#allocation8 + $0x584] ss:$16 sps:$4 sm:$0xff]  }
 0x31a   : > { %3726 = vmatprep.mubr.bf16.mxu0 %v13265_v61  ;;  %3938 = vmatprep.mubr.bf16.mxu1 %v13265_v61  ;;  %v13300_v61 = vpack.c.bf16 %v2013_v3, %v2005_v56  ;;  %v11344_v4 = vld [vmem:[#allocation8 + $0x58c] ss:$16 sps:$4 sm:$0xff]   ;;  %v11339_v42 = vld [vmem:[#allocation8 + $0x580] ss:$16 sps:$4 sm:$0xff]   ;;  %v11354_v48 = vld [vmem:[#allocation8 + $0x5c8] ss:$16 sps:$4 sm:$0xff]  }
 0x31b   : > { %v11350_v45 = vld [vmem:[#allocation8 + $0x5ac] ss:$16 sps:$4 sm:$0xff]   ;;  %v11345_v46 = vld [vmem:[#allocation8 + $0x5a0] ss:$16 sps:$4 sm:$0xff]   ;;  %v11359_v54 = vld [vmem:[#allocation8 + $0x5e4] ss:$16 sps:$4 sm:$0xff]  }
 0x31c   : > { %3701 = vmatpush1.bf16.msra.mxu0 %v11285_v43  ;;  %3913 = vmatpush1.bf16.msra.mxu1 %v11288_v44  ;;  %v11342_v43 = vld [vmem:[#allocation8 + $0x588] ss:$16 sps:$4 sm:$0xff]   ;;  %v11347_v44 = vld [vmem:[#allocation8 + $0x5a4] ss:$16 sps:$4 sm:$0xff]   ;;  %v11356_v51 = vld [vmem:[#allocation8 + $0x5cc] ss:$16 sps:$4 sm:$0xff]  }
 0x31d   : > { %3702 = vmatprep.subr.bf16.mxu0 %v11293_v49  ;;  %3914 = vmatprep.subr.bf16.mxu1 %v11296_v50  ;;  %v11348_v49 = vld [vmem:[#allocation8 + $0x5a8] ss:$16 sps:$4 sm:$0xff]   ;;  %v11353_v50 = vld [vmem:[#allocation8 + $0x5c4] ss:$16 sps:$4 sm:$0xff]   ;;  %v11351_v53 = vld [vmem:[#allocation8 + $0x5c0] ss:$16 sps:$4 sm:$0xff]  }
 0x31e   : > { %v11362_v55 = vld [vmem:[#allocation8 + $0x5ec] ss:$16 sps:$4 sm:$0xff]   ;;  %v11357_v56 = vld [vmem:[#allocation8 + $0x5e0] ss:$16 sps:$4 sm:$0xff]   ;;  %v11360_v59 = vld [vmem:[#allocation8 + $0x5e8] ss:$16 sps:$4 sm:$0xff]  }
 0x31f   : > { %v11363_v0 = vld [vmem:[#allocation8 + $0x600] ss:$16 sps:$4 sm:$0xff]   ;;  %v11374_v3 = vld [vmem:[#allocation8 + $0x62c] ss:$16 sps:$4 sm:$0xff]  }
 0x320   : > { %3703 = vmatpush1.bf16.msra.mxu0 %v11291_v60  ;;  %3915 = vmatpush1.bf16.msra.mxu1 %v11294_v62  ;;  %v11365_v60 = vld [vmem:[#allocation8 + $0x604] ss:$16 sps:$4 sm:$0xff]   ;;  %v11368_v62 = vld [vmem:[#allocation8 + $0x60c] ss:$16 sps:$4 sm:$0xff]  }
 0x321   : > { %3704 = vmatprep.subr.bf16.mxu0 %v11299_v1  ;;  %3916 = vmatprep.subr.bf16.mxu1 %v11302_v2  ;;  %v11366_v1 = vld [vmem:[#allocation8 + $0x608] ss:$16 sps:$4 sm:$0xff]   ;;  %v11371_v2 = vld [vmem:[#allocation8 + $0x624] ss:$16 sps:$4 sm:$0xff]  }
 0x324   : > { %3705 = vmatpush1.bf16.msra.mxu0 %v11297_v58  ;;  %3917 = vmatpush1.bf16.msra.mxu1 %v11300_v6  ;;  %v11369_v58 = vld [vmem:[#allocation8 + $0x620] ss:$16 sps:$4 sm:$0xff]   ;;  %v11372_v6 = vld [vmem:[#allocation8 + $0x628] ss:$16 sps:$4 sm:$0xff]  }
 0x325   : > { %3706 = vmatprep.subr.bf16.mxu0 %v11305_v63  ;;  %3918 = vmatprep.subr.bf16.mxu1 %v11308_v7  ;;  %v11377_v63 = vld [vmem:[#allocation8 + $0x644] ss:$16 sps:$4 sm:$0xff]   ;;  %v11380_v7 = vld [vmem:[#allocation8 + $0x64c] ss:$16 sps:$4 sm:$0xff]  }
 0x328   : > { %3707 = vmatpush1.bf16.msra.mxu0 %v11303_v9  ;;  %3919 = vmatpush1.bf16.msra.mxu1 %v11306_v10  ;;  %v11375_v9 = vld [vmem:[#allocation8 + $0x640] ss:$16 sps:$4 sm:$0xff]   ;;  %v11378_v10 = vld [vmem:[#allocation8 + $0x648] ss:$16 sps:$4 sm:$0xff]  }
 0x329   : > { %3708 = vmatprep.subr.bf16.mxu0 %v11311_v11  ;;  %3920 = vmatprep.subr.bf16.mxu1 %v11314_v22  ;;  %v11383_v11 = vld [vmem:[#allocation8 + $0x664] ss:$16 sps:$4 sm:$0xff]   ;;  %v11381_v22 = vld [vmem:[#allocation8 + $0x660] ss:$16 sps:$4 sm:$0xff]  }
 0x32c   : > { %3709 = vmatpush1.bf16.msra.mxu0 %v11309_v12  ;;  %3921 = vmatpush1.bf16.msra.mxu1 %v11312_v24  ;;  %v11384_v12 = vld [vmem:[#allocation8 + $0x668] ss:$16 sps:$4 sm:$0xff]   ;;  %v11389_v24 = vld [vmem:[#allocation8 + $0x684] ss:$16 sps:$4 sm:$0xff]  }
 0x32d   : > { %3710 = vmatprep.subr.bf16.mxu0 %v11317_v13  ;;  %3922 = vmatprep.subr.bf16.mxu1 %v11320_v14  ;;  %v11387_v13 = vld [vmem:[#allocation8 + $0x680] ss:$16 sps:$4 sm:$0xff]   ;;  %v11390_v14 = vld [vmem:[#allocation8 + $0x688] ss:$16 sps:$4 sm:$0xff]  }
 0x330   : > { %3711 = vmatpush1.bf16.msra.mxu0 %v11315_v19  ;;  %3923 = vmatpush1.bf16.msra.mxu1 %v11318_v15  ;;  %v11395_v19 = vld [vmem:[#allocation8 + $0x6a4] ss:$16 sps:$4 sm:$0xff]   ;;  %v11393_v15 = vld [vmem:[#allocation8 + $0x6a0] ss:$16 sps:$4 sm:$0xff]  }
 0x331   : > { %3712 = vmatprep.subr.bf16.mxu0 %v11323_v16  ;;  %3924 = vmatprep.subr.bf16.mxu1 %v11326_v20  ;;  %v11396_v16 = vld [vmem:[#allocation8 + $0x6a8] ss:$16 sps:$4 sm:$0xff]   ;;  %v11401_v20 = vld [vmem:[#allocation8 + $0x6c4] ss:$16 sps:$4 sm:$0xff]  }
 0x334   : > { %3713 = vmatpush1.bf16.msra.mxu0 %v11321_v27  ;;  %3925 = vmatpush1.bf16.msra.mxu1 %v11324_v28  ;;  %v11404_v27 = vld [vmem:[#allocation8 + $0x6cc] ss:$16 sps:$4 sm:$0xff]   ;;  %v11399_v28 = vld [vmem:[#allocation8 + $0x6c0] ss:$16 sps:$4 sm:$0xff]  }
 0x335   : > { %3714 = vmatprep.subr.bf16.mxu0 %v11329_v29  ;;  %3926 = vmatprep.subr.bf16.mxu1 %v11332_v30  ;;  %v11407_v29 = vld [vmem:[#allocation8 + $0x6e4] ss:$16 sps:$4 sm:$0xff]   ;;  %v11410_v30 = vld [vmem:[#allocation8 + $0x6ec] ss:$16 sps:$4 sm:$0xff]  }
 0x338   : > { %3715 = vmatpush1.bf16.msra.mxu0 %v11327_v32  ;;  %3927 = vmatpush1.bf16.msra.mxu1 %v11330_v33  ;;  %v11405_v32 = vld [vmem:[#allocation8 + $0x6e0] ss:$16 sps:$4 sm:$0xff]   ;;  %v11408_v33 = vld [vmem:[#allocation8 + $0x6e8] ss:$16 sps:$4 sm:$0xff]  }
 0x339   : > { %3716 = vmatprep.subr.bf16.mxu0 %v11335_v34  ;;  %3928 = vmatprep.subr.bf16.mxu1 %v11338_v31  ;;  %v11413_v34 = vld [vmem:[#allocation8 + $0x704] ss:$16 sps:$4 sm:$0xff]   ;;  %v11416_v31 = vld [vmem:[#allocation8 + $0x70c] ss:$16 sps:$4 sm:$0xff]  }
 0x33c   : > { %3717 = vmatpush1.bf16.msra.mxu0 %v11333_v36  ;;  %3929 = vmatpush1.bf16.msra.mxu1 %v11336_v38  ;;  %v11411_v36 = vld [vmem:[#allocation8 + $0x700] ss:$16 sps:$4 sm:$0xff]   ;;  %v11414_v38 = vld [vmem:[#allocation8 + $0x708] ss:$16 sps:$4 sm:$0xff]  }
 0x33d   : > { %3718 = vmatprep.subr.bf16.mxu0 %v11341_v25  ;;  %3930 = vmatprep.subr.bf16.mxu1 %v11344_v4  ;;  %v11419_v25 = vld [vmem:[#allocation8 + $0x724] ss:$16 sps:$4 sm:$0xff]   ;;  %v11422_v4 = vld [vmem:[#allocation8 + $0x72c] ss:$16 sps:$4 sm:$0xff]  }
 0x340   : > { %3719 = vmatpush1.bf16.msra.mxu0 %v11339_v42  ;;  %3931 = vmatpush1.bf16.msra.mxu1 %v11342_v43  ;;  %v11417_v42 = vld [vmem:[#allocation8 + $0x720] ss:$16 sps:$4 sm:$0xff]   ;;  %v11420_v43 = vld [vmem:[#allocation8 + $0x728] ss:$16 sps:$4 sm:$0xff]  }
 0x341   : > { %3720 = vmatprep.subr.bf16.mxu0 %v11347_v44  ;;  %3932 = vmatprep.subr.bf16.mxu1 %v11350_v45  ;;  %v11425_v44 = vld [vmem:[#allocation8 + $0x744] ss:$16 sps:$4 sm:$0xff]   ;;  %v11428_v45 = vld [vmem:[#allocation8 + $0x74c] ss:$16 sps:$4 sm:$0xff]  }
 0x344   : > { %3721 = vmatpush1.bf16.msra.mxu0 %v11345_v46  ;;  %3933 = vmatpush1.bf16.msra.mxu1 %v11348_v49  ;;  %v11423_v46 = vld [vmem:[#allocation8 + $0x740] ss:$16 sps:$4 sm:$0xff]   ;;  %v11426_v49 = vld [vmem:[#allocation8 + $0x748] ss:$16 sps:$4 sm:$0xff]  }
 0x345   : > { %3722 = vmatprep.subr.bf16.mxu0 %v11353_v50  ;;  %3934 = vmatprep.subr.bf16.mxu1 %v11356_v51  ;;  %v11431_v50 = vld [vmem:[#allocation8 + $0x764] ss:$16 sps:$4 sm:$0xff]   ;;  %v11434_v51 = vld [vmem:[#allocation8 + $0x76c] ss:$16 sps:$4 sm:$0xff]  }
 0x348   : > { %3723 = vmatpush1.bf16.msra.mxu0 %v11351_v53  ;;  %3935 = vmatpush1.bf16.msra.mxu1 %v11354_v48  ;;  %v11429_v53 = vld [vmem:[#allocation8 + $0x760] ss:$16 sps:$4 sm:$0xff]   ;;  %v11432_v48 = vld [vmem:[#allocation8 + $0x768] ss:$16 sps:$4 sm:$0xff]  }
 0x349   : > { %3724 = vmatprep.subr.bf16.mxu0 %v11359_v54  ;;  %3936 = vmatprep.subr.bf16.mxu1 %v11362_v55  ;;  %v11437_v54 = vld [vmem:[#allocation8 + $0x784] ss:$16 sps:$4 sm:$0xff]   ;;  %v11440_v55 = vld [vmem:[#allocation8 + $0x78c] ss:$16 sps:$4 sm:$0xff]  }
 0x34c   : > { %3725 = vmatpush1.bf16.msra.mxu0 %v11357_v56  ;;  %3937 = vmatpush1.bf16.msra.mxu1 %v11360_v59  ;;  %v11435_v56 = vld [vmem:[#allocation8 + $0x780] ss:$16 sps:$4 sm:$0xff]   ;;  %v11438_v59 = vld [vmem:[#allocation8 + $0x788] ss:$16 sps:$4 sm:$0xff]  }
 0x34d   : > { %3747 = vmatprep.subr.bf16.mxu0 %v11365_v60  ;;  %3959 = vmatprep.subr.bf16.mxu1 %v11368_v62  ;;  %v11443_v60 = vld [vmem:[#allocation8 + $0x7a4] ss:$16 sps:$4 sm:$0xff]   ;;  %v11446_v62 = vld [vmem:[#allocation8 + $0x7ac] ss:$16 sps:$4 sm:$0xff]  }
 0x34f   : > { %3727 = vmatmul.mubr.bf16.vlgmr.msra.gmra.mrb[16].mxu0 %v13258_v57  ;;  %3939 = vmatmul.mubr.bf16.vlgmr.msra.gmra.mrb[16].mxu1 %v13258_v57  ;;  %v11386_v57 = vld [vmem:[#allocation8 + $0x66c] ss:$16 sps:$4 sm:$0xff]  }
 0x350   : > { %3748 = vmatpush1.bf16.msra.mxu0 %v11363_v0  ;;  %3960 = vmatpush1.bf16.msra.mxu1 %v11366_v1  ;;  %v11441_v0 = vld [vmem:[#allocation8 + $0x7a0] ss:$16 sps:$4 sm:$0xff]   ;;  %v11444_v1 = vld [vmem:[#allocation8 + $0x7a8] ss:$16 sps:$4 sm:$0xff]  }
 0x351   : > { %3749 = vmatprep.subr.bf16.mxu0 %v11371_v2  ;;  %3961 = vmatprep.subr.bf16.mxu1 %v11374_v3  ;;  %v11449_v2 = vld [vmem:[#allocation8 + $0x7c4] ss:$16 sps:$4 sm:$0xff]   ;;  %v11452_v3 = vld [vmem:[#allocation8 + $0x7cc] ss:$16 sps:$4 sm:$0xff]  }
 0x352   : > { %3736 = vmatprep.mubr.bf16.mxu0 %v13284_v39  ;;  %3948 = vmatprep.mubr.bf16.mxu1 %v13284_v39  ;;  %v11392_v39 = vld [vmem:[#allocation8 + $0x68c] ss:$16 sps:$4 sm:$0xff]  }
 0x354   : > { %3750 = vmatpush1.bf16.msra.mxu0 %v11369_v58  ;;  %3962 = vmatpush1.bf16.msra.mxu1 %v11372_v6  ;;  %v11447_v58 = vld [vmem:[#allocation8 + $0x7c0] ss:$16 sps:$4 sm:$0xff]   ;;  %v11450_v6 = vld [vmem:[#allocation8 + $0x7c8] ss:$16 sps:$4 sm:$0xff]  }
 0x355   : > { %3751 = vmatprep.subr.bf16.mxu0 %v11377_v63  ;;  %3963 = vmatprep.subr.bf16.mxu1 %v11380_v7  ;;  %v11455_v63 = vld [vmem:[#allocation8 + $0x7e4] ss:$16 sps:$4 sm:$0xff]   ;;  %v11458_v7 = vld [vmem:[#allocation8 + $0x7ec] ss:$16 sps:$4 sm:$0xff]  }
 0x357   : > { %3737 = vmatmul.mubr.bf16.gmra.mrb[20].mxu0 %v13282_v35  ;;  %3949 = vmatmul.mubr.bf16.gmra.mrb[20].mxu1 %v13282_v35  ;;  %v11398_v35 = vld [vmem:[#allocation8 + $0x6ac] ss:$16 sps:$4 sm:$0xff]  }
 0x358   : > { %3752 = vmatpush1.bf16.msra.mxu0 %v11375_v9  ;;  %3964 = vmatpush1.bf16.msra.mxu1 %v11378_v10  ;;  %v11453_v9 = vld [vmem:[#allocation8 + $0x7e0] ss:$16 sps:$4 sm:$0xff]   ;;  %v11456_v10 = vld [vmem:[#allocation8 + $0x7e8] ss:$16 sps:$4 sm:$0xff]  }
 0x359   : > { %3753 = vmatprep.subr.bf16.mxu0 %v11383_v11  ;;  %3965 = vmatprep.subr.bf16.mxu1 %v11386_v57  ;;  %v11461_v11 = vld [vmem:[#allocation11 + $0x4] ss:$8 sps:$4 sm:$0xff]   ;;  %v11459_v57 = vld [vmem:[#allocation11] ss:$8 sps:$4 sm:$0xff]  }
 0x35a   : > { %3779 = vmatprep.mubr.bf16.mxu0 %v13290_v8  ;;  %3991 = vmatprep.mubr.bf16.mxu1 %v13290_v8  ;;  %v11402_v8 = vld [vmem:[#allocation8 + $0x6c8] ss:$16 sps:$4 sm:$0xff]  }
 0x35c   : > { %3754 = vmatpush1.bf16.msra.mxu0 %v11381_v22  ;;  %3966 = vmatpush1.bf16.msra.mxu1 %v11384_v12  ;;  %v11464_v22 = vld [vmem:[#allocation11 + $0x14] ss:$8 sps:$4 sm:$0xff]   ;;  %v11462_v12 = vld [vmem:[#allocation11 + $0x10] ss:$8 sps:$4 sm:$0xff]  }
 0x35d   : > { %3755 = vmatprep.subr.bf16.mxu0 %v11389_v24  ;;  %3967 = vmatprep.subr.bf16.mxu1 %v11392_v39  ;;  %v11467_v24 = vld [vmem:[#allocation11 + $0x24] ss:$8 sps:$4 sm:$0xff]   ;;  %v11465_v39 = vld [vmem:[#allocation11 + $0x20] ss:$8 sps:$4 sm:$0xff]  }
 0x360   : > { %3756 = vmatpush1.bf16.msra.mxu0 %v11387_v13  ;;  %3968 = vmatpush1.bf16.msra.mxu1 %v11390_v14  ;;  %v11470_v13 = vld [vmem:[#allocation11 + $0x34] ss:$8 sps:$4 sm:$0xff]   ;;  %v11468_v14 = vld [vmem:[#allocation11 + $0x30] ss:$8 sps:$4 sm:$0xff]  }
 0x361   : > { %3757 = vmatprep.subr.bf16.mxu0 %v11395_v19  ;;  %3969 = vmatprep.subr.bf16.mxu1 %v11398_v35  ;;  %v11471_v19 = vld [vmem:[#allocation11 + $0x40] ss:$8 sps:$4 sm:$0xff]   ;;  %v11474_v35 = vld [vmem:[#allocation11 + $0x50] ss:$8 sps:$4 sm:$0xff]  }
 0x364   : > { %3758 = vmatpush1.bf16.msra.mxu0 %v11393_v15  ;;  %3970 = vmatpush1.bf16.msra.mxu1 %v11396_v16  ;;  %v11479_v15 = vld [vmem:[#allocation11 + $0x64] ss:$8 sps:$4 sm:$0xff]   ;;  %v11477_v16 = vld [vmem:[#allocation11 + $0x60] ss:$8 sps:$4 sm:$0xff]  }
 0x365   : > { %3759 = vmatprep.subr.bf16.mxu0 %v11401_v20  ;;  %3971 = vmatprep.subr.bf16.mxu1 %v11404_v27  ;;  %v11482_v20 = vld [vmem:[#allocation11 + $0x74] ss:$8 sps:$4 sm:$0xff]   ;;  %v11480_v27 = vld [vmem:[#allocation11 + $0x70] ss:$8 sps:$4 sm:$0xff]  }
 0x368   : > { %3760 = vmatpush1.bf16.msra.mxu0 %v11399_v28  ;;  %3972 = vmatpush1.bf16.msra.mxu1 %v11402_v8  ;;  %v11483_v28 = vld [vmem:[#allocation11 + $0x80] ss:$8 sps:$4 sm:$0xff]   ;;  %v11488_v8 = vld [vmem:[#allocation11 + $0x94] ss:$8 sps:$4 sm:$0xff]  }
 0x369   : > { %3761 = vmatprep.subr.bf16.mxu0 %v11407_v29  ;;  %3973 = vmatprep.subr.bf16.mxu1 %v11410_v30  ;;  %v11486_v29 = vld [vmem:[#allocation11 + $0x90] ss:$8 sps:$4 sm:$0xff]   ;;  %v11491_v30 = vld [vmem:[#allocation11 + $0xa4] ss:$8 sps:$4 sm:$0xff]  }
 0x36c   : > { %3762 = vmatpush1.bf16.msra.mxu0 %v11405_v32  ;;  %3974 = vmatpush1.bf16.msra.mxu1 %v11408_v33  ;;  %v11489_v32 = vld [vmem:[#allocation11 + $0xa0] ss:$8 sps:$4 sm:$0xff]   ;;  %v11494_v33 = vld [vmem:[#allocation11 + $0xb4] ss:$8 sps:$4 sm:$0xff]  }
 0x36d   : > { %3763 = vmatprep.subr.bf16.mxu0 %v11413_v34  ;;  %3975 = vmatprep.subr.bf16.mxu1 %v11416_v31  ;;  %v11492_v34 = vld [vmem:[#allocation11 + $0xb0] ss:$8 sps:$4 sm:$0xff]   ;;  %v11497_v31 = vld [vmem:[#allocation11 + $0xc4] ss:$8 sps:$4 sm:$0xff]  }
 0x370   : > { %3764 = vmatpush1.bf16.msra.mxu0 %v11411_v36  ;;  %3976 = vmatpush1.bf16.msra.mxu1 %v11414_v38  ;;  %v11495_v36 = vld [vmem:[#allocation11 + $0xc0] ss:$8 sps:$4 sm:$0xff]   ;;  %v11500_v38 = vld [vmem:[#allocation11 + $0xd4] ss:$8 sps:$4 sm:$0xff]  }
 0x371   : > { %3765 = vmatprep.subr.bf16.mxu0 %v11419_v25  ;;  %3977 = vmatprep.subr.bf16.mxu1 %v11422_v4  ;;  %v11498_v25 = vld [vmem:[#allocation11 + $0xd0] ss:$8 sps:$4 sm:$0xff]   ;;  %v11503_v4 = vld [vmem:[#allocation11 + $0xe4] ss:$8 sps:$4 sm:$0xff]  }
 0x374   : > { %3766 = vmatpush1.bf16.msra.mxu0 %v11417_v42  ;;  %3978 = vmatpush1.bf16.msra.mxu1 %v11420_v43  ;;  %v11501_v42 = vld [vmem:[#allocation11 + $0xe0] ss:$8 sps:$4 sm:$0xff]   ;;  %v11506_v43 = vld [vmem:[#allocation11 + $0xf4] ss:$8 sps:$4 sm:$0xff]  }
 0x375   : > { %3767 = vmatprep.subr.bf16.mxu0 %v11425_v44  ;;  %3979 = vmatprep.subr.bf16.mxu1 %v11428_v45  ;;  %v11504_v44 = vld [vmem:[#allocation11 + $0xf0] ss:$8 sps:$4 sm:$0xff]   ;;  %v11509_v45 = vld [vmem:[#allocation11 + $0x104] ss:$8 sps:$4 sm:$0xff]  }
 0x378   : > { %3768 = vmatpush1.bf16.msra.mxu0 %v11423_v46  ;;  %3980 = vmatpush1.bf16.msra.mxu1 %v11426_v49  ;;  %v11555_v46 = vld [vmem:[#allocation13] ss:$16 sps:$4 sm:$0xff]   ;;  %v11557_v49 = vld [vmem:[#allocation13 + $0x4] ss:$16 sps:$4 sm:$0xff]  }
 0x379   : > { %3769 = vmatprep.subr.bf16.mxu0 %v11431_v50  ;;  %3981 = vmatprep.subr.bf16.mxu1 %v11434_v51  ;;  %v11560_v50 = vld [vmem:[#allocation13 + $0x24] ss:$16 sps:$4 sm:$0xff]   ;;  %v11558_v51 = vld [vmem:[#allocation13 + $0x20] ss:$16 sps:$4 sm:$0xff]  }
 0x37c   : > { %3770 = vmatpush1.bf16.msra.mxu0 %v11429_v53  ;;  %3982 = vmatpush1.bf16.msra.mxu1 %v11432_v48  ;;  %v2286_v53 = vld [vmem:[#allocation10] sm:$0xf] }
 0x37d   : > { %3771 = vmatprep.subr.bf16.mxu0 %v11437_v54  ;;  %3983 = vmatprep.subr.bf16.mxu1 %v11440_v55  ;;  %v2291_v48 = vrot.slane %v2286_v53, %v13207_v23  ;;  %v2299_v54 = vrot.slane %v2286_v53, %v13217_v37  ;;  %v2295_v55 = vrot.slane %v2286_v53, %v13210_v26 }
 0x380   : > { %3772 = vmatpush1.bf16.msra.mxu0 %v11435_v56  ;;  %3984 = vmatpush1.bf16.msra.mxu1 %v11438_v59  ;;  %v2303_v56 = vrot.slane %v2286_v53, %v13220_v40 }
 0x381   : > { %3773 = vmatprep.subr.bf16.mxu0 %v11443_v60  ;;  %3985 = vmatprep.subr.bf16.mxu1 %v11446_v62 }
 0x384   : > { %3774 = vmatpush1.bf16.msra.mxu0 %v11441_v0  ;;  %3986 = vmatpush1.bf16.msra.mxu1 %v11444_v1 }
 0x385   : > { %3775 = vmatprep.subr.bf16.mxu0 %v11449_v2  ;;  %3987 = vmatprep.subr.bf16.mxu1 %v11452_v3 }
 0x388   : > { %3776 = vmatpush1.bf16.msra.mxu0 %v11447_v58  ;;  %3988 = vmatpush1.bf16.msra.mxu1 %v11450_v6 }
 0x389   : > { %3777 = vmatprep.subr.bf16.mxu0 %v11455_v63  ;;  %3989 = vmatprep.subr.bf16.mxu1 %v11458_v7 }
 0x38c   : > { %3778 = vmatpush1.bf16.msra.mxu0 %v11453_v9  ;;  %3990 = vmatpush1.bf16.msra.mxu1 %v11456_v10 }
 0x38d   : > { %4432 = vmatprep.subr.bf16.mxu0 %v11461_v11  ;;  %4786 = vmatprep.subr.bf16.mxu1 %v11557_v49 }
 0x38f   : > { %3780 = vmatmul.mubr.bf16.vlgmr.msra.gmra.mrb[16].mxu0 %v13286_v41  ;;  %3992 = vmatmul.mubr.bf16.vlgmr.msra.gmra.mrb[16].mxu1 %v13286_v41  ;;  %v11473_v41 = vld [vmem:[#allocation11 + $0x44] ss:$8 sps:$4 sm:$0xff]  }
 0x390   : > { %3789 = vmatprep.mubr.bf16.mxu0 %v13300_v61  ;;  %4001 = vmatprep.mubr.bf16.mxu1 %v13300_v61  ;;  %v11476_v61 = vld [vmem:[#allocation11 + $0x54] ss:$8 sps:$4 sm:$0xff]  }
 0x391   : > { %4433 = vmatpush1.bf16.msra.mxu0 %v11459_v57  ;;  %4787 = vmatpush1.bf16.msra.mxu1 %v11555_v46  ;;  %v11510_v46 = vld [vmem:[#allocation11 + $0x110] ss:$8 sps:$4 sm:$0xff]  }
 0x392   : > { %4434 = vmatprep.subr.bf16.mxu0 %v11464_v22  ;;  %4788 = vmatprep.subr.bf16.mxu1 %v11560_v50 }
 0x395   : > { %4435 = vmatpush1.bf16.msra.mxu0 %v11462_v12  ;;  %4789 = vmatpush1.bf16.msra.mxu1 %v11558_v51 }
 0x396   : > { %4436 = vmatprep.subr.bf16.mxu0 %v11467_v24 }
 0x397   : > { %3790 = vmatmul.mubr.bf16.gmra.mrb[20].mxu0 %v13298_v5  ;;  %4002 = vmatmul.mubr.bf16.gmra.mrb[20].mxu1 %v13298_v5  ;;  %v11485_v5 = vld [vmem:[#allocation11 + $0x84] ss:$8 sps:$4 sm:$0xff]  }
 0x399   : > { %4437 = vmatpush1.bf16.msra.mxu0 %v11465_v39 }
 0x39a   : > { %4438 = vmatprep.subr.bf16.mxu0 %v11470_v13 }
 0x39d   : > { %4439 = vmatpush1.bf16.msra.mxu0 %v11468_v14 }
 0x39e   : > { %4440 = vmatprep.subr.bf16.mxu0 %v11473_v41 }
 0x3a1   : > { %4441 = vmatpush1.bf16.msra.mxu0 %v11471_v19 }
 0x3a2   : > { %4442 = vmatprep.subr.bf16.mxu0 %v11476_v61 }
 0x3a5   : > { %4443 = vmatpush1.bf16.msra.mxu0 %v11474_v35 }
 0x3a6   : > { %4444 = vmatprep.subr.bf16.mxu0 %v11479_v15 }
 0x3a9   : > { %4445 = vmatpush1.bf16.msra.mxu0 %v11477_v16 }
 0x3aa   : > { %4446 = vmatprep.subr.bf16.mxu0 %v11482_v20 }
 0x3ad   : > { %4447 = vmatpush1.bf16.msra.mxu0 %v11480_v27 }
 0x3ae   : > { %4448 = vmatprep.subr.bf16.mxu0 %v11485_v5 }
 0x3b1   : > { %4449 = vmatpush1.bf16.msra.mxu0 %v11483_v28  ;;  %v11507_v28 = vld [vmem:[#allocation11 + $0x100] ss:$8 sps:$4 sm:$0xff]  }
 0x3b2   : > { %4450 = vmatprep.subr.bf16.mxu0 %v11488_v8 }
 0x3b5   : > { %4451 = vmatpush1.bf16.msra.mxu0 %v11486_v29 }
 0x3b6   : > { %4452 = vmatprep.subr.bf16.mxu0 %v11491_v30 }
 0x3b9   : > { %4453 = vmatpush1.bf16.msra.mxu0 %v11489_v32 }
 0x3ba   : > { %4454 = vmatprep.subr.bf16.mxu0 %v11494_v33  ;;  %v11512_v33 = vld [vmem:[#allocation11 + $0x114] ss:$8 sps:$4 sm:$0xff]  }
 0x3bd   : > { %4455 = vmatpush1.bf16.msra.mxu0 %v11492_v34 }
 0x3be   : > { %4456 = vmatprep.subr.bf16.mxu0 %v11497_v31 }
 0x3c1   : > { %4457 = vmatpush1.bf16.msra.mxu0 %v11495_v36 }
 0x3c2   : > { %4458 = vmatprep.subr.bf16.mxu0 %v11500_v38 }
 0x3c5   : > { %4459 = vmatpush1.bf16.msra.mxu0 %v11498_v25 }
 0x3c6   : > { %4460 = vmatprep.subr.bf16.mxu0 %v11503_v4 }
 0x3c9   : > { %4461 = vmatpush1.bf16.msra.mxu0 %v11501_v42 }
 0x3ca   : > { %4462 = vmatprep.subr.bf16.mxu0 %v11506_v43 }
 0x3cd   : > { %4463 = vmatpush1.bf16.msra.mxu0 %v11504_v44 }
 0x3ce   : > { %4485 = vmatprep.subr.bf16.mxu0 %v11509_v45 }
 0x462   : > { %v3781_v59 = vpop.f32.mrb[16].mxu0  ;;  %v3993_v60 = vpop.f32.mrb[16].mxu1 }
 0x463   : > { %v10703_v62 = vadd.f32 %v3781_v59, %v2291_v48  ;;  %v10711_v0 = vadd.f32 %v3993_v60, %v2299_v54  ;;  %v3783_v1 = vpop.f32.mrb[17].mxu0  ;;  %v3995_v2 = vpop.f32.mrb[17].mxu1  ;;  %v11515_v59 = vld [vmem:[#allocation11 + $0x124] ss:$8 sps:$4 sm:$0xff]  }
 0x464   : > { %v10704_v3 = vadd.f32 %v3783_v1, %v2295_v55  ;;  %v10712_v58 = vadd.f32 %v3995_v2, %v2303_v56  ;;  %v3785_v6 = vpop.f32.mrb[18].mxu0  ;;  %v3997_v63 = vpop.f32.mrb[18].mxu1 }
 0x465   : > { %v10705_v7 = vadd.f32 %v3785_v6, %v2291_v48  ;;  %v10713_v9 = vadd.f32 %v3997_v63, %v2299_v54  ;;  %v3787_v10 = vpop.f32.mrb[19].mxu0  ;;  %v3999_v11 = vpop.f32.mrb[19].mxu1  ;;  %v4012_v12 = vmax.f32 %v10703_v62, 0.0  ;;  %v4014_v24 = vmax.f32 %v10711_v0, 0.0  ;;  %v11521_v6 = vld [vmem:[#allocation11 + $0x144] ss:$8 sps:$4 sm:$0xff]  }
 0x466   : > { %v10706_v57 = vadd.f32 %v3787_v10, %v2295_v55  ;;  %v10714_v22 = vadd.f32 %v3999_v11, %v2303_v56  ;;  %v4013_v14 = vmax.f32 %v10704_v3, 0.0  ;;  %v4015_v41 = vmax.f32 %v10712_v58, 0.0  ;;  %v11516_v58 = vld [vmem:[#allocation11 + $0x130] ss:$8 sps:$4 sm:$0xff]   ;;  %v11519_v63 = vld [vmem:[#allocation11 + $0x140] ss:$8 sps:$4 sm:$0xff]  }
 0x467   : > { %v4016_v39 = vmax.f32 %v10705_v7, 0.0  ;;  %v4018_v13 = vmax.f32 %v10713_v9, 0.0  ;;  %v11524_v7 = vld [vmem:[#allocation11 + $0x154] ss:$8 sps:$4 sm:$0xff]   ;;  %v11522_v9 = vld [vmem:[#allocation11 + $0x150] ss:$8 sps:$4 sm:$0xff]  }
 0x468   : > { %v4017_v19 = vmax.f32 %v10706_v57, 0.0  ;;  %v4019_v61 = vmax.f32 %v10714_v22, 0.0  ;;  %v11527_v10 = vld [vmem:[#allocation11 + $0x164] ss:$8 sps:$4 sm:$0xff]   ;;  %v11525_v11 = vld [vmem:[#allocation11 + $0x160] ss:$8 sps:$4 sm:$0xff]  }
 0x469   : > { %v4028_v35 = vpack.c.bf16 %v4016_v39, %v4012_v12  ;;  %v13320_v15 = vpack.c.bf16 %v4018_v13, %v4014_v24  ;;  %v11530_v57 = vld [vmem:[#allocation11 + $0x174] ss:$8 sps:$4 sm:$0xff]   ;;  %v11528_v22 = vld [vmem:[#allocation11 + $0x170] ss:$8 sps:$4 sm:$0xff]   ;;  %v11533_v12 = vld [vmem:[#allocation11 + $0x184] ss:$8 sps:$4 sm:$0xff]  }
 0x46a   : > { %v4029_v16 = vpack.c.bf16 %v4017_v19, %v4013_v14  ;;  %v4031_v20 = vpack.c.bf16 %v4019_v61, %v4015_v41  ;;  %v3791_v27 = vpop.f32.mrb[20].mxu0  ;;  %v4003_v5 = vpop.f32.mrb[20].mxu1  ;;  %v11531_v24 = vld [vmem:[#allocation11 + $0x180] ss:$8 sps:$4 sm:$0xff]   ;;  %v11536_v39 = vld [vmem:[#allocation11 + $0x194] ss:$8 sps:$4 sm:$0xff]  }
 0x46b   : > { %v10707_v8 = vadd.f32 %v3791_v27, %v2291_v48  ;;  %v10715_v29 = vadd.f32 %v4003_v5, %v2299_v54  ;;  %v3793_v30 = vpop.f32.mrb[21].mxu0  ;;  %v4005_v32 = vpop.f32.mrb[21].mxu1  ;;  %v11534_v13 = vld [vmem:[#allocation11 + $0x190] ss:$8 sps:$4 sm:$0xff]   ;;  %v11539_v14 = vld [vmem:[#allocation11 + $0x1a4] ss:$8 sps:$4 sm:$0xff]  }
 0x46c   : > { %v10708_v34 = vadd.f32 %v3793_v30, %v2295_v55  ;;  %v10716_v31 = vadd.f32 %v4005_v32, %v2303_v56  ;;  %v3795_v36 = vpop.f32.mrb[22].mxu0  ;;  %v4007_v38 = vpop.f32.mrb[22].mxu1  ;;  %4464 = vmatprep.mubr.bf16.mxu0 %v4029_v16  ;;  %v11537_v41 = vld [vmem:[#allocation11 + $0x1a0] ss:$8 sps:$4 sm:$0xff]   ;;  %v11542_v19 = vld [vmem:[#allocation11 + $0x1b4] ss:$8 sps:$4 sm:$0xff]  }
 0x46d   : > { %v10709_v25 = vadd.f32 %v3795_v36, %v2291_v48  ;;  %v10717_v4 = vadd.f32 %v4007_v38, %v2299_v54  ;;  %v3797_v42 = vpop.f32.mrb[23].mxu0  ;;  %v4009_v43 = vpop.f32.mrb[23].mxu1  ;;  %4465 = vmatmul.mubr.bf16.vlgmr.msra.gmra.mrb[24].mxu0 %v4028_v35  ;;  %v4020_v49 = vmax.f32 %v10707_v8, 0.0  ;;  %v4022_v50 = vmax.f32 %v10715_v29, 0.0  ;;  %v11540_v61 = vld [vmem:[#allocation11 + $0x1b0] ss:$8 sps:$4 sm:$0xff]  }
 0x46e   : > { %v10710_v44 = vadd.f32 %v3797_v42, %v2295_v55  ;;  %v10718_v45 = vadd.f32 %v4009_v43, %v2303_v56  ;;  %4486 = vmatpush1.bf16.msra.mxu0 %v11507_v28  ;;  %v4021_v60 = vmax.f32 %v10708_v34, 0.0  ;;  %v4023_v62 = vmax.f32 %v10716_v31, 0.0  ;;  %v11513_v55 = vld [vmem:[#allocation11 + $0x120] ss:$8 sps:$4 sm:$0xff]   ;;  %v11518_v56 = vld [vmem:[#allocation11 + $0x134] ss:$8 sps:$4 sm:$0xff]  }
 0x46f   : > { %v4024_v51 = vmax.f32 %v10709_v25, 0.0  ;;  %v4026_v53 = vmax.f32 %v10717_v4, 0.0  ;;  %4487 = vmatprep.subr.bf16.mxu0 %v11512_v33  ;;  %v11545_v35 = vld [vmem:[#allocation11 + $0x1c4] ss:$8 sps:$4 sm:$0xff]   ;;  %v11543_v16 = vld [vmem:[#allocation11 + $0x1c0] ss:$8 sps:$4 sm:$0xff]  }
 0x470   : > { %v4025_v0 = vmax.f32 %v10710_v44, 0.0  ;;  %v4027_v1 = vmax.f32 %v10718_v45, 0.0  ;;  %v11546_v27 = vld [vmem:[#allocation11 + $0x1d0] ss:$8 sps:$4 sm:$0xff]   ;;  %v11551_v5 = vld [vmem:[#allocation11 + $0x1e4] ss:$8 sps:$4 sm:$0xff]  }
 0x471   : > { %v4032_v2 = vpack.c.bf16 %v4024_v51, %v4020_v49  ;;  %v13322_v48 = vpack.c.bf16 %v4026_v53, %v4022_v50  ;;  %v11549_v28 = vld [vmem:[#allocation11 + $0x1e0] ss:$8 sps:$4 sm:$0xff]   ;;  %v11554_v8 = vld [vmem:[#allocation11 + $0x1f4] ss:$8 sps:$4 sm:$0xff]   ;;  %v11552_v29 = vld [vmem:[#allocation11 + $0x1f0] ss:$8 sps:$4 sm:$0xff]  }
 0x472   : > { %v4033_v54 = vpack.c.bf16 %v4025_v0, %v4021_v60  ;;  %v4035_v3 = vpack.c.bf16 %v4027_v1, %v4023_v62  ;;  %4488 = vmatpush1.bf16.msra.mxu0 %v11510_v46  ;;  %v11563_v30 = vld [vmem:[#allocation13 + $0x44] ss:$16 sps:$4 sm:$0xff]   ;;  %v11561_v32 = vld [vmem:[#allocation13 + $0x40] ss:$16 sps:$4 sm:$0xff]   ;;  %v12591_v44 = vmov 0   ;;  %v4917_v46 = vld [vmem:[#allocation14 + $0x8] sm:$0xff] }
 0x473   : > { %4489 = vmatprep.subr.bf16.mxu0 %v11515_v59  ;;  %4790 = vmatprep.subr.bf16.mxu1 %v11563_v30  ;;  %v11566_v33 = vld [vmem:[#allocation13 + $0x64] ss:$16 sps:$4 sm:$0xff]   ;;  %v11564_v34 = vld [vmem:[#allocation13 + $0x60] ss:$16 sps:$4 sm:$0xff]   ;;  %v11581_v45 = vld [vmem:[#allocation13 + $0xc] ss:$16 sps:$4 sm:$0xff]  }
 0x474   : > { %4474 = vmatprep.mubr.bf16.mxu0 %v4033_v54  ;;  %4791 = vmatpush1.bf16.msra.mxu1 %v11561_v32  ;;  %v11569_v31 = vld [vmem:[#allocation13 + $0x84] ss:$16 sps:$4 sm:$0xff]   ;;  %v11567_v36 = vld [vmem:[#allocation13 + $0x80] ss:$16 sps:$4 sm:$0xff]   ;;  %v4921_v49 = vld [vmem:[#allocation14 + $0x28] sm:$0xff] }
 0x475   : > { %4475 = vmatmul.mubr.bf16.gmra.mrb[28].mxu0 %v4032_v2  ;;  %4792 = vmatprep.subr.bf16.mxu1 %v11566_v33  ;;  %v11572_v38 = vld [vmem:[#allocation13 + $0xa4] ss:$16 sps:$4 sm:$0xff]   ;;  %v11570_v25 = vld [vmem:[#allocation13 + $0xa0] ss:$16 sps:$4 sm:$0xff]   ;;  %v10121_v50 = vcombine.low %v4917_v46, %v4921_v49  ;;  %v10122_v51 = vcombine.high %v4917_v46, %v4921_v49  ;;  %v4925_v53 = vld [vmem:[#allocation14 + $0x48] sm:$0xff] }
 0x476   : > { %4490 = vmatpush1.bf16.msra.mxu0 %v11513_v55  ;;  %4517 = vmatprep.mubr.bf16.mxu0 %v4031_v20  ;;  %v11548_v20 = vld [vmem:[#allocation11 + $0x1d4] ss:$8 sps:$4 sm:$0xff]   ;;  %v11573_v4 = vld [vmem:[#allocation13 + $0xc0] ss:$16 sps:$4 sm:$0xff]   ;;  %v4929_v59 = vld [vmem:[#allocation14 + $0x68] sm:$0xff] }
 0x477   : > { %4491 = vmatprep.subr.bf16.mxu0 %v11518_v56  ;;  %v11578_v42 = vld [vmem:[#allocation13 + $0xe4] ss:$16 sps:$4 sm:$0xff]   ;;  %v11576_v43 = vld [vmem:[#allocation13 + $0xe0] ss:$16 sps:$4 sm:$0xff]   ;;  %4818 = vmatprep.mubr.bf16.mxu1 %v12591_v44  ;;  %v10130_v60 = vcombine.high %v4925_v53, %v4929_v59  ;;  %v4933_v62 = vld [vmem:[#allocation14 + $0x88] sm:$0xff]  ;;  %v10129_v1 = vcombine.low %v4925_v53, %v4929_v59 }
 0x478   : > { %4793 = vmatpush1.bf16.msra.mxu1 %v11564_v34  ;;  %v4937_v0 = vld [vmem:[#allocation14 + $0xa8] sm:$0xff] }
 0x479   : > { %4794 = vmatprep.subr.bf16.mxu1 %v11569_v31  ;;  %v10138_v2 = vcombine.high %v4933_v62, %v4937_v0  ;;  %v4945_v54 = vld [vmem:[#allocation14 + $0xe8] sm:$0xff] }
 0x47a   : > { %4492 = vmatpush1.bf16.msra.mxu0 %v11516_v58  ;;  %v4949_v56 = vld [vmem:[#allocation14 + $0x108] sm:$0xff] }
 0x47b   : > { %4493 = vmatprep.subr.bf16.mxu0 %v11521_v6  ;;  %v4953_v58 = vld [vmem:[#allocation14 + $0x128] sm:$0xff] }
 0x47c   : > { %4795 = vmatpush1.bf16.msra.mxu1 %v11567_v36  ;;  %v5005_v33 = vld [vmem:[#allocation14 + $0x2c8] sm:$0xff] }
 0x47d   : > { %4796 = vmatprep.subr.bf16.mxu1 %v11572_v38  ;;  %v5009_v34 = vld [vmem:[#allocation14 + $0x2e8] sm:$0xff] }
 0x47e   : > { %4494 = vmatpush1.bf16.msra.mxu0 %v11519_v63  ;;  %v10154_v63 = vcombine.high %v4949_v56, %v4953_v58  ;;  %v10210_v36 = vcombine.high %v5005_v33, %v5009_v34  ;;  %v5013_v38 = vld [vmem:[#allocation14 + $0x308] sm:$0xff] }
 0x47f   : > { %4495 = vmatprep.subr.bf16.mxu0 %v11524_v7  ;;  %v4957_v7 = vld [vmem:[#allocation14 + $0x148] sm:$0xff] }
 0x480   : > { %4797 = vmatpush1.bf16.msra.mxu1 %v11570_v25  ;;  %v5017_v25 = vld [vmem:[#allocation14 + $0x328] sm:$0xff] }
 0x482   : > { %4496 = vmatpush1.bf16.msra.mxu0 %v11522_v9  ;;  %v4961_v9 = vld [vmem:[#allocation14 + $0x168] sm:$0xff] }
 0x483   : > { %4497 = vmatprep.subr.bf16.mxu0 %v11527_v10  ;;  %v10153_v10 = vcombine.low %v4949_v56, %v4953_v58 }
 0x486   : > { %4498 = vmatpush1.bf16.msra.mxu0 %v11525_v11  ;;  %v10162_v11 = vcombine.high %v4957_v7, %v4961_v9 }
 0x487   : > { %4499 = vmatprep.subr.bf16.mxu0 %v11530_v57  ;;  %v4965_v57 = vld [vmem:[#allocation14 + $0x188] sm:$0xff] }
 0x48a   : > { %4500 = vmatpush1.bf16.msra.mxu0 %v11528_v22  ;;  %v4969_v22 = vld [vmem:[#allocation14 + $0x1a8] sm:$0xff] }
 0x48b   : > { %4501 = vmatprep.subr.bf16.mxu0 %v11533_v12  ;;  %v10161_v12 = vcombine.low %v4957_v7, %v4961_v9 }
 0x48e   : > { %4502 = vmatpush1.bf16.msra.mxu0 %v11531_v24  ;;  %v10170_v24 = vcombine.high %v4965_v57, %v4969_v22 }
 0x48f   : > { %4503 = vmatprep.subr.bf16.mxu0 %v11536_v39  ;;  %v4973_v39 = vld [vmem:[#allocation14 + $0x1c8] sm:$0xff] }
 0x492   : > { %4504 = vmatpush1.bf16.msra.mxu0 %v11534_v13  ;;  %v4977_v13 = vld [vmem:[#allocation14 + $0x1e8] sm:$0xff] }
 0x493   : > { %4505 = vmatprep.subr.bf16.mxu0 %v11539_v14  ;;  %v10169_v14 = vcombine.low %v4965_v57, %v4969_v22 }
 0x496   : > { %4506 = vmatpush1.bf16.msra.mxu0 %v11537_v41  ;;  %v10178_v41 = vcombine.high %v4973_v39, %v4977_v13 }
 0x497   : > { %4507 = vmatprep.subr.bf16.mxu0 %v11542_v19  ;;  %v4981_v19 = vld [vmem:[#allocation14 + $0x208] sm:$0xff] }
 0x49a   : > { %4508 = vmatpush1.bf16.msra.mxu0 %v11540_v61  ;;  %v4985_v61 = vld [vmem:[#allocation14 + $0x228] sm:$0xff] }
 0x49b   : > { %4509 = vmatprep.subr.bf16.mxu0 %v11545_v35  ;;  %v10177_v35 = vcombine.low %v4973_v39, %v4977_v13  ;;  %v4546_v13 = vld [vmem:[%s13137_s27] sm:$0xff] }
 0x49e   : > { %4510 = vmatpush1.bf16.msra.mxu0 %v11543_v16  ;;  %v10186_v16 = vcombine.high %v4981_v19, %v4985_v61 }
 0x49f   : > { %4511 = vmatprep.subr.bf16.mxu0 %v11548_v20  ;;  %v4989_v20 = vld [vmem:[#allocation14 + $0x248] sm:$0xff] }
 0x4a2   : > { %4512 = vmatpush1.bf16.msra.mxu0 %v11546_v27  ;;  %v4993_v27 = vld [vmem:[#allocation14 + $0x268] sm:$0xff] }
 0x4a3   : > { %4513 = vmatprep.subr.bf16.mxu0 %v11551_v5  ;;  %v10185_v5 = vcombine.low %v4981_v19, %v4985_v61  ;;  %v10193_v30 = vcombine.low %v4989_v20, %v4993_v27  ;;  %v4547_v19 = vld [vmem:[%s13137_s27 + $0x8] sm:$0xff] }
 0x4a6   : > { %4514 = vmatpush1.bf16.msra.mxu0 %v11549_v28  ;;  %v10194_v28 = vcombine.high %v4989_v20, %v4993_v27 }
 0x4a7   : > { %4515 = vmatprep.subr.bf16.mxu0 %v11554_v8  ;;  %v4997_v8 = vld [vmem:[#allocation14 + $0x288] sm:$0xff] }
 0x4aa   : > { %4516 = vmatpush1.bf16.msra.mxu0 %v11552_v29  ;;  %v5001_v29 = vld [vmem:[#allocation14 + $0x2a8] sm:$0xff] }
 0x4ab   : > { %6600 = vmatprep.subr.bf16.mxu0 %v10122_v51  ;;  %v10202_v32 = vcombine.high %v4997_v8, %v5001_v29  ;;  %v10201_v31 = vcombine.low %v4997_v8, %v5001_v29  ;;  %v11584_v29 = vld [vmem:[#allocation13 + $0x2c] ss:$16 sps:$4 sm:$0xff]  }
 0x4ad   : > { %4518 = vmatmul.mubr.bf16.vlgmr.msra.gmra.mrb[24].mxu0 %v13320_v15  ;;  %v11575_v15 = vld [vmem:[#allocation13 + $0xc4] ss:$16 sps:$4 sm:$0xff]  }
 0x4ae   : > { %4527 = vmatprep.mubr.bf16.mxu0 %v4035_v3  ;;  %4798 = vmatprep.subr.bf16.mxu1 %v11575_v15  ;;  %v10137_v3 = vcombine.low %v4933_v62, %v4937_v0  ;;  %v10209_v15 = vcombine.low %v5005_v33, %v5009_v34 }
 0x4af   : > { %4799 = vmatpush1.bf16.msra.mxu1 %v11573_v4  ;;  %6601 = vmatpush1.bf16.msra.mxu0 %v10121_v50  ;;  %v10218_v4 = vcombine.high %v5013_v38, %v5017_v25  ;;  %v4100_v50 = vld [vmem:[%s13806_s5] sm:$0x3]  ;;  %s13811_s5 = sld [smem:[#allocation56_spill]] }
 0x4b0   : > { %4800 = vmatprep.subr.bf16.mxu1 %v11578_v42  ;;  %6602 = vmatprep.subr.bf16.mxu0 %v10130_v60  ;;  %v5021_v42 = vld [vmem:[#allocation14 + $0x348] sm:$0xff]  ;;  %v4105_v51 = vrot.slane %v4100_v50, %v13207_v23  ;;  %v4109_v53 = vrot.slane %v4100_v50, %v13210_v26 }
 0x4b1   : > { %v11596_v50 = vld [vmem:[#allocation13 + $0xac] ss:$16 sps:$4 sm:$0xff]  }
 0x4b3   : > { %4801 = vmatpush1.bf16.msra.mxu1 %v11576_v43  ;;  %6603 = vmatpush1.bf16.msra.mxu0 %v10129_v1  ;;  %v5025_v43 = vld [vmem:[#allocation14 + $0x368] sm:$0xff] }
 0x4b4   : > { %4839 = vmatprep.subr.bf16.mxu1 %v11581_v45  ;;  %6604 = vmatprep.subr.bf16.mxu0 %v10138_v2  ;;  %v10217_v45 = vcombine.low %v5013_v38, %v5017_v25  ;;  %v10226_v46 = vcombine.high %v5021_v42, %v5025_v43  ;;  %v10225_v49 = vcombine.low %v5021_v42, %v5025_v43  ;;  %v11590_v43 = vld [vmem:[#allocation13 + $0x6c] ss:$16 sps:$4 sm:$0xff]  }
 0x4b5   : > { %4528 = vmatmul.mubr.bf16.gmra.mrb[28].mxu0 %v13322_v48  ;;  %v4941_v48 = vld [vmem:[#allocation14 + $0xc8] sm:$0xff] }
 0x4b6   : > { %v10146_v55 = vcombine.high %v4941_v48, %v4945_v54  ;;  %v10145_v6 = vcombine.low %v4941_v48, %v4945_v54 }
 0x4b7   : > { %6605 = vmatpush1.bf16.msra.mxu0 %v10137_v3 }
 0x4b8   : > { %6606 = vmatprep.subr.bf16.mxu0 %v10146_v55 }
 0x4bb   : > { %6607 = vmatpush1.bf16.msra.mxu0 %v10145_v6 }
 0x4bc   : > { %6608 = vmatprep.subr.bf16.mxu0 %v10154_v63 }
 0x4bf   : > { %6609 = vmatpush1.bf16.msra.mxu0 %v10153_v10 }
 0x4c0   : > { %6610 = vmatprep.subr.bf16.mxu0 %v10162_v11 }
 0x4c3   : > { %6611 = vmatpush1.bf16.msra.mxu0 %v10161_v12 }
 0x4c4   : > { %6612 = vmatprep.subr.bf16.mxu0 %v10170_v24 }
 0x4c7   : > { %6613 = vmatpush1.bf16.msra.mxu0 %v10169_v14 }
 0x4c8   : > { %6614 = vmatprep.subr.bf16.mxu0 %v10178_v41 }
 0x4cb   : > { %6615 = vmatpush1.bf16.msra.mxu0 %v10177_v35 }
 0x4cc   : > { %6616 = vmatprep.subr.bf16.mxu0 %v10186_v16 }
 0x4cf   : > { %6617 = vmatpush1.bf16.msra.mxu0 %v10185_v5  ;;  %v11579_v5 = vld [vmem:[#allocation13 + $0x8] ss:$16 sps:$4 sm:$0xff]  }
 0x4d0   : > { %6618 = vmatprep.subr.bf16.mxu0 %v10194_v28  ;;  %v4548_v28 = vld [vmem:[%s13137_s27 + $0x10] sm:$0xff] }
 0x4d3   : > { %6619 = vmatpush1.bf16.msra.mxu0 %v10193_v30 }
 0x4d4   : > { %6620 = vmatprep.subr.bf16.mxu0 %v10202_v32  ;;  %v4549_v32 = vld [vmem:[%s13137_s27 + $0x18] sm:$0xff]  ;;  %s13809_s27 = sld [smem:[#allocation52_spill]] }
 0x4d7   : > { %6621 = vmatpush1.bf16.msra.mxu0 %v10201_v31  ;;  %v11582_v31 = vld [vmem:[#allocation13 + $0x28] ss:$16 sps:$4 sm:$0xff]  }
 0x4d8   : > { %6622 = vmatprep.subr.bf16.mxu0 %v10210_v36  ;;  %v11587_v36 = vld [vmem:[#allocation13 + $0x4c] ss:$16 sps:$4 sm:$0xff]  }
 0x4db   : > { %6623 = vmatpush1.bf16.msra.mxu0 %v10209_v15 }
 0x4dc   : > { %6624 = vmatprep.subr.bf16.mxu0 %v10218_v4  ;;  %v11585_v4 = vld [vmem:[#allocation13 + $0x48] ss:$16 sps:$4 sm:$0xff]  }
 0x4df   : > { %6625 = vmatpush1.bf16.msra.mxu0 %v10217_v45  ;;  %v11588_v45 = vld [vmem:[#allocation13 + $0x68] ss:$16 sps:$4 sm:$0xff]  }
 0x4e0   : > { %6626 = vmatprep.subr.bf16.mxu0 %v10226_v46  ;;  %v11593_v46 = vld [vmem:[#allocation13 + $0x8c] ss:$16 sps:$4 sm:$0xff]  }
 0x4e3   : > { %6627 = vmatpush1.bf16.msra.mxu0 %v10225_v49  ;;  %v11591_v49 = vld [vmem:[#allocation13 + $0x88] ss:$16 sps:$4 sm:$0xff]  }
 0x580   : > { %v4519_v59 = vpop.f32.mrb[24].mxu0 }
 0x581   : > { %v10719_v60 = vadd.f32 %v4519_v59, %v4105_v51  ;;  %v4521_v62 = vpop.f32.mrb[25].mxu0  ;;  %v11597_v59 = vld [vmem:[#allocation13 + $0xc8] ss:$16 sps:$4 sm:$0xff]  }
 0x582   : > { %v10720_v0 = vadd.f32 %v4521_v62, %v4109_v53  ;;  %v4523_v1 = vpop.f32.mrb[26].mxu0  ;;  %v4916_v62 = vld [vmem:[#allocation14] sm:$0xff] }
 0x583   : > { %4538 = vst [vmem:[%s13333_s1] sm:$0xff] %v10719_v60  ;;  %v10721_v2 = vadd.f32 %v4523_v1, %v4105_v51  ;;  %v4525_v48 = vpop.f32.mrb[27].mxu0  ;;  %v11600_v1 = vld [vmem:[#allocation13 + $0xe8] ss:$16 sps:$4 sm:$0xff]  }
 0x584   : > { %4542 = vst [vmem:[%s13337_s22] sm:$0xff] %v10720_v0  ;;  %v4550_v54 = vmul.f32 0.5, %v10720_v0  ;;  %v10722_v3 = vadd.f32 %v4525_v48, %v4109_v53  ;;  %v4920_v0 = vld [vmem:[#allocation14 + $0x20] sm:$0xff] }
 0x585   : > { %4539 = vst [vmem:[%s13333_s1 + $0x8] sm:$0xff] %v10721_v2  ;;  %v4924_v48 = vld [vmem:[#allocation14 + $0x40] sm:$0xff] }
 0x586   : > { %v4554_v55 = vmul.f32 1.442695, %v4550_v54  ;;  %4543 = vst [vmem:[%s13337_s22 + $0x8] sm:$0xff] %v10722_v3  ;;  %v4551_v56 = vmul.f32 0.5, %v10722_v3  ;;  %v4928_v54 = vld [vmem:[#allocation14 + $0x60] sm:$0xff]  ;;  %v10119_v3 = vcombine.low %v4916_v62, %v4920_v0 }
 0x588   : > { %12003 = vpow2.f32 %v4554_v55  ;;  %v4556_v58 = vmul.f32 1.442695, %v4551_v56  ;;  %v4529_v6 = vpop.f32.mrb[28].mxu0  ;;  %v10128_v55 = vcombine.high %v4924_v48, %v4928_v54  ;;  %v4932_v56 = vld [vmem:[#allocation14 + $0x80] sm:$0xff] }
 0x589   : > { %v10723_v63 = vadd.f32 %v4529_v6, %v4105_v51  ;;  %v4531_v7 = vpop.f32.mrb[29].mxu0  ;;  %v10127_v6 = vcombine.low %v4924_v48, %v4928_v54  ;;  %v5029_v48 = vld [vmem:[#allocation14 + $0x388] sm:$0xff] }
 0x58a   : > { %12005 = vpow2.f32 %v4556_v58  ;;  %v10724_v9 = vadd.f32 %v4531_v7, %v4109_v53  ;;  %v4533_v10 = vpop.f32.mrb[30].mxu0  ;;  %v4936_v58 = vld [vmem:[#allocation14 + $0xa0] sm:$0xff] }
 0x58b   : > { %4540 = vst [vmem:[%s13333_s1 + $0x10] sm:$0xff] %v10723_v63  ;;  %v10725_v11 = vadd.f32 %v4533_v10, %v4105_v51  ;;  %v4535_v57 = vpop.f32.mrb[31].mxu0  ;;  %v11594_v51 = vld [vmem:[#allocation13 + $0xa8] ss:$16 sps:$4 sm:$0xff]   ;;  %v4940_v7 = vld [vmem:[#allocation14 + $0xc0] sm:$0xff]  ;;  %v10135_v10 = vcombine.low %v4932_v56, %v4936_v58 }
 0x58c   : > { %4544 = vst [vmem:[%s13337_s22 + $0x10] sm:$0xff] %v10724_v9  ;;  %v4552_v22 = vmul.f32 0.5, %v10724_v9  ;;  %v10726_v12 = vadd.f32 %v4535_v57, %v4109_v53  ;;  %v11599_v53 = vld [vmem:[#allocation13 + $0xcc] ss:$16 sps:$4 sm:$0xff]   ;;  %v4944_v9 = vld [vmem:[#allocation14 + $0xe0] sm:$0xff] }
 0x58d   : > { %4541 = vst [vmem:[%s13333_s1 + $0x18] sm:$0xff] %v10725_v11  ;;  %v4948_v57 = vld [vmem:[#allocation14 + $0x100] sm:$0xff]  ;;  %s13813_s1 = sld [smem:[#allocation61_spill]] }
 0x58e   : > { %v4558_v24 = vmul.f32 1.442695, %v4552_v22  ;;  %4545 = vst [vmem:[%s13337_s22 + $0x18] sm:$0xff] %v10726_v12  ;;  %v4553_v39 = vmul.f32 0.5, %v10726_v12  ;;  %v4952_v22 = vld [vmem:[#allocation14 + $0x120] sm:$0xff]  ;;  %v10143_v12 = vcombine.low %v4940_v7, %v4944_v9 }
 0x590   : > { %12007 = vpow2.f32 %v4558_v24  ;;  %v4560_v14 = vmul.f32 1.442695, %v4553_v39  ;;  %v10152_v24 = vcombine.high %v4948_v57, %v4952_v22  ;;  %v4956_v39 = vld [vmem:[#allocation14 + $0x140] sm:$0xff] }
 0x592   : > { %v12004_v41 = vpop.eup %12003  ;;  %12009 = vpow2.f32 %v4560_v14 }
 0x593   : > { %v4562_v61 = vmul.f32 %v12004_v41, %v4546_v13  ;;  %v4960_v13 = vld [vmem:[#allocation14 + $0x160] sm:$0xff] }
 0x594   : > { %v12006_v35 = vpop.eup %12005  ;;  %v10160_v14 = vcombine.high %v4956_v39, %v4960_v13  ;;  %v4964_v41 = vld [vmem:[#allocation14 + $0x180] sm:$0xff] }
 0x595   : > { %v4563_v16 = vmul.f32 %v12006_v35, %v4547_v19  ;;  %v4566_v20 = vadd.f32 %v10719_v60, %v4562_v61  ;;  %v11602_v60 = vld [vmem:[#allocation13 + $0xec] ss:$16 sps:$4 sm:$0xff]   ;;  %v4968_v19 = vld [vmem:[#allocation14 + $0x1a0] sm:$0xff]  ;;  %v10159_v61 = vcombine.low %v4956_v39, %v4960_v13 }
 0x596   : > { %v10168_v35 = vcombine.high %v4964_v41, %v4968_v19  ;;  %v5045_v39 = vld [vmem:[#allocation14 + $0x408] sm:$0xff] }
 0x597   : > { %v4567_v27 = vadd.f32 %v10721_v2, %v4563_v16  ;;  %v10120_v2 = vcombine.high %v4916_v62, %v4920_v0  ;;  %v4972_v16 = vld [vmem:[#allocation14 + $0x1c0] sm:$0xff] }
 0x599   : > { %v4570_v8 = vpack.c.bf16 %v4567_v27, %v4566_v20  ;;  %v4976_v20 = vld [vmem:[#allocation14 + $0x1e0] sm:$0xff]  ;;  %v10167_v27 = vcombine.low %v4964_v41, %v4968_v19 }
 0x59a   : > { %v12008_v30 = vpop.eup %12007 }
 0x59b   : > { %4819 = vmatmul.mubr.bf16.vlgmr.msra.gmra.mrb[24].mxu1 %v4570_v8  ;;  %v4564_v33 = vmul.f32 %v12008_v30, %v4548_v28  ;;  %v4980_v28 = vld [vmem:[#allocation14 + $0x200] sm:$0xff] }
 0x59c   : > { %v12010_v34 = vpop.eup %12009  ;;  %4840 = vmatpush1.bf16.msra.mxu1 %v11579_v5  ;;  %4828 = vmatprep.mubr.bf16.mxu1 %v12591_v44  ;;  %v10176_v5 = vcombine.high %v4972_v16, %v4976_v20 }
 0x59d   : > { %4841 = vmatprep.subr.bf16.mxu1 %v11584_v29  ;;  %v4565_v38 = vmul.f32 %v12010_v34, %v4549_v32  ;;  %v4568_v25 = vadd.f32 %v10723_v63, %v4564_v33  ;;  %v10136_v63 = vcombine.high %v4932_v56, %v4936_v58  ;;  %v10175_v29 = vcombine.low %v4972_v16, %v4976_v20  ;;  %v4988_v32 = vld [vmem:[#allocation14 + $0x240] sm:$0xff] }
 0x59e   : > { %v4992_v33 = vld [vmem:[#allocation14 + $0x260] sm:$0xff] }
 0x59f   : > { %v4569_v15 = vadd.f32 %v10725_v11, %v4565_v38  ;;  %v10144_v11 = vcombine.high %v4940_v7, %v4944_v9  ;;  %v5000_v38 = vld [vmem:[#allocation14 + $0x2a0] sm:$0xff]  ;;  %v5037_v7 = vld [vmem:[#allocation14 + $0x3c8] sm:$0xff] }
 0x5a0   : > { %4842 = vmatpush1.bf16.msra.mxu1 %v11582_v31  ;;  %v10192_v31 = vcombine.high %v4988_v32, %v4992_v33 }
 0x5a1   : > { %4843 = vmatprep.subr.bf16.mxu1 %v11587_v36  ;;  %v4571_v42 = vpack.c.bf16 %v4569_v15, %v4568_v25  ;;  %v4996_v36 = vld [vmem:[#allocation14 + $0x280] sm:$0xff]  ;;  %v10191_v25 = vcombine.low %v4988_v32, %v4992_v33 }
 0x5a2   : > { %v10200_v15 = vcombine.high %v4996_v36, %v5000_v38 }
 0x5a3   : > { %4829 = vmatmul.mubr.bf16.gmra.mrb[28].mxu1 %v4571_v42 }
 0x5a4   : > { %4844 = vmatpush1.bf16.msra.mxu1 %v11585_v4  ;;  %4871 = vmatprep.mubr.bf16.mxu1 %v12591_v44  ;;  %v5004_v4 = vld [vmem:[#allocation14 + $0x2c0] sm:$0xff] }
 0x5a5   : > { %4845 = vmatprep.subr.bf16.mxu1 %v11590_v43  ;;  %v10199_v43 = vcombine.low %v4996_v36, %v5000_v38 }
 0x5a8   : > { %4846 = vmatpush1.bf16.msra.mxu1 %v11588_v45 }
 0x5a9   : > { %4847 = vmatprep.subr.bf16.mxu1 %v11593_v46  ;;  %v5012_v46 = vld [vmem:[#allocation14 + $0x300] sm:$0xff] }
 0x5ac   : > { %4848 = vmatpush1.bf16.msra.mxu1 %v11591_v49  ;;  %v5016_v49 = vld [vmem:[#allocation14 + $0x320] sm:$0xff] }
 0x5ad   : > { %4849 = vmatprep.subr.bf16.mxu1 %v11596_v50 }
 0x5b0   : > { %4850 = vmatpush1.bf16.msra.mxu1 %v11594_v51  ;;  %v10216_v51 = vcombine.high %v5012_v46, %v5016_v49 }
 0x5b1   : > { %4851 = vmatprep.subr.bf16.mxu1 %v11599_v53  ;;  %v5020_v53 = vld [vmem:[#allocation14 + $0x340] sm:$0xff] }
 0x5b4   : > { %4852 = vmatpush1.bf16.msra.mxu1 %v11597_v59  ;;  %v5024_v59 = vld [vmem:[#allocation14 + $0x360] sm:$0xff] }
 0x5b5   : > { %4853 = vmatprep.subr.bf16.mxu1 %v11602_v60  ;;  %v10215_v60 = vcombine.low %v5012_v46, %v5016_v49  ;;  %v10224_v62 = vcombine.high %v5020_v53, %v5024_v59  ;;  %v10223_v0 = vcombine.low %v5020_v53, %v5024_v59  ;;  %v5060_v53 = vld [vmem:[#allocation14 + $0x480] sm:$0xff] }
 0x5b8   : > { %4854 = vmatpush1.bf16.msra.mxu1 %v11600_v1  ;;  %v5028_v1 = vld [vmem:[#allocation14 + $0x380] sm:$0xff] }
 0x5b9   : > { %6494 = vmatprep.subr.bf16.mxu1 %v10120_v2  ;;  %v5032_v2 = vld [vmem:[#allocation14 + $0x3a0] sm:$0xff] }
 0x5ba   : > { %v10232_v54 = vcombine.high %v5028_v1, %v5032_v2 }
 0x5bb   : > { %4872 = vmatmul.mubr.bf16.vlgmr.msra.gmra.mrb[32].mxu1 %v4570_v8  ;;  %v4984_v8 = vld [vmem:[#allocation14 + $0x220] sm:$0xff] }
 0x5bc   : > { %4881 = vmatprep.mubr.bf16.mxu1 %v12591_v44  ;;  %6495 = vmatpush1.bf16.msra.mxu1 %v10119_v3  ;;  %v10151_v44 = vcombine.low %v4948_v57, %v4952_v22  ;;  %v10184_v30 = vcombine.high %v4980_v28, %v4984_v8  ;;  %v10183_v34 = vcombine.low %v4980_v28, %v4984_v8  ;;  %v5033_v3 = vld [vmem:[#allocation14 + $0x3a8] sm:$0xff] }
 0x5bd   : > { %6496 = vmatprep.subr.bf16.mxu1 %v10128_v55  ;;  %v10231_v55 = vcombine.low %v5028_v1, %v5032_v2  ;;  %v10233_v56 = vcombine.low %v5029_v48, %v5033_v3  ;;  %v10234_v58 = vcombine.high %v5029_v48, %v5033_v3  ;;  %v5065_v1 = vld [vmem:[#allocation14 + $0x4a8] sm:$0xff] }
 0x5bf   : > { %6628 = vmatprep.subr.bf16.mxu0 %v10234_v58 }
 0x5c0   : > { %6497 = vmatpush1.bf16.msra.mxu1 %v10127_v6  ;;  %v5036_v6 = vld [vmem:[#allocation14 + $0x3c0] sm:$0xff]  ;;  %6629 = vmatpush1.bf16.msra.mxu0 %v10233_v56 }
 0x5c1   : > { %6498 = vmatprep.subr.bf16.mxu1 %v10136_v63  ;;  %v5040_v63 = vld [vmem:[#allocation14 + $0x3e0] sm:$0xff] }
 0x5c2   : > { %v10240_v9 = vcombine.high %v5036_v6, %v5040_v63 }
 0x5c3   : > { %4882 = vmatmul.mubr.bf16.gmra.mrb[36].mxu1 %v4571_v42  ;;  %v5008_v42 = vld [vmem:[#allocation14 + $0x2e0] sm:$0xff] }
 0x5c4   : > { %6499 = vmatpush1.bf16.msra.mxu1 %v10135_v10  ;;  %v10208_v45 = vcombine.high %v5004_v4, %v5008_v42  ;;  %v10207_v50 = vcombine.low %v5004_v4, %v5008_v42  ;;  %v5041_v10 = vld [vmem:[#allocation14 + $0x3e8] sm:$0xff] }
 0x5c5   : > { %6500 = vmatprep.subr.bf16.mxu1 %v10144_v11  ;;  %v10239_v11 = vcombine.low %v5036_v6, %v5040_v63  ;;  %v10241_v57 = vcombine.low %v5037_v7, %v5041_v10  ;;  %v10242_v22 = vcombine.high %v5037_v7, %v5041_v10  ;;  %v5057_v4 = vld [vmem:[#allocation14 + $0x468] sm:$0xff]  ;;  %v5068_v7 = vld [vmem:[#allocation14 + $0x4c0] sm:$0xff] }
 0x5c7   : > { %6630 = vmatprep.subr.bf16.mxu0 %v10242_v22  ;;  %v5073_v22 = vld [vmem:[#allocation14 + $0x4e8] sm:$0xff] }
 0x5c8   : > { %6501 = vmatpush1.bf16.msra.mxu1 %v10143_v12  ;;  %v5044_v12 = vld [vmem:[#allocation14 + $0x400] sm:$0xff]  ;;  %6631 = vmatpush1.bf16.msra.mxu0 %v10241_v57  ;;  %v5069_v57 = vld [vmem:[#allocation14 + $0x4c8] sm:$0xff] }
 0x5c9   : > { %6502 = vmatprep.subr.bf16.mxu1 %v10152_v24  ;;  %v5048_v24 = vld [vmem:[#allocation14 + $0x420] sm:$0xff] }
 0x5ca   : > { %v10248_v13 = vcombine.high %v5044_v12, %v5048_v24 }
 0x5cc   : > { %6503 = vmatpush1.bf16.msra.mxu1 %v10151_v44  ;;  %v5049_v44 = vld [vmem:[#allocation14 + $0x428] sm:$0xff] }
 0x5cd   : > { %6504 = vmatprep.subr.bf16.mxu1 %v10160_v14  ;;  %v10247_v14 = vcombine.low %v5044_v12, %v5048_v24  ;;  %v10249_v41 = vcombine.low %v5045_v39, %v5049_v44  ;;  %v10250_v19 = vcombine.high %v5045_v39, %v5049_v44 }
 0x5cf   : > { %6653 = vmatprep.subr.bf16.mxu0 %v10250_v19  ;;  %v5080_v19 = vld [vmem:[#allocation14 + $0x520] sm:$0xff] }
 0x5d0   : > { %6505 = vmatpush1.bf16.msra.mxu1 %v10159_v61  ;;  %v13356_v61 = vld [vmem:[%s13807_s16] sm:$0xf]  ;;  %s13526_s16 = sshll.u32 %s12741_s26, 9 }
 0x5d1   : > { %6506 = vmatprep.subr.bf16.mxu1 %v10168_v35  ;;  %v4609_v35 = vrot.slane %v13356_v61, %v13207_v23  ;;  %v4613_v16 = vrot.slane %v13356_v61, %v13210_v26  ;;  %s13538_s22 = scalar_lea.hbm %s13813_s1, %s13526_s16 }
 0x5d4   : > { %6507 = vmatpush1.bf16.msra.mxu1 %v10167_v27 }
 0x5d5   : > { %6508 = vmatprep.subr.bf16.mxu1 %v10176_v5 }
 0x5d8   : > { %6509 = vmatpush1.bf16.msra.mxu1 %v10175_v29 }
 0x5d9   : > { %6510 = vmatprep.subr.bf16.mxu1 %v10184_v30 }
 0x5dc   : > { %6511 = vmatpush1.bf16.msra.mxu1 %v10183_v34 }
 0x5dd   : > { %6512 = vmatprep.subr.bf16.mxu1 %v10192_v31  ;;  %v5052_v31 = vld [vmem:[#allocation14 + $0x440] sm:$0xff] }
 0x5e0   : > { %6513 = vmatpush1.bf16.msra.mxu1 %v10191_v25  ;;  %v5056_v25 = vld [vmem:[#allocation14 + $0x460] sm:$0xff] }
 0x5e1   : > { %6514 = vmatprep.subr.bf16.mxu1 %v10200_v15  ;;  %v5053_v15 = vld [vmem:[#allocation14 + $0x448] sm:$0xff]  ;;  %v10255_v3 = vcombine.low %v5052_v31, %v5056_v25 }
 0x5e4   : > { %6515 = vmatpush1.bf16.msra.mxu1 %v10199_v43 }
 0x5e5   : > { %6516 = vmatprep.subr.bf16.mxu1 %v10208_v45 }
 0x5e8   : > { %6517 = vmatpush1.bf16.msra.mxu1 %v10207_v50  ;;  %v10256_v50 = vcombine.high %v5052_v31, %v5056_v25  ;;  %v5096_v25 = vld [vmem:[#allocation14 + $0x5a0] sm:$0xff] }
 0x5e9   : > { %6518 = vmatprep.subr.bf16.mxu1 %v10216_v51  ;;  %v10258_v51 = vcombine.high %v5053_v15, %v5057_v4 }
 0x5ec   : > { %6519 = vmatpush1.bf16.msra.mxu1 %v10215_v60 }
 0x5ed   : > { %6520 = vmatprep.subr.bf16.mxu1 %v10224_v62  ;;  %v5064_v62 = vld [vmem:[#allocation14 + $0x4a0] sm:$0xff] }
 0x5ee   : > { %v10264_v6 = vcombine.high %v5060_v53, %v5064_v62  ;;  %v10263_v39 = vcombine.low %v5060_v53, %v5064_v62  ;;  %v5100_v53 = vld [vmem:[#allocation14 + $0x5c0] sm:$0xff]  ;;  %v5101_v62 = vld [vmem:[#allocation14 + $0x5c8] sm:$0xff] }
 0x5f0   : > { %6521 = vmatpush1.bf16.msra.mxu1 %v10223_v0  ;;  %v5061_v0 = vld [vmem:[#allocation14 + $0x488] sm:$0xff] }
 0x5f1   : > { %6522 = vmatprep.subr.bf16.mxu1 %v10232_v54  ;;  %v10266_v63 = vcombine.high %v5061_v0, %v5065_v1 }
 0x5f4   : > { %6523 = vmatpush1.bf16.msra.mxu1 %v10231_v55  ;;  %v10257_v55 = vcombine.low %v5053_v15, %v5057_v4  ;;  %v5093_v15 = vld [vmem:[#allocation14 + $0x588] sm:$0xff] }
 0x5f5   : > { %6524 = vmatprep.subr.bf16.mxu1 %v10240_v9  ;;  %v5097_v4 = vld [vmem:[#allocation14 + $0x5a8] sm:$0xff] }
 0x5f8   : > { %6525 = vmatpush1.bf16.msra.mxu1 %v10239_v11  ;;  %v5072_v11 = vld [vmem:[#allocation14 + $0x4e0] sm:$0xff] }
 0x5f9   : > { %6547 = vmatprep.subr.bf16.mxu1 %v10248_v13  ;;  %v10265_v13 = vcombine.low %v5061_v0, %v5065_v1  ;;  %v10272_v44 = vcombine.high %v5068_v7, %v5072_v11  ;;  %v5105_v0 = vld [vmem:[#allocation14 + $0x5e8] sm:$0xff] }
 0x66e   : > { %v4820_v20 = vpop.f32.mrb[24].mxu1 }
 0x66f   : > { %v4821_v27 = vadd.f32 %v4820_v20, %v4609_v35  ;;  %v4822_v5 = vpop.f32.mrb[25].mxu1  ;;  %v10271_v20 = vcombine.low %v5068_v7, %v5072_v11  ;;  %v5109_v7 = vld [vmem:[#allocation14 + $0x608] sm:$0xff] }
 0x670   : > { %v4823_v28 = vadd.f32 %v4822_v5, %v4613_v16  ;;  %v4824_v8 = vpop.f32.mrb[26].mxu1 }
 0x671   : > { %v4825_v29 = vadd.f32 %v4824_v8, %v4609_v35  ;;  %v4826_v30 = vpop.f32.mrb[27].mxu1  ;;  %v4892_v33 = vmax.f32 %v4821_v27, 0.0  ;;  %v10273_v27 = vcombine.low %v5069_v57, %v5073_v22  ;;  %v5084_v8 = vld [vmem:[#allocation14 + $0x540] sm:$0xff] }
 0x672   : > { %v4827_v32 = vadd.f32 %v4826_v30, %v4613_v16  ;;  %v4893_v36 = vmax.f32 %v4823_v28, 0.0  ;;  %v5085_v30 = vld [vmem:[#allocation14 + $0x548] sm:$0xff] }
 0x673   : > { %v4896_v34 = vmax.f32 %v4825_v29, 0.0  ;;  %v5088_v29 = vld [vmem:[#allocation14 + $0x560] sm:$0xff] }
 0x674   : > { %v4897_v38 = vmax.f32 %v4827_v32, 0.0  ;;  %v5089_v32 = vld [vmem:[#allocation14 + $0x568] sm:$0xff]  ;;  %v10288_v31 = vcombine.high %v5084_v8, %v5088_v29 }
 0x675   : > { %v13362_v42 = vpack.c.bf16 %v4896_v34, %v4892_v33 }
 0x676   : > { %v13364_v43 = vpack.c.bf16 %v4897_v38, %v4893_v36  ;;  %v4830_v45 = vpop.f32.mrb[28].mxu1  ;;  %v10290_v36 = vcombine.high %v5085_v30, %v5089_v32  ;;  %v5092_v38 = vld [vmem:[#allocation14 + $0x580] sm:$0xff] }
 0x677   : > { %v4831_v46 = vadd.f32 %v4830_v45, %v4609_v35  ;;  %v4832_v49 = vpop.f32.mrb[29].mxu1  ;;  %v10287_v45 = vcombine.low %v5084_v8, %v5088_v29 }
 0x678   : > { %v4833_v59 = vadd.f32 %v4832_v49, %v4613_v16  ;;  %v4834_v60 = vpop.f32.mrb[30].mxu1  ;;  %6526 = vmatprep.mubr.bf16.mxu1 %v13364_v43  ;;  %6632 = vmatprep.mubr.bf16.mxu0 %v13364_v43  ;;  %v13380_v49 = vrot.slane %v13356_v61, %v13217_v37 }
 0x679   : > { %v4835_v2 = vadd.f32 %v4834_v60, %v4609_v35  ;;  %v4836_v48 = vpop.f32.mrb[31].mxu1  ;;  %6527 = vmatmul.mubr.bf16.vlgmr.msra.gmra.mrb[40].mxu1 %v13362_v42  ;;  %6633 = vmatmul.mubr.bf16.vlgmr.msra.gmra.mrb[32].mxu0 %v13362_v42  ;;  %v4900_v56 = vmax.f32 %v4831_v46, 0.0  ;;  %v5077_v35 = vld [vmem:[#allocation14 + $0x508] sm:$0xff]  ;;  %v10289_v46 = vcombine.low %v5085_v30, %v5089_v32  ;;  %v5104_v60 = vld [vmem:[#allocation14 + $0x5e0] sm:$0xff] }
 0x67a   : > { %v4837_v54 = vadd.f32 %v4836_v48, %v4613_v16  ;;  %6548 = vmatpush1.bf16.msra.mxu1 %v10247_v14  ;;  %6654 = vmatpush1.bf16.msra.mxu0 %v10249_v41  ;;  %v4901_v9 = vmax.f32 %v4833_v59, 0.0  ;;  %v10274_v14 = vcombine.high %v5069_v57, %v5073_v22  ;;  %v5076_v41 = vld [vmem:[#allocation14 + $0x500] sm:$0xff]  ;;  %v5081_v16 = vld [vmem:[#allocation14 + $0x528] sm:$0xff]  ;;  %v13384_v59 = vrot.slane %v13356_v61, %v13220_v40 }
 0x67b   : > { %v4904_v58 = vmax.f32 %v4835_v2, 0.0  ;;  %6549 = vmatprep.subr.bf16.mxu1 %v10256_v50  ;;  %6655 = vmatprep.subr.bf16.mxu0 %v10258_v51  ;;  %v10280_v5 = vcombine.high %v5076_v41, %v5080_v19  ;;  %v10282_v28 = vcombine.high %v5077_v35, %v5081_v16  ;;  %v10279_v33 = vcombine.low %v5076_v41, %v5080_v19  ;;  %v5116_v19 = vld [vmem:[#allocation14 + $0x640] sm:$0xff] }
 0x67c   : > { %v4905_v10 = vmax.f32 %v4837_v54, 0.0  ;;  %v10281_v34 = vcombine.low %v5077_v35, %v5081_v16  ;;  %v10296_v50 = vcombine.high %v5092_v38, %v5096_v25  ;;  %v10298_v51 = vcombine.high %v5093_v15, %v5097_v4 }
 0x67d   : > { %v13370_v12 = vpack.c.bf16 %v4904_v58, %v4900_v56  ;;  %v10295_v2 = vcombine.low %v5092_v38, %v5096_v25  ;;  %v10297_v48 = vcombine.low %v5093_v15, %v5097_v4  ;;  %v10306_v56 = vcombine.high %v5101_v62, %v5105_v0  ;;  %v5108_v58 = vld [vmem:[#allocation14 + $0x600] sm:$0xff] }
 0x67e   : > { %v13372_v24 = vpack.c.bf16 %v4905_v10, %v4901_v9  ;;  %6550 = vmatpush1.bf16.msra.mxu1 %v10255_v3  ;;  %6656 = vmatpush1.bf16.msra.mxu0 %v10257_v55  ;;  %v10304_v55 = vcombine.high %v5100_v53, %v5104_v60  ;;  %v5113_v9 = vld [vmem:[#allocation14 + $0x628] sm:$0xff]  ;;  %v10303_v22 = vcombine.low %v5100_v53, %v5104_v60  ;;  %v5124_v38 = vld [vmem:[#allocation14 + $0x680] sm:$0xff] }
 0x67f   : > { %6551 = vmatprep.subr.bf16.mxu1 %v10264_v6  ;;  %6657 = vmatprep.subr.bf16.mxu0 %v10266_v63  ;;  %v5112_v63 = vld [vmem:[#allocation14 + $0x620] sm:$0xff]  ;;  %v10314_v41 = vcombine.high %v5109_v7, %v5113_v9  ;;  %v10313_v32 = vcombine.low %v5109_v7, %v5113_v9 }
 0x680   : > { %6536 = vmatprep.mubr.bf16.mxu1 %v13372_v24  ;;  %6642 = vmatprep.mubr.bf16.mxu0 %v13372_v24  ;;  %v10311_v30 = vcombine.low %v5108_v58, %v5112_v63  ;;  %v5128_v4 = vld [vmem:[#allocation14 + $0x6a0] sm:$0xff] }
 0x681   : > { %6537 = vmatmul.mubr.bf16.gmra.mrb[44].mxu1 %v13370_v12  ;;  %6643 = vmatmul.mubr.bf16.gmra.mrb[36].mxu0 %v13370_v12 }
 0x682   : > { %6552 = vmatpush1.bf16.msra.mxu1 %v10263_v39  ;;  %6658 = vmatpush1.bf16.msra.mxu0 %v10265_v13  ;;  %v10305_v39 = vcombine.low %v5101_v62, %v5105_v0 }
 0x683   : > { %6553 = vmatprep.subr.bf16.mxu1 %v10272_v44  ;;  %6659 = vmatprep.subr.bf16.mxu0 %v10274_v14  ;;  %v10312_v14 = vcombine.high %v5108_v58, %v5112_v63  ;;  %v5133_v58 = vld [vmem:[#allocation14 + $0x6c8] sm:$0xff] }
 0x686   : > { %6554 = vmatpush1.bf16.msra.mxu1 %v10271_v20  ;;  %6660 = vmatpush1.bf16.msra.mxu0 %v10273_v27  ;;  %v5120_v20 = vld [vmem:[#allocation14 + $0x660] sm:$0xff]  ;;  %v5117_v27 = vld [vmem:[#allocation14 + $0x648] sm:$0xff] }
 0x687   : > { %6555 = vmatprep.subr.bf16.mxu1 %v10280_v5  ;;  %6661 = vmatprep.subr.bf16.mxu0 %v10282_v28  ;;  %v5121_v5 = vld [vmem:[#allocation14 + $0x668] sm:$0xff]  ;;  %v10319_v60 = vcombine.low %v5116_v19, %v5120_v20 }
 0x688   : > { %v10321_v62 = vcombine.low %v5117_v27, %v5121_v5 }
 0x68a   : > { %6556 = vmatpush1.bf16.msra.mxu1 %v10279_v33  ;;  %6662 = vmatpush1.bf16.msra.mxu0 %v10281_v34 }
 0x68b   : > { %6557 = vmatprep.subr.bf16.mxu1 %v10288_v31  ;;  %6663 = vmatprep.subr.bf16.mxu0 %v10290_v36  ;;  %v10320_v31 = vcombine.high %v5116_v19, %v5120_v20  ;;  %v10322_v36 = vcombine.high %v5117_v27, %v5121_v5  ;;  %v5152_v19 = vld [vmem:[#allocation14 + $0x760] sm:$0xff] }
 0x68e   : > { %v4873_v1 = vpop.f32.mrb[32].mxu1  ;;  %6558 = vmatpush1.bf16.msra.mxu1 %v10287_v45  ;;  %6664 = vmatpush1.bf16.msra.mxu0 %v10289_v46  ;;  %v5125_v45 = vld [vmem:[#allocation14 + $0x688] sm:$0xff] }
 0x68f   : > { %v4874_v54 = vadd.f32 %v4873_v1, %v13380_v49  ;;  %v4875_v3 = vpop.f32.mrb[33].mxu1  ;;  %6559 = vmatprep.subr.bf16.mxu1 %v10296_v50  ;;  %6665 = vmatprep.subr.bf16.mxu0 %v10298_v51  ;;  %v5129_v46 = vld [vmem:[#allocation14 + $0x6a8] sm:$0xff] }
 0x690   : > { %v4876_v6 = vadd.f32 %v4875_v3, %v13384_v59  ;;  %v4877_v61 = vpop.f32.mrb[34].mxu1  ;;  %v10329_v63 = vcombine.low %v5125_v45, %v5129_v46 }
 0x691   : > { %v4878_v10 = vadd.f32 %v4877_v61, %v13380_v49  ;;  %v4879_v11 = vpop.f32.mrb[35].mxu1  ;;  %v4894_v13 = vmax.f32 %v4874_v54, 0.0  ;;  %v5132_v54 = vld [vmem:[#allocation14 + $0x6c0] sm:$0xff] }
 0x692   : > { %v4880_v57 = vadd.f32 %v4879_v11, %v13384_v59  ;;  %6560 = vmatpush1.bf16.msra.mxu1 %v10295_v2  ;;  %6666 = vmatpush1.bf16.msra.mxu0 %v10297_v48  ;;  %v4895_v35 = vmax.f32 %v4876_v6, 0.0  ;;  %v10328_v2 = vcombine.high %v5124_v38, %v5128_v4  ;;  %v10330_v48 = vcombine.high %v5125_v45, %v5129_v46  ;;  %v5137_v6 = vld [vmem:[#allocation14 + $0x6e8] sm:$0xff]  ;;  %v5144_v11 = vld [vmem:[#allocation14 + $0x720] sm:$0xff] }
 0x693   : > { %v4898_v44 = vmax.f32 %v4878_v10, 0.0  ;;  %6561 = vmatprep.subr.bf16.mxu1 %v10304_v55  ;;  %6667 = vmatprep.subr.bf16.mxu0 %v10306_v56  ;;  %v5136_v56 = vld [vmem:[#allocation14 + $0x6e0] sm:$0xff]  ;;  %v10338_v9 = vcombine.high %v5133_v58, %v5137_v6  ;;  %v5165_v45 = vld [vmem:[#allocation14 + $0x7c8] sm:$0xff] }
 0x694   : > { %v4899_v16 = vmax.f32 %v4880_v57, 0.0  ;;  %v10336_v7 = vcombine.high %v5132_v54, %v5136_v56  ;;  %v5140_v10 = vld [vmem:[#allocation14 + $0x700] sm:$0xff]  ;;  %v5141_v57 = vld [vmem:[#allocation14 + $0x708] sm:$0xff] }
 0x695   : > { %v13390_v28 = vpack.c.bf16 %v4898_v44, %v4894_v13  ;;  %v10337_v13 = vcombine.low %v5133_v58, %v5137_v6  ;;  %v10344_v44 = vcombine.high %v5140_v10, %v5144_v11  ;;  %v10343_v20 = vcombine.low %v5140_v10, %v5144_v11  ;;  %v5169_v46 = vld [vmem:[#allocation14 + $0x7e8] sm:$0xff]  ;;  %v4930_v58 = vld [vmem:[#allocation14 + $0x70] sm:$0xff]  ;;  %v4927_v6 = vld [vmem:[#allocation14 + $0x58] sm:$0xff] }
 0x696   : > { %v13392_v8 = vpack.c.bf16 %v4899_v16, %v4895_v35  ;;  %v4883_v29 = vpop.f32.mrb[36].mxu1  ;;  %6562 = vmatpush1.bf16.msra.mxu1 %v10303_v22  ;;  %6668 = vmatpush1.bf16.msra.mxu0 %v10305_v39  ;;  %v5145_v22 = vld [vmem:[#allocation14 + $0x728] sm:$0xff]  ;;  %v10335_v39 = vcombine.low %v5132_v54, %v5136_v56  ;;  %v10369_v54 = vcombine.low %v5165_v45, %v5169_v46  ;;  %v4926_v56 = vld [vmem:[#allocation14 + $0x50] sm:$0xff] }
 0x697   : > { %v4884_v33 = vadd.f32 %v4883_v29, %v13380_v49  ;;  %v4885_v34 = vpop.f32.mrb[37].mxu1  ;;  %6563 = vmatprep.subr.bf16.mxu1 %v10312_v14  ;;  %6669 = vmatprep.subr.bf16.mxu0 %v10314_v41  ;;  %v10346_v14 = vcombine.high %v5141_v57, %v5145_v22  ;;  %v5148_v41 = vld [vmem:[#allocation14 + $0x740] sm:$0xff]  ;;  %v5149_v35 = vld [vmem:[#allocation14 + $0x748] sm:$0xff]  ;;  %v10345_v27 = vcombine.low %v5141_v57, %v5145_v22  ;;  %v4934_v11 = vld [vmem:[#allocation14 + $0x90] sm:$0xff] }
 0x698   : > { %v4886_v25 = vadd.f32 %v4885_v34, %v13384_v59  ;;  %v4887_v15 = vpop.f32.mrb[38].mxu1  ;;  %6579 = vmatprep.mubr.bf16.mxu1 %v13392_v8  ;;  %6685 = vmatprep.mubr.bf16.mxu0 %v13392_v8  ;;  %v5153_v16 = vld [vmem:[#allocation14 + $0x768] sm:$0xff]  ;;  %v10352_v5 = vcombine.high %v5148_v41, %v5152_v19  ;;  %v4938_v57 = vld [vmem:[#allocation14 + $0xb0] sm:$0xff]  ;;  %v4935_v22 = vld [vmem:[#allocation14 + $0x98] sm:$0xff] }
 0x699   : > { %v4888_v50 = vadd.f32 %v4887_v15, %v13380_v49  ;;  %v4889_v51 = vpop.f32.mrb[39].mxu1  ;;  %v4902_v0 = vmax.f32 %v4884_v33, 0.0  ;;  %v10354_v29 = vcombine.high %v5149_v35, %v5153_v16  ;;  %v5157_v33 = vld [vmem:[#allocation14 + $0x788] sm:$0xff]  ;;  %v5164_v15 = vld [vmem:[#allocation14 + $0x7c0] sm:$0xff] }
 0x69a   : > { %v4890_v53 = vadd.f32 %v4889_v51, %v13384_v59  ;;  %6564 = vmatpush1.bf16.msra.mxu1 %v10311_v30  ;;  %6670 = vmatpush1.bf16.msra.mxu0 %v10313_v32  ;;  %v4903_v3 = vmax.f32 %v4886_v25, 0.0  ;;  %v10327_v59 = vcombine.low %v5124_v38, %v5128_v4  ;;  %v5156_v30 = vld [vmem:[#allocation14 + $0x780] sm:$0xff]  ;;  %v5161_v34 = vld [vmem:[#allocation14 + $0x7a8] sm:$0xff] }
 0x69b   : > { %v4906_v1 = vmax.f32 %v4888_v50, 0.0  ;;  %6565 = vmatprep.subr.bf16.mxu1 %v10320_v31  ;;  %6671 = vmatprep.subr.bf16.mxu0 %v10322_v36  ;;  %v5160_v32 = vld [vmem:[#allocation14 + $0x7a0] sm:$0xff]  ;;  %v10351_v31 = vcombine.low %v5148_v41, %v5152_v19  ;;  %v10353_v36 = vcombine.low %v5149_v35, %v5153_v16  ;;  %v10362_v25 = vcombine.high %v5157_v33, %v5161_v34  ;;  %v4942_v19 = vld [vmem:[#allocation14 + $0xd0] sm:$0xff]  ;;  %v4943_v16 = vld [vmem:[#allocation14 + $0xd8] sm:$0xff] }
 0x69c   : > { %v4907_v55 = vmax.f32 %v4890_v53, 0.0  ;;  %v10360_v38 = vcombine.high %v5156_v30, %v5160_v32  ;;  %v5168_v4 = vld [vmem:[#allocation14 + $0x7e0] sm:$0xff]  ;;  %v10359_v50 = vcombine.low %v5156_v30, %v5160_v32  ;;  %v10361_v51 = vcombine.low %v5157_v33, %v5161_v34  ;;  %v4946_v35 = vld [vmem:[#allocation14 + $0xf0] sm:$0xff]  ;;  %v4951_v34 = vld [vmem:[#allocation14 + $0x118] sm:$0xff] }
 0x69d   : > { %v13400_v49 = vpack.c.bf16 %v4906_v1, %v4902_v0  ;;  %v10368_v53 = vcombine.high %v5164_v15, %v5168_v4  ;;  %v4922_v0 = vld [vmem:[#allocation14 + $0x30] sm:$0xff]  ;;  %v4919_v1 = vld [vmem:[#allocation14 + $0x18] sm:$0xff] }
 0x69e   : > { %v13402_v61 = vpack.c.bf16 %v4907_v55, %v4903_v3  ;;  %6566 = vmatpush1.bf16.msra.mxu1 %v10319_v60  ;;  %6672 = vmatpush1.bf16.msra.mxu0 %v10321_v62  ;;  %v10370_v60 = vcombine.high %v5165_v45, %v5169_v46  ;;  %v4918_v62 = vld [vmem:[#allocation14 + $0x10] sm:$0xff]  ;;  %v4959_v46 = vld [vmem:[#allocation14 + $0x158] sm:$0xff] }
 0x69f   : > { %6567 = vmatprep.subr.bf16.mxu1 %v10328_v2  ;;  %6673 = vmatprep.subr.bf16.mxu0 %v10330_v48  ;;  %v4923_v2 = vld [vmem:[#allocation14 + $0x38] sm:$0xff]  ;;  %v10367_v48 = vcombine.low %v5164_v15, %v5168_v4  ;;  %v10124_v3 = vcombine.high %v4918_v62, %v4922_v0  ;;  %v4950_v32 = vld [vmem:[#allocation14 + $0x110] sm:$0xff] }
 0x6a0   : > { %v10126_v55 = vcombine.high %v4919_v1, %v4923_v2  ;;  %v4954_v33 = vld [vmem:[#allocation14 + $0x130] sm:$0xff] }
 0x6a1   : > { %v4958_v4 = vld [vmem:[#allocation14 + $0x150] sm:$0xff] }
 0x6a2   : > { %6568 = vmatpush1.bf16.msra.mxu1 %v10327_v59  ;;  %6674 = vmatpush1.bf16.msra.mxu0 %v10329_v63  ;;  %v4931_v59 = vld [vmem:[#allocation14 + $0x78] sm:$0xff]  ;;  %v10123_v63 = vcombine.low %v4918_v62, %v4922_v0  ;;  %v4962_v45 = vld [vmem:[#allocation14 + $0x170] sm:$0xff] }
 0x6a3   : > { %6569 = vmatprep.subr.bf16.mxu1 %v10336_v7  ;;  %6675 = vmatprep.subr.bf16.mxu0 %v10338_v9  ;;  %v10125_v7 = vcombine.low %v4919_v1, %v4923_v2  ;;  %v10132_v9 = vcombine.high %v4926_v56, %v4930_v58  ;;  %v10134_v10 = vcombine.high %v4927_v6, %v4931_v59  ;;  %v4966_v62 = vld [vmem:[#allocation14 + $0x190] sm:$0xff]  ;;  %v4967_v1 = vld [vmem:[#allocation14 + $0x198] sm:$0xff] }
 0x6a4   : > { %v4970_v0 = vld [vmem:[#allocation14 + $0x1b0] sm:$0xff]  ;;  %v4971_v2 = vld [vmem:[#allocation14 + $0x1b8] sm:$0xff] }
 0x6a6   : > { %6570 = vmatpush1.bf16.msra.mxu1 %v10335_v39  ;;  %6676 = vmatpush1.bf16.msra.mxu0 %v10337_v13  ;;  %v4939_v39 = vld [vmem:[#allocation14 + $0xb8] sm:$0xff]  ;;  %v10131_v13 = vcombine.low %v4926_v56, %v4930_v58  ;;  %v4974_v56 = vld [vmem:[#allocation14 + $0x1d0] sm:$0xff] }
 0x6a7   : > { %6571 = vmatprep.subr.bf16.mxu1 %v10344_v44  ;;  %6677 = vmatprep.subr.bf16.mxu0 %v10346_v14  ;;  %v10133_v44 = vcombine.low %v4927_v6, %v4931_v59  ;;  %v10140_v14 = vcombine.high %v4934_v11, %v4938_v57  ;;  %v10142_v41 = vcombine.high %v4935_v22, %v4939_v39  ;;  %v4978_v58 = vld [vmem:[#allocation14 + $0x1f0] sm:$0xff]  ;;  %v4975_v6 = vld [vmem:[#allocation14 + $0x1d8] sm:$0xff] }
 0x6a8   : > { %v4979_v59 = vld [vmem:[#allocation14 + $0x1f8] sm:$0xff] }
 0x6aa   : > { %6572 = vmatpush1.bf16.msra.mxu1 %v10343_v20  ;;  %6678 = vmatpush1.bf16.msra.mxu0 %v10345_v27  ;;  %v4947_v20 = vld [vmem:[#allocation14 + $0xf8] sm:$0xff]  ;;  %v10139_v27 = vcombine.low %v4934_v11, %v4938_v57  ;;  %v4982_v11 = vld [vmem:[#allocation14 + $0x210] sm:$0xff] }
 0x6ab   : > { %6573 = vmatprep.subr.bf16.mxu1 %v10352_v5  ;;  %6679 = vmatprep.subr.bf16.mxu0 %v10354_v29  ;;  %v10141_v5 = vcombine.low %v4935_v22, %v4939_v39  ;;  %v10148_v29 = vcombine.high %v4942_v19, %v4946_v35  ;;  %v10150_v30 = vcombine.high %v4943_v16, %v4947_v20  ;;  %v4986_v57 = vld [vmem:[#allocation14 + $0x230] sm:$0xff]  ;;  %v4983_v22 = vld [vmem:[#allocation14 + $0x218] sm:$0xff] }
 0x6ac   : > { %v4987_v39 = vld [vmem:[#allocation14 + $0x238] sm:$0xff] }
 0x6ae   : > { %6574 = vmatpush1.bf16.msra.mxu1 %v10351_v31  ;;  %6680 = vmatpush1.bf16.msra.mxu0 %v10353_v36  ;;  %v4955_v31 = vld [vmem:[#allocation14 + $0x138] sm:$0xff]  ;;  %v10147_v36 = vcombine.low %v4942_v19, %v4946_v35  ;;  %v4990_v19 = vld [vmem:[#allocation14 + $0x250] sm:$0xff] }
 0x6af   : > { %6575 = vmatprep.subr.bf16.mxu1 %v10360_v38  ;;  %6681 = vmatprep.subr.bf16.mxu0 %v10362_v25  ;;  %v10149_v38 = vcombine.low %v4943_v16, %v4947_v20  ;;  %v10156_v25 = vcombine.high %v4950_v32, %v4954_v33  ;;  %v10158_v15 = vcombine.high %v4951_v34, %v4955_v31  ;;  %v4994_v35 = vld [vmem:[#allocation14 + $0x270] sm:$0xff]  ;;  %v4991_v16 = vld [vmem:[#allocation14 + $0x258] sm:$0xff] }
 0x6b0   : > { %v4995_v20 = vld [vmem:[#allocation14 + $0x278] sm:$0xff] }
 0x6b2   : > { %6576 = vmatpush1.bf16.msra.mxu1 %v10359_v50  ;;  %6682 = vmatpush1.bf16.msra.mxu0 %v10361_v51  ;;  %v4963_v50 = vld [vmem:[#allocation14 + $0x178] sm:$0xff]  ;;  %v10155_v51 = vcombine.low %v4950_v32, %v4954_v33  ;;  %v4998_v32 = vld [vmem:[#allocation14 + $0x290] sm:$0xff] }
 0x6b3   : > { %6577 = vmatprep.subr.bf16.mxu1 %v10368_v53  ;;  %6683 = vmatprep.subr.bf16.mxu0 %v10370_v60  ;;  %v10157_v53 = vcombine.low %v4951_v34, %v4955_v31  ;;  %v10164_v60 = vcombine.high %v4958_v4, %v4962_v45  ;;  %v5002_v33 = vld [vmem:[#allocation14 + $0x2b0] sm:$0xff]  ;;  %v4999_v34 = vld [vmem:[#allocation14 + $0x298] sm:$0xff] }
 0x6b4   : > { %v5003_v31 = vld [vmem:[#allocation14 + $0x2b8] sm:$0xff] }
 0x6b6   : > { %6578 = vmatpush1.bf16.msra.mxu1 %v10367_v48  ;;  %6684 = vmatpush1.bf16.msra.mxu0 %v10369_v54  ;;  %v10163_v48 = vcombine.low %v4958_v4, %v4962_v45  ;;  %v10165_v54 = vcombine.low %v4959_v46, %v4963_v50  ;;  %v5006_v4 = vld [vmem:[#allocation14 + $0x2d0] sm:$0xff] }
 0x6b7   : > { %6706 = vmatprep.subr.bf16.mxu1 %v10124_v3  ;;  %6812 = vmatprep.subr.bf16.mxu0 %v10126_v55  ;;  %v10172_v3 = vcombine.high %v4966_v62, %v4970_v0  ;;  %v10174_v55 = vcombine.high %v4967_v1, %v4971_v2  ;;  %v5010_v45 = vld [vmem:[#allocation14 + $0x2f0] sm:$0xff] }
 0x6b9   : > { %6580 = vmatmul.mubr.bf16.vlgmr.msra.gmra.mrb[40].mxu1 %v13390_v28  ;;  %6686 = vmatmul.mubr.bf16.vlgmr.msra.gmra.mrb[32].mxu0 %v13390_v28 }
 0x6ba   : > { %6589 = vmatprep.mubr.bf16.mxu1 %v13402_v61  ;;  %6695 = vmatprep.mubr.bf16.mxu0 %v13402_v61 }
 0x6bb   : > { %6707 = vmatpush1.bf16.msra.mxu1 %v10123_v63  ;;  %6813 = vmatpush1.bf16.msra.mxu0 %v10125_v7  ;;  %v10171_v63 = vcombine.low %v4966_v62, %v4970_v0  ;;  %v10173_v7 = vcombine.low %v4967_v1, %v4971_v2  ;;  %v5014_v62 = vld [vmem:[#allocation14 + $0x310] sm:$0xff]  ;;  %v5015_v1 = vld [vmem:[#allocation14 + $0x318] sm:$0xff] }
 0x6bc   : > { %6708 = vmatprep.subr.bf16.mxu1 %v10132_v9  ;;  %6814 = vmatprep.subr.bf16.mxu0 %v10134_v10  ;;  %v10180_v9 = vcombine.high %v4974_v56, %v4978_v58  ;;  %v10182_v10 = vcombine.high %v4975_v6, %v4979_v59  ;;  %v5018_v0 = vld [vmem:[#allocation14 + $0x330] sm:$0xff]  ;;  %v5019_v2 = vld [vmem:[#allocation14 + $0x338] sm:$0xff] }
 0x6bf   : > { %6709 = vmatpush1.bf16.msra.mxu1 %v10131_v13  ;;  %6815 = vmatpush1.bf16.msra.mxu0 %v10133_v44  ;;  %v10179_v13 = vcombine.low %v4974_v56, %v4978_v58  ;;  %v10181_v44 = vcombine.low %v4975_v6, %v4979_v59  ;;  %v5022_v56 = vld [vmem:[#allocation14 + $0x350] sm:$0xff]  ;;  %v5023_v6 = vld [vmem:[#allocation14 + $0x358] sm:$0xff] }
 0x6c0   : > { %6710 = vmatprep.subr.bf16.mxu1 %v10140_v14  ;;  %6816 = vmatprep.subr.bf16.mxu0 %v10142_v41  ;;  %v10188_v14 = vcombine.high %v4982_v11, %v4986_v57  ;;  %v10190_v41 = vcombine.high %v4983_v22, %v4987_v39  ;;  %v5026_v58 = vld [vmem:[#allocation14 + $0x370] sm:$0xff]  ;;  %v5027_v59 = vld [vmem:[#allocation14 + $0x378] sm:$0xff] }
 0x6c1   : > { %6590 = vmatmul.mubr.bf16.gmra.mrb[44].mxu1 %v13400_v49  ;;  %6696 = vmatmul.mubr.bf16.gmra.mrb[36].mxu0 %v13400_v49 }
 0x6c2   : > { %6738 = vmatprep.mubr.bf16.mxu1 %v13364_v43  ;;  %6844 = vmatprep.mubr.bf16.mxu0 %v13364_v43  ;;  %v10166_v43 = vcombine.high %v4959_v46, %v4963_v50  ;;  %v5007_v46 = vld [vmem:[#allocation14 + $0x2d8] sm:$0xff] }
 0x6c3   : > { %6711 = vmatpush1.bf16.msra.mxu1 %v10139_v27  ;;  %6817 = vmatpush1.bf16.msra.mxu0 %v10141_v5  ;;  %v10187_v27 = vcombine.low %v4982_v11, %v4986_v57  ;;  %v10189_v5 = vcombine.low %v4983_v22, %v4987_v39  ;;  %v5011_v50 = vld [vmem:[#allocation14 + $0x2f8] sm:$0xff]  ;;  %v5030_v11 = vld [vmem:[#allocation14 + $0x390] sm:$0xff] }
 0x6c4   : > { %6712 = vmatprep.subr.bf16.mxu1 %v10148_v29  ;;  %6818 = vmatprep.subr.bf16.mxu0 %v10150_v30  ;;  %v10196_v29 = vcombine.high %v4990_v19, %v4994_v35  ;;  %v10198_v30 = vcombine.high %v4991_v16, %v4995_v20  ;;  %v5034_v57 = vld [vmem:[#allocation14 + $0x3b0] sm:$0xff]  ;;  %v5031_v22 = vld [vmem:[#allocation14 + $0x398] sm:$0xff] }
 0x6c5   : > { %v5035_v39 = vld [vmem:[#allocation14 + $0x3b8] sm:$0xff] }
 0x6c7   : > { %6713 = vmatpush1.bf16.msra.mxu1 %v10147_v36  ;;  %6819 = vmatpush1.bf16.msra.mxu0 %v10149_v38  ;;  %v10195_v36 = vcombine.low %v4990_v19, %v4994_v35  ;;  %v10197_v38 = vcombine.low %v4991_v16, %v4995_v20  ;;  %v5038_v19 = vld [vmem:[#allocation14 + $0x3d0] sm:$0xff]  ;;  %v5039_v16 = vld [vmem:[#allocation14 + $0x3d8] sm:$0xff] }
 0x6c8   : > { %6714 = vmatprep.subr.bf16.mxu1 %v10156_v25  ;;  %6820 = vmatprep.subr.bf16.mxu0 %v10158_v15  ;;  %v10204_v25 = vcombine.high %v4998_v32, %v5002_v33  ;;  %v10206_v15 = vcombine.high %v4999_v34, %v5003_v31  ;;  %v5042_v35 = vld [vmem:[#allocation14 + $0x3f0] sm:$0xff]  ;;  %v5043_v20 = vld [vmem:[#allocation14 + $0x3f8] sm:$0xff] }
 0x6cb   : > { %6715 = vmatpush1.bf16.msra.mxu1 %v10155_v51  ;;  %6821 = vmatpush1.bf16.msra.mxu0 %v10157_v53  ;;  %v10203_v51 = vcombine.low %v4998_v32, %v5002_v33  ;;  %v10205_v53 = vcombine.low %v4999_v34, %v5003_v31  ;;  %v5046_v32 = vld [vmem:[#allocation14 + $0x410] sm:$0xff]  ;;  %v5047_v34 = vld [vmem:[#allocation14 + $0x418] sm:$0xff] }
 0x6cc   : > { %6716 = vmatprep.subr.bf16.mxu1 %v10164_v60  ;;  %6822 = vmatprep.subr.bf16.mxu0 %v10166_v43  ;;  %v10212_v60 = vcombine.high %v5006_v4, %v5010_v45  ;;  %v10214_v43 = vcombine.high %v5007_v46, %v5011_v50  ;;  %v5050_v33 = vld [vmem:[#allocation14 + $0x430] sm:$0xff]  ;;  %v5051_v31 = vld [vmem:[#allocation14 + $0x438] sm:$0xff] }
 0x6cf   : > { %6717 = vmatpush1.bf16.msra.mxu1 %v10163_v48  ;;  %6823 = vmatpush1.bf16.msra.mxu0 %v10165_v54  ;;  %v10211_v48 = vcombine.low %v5006_v4, %v5010_v45  ;;  %v10213_v54 = vcombine.low %v5007_v46, %v5011_v50  ;;  %v5054_v4 = vld [vmem:[#allocation14 + $0x450] sm:$0xff]  ;;  %v5055_v46 = vld [vmem:[#allocation14 + $0x458] sm:$0xff] }
 0x6d0   : > { %6718 = vmatprep.subr.bf16.mxu1 %v10172_v3  ;;  %6824 = vmatprep.subr.bf16.mxu0 %v10174_v55  ;;  %v10220_v3 = vcombine.high %v5014_v62, %v5018_v0  ;;  %v10222_v55 = vcombine.high %v5015_v1, %v5019_v2  ;;  %v5058_v45 = vld [vmem:[#allocation14 + $0x470] sm:$0xff]  ;;  %v5059_v50 = vld [vmem:[#allocation14 + $0x478] sm:$0xff] }
 0x6d3   : > { %6719 = vmatpush1.bf16.msra.mxu1 %v10171_v63  ;;  %6825 = vmatpush1.bf16.msra.mxu0 %v10173_v7  ;;  %v10219_v63 = vcombine.low %v5014_v62, %v5018_v0  ;;  %v10221_v7 = vcombine.low %v5015_v1, %v5019_v2  ;;  %v5062_v62 = vld [vmem:[#allocation14 + $0x490] sm:$0xff]  ;;  %v5063_v1 = vld [vmem:[#allocation14 + $0x498] sm:$0xff] }
 0x6d4   : > { %6720 = vmatprep.subr.bf16.mxu1 %v10180_v9  ;;  %6826 = vmatprep.subr.bf16.mxu0 %v10182_v10  ;;  %v10228_v9 = vcombine.high %v5022_v56, %v5026_v58  ;;  %v10230_v10 = vcombine.high %v5023_v6, %v5027_v59  ;;  %v5066_v0 = vld [vmem:[#allocation14 + $0x4b0] sm:$0xff]  ;;  %v5067_v2 = vld [vmem:[#allocation14 + $0x4b8] sm:$0xff] }
 0x6d7   : > { %6721 = vmatpush1.bf16.msra.mxu1 %v10179_v13  ;;  %6827 = vmatpush1.bf16.msra.mxu0 %v10181_v44  ;;  %v10227_v13 = vcombine.low %v5022_v56, %v5026_v58  ;;  %v10229_v44 = vcombine.low %v5023_v6, %v5027_v59  ;;  %v5070_v56 = vld [vmem:[#allocation14 + $0x4d0] sm:$0xff]  ;;  %v5071_v6 = vld [vmem:[#allocation14 + $0x4d8] sm:$0xff] }
 0x6d8   : > { %6722 = vmatprep.subr.bf16.mxu1 %v10188_v14  ;;  %6828 = vmatprep.subr.bf16.mxu0 %v10190_v41  ;;  %v10236_v14 = vcombine.high %v5030_v11, %v5034_v57  ;;  %v10238_v41 = vcombine.high %v5031_v22, %v5035_v39  ;;  %v5074_v58 = vld [vmem:[#allocation14 + $0x4f0] sm:$0xff]  ;;  %v5075_v59 = vld [vmem:[#allocation14 + $0x4f8] sm:$0xff] }
 0x6db   : > { %6723 = vmatpush1.bf16.msra.mxu1 %v10187_v27  ;;  %6829 = vmatpush1.bf16.msra.mxu0 %v10189_v5  ;;  %v10235_v27 = vcombine.low %v5030_v11, %v5034_v57  ;;  %v10237_v5 = vcombine.low %v5031_v22, %v5035_v39  ;;  %v5079_v11 = vld [vmem:[#allocation14 + $0x518] sm:$0xff]  ;;  %v10275_v22 = vcombine.low %v5070_v56, %v5074_v58 }
 0x6dc   : > { %6724 = vmatprep.subr.bf16.mxu1 %v10196_v29  ;;  %6830 = vmatprep.subr.bf16.mxu0 %v10198_v30  ;;  %v10244_v29 = vcombine.high %v5038_v19, %v5042_v35  ;;  %v10246_v30 = vcombine.high %v5039_v16, %v5043_v20  ;;  %v5083_v57 = vld [vmem:[#allocation14 + $0x538] sm:$0xff]  ;;  %v10277_v39 = vcombine.low %v5071_v6, %v5075_v59 }
 0x6df   : > { %6725 = vmatpush1.bf16.msra.mxu1 %v10195_v36  ;;  %6831 = vmatpush1.bf16.msra.mxu0 %v10197_v38  ;;  %v10243_v36 = vcombine.low %v5038_v19, %v5042_v35  ;;  %v10245_v38 = vcombine.low %v5039_v16, %v5043_v20  ;;  %v5087_v19 = vld [vmem:[#allocation14 + $0x558] sm:$0xff]  ;;  %v10285_v16 = vcombine.low %v5079_v11, %v5083_v57 }
 0x6e0   : > { %6726 = vmatprep.subr.bf16.mxu1 %v10204_v25  ;;  %6832 = vmatprep.subr.bf16.mxu0 %v10206_v15  ;;  %v10252_v25 = vcombine.high %v5046_v32, %v5050_v33  ;;  %v10254_v15 = vcombine.high %v5047_v34, %v5051_v31  ;;  %v5091_v35 = vld [vmem:[#allocation14 + $0x578] sm:$0xff] }
 0x6e3   : > { %6727 = vmatpush1.bf16.msra.mxu1 %v10203_v51  ;;  %6833 = vmatpush1.bf16.msra.mxu0 %v10205_v53  ;;  %v10251_v51 = vcombine.low %v5046_v32, %v5050_v33  ;;  %v10253_v53 = vcombine.low %v5047_v34, %v5051_v31  ;;  %v10293_v33 = vcombine.low %v5087_v19, %v5091_v35 }
 0x6e4   : > { %6728 = vmatprep.subr.bf16.mxu1 %v10212_v60  ;;  %6834 = vmatprep.subr.bf16.mxu0 %v10214_v43  ;;  %v10260_v60 = vcombine.high %v5054_v4, %v5058_v45  ;;  %v10262_v43 = vcombine.high %v5055_v46, %v5059_v50 }
 0x6e7   : > { %6729 = vmatpush1.bf16.msra.mxu1 %v10211_v48  ;;  %6835 = vmatpush1.bf16.msra.mxu0 %v10213_v54  ;;  %v10259_v48 = vcombine.low %v5054_v4, %v5058_v45  ;;  %v10261_v54 = vcombine.low %v5055_v46, %v5059_v50 }
 0x6e8   : > { %6730 = vmatprep.subr.bf16.mxu1 %v10220_v3  ;;  %6836 = vmatprep.subr.bf16.mxu0 %v10222_v55  ;;  %v10268_v3 = vcombine.high %v5062_v62, %v5066_v0  ;;  %v10270_v55 = vcombine.high %v5063_v1, %v5067_v2 }
 0x6eb   : > { %6731 = vmatpush1.bf16.msra.mxu1 %v10219_v63  ;;  %6837 = vmatpush1.bf16.msra.mxu0 %v10221_v7  ;;  %v10269_v63 = vcombine.low %v5063_v1, %v5067_v2  ;;  %v10276_v7 = vcombine.high %v5070_v56, %v5074_v58 }
 0x6ec   : > { %6732 = vmatprep.subr.bf16.mxu1 %v10228_v9  ;;  %6838 = vmatprep.subr.bf16.mxu0 %v10230_v10  ;;  %v10278_v9 = vcombine.high %v5071_v6, %v5075_v59  ;;  %v5078_v10 = vld [vmem:[#allocation14 + $0x510] sm:$0xff] }
 0x6ef   : > { %6733 = vmatpush1.bf16.msra.mxu1 %v10227_v13  ;;  %6839 = vmatpush1.bf16.msra.mxu0 %v10229_v44  ;;  %v10286_v44 = vcombine.high %v5079_v11, %v5083_v57 }
 0x6f0   : > { %6734 = vmatprep.subr.bf16.mxu1 %v10236_v14  ;;  %6840 = vmatprep.subr.bf16.mxu0 %v10238_v41  ;;  %v5086_v14 = vld [vmem:[#allocation14 + $0x550] sm:$0xff] }
 0x6f1   : > { %v5090_v41 = vld [vmem:[#allocation14 + $0x570] sm:$0xff] }
 0x6f2   : > { %v10292_v20 = vcombine.high %v5086_v14, %v5090_v41  ;;  %v10291_v32 = vcombine.low %v5086_v14, %v5090_v41 }
 0x6f3   : > { %6735 = vmatpush1.bf16.msra.mxu1 %v10235_v27  ;;  %6841 = vmatpush1.bf16.msra.mxu0 %v10237_v5  ;;  %v10294_v27 = vcombine.high %v5087_v19, %v5091_v35  ;;  %v5094_v5 = vld [vmem:[#allocation14 + $0x590] sm:$0xff] }
 0x6f4   : > { %6736 = vmatprep.subr.bf16.mxu1 %v10244_v29  ;;  %6842 = vmatprep.subr.bf16.mxu0 %v10246_v30  ;;  %v5098_v29 = vld [vmem:[#allocation14 + $0x5b0] sm:$0xff]  ;;  %v5099_v30 = vld [vmem:[#allocation14 + $0x5b8] sm:$0xff] }
 0x6f5   : > { %v10300_v34 = vcombine.high %v5094_v5, %v5098_v29  ;;  %v10299_v4 = vcombine.low %v5094_v5, %v5098_v29 }
 0x6f7   : > { %6737 = vmatpush1.bf16.msra.mxu1 %v10243_v36  ;;  %6843 = vmatpush1.bf16.msra.mxu0 %v10245_v38  ;;  %v5102_v36 = vld [vmem:[#allocation14 + $0x5d0] sm:$0xff] }
 0x6f8   : > { %6759 = vmatprep.subr.bf16.mxu1 %v10252_v25  ;;  %6865 = vmatprep.subr.bf16.mxu0 %v10254_v15  ;;  %v5106_v38 = vld [vmem:[#allocation14 + $0x5f0] sm:$0xff]  ;;  %v5103_v25 = vld [vmem:[#allocation14 + $0x5d8] sm:$0xff] }
 0x6f9   : > { %v5107_v15 = vld [vmem:[#allocation14 + $0x5f8] sm:$0xff]  ;;  %v10308_v46 = vcombine.high %v5102_v36, %v5106_v38 }
 0x6fa   : > { %6739 = vmatmul.mubr.bf16.vlgmr.msra.gmra.mrb[48].mxu1 %v13362_v42  ;;  %6845 = vmatmul.mubr.bf16.vlgmr.msra.gmra.mrb[40].mxu0 %v13362_v42  ;;  %v10267_v42 = vcombine.low %v5062_v62, %v5066_v0  ;;  %v10310_v50 = vcombine.high %v5103_v25, %v5107_v15  ;;  %v10307_v62 = vcombine.low %v5102_v36, %v5106_v38 }
 0x6fb   : > { %6748 = vmatprep.mubr.bf16.mxu1 %v13372_v24  ;;  %6760 = vmatpush1.bf16.msra.mxu1 %v10251_v51  ;;  %v5110_v51 = vld [vmem:[#allocation14 + $0x610] sm:$0xff]  ;;  %v10309_v0 = vcombine.low %v5103_v25, %v5107_v15 }
 0x6fc   : > { %6854 = vmatprep.mubr.bf16.mxu0 %v13372_v24  ;;  %6866 = vmatpush1.bf16.msra.mxu0 %v10253_v53  ;;  %v5082_v24 = vld [vmem:[#allocation14 + $0x530] sm:$0xff] }
 0x6fd   : > { %6761 = vmatprep.subr.bf16.mxu1 %v10260_v60  ;;  %6867 = vmatprep.subr.bf16.mxu0 %v10262_v43  ;;  %v10284_v13 = vcombine.high %v5078_v10, %v5082_v24  ;;  %v5114_v53 = vld [vmem:[#allocation14 + $0x630] sm:$0xff]  ;;  %v5111_v60 = vld [vmem:[#allocation14 + $0x618] sm:$0xff] }
 0x6fe   : > { %v5115_v43 = vld [vmem:[#allocation14 + $0x638] sm:$0xff]  ;;  %v10316_v1 = vcombine.high %v5110_v51, %v5114_v53  ;;  %v10315_v56 = vcombine.low %v5110_v51, %v5114_v53 }
 0x6ff   : > { %6762 = vmatpush1.bf16.msra.mxu1 %v10259_v48  ;;  %v10318_v2 = vcombine.high %v5111_v60, %v5115_v43  ;;  %v5118_v48 = vld [vmem:[#allocation14 + $0x650] sm:$0xff]  ;;  %v10317_v58 = vcombine.low %v5111_v60, %v5115_v43 }
 0x700   : > { %6868 = vmatpush1.bf16.msra.mxu0 %v10261_v54  ;;  %6763 = vmatprep.subr.bf16.mxu1 %v10268_v3  ;;  %v5122_v54 = vld [vmem:[#allocation14 + $0x670] sm:$0xff]  ;;  %v5119_v3 = vld [vmem:[#allocation14 + $0x658] sm:$0xff] }
 0x701   : > { %6869 = vmatprep.subr.bf16.mxu0 %v10270_v55  ;;  %v5123_v55 = vld [vmem:[#allocation14 + $0x678] sm:$0xff]  ;;  %v10324_v6 = vcombine.high %v5118_v48, %v5122_v54 }
 0x702   : > { %6749 = vmatmul.mubr.bf16.gmra.mrb[52].mxu1 %v13370_v12  ;;  %6855 = vmatmul.mubr.bf16.gmra.mrb[44].mxu0 %v13370_v12  ;;  %v10283_v12 = vcombine.low %v5078_v10, %v5082_v24  ;;  %v10326_v59 = vcombine.high %v5119_v3, %v5123_v55  ;;  %v10323_v10 = vcombine.low %v5118_v48, %v5122_v54 }
 0x703   : > { %6764 = vmatpush1.bf16.msra.mxu1 %v10267_v42  ;;  %6791 = vmatprep.mubr.bf16.mxu1 %v13392_v8  ;;  %v5126_v42 = vld [vmem:[#allocation14 + $0x690] sm:$0xff]  ;;  %v10325_v24 = vcombine.low %v5119_v3, %v5123_v55 }
 0x704   : > { %6870 = vmatpush1.bf16.msra.mxu0 %v10269_v63  ;;  %6897 = vmatprep.mubr.bf16.mxu0 %v13392_v8  ;;  %v5095_v8 = vld [vmem:[#allocation14 + $0x598] sm:$0xff]  ;;  %v5130_v63 = vld [vmem:[#allocation14 + $0x6b0] sm:$0xff] }
 0x705   : > { %6765 = vmatprep.subr.bf16.mxu1 %v10276_v7  ;;  %6871 = vmatprep.subr.bf16.mxu0 %v10278_v9  ;;  %v10302_v31 = vcombine.high %v5095_v8, %v5099_v30  ;;  %v10301_v45 = vcombine.low %v5095_v8, %v5099_v30  ;;  %v5127_v7 = vld [vmem:[#allocation14 + $0x698] sm:$0xff]  ;;  %v10332_v11 = vcombine.high %v5126_v42, %v5130_v63 }
 0x706   : > { %v5131_v9 = vld [vmem:[#allocation14 + $0x6b8] sm:$0xff]  ;;  %v10331_v14 = vcombine.low %v5126_v42, %v5130_v63 }
 0x707   : > { %6766 = vmatpush1.bf16.msra.mxu1 %v10275_v22  ;;  %v10334_v57 = vcombine.high %v5127_v7, %v5131_v9  ;;  %v5134_v22 = vld [vmem:[#allocation14 + $0x6d0] sm:$0xff]  ;;  %v10333_v41 = vcombine.low %v5127_v7, %v5131_v9  ;;  %v11611_v7 = vld [vmem:[#allocation16 + $0x24] ss:$8 sps:$4 sm:$0xff]   ;;  %v11609_v9 = vld [vmem:[#allocation16 + $0x20] ss:$8 sps:$4 sm:$0xff]  }
 0x708   : > { %6872 = vmatpush1.bf16.msra.mxu0 %v10277_v39  ;;  %6767 = vmatprep.subr.bf16.mxu1 %v10284_v13  ;;  %v5138_v39 = vld [vmem:[#allocation14 + $0x6f0] sm:$0xff]  ;;  %v5135_v13 = vld [vmem:[#allocation14 + $0x6d8] sm:$0xff] }
 0x709   : > { %6873 = vmatprep.subr.bf16.mxu0 %v10286_v44  ;;  %v5139_v44 = vld [vmem:[#allocation14 + $0x6f8] sm:$0xff]  ;;  %v10340_v19 = vcombine.high %v5134_v22, %v5138_v39  ;;  %v10339_v5 = vcombine.low %v5134_v22, %v5138_v39  ;;  %v11623_v22 = vld [vmem:[#allocation16 + $0x64] ss:$8 sps:$4 sm:$0xff]   ;;  %v11621_v39 = vld [vmem:[#allocation16 + $0x60] ss:$8 sps:$4 sm:$0xff]  }
 0x70a   : > { %v10342_v35 = vcombine.high %v5135_v13, %v5139_v44  ;;  %v10341_v29 = vcombine.low %v5135_v13, %v5139_v44  ;;  %v11608_v42 = vld [vmem:[#allocation16 + $0x14] ss:$8 sps:$4 sm:$0xff]   ;;  %v11606_v63 = vld [vmem:[#allocation16 + $0x10] ss:$8 sps:$4 sm:$0xff]  }
 0x70b   : > { %6768 = vmatpush1.bf16.msra.mxu1 %v10283_v12  ;;  %v5142_v12 = vld [vmem:[#allocation14 + $0x710] sm:$0xff] }
 0x70c   : > { %6874 = vmatpush1.bf16.msra.mxu0 %v10285_v16  ;;  %6769 = vmatprep.subr.bf16.mxu1 %v10292_v20  ;;  %v5146_v16 = vld [vmem:[#allocation14 + $0x730] sm:$0xff]  ;;  %v5143_v20 = vld [vmem:[#allocation14 + $0x718] sm:$0xff] }
 0x70d   : > { %6875 = vmatprep.subr.bf16.mxu0 %v10294_v27  ;;  %v5147_v27 = vld [vmem:[#allocation14 + $0x738] sm:$0xff]  ;;  %v10348_v8 = vcombine.high %v5142_v12, %v5146_v16  ;;  %v10347_v36 = vcombine.low %v5142_v12, %v5146_v16  ;;  %v11633_v12 = vld [vmem:[#allocation16 + $0xa0] ss:$8 sps:$4 sm:$0xff]  }
 0x70e   : > { %v10350_v30 = vcombine.high %v5143_v20, %v5147_v27  ;;  %v10349_v38 = vcombine.low %v5143_v20, %v5147_v27  ;;  %v11626_v13 = vld [vmem:[#allocation16 + $0x74] ss:$8 sps:$4 sm:$0xff]   ;;  %v11624_v44 = vld [vmem:[#allocation16 + $0x70] ss:$8 sps:$4 sm:$0xff]   ;;  %v11641_v27 = vld [vmem:[#allocation16 + $0xc4] ss:$8 sps:$4 sm:$0xff]  }
 0x70f   : > { %6770 = vmatpush1.bf16.msra.mxu1 %v10291_v32  ;;  %v5150_v32 = vld [vmem:[#allocation14 + $0x750] sm:$0xff] }
 0x710   : > { %6876 = vmatpush1.bf16.msra.mxu0 %v10293_v33  ;;  %6771 = vmatprep.subr.bf16.mxu1 %v10300_v34  ;;  %v5154_v33 = vld [vmem:[#allocation14 + $0x770] sm:$0xff]  ;;  %v5151_v34 = vld [vmem:[#allocation14 + $0x758] sm:$0xff] }
 0x711   : > { %6877 = vmatprep.subr.bf16.mxu0 %v10302_v31  ;;  %v5155_v31 = vld [vmem:[#allocation14 + $0x778] sm:$0xff]  ;;  %v10356_v25 = vcombine.high %v5150_v32, %v5154_v33  ;;  %v10355_v51 = vcombine.low %v5150_v32, %v5154_v33  ;;  %v11645_v32 = vld [vmem:[#allocation16 + $0xe0] ss:$8 sps:$4 sm:$0xff]  }
 0x712   : > { %v10358_v15 = vcombine.high %v5151_v34, %v5155_v31  ;;  %v10357_v53 = vcombine.low %v5151_v34, %v5155_v31  ;;  %v11638_v16 = vld [vmem:[#allocation16 + $0xb4] ss:$8 sps:$4 sm:$0xff]   ;;  %v11636_v20 = vld [vmem:[#allocation16 + $0xb0] ss:$8 sps:$4 sm:$0xff]   ;;  %v11653_v31 = vld [vmem:[#allocation16 + $0x104] ss:$8 sps:$4 sm:$0xff]  }
 0x713   : > { %6772 = vmatpush1.bf16.msra.mxu1 %v10299_v4  ;;  %v5158_v4 = vld [vmem:[#allocation14 + $0x790] sm:$0xff] }
 0x714   : > { %6878 = vmatpush1.bf16.msra.mxu0 %v10301_v45  ;;  %6773 = vmatprep.subr.bf16.mxu1 %v10308_v46  ;;  %v5162_v45 = vld [vmem:[#allocation14 + $0x7b0] sm:$0xff]  ;;  %v5159_v46 = vld [vmem:[#allocation14 + $0x798] sm:$0xff] }
 0x715   : > { %6879 = vmatprep.subr.bf16.mxu0 %v10310_v50  ;;  %v5163_v50 = vld [vmem:[#allocation14 + $0x7b8] sm:$0xff]  ;;  %v10364_v60 = vcombine.high %v5158_v4, %v5162_v45  ;;  %v10363_v48 = vcombine.low %v5158_v4, %v5162_v45 }
 0x716   : > { %v10366_v43 = vcombine.high %v5159_v46, %v5163_v50  ;;  %v10365_v54 = vcombine.low %v5159_v46, %v5163_v50  ;;  %v11650_v33 = vld [vmem:[#allocation16 + $0xf4] ss:$8 sps:$4 sm:$0xff]   ;;  %v11648_v34 = vld [vmem:[#allocation16 + $0xf0] ss:$8 sps:$4 sm:$0xff]  }
 0x717   : > { %6774 = vmatpush1.bf16.msra.mxu1 %v10307_v62  ;;  %v5166_v62 = vld [vmem:[#allocation14 + $0x7d0] sm:$0xff] }
 0x718   : > { %6880 = vmatpush1.bf16.msra.mxu0 %v10309_v0  ;;  %6775 = vmatprep.subr.bf16.mxu1 %v10316_v1  ;;  %v5170_v0 = vld [vmem:[#allocation14 + $0x7f0] sm:$0xff]  ;;  %v5167_v1 = vld [vmem:[#allocation14 + $0x7d8] sm:$0xff] }
 0x719   : > { %6881 = vmatprep.subr.bf16.mxu0 %v10318_v2  ;;  %v5171_v2 = vld [vmem:[#allocation14 + $0x7f8] sm:$0xff]  ;;  %v10372_v3 = vcombine.high %v5166_v62, %v5170_v0 }
 0x71a   : > { %v10374_v55 = vcombine.high %v5167_v1, %v5171_v2 }
 0x71b   : > { %6776 = vmatpush1.bf16.msra.mxu1 %v10315_v56  ;;  %v10371_v56 = vcombine.low %v5166_v62, %v5170_v0 }
 0x71c   : > { %6882 = vmatpush1.bf16.msra.mxu0 %v10317_v58  ;;  %6777 = vmatprep.subr.bf16.mxu1 %v10324_v6  ;;  %v10373_v58 = vcombine.low %v5167_v1, %v5171_v2  ;;  %v11605_v6 = vld [vmem:[#allocation16 + $0x4] ss:$8 sps:$4 sm:$0xff]  }
 0x71d   : > { %6883 = vmatprep.subr.bf16.mxu0 %v10326_v59  ;;  %v11603_v59 = vld [vmem:[#allocation16] ss:$8 sps:$4 sm:$0xff]  }
 0x71f   : > { %6778 = vmatpush1.bf16.msra.mxu1 %v10323_v10  ;;  %v11614_v10 = vld [vmem:[#allocation16 + $0x34] ss:$8 sps:$4 sm:$0xff]  }
 0x720   : > { %6884 = vmatpush1.bf16.msra.mxu0 %v10325_v24  ;;  %6779 = vmatprep.subr.bf16.mxu1 %v10332_v11  ;;  %v11612_v24 = vld [vmem:[#allocation16 + $0x30] ss:$8 sps:$4 sm:$0xff]   ;;  %v11615_v11 = vld [vmem:[#allocation16 + $0x40] ss:$8 sps:$4 sm:$0xff]  }
 0x721   : > { %6885 = vmatprep.subr.bf16.mxu0 %v10334_v57  ;;  %v11618_v57 = vld [vmem:[#allocation16 + $0x50] ss:$8 sps:$4 sm:$0xff]  }
 0x723   : > { %6780 = vmatpush1.bf16.msra.mxu1 %v10331_v14  ;;  %v11627_v14 = vld [vmem:[#allocation16 + $0x80] ss:$8 sps:$4 sm:$0xff]  }
 0x724   : > { %6886 = vmatpush1.bf16.msra.mxu0 %v10333_v41  ;;  %6781 = vmatprep.subr.bf16.mxu1 %v10340_v19  ;;  %v11632_v41 = vld [vmem:[#allocation16 + $0x94] ss:$8 sps:$4 sm:$0xff]   ;;  %v11630_v19 = vld [vmem:[#allocation16 + $0x90] ss:$8 sps:$4 sm:$0xff]  }
 0x725   : > { %6887 = vmatprep.subr.bf16.mxu0 %v10342_v35  ;;  %v11635_v35 = vld [vmem:[#allocation16 + $0xa4] ss:$8 sps:$4 sm:$0xff]  }
 0x727   : > { %6782 = vmatpush1.bf16.msra.mxu1 %v10339_v5  ;;  %v11639_v5 = vld [vmem:[#allocation16 + $0xc0] ss:$8 sps:$4 sm:$0xff]  }
 0x728   : > { %6888 = vmatpush1.bf16.msra.mxu0 %v10341_v29  ;;  %6783 = vmatprep.subr.bf16.mxu1 %v10348_v8  ;;  %v11644_v29 = vld [vmem:[#allocation16 + $0xd4] ss:$8 sps:$4 sm:$0xff]   ;;  %v11642_v8 = vld [vmem:[#allocation16 + $0xd0] ss:$8 sps:$4 sm:$0xff]  }
 0x729   : > { %6889 = vmatprep.subr.bf16.mxu0 %v10350_v30  ;;  %v11647_v30 = vld [vmem:[#allocation16 + $0xe4] ss:$8 sps:$4 sm:$0xff]  }
 0x72b   : > { %6784 = vmatpush1.bf16.msra.mxu1 %v10347_v36  ;;  %v13429_v36 = vld [vmem:[%s13808_s10] sm:$0xff]  ;;  %s13812_s10 = sld [smem:[#allocation60_spill]] }
 0x72c   : > { %6890 = vmatpush1.bf16.msra.mxu0 %v10349_v38  ;;  %6785 = vmatprep.subr.bf16.mxu1 %v10356_v25  ;;  %v5177_v38 = vrot.slane %v13429_v36, %v13207_v23  ;;  %v5185_v25 = vrot.slane %v13429_v36, %v13217_v37  ;;  %v5189_v4 = vrot.slane %v13429_v36, %v13220_v40 }
 0x72d   : > { %6891 = vmatprep.subr.bf16.mxu0 %v10358_v15  ;;  %v5181_v15 = vrot.slane %v13429_v36, %v13210_v26 }
 0x72f   : > { %6786 = vmatpush1.bf16.msra.mxu1 %v10355_v51 }
 0x730   : > { %6892 = vmatpush1.bf16.msra.mxu0 %v10357_v53  ;;  %6787 = vmatprep.subr.bf16.mxu1 %v10364_v60 }
 0x731   : > { %6893 = vmatprep.subr.bf16.mxu0 %v10366_v43  ;;  %s13532_s8 = scalar_lea.hbm %s13812_s10, %s13526_s16 }
 0x733   : > { %6788 = vmatpush1.bf16.msra.mxu1 %v10363_v48 }
 0x734   : > { %6894 = vmatpush1.bf16.msra.mxu0 %v10365_v54  ;;  %6789 = vmatprep.subr.bf16.mxu1 %v10372_v3 }
 0x735   : > { %6895 = vmatprep.subr.bf16.mxu0 %v10374_v55 }
 0x737   : > { %6790 = vmatpush1.bf16.msra.mxu1 %v10371_v56 }
 0x738   : > { %6896 = vmatpush1.bf16.msra.mxu0 %v10373_v58  ;;  %7746 = vmatprep.subr.bf16.mxu1 %v11605_v6 }
 0x73a   : > { %6792 = vmatmul.mubr.bf16.vlgmr.msra.gmra.mrb[48].mxu1 %v13390_v28 }
 0x73b   : > { %6898 = vmatmul.mubr.bf16.vlgmr.msra.gmra.mrb[40].mxu0 %v13390_v28  ;;  %6801 = vmatprep.mubr.bf16.mxu1 %v13402_v61  ;;  %v11617_v28 = vld [vmem:[#allocation16 + $0x44] ss:$8 sps:$4 sm:$0xff]  }
 0x73c   : > { %6907 = vmatprep.mubr.bf16.mxu0 %v13402_v61  ;;  %7747 = vmatpush1.bf16.msra.mxu1 %v11603_v59  ;;  %v11620_v61 = vld [vmem:[#allocation16 + $0x54] ss:$8 sps:$4 sm:$0xff]  }
 0x73d   : > { %7748 = vmatprep.subr.bf16.mxu1 %v11608_v42 }
 0x740   : > { %7749 = vmatpush1.bf16.msra.mxu1 %v11606_v63 }
 0x741   : > { %7750 = vmatprep.subr.bf16.mxu1 %v11611_v7 }
 0x742   : > { %6802 = vmatmul.mubr.bf16.gmra.mrb[52].mxu1 %v13400_v49 }
 0x743   : > { %6908 = vmatmul.mubr.bf16.gmra.mrb[44].mxu0 %v13400_v49  ;;  %v11629_v49 = vld [vmem:[#allocation16 + $0x84] ss:$8 sps:$4 sm:$0xff]  }
 0x744   : > { %7751 = vmatpush1.bf16.msra.mxu1 %v11609_v9 }
 0x745   : > { %7752 = vmatprep.subr.bf16.mxu1 %v11614_v10 }
 0x748   : > { %7753 = vmatpush1.bf16.msra.mxu1 %v11612_v24 }
 0x749   : > { %7754 = vmatprep.subr.bf16.mxu1 %v11617_v28 }
 0x74c   : > { %7755 = vmatpush1.bf16.msra.mxu1 %v11615_v11 }
 0x74d   : > { %7756 = vmatprep.subr.bf16.mxu1 %v11620_v61 }
 0x750   : > { %7757 = vmatpush1.bf16.msra.mxu1 %v11618_v57 }
 0x751   : > { %7758 = vmatprep.subr.bf16.mxu1 %v11623_v22 }
 0x754   : > { %7759 = vmatpush1.bf16.msra.mxu1 %v11621_v39  ;;  %v11651_v39 = vld [vmem:[#allocation16 + $0x100] ss:$8 sps:$4 sm:$0xff]  }
 0x755   : > { %7760 = vmatprep.subr.bf16.mxu1 %v11626_v13 }
 0x758   : > { %7761 = vmatpush1.bf16.msra.mxu1 %v11624_v44 }
 0x759   : > { %7762 = vmatprep.subr.bf16.mxu1 %v11629_v49 }
 0x75c   : > { %7763 = vmatpush1.bf16.msra.mxu1 %v11627_v14 }
 0x75d   : > { %7764 = vmatprep.subr.bf16.mxu1 %v11632_v41  ;;  %v11656_v41 = vld [vmem:[#allocation16 + $0x114] ss:$8 sps:$4 sm:$0xff]  }
 0x760   : > { %7765 = vmatpush1.bf16.msra.mxu1 %v11630_v19 }
 0x761   : > { %7766 = vmatprep.subr.bf16.mxu1 %v11635_v35 }
 0x764   : > { %7767 = vmatpush1.bf16.msra.mxu1 %v11633_v12 }
 0x765   : > { %7768 = vmatprep.subr.bf16.mxu1 %v11638_v16 }
 0x768   : > { %7769 = vmatpush1.bf16.msra.mxu1 %v11636_v20 }
 0x769   : > { %7770 = vmatprep.subr.bf16.mxu1 %v11641_v27 }
 0x76c   : > { %7771 = vmatpush1.bf16.msra.mxu1 %v11639_v5 }
 0x76d   : > { %7772 = vmatprep.subr.bf16.mxu1 %v11644_v29 }
 0x770   : > { %7773 = vmatpush1.bf16.msra.mxu1 %v11642_v8 }
 0x771   : > { %7774 = vmatprep.subr.bf16.mxu1 %v11647_v30 }
 0x774   : > { %7775 = vmatpush1.bf16.msra.mxu1 %v11645_v32  ;;  %v11654_v32 = vld [vmem:[#allocation16 + $0x110] ss:$8 sps:$4 sm:$0xff]  }
 0x775   : > { %7776 = vmatprep.subr.bf16.mxu1 %v11650_v33 }
 0x778   : > { %7777 = vmatpush1.bf16.msra.mxu1 %v11648_v34 }
 0x779   : > { %7799 = vmatprep.subr.bf16.mxu1 %v11653_v31 }
 0x78c   : > { %v6581_v45 = vpop.f32.mrb[40].mxu1  ;;  %v6687_v46 = vpop.f32.mrb[32].mxu0 }
 0x78d   : > { %v10727_v50 = vadd.f32 %v6581_v45, %v5177_v38  ;;  %v10735_v51 = vadd.f32 %v6687_v46, %v5185_v25  ;;  %v6583_v53 = vpop.f32.mrb[41].mxu1  ;;  %v6689_v60 = vpop.f32.mrb[33].mxu0  ;;  %v11659_v46 = vld [vmem:[#allocation16 + $0x124] ss:$8 sps:$4 sm:$0xff]  }
 0x78e   : > { %v10728_v43 = vadd.f32 %v6583_v53, %v5181_v15  ;;  %v10736_v62 = vadd.f32 %v6689_v60, %v5189_v4  ;;  %v6585_v0 = vpop.f32.mrb[42].mxu1  ;;  %v6691_v1 = vpop.f32.mrb[34].mxu0 }
 0x78f   : > { %v10729_v2 = vadd.f32 %v6585_v0, %v5177_v38  ;;  %v10737_v48 = vadd.f32 %v6691_v1, %v5185_v25  ;;  %v6587_v54 = vpop.f32.mrb[43].mxu1  ;;  %v6693_v3 = vpop.f32.mrb[35].mxu0  ;;  %v6918_v58 = vmax.f32 %v10727_v50, 0.0  ;;  %v6920_v6 = vmax.f32 %v10735_v51, 0.0  ;;  %v11660_v0 = vld [vmem:[#allocation16 + $0x130] ss:$8 sps:$4 sm:$0xff]  }
 0x790   : > { %v10730_v55 = vadd.f32 %v6587_v54, %v5181_v15  ;;  %v10738_v56 = vadd.f32 %v6693_v3, %v5189_v4  ;;  %v6919_v63 = vmax.f32 %v10728_v43, 0.0  ;;  %v6921_v7 = vmax.f32 %v10736_v62, 0.0  ;;  %v11665_v1 = vld [vmem:[#allocation16 + $0x144] ss:$8 sps:$4 sm:$0xff]   ;;  %v11666_v54 = vld [vmem:[#allocation16 + $0x150] ss:$8 sps:$4 sm:$0xff]  }
 0x791   : > { %v6926_v59 = vmax.f32 %v10729_v2, 0.0  ;;  %v6928_v42 = vmax.f32 %v10737_v48, 0.0  ;;  %v11663_v2 = vld [vmem:[#allocation16 + $0x140] ss:$8 sps:$4 sm:$0xff]   ;;  %v11668_v48 = vld [vmem:[#allocation16 + $0x154] ss:$8 sps:$4 sm:$0xff]  }
 0x792   : > { %v6927_v9 = vmax.f32 %v10730_v55, 0.0  ;;  %v6929_v10 = vmax.f32 %v10738_v56, 0.0  ;;  %v11671_v3 = vld [vmem:[#allocation16 + $0x164] ss:$8 sps:$4 sm:$0xff]   ;;  %v11669_v55 = vld [vmem:[#allocation16 + $0x160] ss:$8 sps:$4 sm:$0xff]  }
 0x793   : > { %v6950_v24 = vpack.c.bf16 %v6926_v59, %v6918_v58  ;;  %v13439_v28 = vpack.c.bf16 %v6928_v42, %v6920_v6  ;;  %v11674_v56 = vld [vmem:[#allocation16 + $0x174] ss:$8 sps:$4 sm:$0xff]   ;;  %v11672_v58 = vld [vmem:[#allocation16 + $0x170] ss:$8 sps:$4 sm:$0xff]   ;;  %v11677_v6 = vld [vmem:[#allocation16 + $0x184] ss:$8 sps:$4 sm:$0xff]  }
 0x794   : > { %v6951_v11 = vpack.c.bf16 %v6927_v9, %v6919_v63  ;;  %v6953_v61 = vpack.c.bf16 %v6929_v10, %v6921_v7  ;;  %v6591_v57 = vpop.f32.mrb[44].mxu1  ;;  %v6697_v22 = vpop.f32.mrb[36].mxu0  ;;  %v11675_v59 = vld [vmem:[#allocation16 + $0x180] ss:$8 sps:$4 sm:$0xff]   ;;  %v11680_v42 = vld [vmem:[#allocation16 + $0x194] ss:$8 sps:$4 sm:$0xff]  }
 0x795   : > { %v10731_v13 = vadd.f32 %v6591_v57, %v5177_v38  ;;  %v10739_v44 = vadd.f32 %v6697_v22, %v5185_v25  ;;  %v6593_v49 = vpop.f32.mrb[45].mxu1  ;;  %v6699_v14 = vpop.f32.mrb[37].mxu0  ;;  %v11678_v63 = vld [vmem:[#allocation16 + $0x190] ss:$8 sps:$4 sm:$0xff]   ;;  %v11683_v7 = vld [vmem:[#allocation16 + $0x1a4] ss:$8 sps:$4 sm:$0xff]  }
 0x796   : > { %v10732_v19 = vadd.f32 %v6593_v49, %v5181_v15  ;;  %v10740_v35 = vadd.f32 %v6699_v14, %v5189_v4  ;;  %v6595_v12 = vpop.f32.mrb[46].mxu1  ;;  %v6701_v16 = vpop.f32.mrb[38].mxu0  ;;  %7778 = vmatprep.mubr.bf16.mxu1 %v6951_v11  ;;  %v11681_v9 = vld [vmem:[#allocation16 + $0x1a0] ss:$8 sps:$4 sm:$0xff]   ;;  %v11686_v10 = vld [vmem:[#allocation16 + $0x1b4] ss:$8 sps:$4 sm:$0xff]  }
 0x797   : > { %v10733_v20 = vadd.f32 %v6595_v12, %v5177_v38  ;;  %v10741_v27 = vadd.f32 %v6701_v16, %v5185_v25  ;;  %v6597_v5 = vpop.f32.mrb[47].mxu1  ;;  %v6703_v29 = vpop.f32.mrb[39].mxu0  ;;  %7779 = vmatmul.mubr.bf16.vlgmr.msra.gmra.mrb[56].mxu1 %v6950_v24  ;;  %v6934_v33 = vmax.f32 %v10731_v13, 0.0  ;;  %v6936_v34 = vmax.f32 %v10739_v44, 0.0  ;;  %v11684_v24 = vld [vmem:[#allocation16 + $0x1b0] ss:$8 sps:$4 sm:$0xff]  }
 0x798   : > { %v10734_v8 = vadd.f32 %v6597_v5, %v5181_v15  ;;  %v10742_v30 = vadd.f32 %v6703_v29, %v5189_v4  ;;  %7800 = vmatpush1.bf16.msra.mxu1 %v11651_v39  ;;  %v6935_v50 = vmax.f32 %v10732_v19, 0.0  ;;  %v6937_v51 = vmax.f32 %v10740_v35, 0.0  ;;  %v11657_v15 = vld [vmem:[#allocation16 + $0x120] ss:$8 sps:$4 sm:$0xff]   ;;  %v11662_v4 = vld [vmem:[#allocation16 + $0x134] ss:$8 sps:$4 sm:$0xff]  }
 0x799   : > { %v6942_v31 = vmax.f32 %v10733_v20, 0.0  ;;  %v6944_v45 = vmax.f32 %v10741_v27, 0.0  ;;  %7801 = vmatprep.subr.bf16.mxu1 %v11656_v41  ;;  %v11689_v11 = vld [vmem:[#allocation16 + $0x1c4] ss:$8 sps:$4 sm:$0xff]   ;;  %v11692_v57 = vld [vmem:[#allocation16 + $0x1d4] ss:$8 sps:$4 sm:$0xff]  }
 0x79a   : > { %v6943_v53 = vmax.f32 %v10734_v8, 0.0  ;;  %v6945_v60 = vmax.f32 %v10742_v30, 0.0  ;;  %v11690_v22 = vld [vmem:[#allocation16 + $0x1d0] ss:$8 sps:$4 sm:$0xff]   ;;  %v11695_v39 = vld [vmem:[#allocation16 + $0x1e4] ss:$8 sps:$4 sm:$0xff]  }
 0x79b   : > { %v6958_v43 = vpack.c.bf16 %v6942_v31, %v6934_v33  ;;  %v13441_v38 = vpack.c.bf16 %v6944_v45, %v6936_v34  ;;  %v11693_v13 = vld [vmem:[#allocation16 + $0x1e0] ss:$8 sps:$4 sm:$0xff]   ;;  %v11698_v44 = vld [vmem:[#allocation16 + $0x1f4] ss:$8 sps:$4 sm:$0xff]   ;;  %v11696_v49 = vld [vmem:[#allocation16 + $0x1f0] ss:$8 sps:$4 sm:$0xff]  }
 0x79c   : > { %v6959_v25 = vpack.c.bf16 %v6943_v53, %v6935_v50  ;;  %v13443_v62 = vpack.c.bf16 %v6945_v60, %v6937_v51  ;;  %7802 = vmatpush1.bf16.msra.mxu1 %v11654_v32  ;;  %v11701_v14 = vld [vmem:[#allocation16 + $0x204] ss:$8 sps:$4 sm:$0xff]   ;;  %v11699_v41 = vld [vmem:[#allocation16 + $0x200] ss:$8 sps:$4 sm:$0xff]   ;;  %v11704_v19 = vld [vmem:[#allocation16 + $0x214] ss:$8 sps:$4 sm:$0xff]  }
 0x79d   : > { %7803 = vmatprep.subr.bf16.mxu1 %v11659_v46  ;;  %v11702_v35 = vld [vmem:[#allocation16 + $0x210] ss:$8 sps:$4 sm:$0xff]   ;;  %v11707_v12 = vld [vmem:[#allocation16 + $0x224] ss:$8 sps:$4 sm:$0xff]   ;;  %v11705_v16 = vld [vmem:[#allocation16 + $0x220] ss:$8 sps:$4 sm:$0xff]  }
 0x79e   : > { %7788 = vmatprep.mubr.bf16.mxu1 %v6959_v25  ;;  %v11710_v20 = vld [vmem:[#allocation16 + $0x234] ss:$8 sps:$4 sm:$0xff]   ;;  %v11708_v27 = vld [vmem:[#allocation16 + $0x230] ss:$8 sps:$4 sm:$0xff]   ;;  %v11713_v8 = vld [vmem:[#allocation16 + $0x244] ss:$8 sps:$4 sm:$0xff]  }
 0x79f   : > { %7789 = vmatmul.mubr.bf16.gmra.mrb[60].mxu1 %v6958_v43  ;;  %v11795_v5 = vld [vmem:[#allocation17] ss:$16 sps:$4 sm:$0xff]   ;;  %v11797_v29 = vld [vmem:[#allocation17 + $0x4] ss:$16 sps:$4 sm:$0xff]  }
 0x7a0   : > { %7804 = vmatpush1.bf16.msra.mxu1 %v11657_v15  ;;  %7831 = vmatprep.mubr.bf16.mxu1 %v6953_v61  ;;  %v11687_v61 = vld [vmem:[#allocation16 + $0x1c0] ss:$8 sps:$4 sm:$0xff]   ;;  %v11800_v30 = vld [vmem:[#allocation17 + $0x24] ss:$16 sps:$4 sm:$0xff]   ;;  %v11714_v45 = vld [vmem:[#allocation16 + $0x250] ss:$8 sps:$4 sm:$0xff]  }
 0x7a1   : > { %7805 = vmatprep.subr.bf16.mxu1 %v11662_v4  ;;  %8384 = vmatprep.subr.bf16.mxu0 %v11797_v29  ;;  %v11711_v32 = vld [vmem:[#allocation16 + $0x240] ss:$8 sps:$4 sm:$0xff]   ;;  %v11803_v33 = vld [vmem:[#allocation17 + $0x44] ss:$16 sps:$4 sm:$0xff]   ;;  %v11720_v25 = vld [vmem:[#allocation16 + $0x270] ss:$8 sps:$4 sm:$0xff]  }
 0x7a2   : > { %8385 = vmatpush1.bf16.msra.mxu0 %v11795_v5  ;;  %v11716_v34 = vld [vmem:[#allocation16 + $0x254] ss:$8 sps:$4 sm:$0xff]   ;;  %v11801_v31 = vld [vmem:[#allocation17 + $0x40] ss:$16 sps:$4 sm:$0xff]   ;;  %v11719_v50 = vld [vmem:[#allocation16 + $0x264] ss:$8 sps:$4 sm:$0xff]  }
 0x7a3   : > { %8386 = vmatprep.subr.bf16.mxu0 %v11800_v30  ;;  %v11806_v46 = vld [vmem:[#allocation17 + $0x64] ss:$16 sps:$4 sm:$0xff]   ;;  %v11804_v51 = vld [vmem:[#allocation17 + $0x60] ss:$16 sps:$4 sm:$0xff]  }
 0x7a4   : > { %7806 = vmatpush1.bf16.msra.mxu1 %v11660_v0  ;;  %v11717_v53 = vld [vmem:[#allocation16 + $0x260] ss:$8 sps:$4 sm:$0xff]   ;;  %v11809_v60 = vld [vmem:[#allocation17 + $0x84] ss:$16 sps:$4 sm:$0xff]  }
 0x7a5   : > { %7807 = vmatprep.subr.bf16.mxu1 %v11665_v1  ;;  %v11722_v43 = vld [vmem:[#allocation16 + $0x274] ss:$8 sps:$4 sm:$0xff]   ;;  %v11725_v15 = vld [vmem:[#allocation16 + $0x284] ss:$8 sps:$4 sm:$0xff]   ;;  %v11810_v4 = vld [vmem:[#allocation17 + $0xa0] ss:$16 sps:$4 sm:$0xff]  }
 0x7a6   : > { %v11723_v0 = vld [vmem:[#allocation16 + $0x280] ss:$8 sps:$4 sm:$0xff]   ;;  %v11815_v1 = vld [vmem:[#allocation17 + $0xc4] ss:$16 sps:$4 sm:$0xff]  }
 0x7a8   : > { %7808 = vmatpush1.bf16.msra.mxu1 %v11663_v2  ;;  %v11728_v2 = vld [vmem:[#allocation16 + $0x294] ss:$8 sps:$4 sm:$0xff]  }
 0x7a9   : > { %7809 = vmatprep.subr.bf16.mxu1 %v11668_v48  ;;  %v11813_v48 = vld [vmem:[#allocation17 + $0xc0] ss:$16 sps:$4 sm:$0xff]  }
 0x7ac   : > { %7810 = vmatpush1.bf16.msra.mxu1 %v11666_v54  ;;  %v11726_v54 = vld [vmem:[#allocation16 + $0x290] ss:$8 sps:$4 sm:$0xff]  }
 0x7ad   : > { %7811 = vmatprep.subr.bf16.mxu1 %v11671_v3  ;;  %v11818_v3 = vld [vmem:[#allocation17 + $0xe4] ss:$16 sps:$4 sm:$0xff]  }
 0x7b0   : > { %7812 = vmatpush1.bf16.msra.mxu1 %v11669_v55  ;;  %v11731_v55 = vld [vmem:[#allocation16 + $0x2a4] ss:$8 sps:$4 sm:$0xff]  }
 0x7b1   : > { %7813 = vmatprep.subr.bf16.mxu1 %v11674_v56  ;;  %v11816_v56 = vld [vmem:[#allocation17 + $0xe0] ss:$16 sps:$4 sm:$0xff]  }
 0x7b4   : > { %7814 = vmatpush1.bf16.msra.mxu1 %v11672_v58  ;;  %v11729_v58 = vld [vmem:[#allocation16 + $0x2a0] ss:$8 sps:$4 sm:$0xff]  }
 0x7b5   : > { %7815 = vmatprep.subr.bf16.mxu1 %v11677_v6  ;;  %v11821_v6 = vld [vmem:[#allocation17 + $0x104] ss:$16 sps:$4 sm:$0xff]  }
 0x7b8   : > { %7816 = vmatpush1.bf16.msra.mxu1 %v11675_v59  ;;  %v11734_v59 = vld [vmem:[#allocation16 + $0x2b4] ss:$8 sps:$4 sm:$0xff]  }
 0x7b9   : > { %7817 = vmatprep.subr.bf16.mxu1 %v11680_v42  ;;  %v11819_v42 = vld [vmem:[#allocation17 + $0x100] ss:$16 sps:$4 sm:$0xff]  }
 0x7bc   : > { %7818 = vmatpush1.bf16.msra.mxu1 %v11678_v63  ;;  %v11732_v63 = vld [vmem:[#allocation16 + $0x2b0] ss:$8 sps:$4 sm:$0xff]  }
 0x7bd   : > { %7819 = vmatprep.subr.bf16.mxu1 %v11683_v7  ;;  %v11824_v7 = vld [vmem:[#allocation17 + $0x124] ss:$16 sps:$4 sm:$0xff]  }
 0x7c0   : > { %7820 = vmatpush1.bf16.msra.mxu1 %v11681_v9  ;;  %v11737_v9 = vld [vmem:[#allocation16 + $0x2c4] ss:$8 sps:$4 sm:$0xff]  }
 0x7c1   : > { %7821 = vmatprep.subr.bf16.mxu1 %v11686_v10  ;;  %v11822_v10 = vld [vmem:[#allocation17 + $0x120] ss:$16 sps:$4 sm:$0xff]  }
 0x7c4   : > { %7822 = vmatpush1.bf16.msra.mxu1 %v11684_v24  ;;  %v11735_v24 = vld [vmem:[#allocation16 + $0x2c0] ss:$8 sps:$4 sm:$0xff]  }
 0x7c5   : > { %7823 = vmatprep.subr.bf16.mxu1 %v11689_v11  ;;  %v11827_v11 = vld [vmem:[#allocation17 + $0x144] ss:$16 sps:$4 sm:$0xff]  }
 0x7c8   : > { %7824 = vmatpush1.bf16.msra.mxu1 %v11687_v61  ;;  %v11740_v61 = vld [vmem:[#allocation16 + $0x2d4] ss:$8 sps:$4 sm:$0xff]  }
 0x7c9   : > { %7825 = vmatprep.subr.bf16.mxu1 %v11692_v57  ;;  %v11825_v57 = vld [vmem:[#allocation17 + $0x140] ss:$16 sps:$4 sm:$0xff]  }
 0x7cc   : > { %7826 = vmatpush1.bf16.msra.mxu1 %v11690_v22  ;;  %v11738_v22 = vld [vmem:[#allocation16 + $0x2d0] ss:$8 sps:$4 sm:$0xff]  }
 0x7cd   : > { %7827 = vmatprep.subr.bf16.mxu1 %v11695_v39  ;;  %v11830_v39 = vld [vmem:[#allocation17 + $0x164] ss:$16 sps:$4 sm:$0xff]  }
 0x7d0   : > { %7828 = vmatpush1.bf16.msra.mxu1 %v11693_v13  ;;  %v11743_v13 = vld [vmem:[#allocation16 + $0x2e4] ss:$8 sps:$4 sm:$0xff]  }
 0x7d1   : > { %7829 = vmatprep.subr.bf16.mxu1 %v11698_v44  ;;  %v5193_v44 = vrot.slane %v13429_v36, %v1108_v17  ;;  %v11746_v17 = vld [vmem:[#allocation16 + $0x2f4] ss:$8 sps:$4 sm:$0xff]  }
 0x7d4   : > { %7830 = vmatpush1.bf16.msra.mxu1 %v11696_v49  ;;  %v5201_v49 = vrot.slane %v13429_v36, %v1116_v47 }
 0x7d5   : > { %7852 = vmatprep.subr.bf16.mxu1 %v11701_v14  ;;  %v5197_v14 = vrot.slane %v13429_v36, %v1112_v18 }
 0x7d7   : > { %7832 = vmatmul.mubr.bf16.vlgmr.msra.gmra.mrb[56].mxu1 %v13439_v28  ;;  %v11798_v28 = vld [vmem:[#allocation17 + $0x20] ss:$16 sps:$4 sm:$0xff]  }
 0x7d8   : > { %7841 = vmatprep.mubr.bf16.mxu1 %v13443_v62  ;;  %7853 = vmatpush1.bf16.msra.mxu1 %v11699_v41  ;;  %v11812_v62 = vld [vmem:[#allocation17 + $0xa4] ss:$16 sps:$4 sm:$0xff]   ;;  %v11828_v41 = vld [vmem:[#allocation17 + $0x160] ss:$16 sps:$4 sm:$0xff]  }
 0x7d9   : > { %7854 = vmatprep.subr.bf16.mxu1 %v11704_v19  ;;  %8387 = vmatpush1.bf16.msra.mxu0 %v11798_v28  ;;  %v13460_v19 = vrot.slane %v13429_v36, %v1120_v52  ;;  %v11744_v52 = vld [vmem:[#allocation16 + $0x2f0] ss:$8 sps:$4 sm:$0xff]  }
 0x7da   : > { %8388 = vmatprep.subr.bf16.mxu0 %v11803_v33 }
 0x7dc   : > { %7855 = vmatpush1.bf16.msra.mxu1 %v11702_v35  ;;  %v11741_v35 = vld [vmem:[#allocation16 + $0x2e0] ss:$8 sps:$4 sm:$0xff]  }
 0x7dd   : > { %7856 = vmatprep.subr.bf16.mxu1 %v11707_v12  ;;  %8389 = vmatpush1.bf16.msra.mxu0 %v11801_v31 }
 0x7de   : > { %8390 = vmatprep.subr.bf16.mxu0 %v11806_v46 }
 0x7df   : > { %7842 = vmatmul.mubr.bf16.gmra.mrb[60].mxu1 %v13441_v38  ;;  %v11807_v38 = vld [vmem:[#allocation17 + $0x80] ss:$16 sps:$4 sm:$0xff]  }
 0x7e0   : > { %7857 = vmatpush1.bf16.msra.mxu1 %v11705_v16 }
 0x7e1   : > { %7858 = vmatprep.subr.bf16.mxu1 %v11710_v20  ;;  %8391 = vmatpush1.bf16.msra.mxu0 %v11804_v51 }
 0x7e2   : > { %8392 = vmatprep.subr.bf16.mxu0 %v11809_v60 }
 0x7e4   : > { %7859 = vmatpush1.bf16.msra.mxu1 %v11708_v27 }
 0x7e5   : > { %7860 = vmatprep.subr.bf16.mxu1 %v11713_v8  ;;  %8393 = vmatpush1.bf16.msra.mxu0 %v11807_v38 }
 0x7e6   : > { %8394 = vmatprep.subr.bf16.mxu0 %v11812_v62 }
 0x7e8   : > { %7861 = vmatpush1.bf16.msra.mxu1 %v11711_v32 }
 0x7e9   : > { %7862 = vmatprep.subr.bf16.mxu1 %v11716_v34  ;;  %8395 = vmatpush1.bf16.msra.mxu0 %v11810_v4  ;;  %v11749_v34 = vld [vmem:[#allocation16 + $0x304] ss:$8 sps:$4 sm:$0xff]  }
 0x7ea   : > { %8396 = vmatprep.subr.bf16.mxu0 %v11815_v1 }
 0x7ec   : > { %7863 = vmatpush1.bf16.msra.mxu1 %v11714_v45 }
 0x7ed   : > { %7864 = vmatprep.subr.bf16.mxu1 %v11719_v50  ;;  %8397 = vmatpush1.bf16.msra.mxu0 %v11813_v48 }
 0x7ee   : > { %8398 = vmatprep.subr.bf16.mxu0 %v11818_v3  ;;  %v11752_v3 = vld [vmem:[#allocation16 + $0x314] ss:$8 sps:$4 sm:$0xff]  }
 0x7f0   : > { %7865 = vmatpush1.bf16.msra.mxu1 %v11717_v53 }
 0x7f1   : > { %7866 = vmatprep.subr.bf16.mxu1 %v11722_v43  ;;  %8399 = vmatpush1.bf16.msra.mxu0 %v11816_v56 }
 0x7f2   : > { %8400 = vmatprep.subr.bf16.mxu0 %v11821_v6 }
 0x7f4   : > { %7867 = vmatpush1.bf16.msra.mxu1 %v11720_v25 }
 0x7f5   : > { %7868 = vmatprep.subr.bf16.mxu1 %v11725_v15  ;;  %8401 = vmatpush1.bf16.msra.mxu0 %v11819_v42 }
 0x7f6   : > { %8402 = vmatprep.subr.bf16.mxu0 %v11824_v7 }
 0x7f8   : > { %7869 = vmatpush1.bf16.msra.mxu1 %v11723_v0  ;;  %v11747_v0 = vld [vmem:[#allocation16 + $0x300] ss:$8 sps:$4 sm:$0xff]  }
 0x7f9   : > { %7870 = vmatprep.subr.bf16.mxu1 %v11728_v2  ;;  %8403 = vmatpush1.bf16.msra.mxu0 %v11822_v10 }
 0x7fa   : > { %8404 = vmatprep.subr.bf16.mxu0 %v11827_v11  ;;  %v11750_v11 = vld [vmem:[#allocation16 + $0x310] ss:$8 sps:$4 sm:$0xff]  }
 0x7fc   : > { %7871 = vmatpush1.bf16.msra.mxu1 %v11726_v54 }
 0x7fd   : > { %7872 = vmatprep.subr.bf16.mxu1 %v11731_v55  ;;  %8405 = vmatpush1.bf16.msra.mxu0 %v11825_v57 }
 0x7fe   : > { %8406 = vmatprep.subr.bf16.mxu0 %v11830_v39  ;;  %v11755_v39 = vld [vmem:[#allocation16 + $0x324] ss:$8 sps:$4 sm:$0xff]  }
 0x800   : > { %7873 = vmatpush1.bf16.msra.mxu1 %v11729_v58 }
 0x801   : > { %7874 = vmatprep.subr.bf16.mxu1 %v11734_v59  ;;  %8407 = vmatpush1.bf16.msra.mxu0 %v11828_v41 }
 0x804   : > { %7875 = vmatpush1.bf16.msra.mxu1 %v11732_v63 }
 0x805   : > { %7876 = vmatprep.subr.bf16.mxu1 %v11737_v9 }
 0x808   : > { %7877 = vmatpush1.bf16.msra.mxu1 %v11735_v24 }
 0x809   : > { %7878 = vmatprep.subr.bf16.mxu1 %v11740_v61 }
 0x80c   : > { %7879 = vmatpush1.bf16.msra.mxu1 %v11738_v22 }
 0x80d   : > { %v6793_v12 = vpop.f32.mrb[48].mxu1  ;;  %7880 = vmatprep.subr.bf16.mxu1 %v11743_v13 }
 0x80e   : > { %v10743_v16 = vadd.f32 %v6793_v12, %v5193_v44  ;;  %v6899_v20 = vpop.f32.mrb[40].mxu0  ;;  %v6795_v47 = vpop.f32.mrb[49].mxu1 }
 0x80f   : > { %v10751_v27 = vadd.f32 %v6899_v20, %v5201_v49  ;;  %v10744_v5 = vadd.f32 %v6795_v47, %v5197_v14  ;;  %v6901_v29 = vpop.f32.mrb[41].mxu0  ;;  %v6797_v18 = vpop.f32.mrb[50].mxu1 }
 0x810   : > { %v10752_v8 = vadd.f32 %v6901_v29, %v13460_v19  ;;  %v10745_v30 = vadd.f32 %v6797_v18, %v5193_v44  ;;  %v6903_v21 = vpop.f32.mrb[42].mxu0  ;;  %v6799_v28 = vpop.f32.mrb[51].mxu1  ;;  %7881 = vmatpush1.bf16.msra.mxu1 %v11741_v35  ;;  %v6922_v31 = vmax.f32 %v10743_v16, 0.0  ;;  %v11759_v29 = vld [vmem:[#allocation16 + $0x340] ss:$8 sps:$4 sm:$0xff]  }
 0x811   : > { %v10753_v36 = vadd.f32 %v6903_v21, %v5201_v49  ;;  %v10746_v32 = vadd.f32 %v6799_v28, %v5197_v14  ;;  %v6905_v33 = vpop.f32.mrb[43].mxu0  ;;  %7882 = vmatprep.subr.bf16.mxu1 %v11746_v17  ;;  %v6924_v50 = vmax.f32 %v10751_v27, 0.0  ;;  %v6923_v51 = vmax.f32 %v10744_v5, 0.0  ;;  %v11758_v27 = vld [vmem:[#allocation16 + $0x334] ss:$8 sps:$4 sm:$0xff]  }
 0x812   : > { %v6930_v45 = vmax.f32 %v10745_v30, 0.0  ;;  %v10754_v46 = vadd.f32 %v6905_v33, %v13460_v19  ;;  %v6925_v43 = vmax.f32 %v10752_v8, 0.0  ;;  %v11761_v5 = vld [vmem:[#allocation16 + $0x344] ss:$8 sps:$4 sm:$0xff]   ;;  %v11764_v18 = vld [vmem:[#allocation16 + $0x354] ss:$8 sps:$4 sm:$0xff]  }
 0x813   : > { %v6932_v53 = vmax.f32 %v10753_v36, 0.0  ;;  %v6931_v60 = vmax.f32 %v10746_v32, 0.0  ;;  %v11762_v8 = vld [vmem:[#allocation16 + $0x350] ss:$8 sps:$4 sm:$0xff]   ;;  %v11767_v30 = vld [vmem:[#allocation16 + $0x364] ss:$8 sps:$4 sm:$0xff]  }
 0x814   : > { %v6954_v38 = vpack.c.bf16 %v6930_v45, %v6922_v31  ;;  %v6933_v25 = vmax.f32 %v10754_v46, 0.0  ;;  %7883 = vmatpush1.bf16.msra.mxu1 %v11744_v52  ;;  %v11765_v21 = vld [vmem:[#allocation16 + $0x360] ss:$8 sps:$4 sm:$0xff]   ;;  %v11770_v28 = vld [vmem:[#allocation16 + $0x374] ss:$8 sps:$4 sm:$0xff]  }
 0x815   : > { %v13464_v62 = vpack.c.bf16 %v6932_v53, %v6924_v50  ;;  %v6955_v15 = vpack.c.bf16 %v6931_v60, %v6923_v51  ;;  %v6803_v4 = vpop.f32.mrb[52].mxu1  ;;  %7905 = vmatprep.subr.bf16.mxu1 %v11749_v34  ;;  %v11768_v52 = vld [vmem:[#allocation16 + $0x370] ss:$8 sps:$4 sm:$0xff]   ;;  %v11773_v36 = vld [vmem:[#allocation16 + $0x384] ss:$8 sps:$4 sm:$0xff]  }
 0x816   : > { %v6957_v1 = vpack.c.bf16 %v6933_v25, %v6925_v43  ;;  %v10747_v2 = vadd.f32 %v6803_v4, %v5193_v44  ;;  %v6909_v48 = vpop.f32.mrb[44].mxu0  ;;  %v6805_v54 = vpop.f32.mrb[53].mxu1  ;;  %v11771_v32 = vld [vmem:[#allocation16 + $0x380] ss:$8 sps:$4 sm:$0xff]   ;;  %v11776_v33 = vld [vmem:[#allocation16 + $0x394] ss:$8 sps:$4 sm:$0xff]  }
 0x817   : > { %v10755_v55 = vadd.f32 %v6909_v48, %v5201_v49  ;;  %v10748_v56 = vadd.f32 %v6805_v54, %v5197_v14  ;;  %v6911_v58 = vpop.f32.mrb[45].mxu0  ;;  %v6807_v6 = vpop.f32.mrb[54].mxu1  ;;  %7884 = vmatprep.mubr.bf16.mxu1 %v6955_v15  ;;  %v11774_v34 = vld [vmem:[#allocation16 + $0x390] ss:$8 sps:$4 sm:$0xff]   ;;  %v11779_v31 = vld [vmem:[#allocation16 + $0x3a4] ss:$8 sps:$4 sm:$0xff]  }
 0x818   : > { %v10756_v59 = vadd.f32 %v6911_v58, %v13460_v19  ;;  %v10749_v42 = vadd.f32 %v6807_v6, %v5193_v44  ;;  %v6913_v63 = vpop.f32.mrb[46].mxu0  ;;  %v6809_v7 = vpop.f32.mrb[55].mxu1  ;;  %7885 = vmatmul.mubr.bf16.vlgmr.msra.gmra.mrb[56].mxu1 %v6954_v38  ;;  %v6938_v61 = vmax.f32 %v10747_v2, 0.0  ;;  %v11777_v45 = vld [vmem:[#allocation16 + $0x3a0] ss:$8 sps:$4 sm:$0xff]  }
 0x819   : > { %v10757_v9 = vadd.f32 %v6913_v63, %v5201_v49  ;;  %v10750_v10 = vadd.f32 %v6809_v7, %v5197_v14  ;;  %v6915_v24 = vpop.f32.mrb[47].mxu0  ;;  %7906 = vmatpush1.bf16.msra.mxu1 %v11747_v0  ;;  %v6940_v13 = vmax.f32 %v10755_v55, 0.0  ;;  %v6939_v41 = vmax.f32 %v10748_v56, 0.0  ;;  %v11753_v14 = vld [vmem:[#allocation16 + $0x320] ss:$8 sps:$4 sm:$0xff]  }
 0x81a   : > { %v6946_v57 = vmax.f32 %v10749_v42, 0.0  ;;  %v10758_v22 = vadd.f32 %v6915_v24, %v13460_v19  ;;  %7907 = vmatprep.subr.bf16.mxu1 %v11752_v3  ;;  %v6941_v17 = vmax.f32 %v10756_v59, 0.0  ;;  %v11756_v19 = vld [vmem:[#allocation16 + $0x330] ss:$8 sps:$4 sm:$0xff]   ;;  %v11782_v46 = vld [vmem:[#allocation16 + $0x3b4] ss:$8 sps:$4 sm:$0xff]  }
 0x81b   : > { %v6948_v35 = vmax.f32 %v10757_v9, 0.0  ;;  %v6947_v12 = vmax.f32 %v10750_v10, 0.0  ;;  %v11780_v50 = vld [vmem:[#allocation16 + $0x3b0] ss:$8 sps:$4 sm:$0xff]   ;;  %v11785_v51 = vld [vmem:[#allocation16 + $0x3c4] ss:$8 sps:$4 sm:$0xff]  }
 0x81c   : > { %v6962_v44 = vpack.c.bf16 %v6946_v57, %v6938_v61  ;;  %v6949_v16 = vmax.f32 %v10758_v22, 0.0  ;;  %v11783_v53 = vld [vmem:[#allocation16 + $0x3c0] ss:$8 sps:$4 sm:$0xff]   ;;  %v11788_v60 = vld [vmem:[#allocation16 + $0x3d4] ss:$8 sps:$4 sm:$0xff]  }
 0x81d   : > { %v13468_v20 = vpack.c.bf16 %v6948_v35, %v6940_v13  ;;  %v6963_v49 = vpack.c.bf16 %v6947_v12, %v6939_v41  ;;  %7908 = vmatpush1.bf16.msra.mxu1 %v11750_v11  ;;  %v11786_v43 = vld [vmem:[#allocation16 + $0x3d0] ss:$8 sps:$4 sm:$0xff]   ;;  %v11791_v38 = vld [vmem:[#allocation16 + $0x3e4] ss:$8 sps:$4 sm:$0xff]   ;;  %v11789_v25 = vld [vmem:[#allocation16 + $0x3e0] ss:$8 sps:$4 sm:$0xff]  }
 0x81e   : > { %v6965_v47 = vpack.c.bf16 %v6949_v16, %v6941_v17  ;;  %7909 = vmatprep.subr.bf16.mxu1 %v11755_v39  ;;  %v11794_v15 = vld [vmem:[#allocation16 + $0x3f4] ss:$8 sps:$4 sm:$0xff]   ;;  %v11792_v4 = vld [vmem:[#allocation16 + $0x3f0] ss:$8 sps:$4 sm:$0xff]  }
 0x81f   : > { %7894 = vmatprep.mubr.bf16.mxu1 %v6963_v49  ;;  %v11833_v0 = vld [vmem:[#allocation17 + $0x184] ss:$16 sps:$4 sm:$0xff]   ;;  %v11834_v48 = vld [vmem:[#allocation17 + $0x1a0] ss:$16 sps:$4 sm:$0xff]   ;;  %v7094_v58 = vld [vmem:[%s13809_s27] sm:$0x3] }
 0x820   : > { %7895 = vmatmul.mubr.bf16.gmra.mrb[60].mxu1 %v6962_v44  ;;  %8408 = vmatprep.subr.bf16.mxu0 %v11833_v0  ;;  %v11836_v2 = vld [vmem:[#allocation17 + $0x1a4] ss:$16 sps:$4 sm:$0xff]   ;;  %v11837_v3 = vld [vmem:[#allocation17 + $0x1c0] ss:$16 sps:$4 sm:$0xff]   ;;  %v7099_v6 = vrot.slane %v7094_v58, %v13207_v23  ;;  %v7103_v59 = vrot.slane %v7094_v58, %v13210_v26  ;;  %v11873_v0 = vld [vmem:[#allocation17 + $0x148] ss:$16 sps:$4 sm:$0xff]  }
 0x821   : > { %7910 = vmatpush1.bf16.msra.mxu1 %v11753_v14  ;;  %7937 = vmatprep.mubr.bf16.mxu1 %v6957_v1  ;;  %v11831_v1 = vld [vmem:[#allocation17 + $0x180] ss:$16 sps:$4 sm:$0xff]   ;;  %v11839_v54 = vld [vmem:[#allocation17 + $0x1c4] ss:$16 sps:$4 sm:$0xff]   ;;  %v11890_v58 = vld [vmem:[#allocation17 + $0x1ec] ss:$16 sps:$4 sm:$0xff]  }
 0x822   : > { %7911 = vmatprep.subr.bf16.mxu1 %v11758_v27  ;;  %8409 = vmatpush1.bf16.msra.mxu0 %v11831_v1  ;;  %v11842_v55 = vld [vmem:[#allocation17 + $0x1e4] ss:$16 sps:$4 sm:$0xff]   ;;  %v11840_v56 = vld [vmem:[#allocation17 + $0x1e0] ss:$16 sps:$4 sm:$0xff]   ;;  %v11843_v27 = vld [vmem:[#allocation17 + $0x8] ss:$16 sps:$4 sm:$0xff]  }
 0x823   : > { %8410 = vmatprep.subr.bf16.mxu0 %v11836_v2  ;;  %v11878_v1 = vld [vmem:[#allocation17 + $0x16c] ss:$16 sps:$4 sm:$0xff]   ;;  %v11876_v2 = vld [vmem:[#allocation17 + $0x168] ss:$16 sps:$4 sm:$0xff]  }
 0x825   : > { %7912 = vmatpush1.bf16.msra.mxu1 %v11756_v19  ;;  %v11848_v19 = vld [vmem:[#allocation17 + $0x2c] ss:$16 sps:$4 sm:$0xff]  }
 0x826   : > { %7913 = vmatprep.subr.bf16.mxu1 %v11761_v5  ;;  %8411 = vmatpush1.bf16.msra.mxu0 %v11834_v48  ;;  %v11881_v48 = vld [vmem:[#allocation17 + $0x18c] ss:$16 sps:$4 sm:$0xff]  }
 0x827   : > { %8412 = vmatprep.subr.bf16.mxu0 %v11839_v54  ;;  %v11879_v54 = vld [vmem:[#allocation17 + $0x188] ss:$16 sps:$4 sm:$0xff]  }
 0x829   : > { %7914 = vmatpush1.bf16.msra.mxu1 %v11759_v29  ;;  %v11846_v29 = vld [vmem:[#allocation17 + $0x28] ss:$16 sps:$4 sm:$0xff]  }
 0x82a   : > { %7915 = vmatprep.subr.bf16.mxu1 %v11764_v18  ;;  %8413 = vmatpush1.bf16.msra.mxu0 %v11837_v3  ;;  %v11884_v3 = vld [vmem:[#allocation17 + $0x1ac] ss:$16 sps:$4 sm:$0xff]  }
 0x82b   : > { %8414 = vmatprep.subr.bf16.mxu0 %v11842_v55  ;;  %v11882_v55 = vld [vmem:[#allocation17 + $0x1a8] ss:$16 sps:$4 sm:$0xff]  }
 0x82d   : > { %7916 = vmatpush1.bf16.msra.mxu1 %v11762_v8  ;;  %v11851_v8 = vld [vmem:[#allocation17 + $0x4c] ss:$16 sps:$4 sm:$0xff]  }
 0x82e   : > { %7917 = vmatprep.subr.bf16.mxu1 %v11767_v30  ;;  %8415 = vmatpush1.bf16.msra.mxu0 %v11840_v56  ;;  %v11887_v56 = vld [vmem:[#allocation17 + $0x1cc] ss:$16 sps:$4 sm:$0xff]  }
 0x831   : > { %7918 = vmatpush1.bf16.msra.mxu1 %v11765_v21 }
 0x832   : > { %7919 = vmatprep.subr.bf16.mxu1 %v11770_v28 }
 0x835   : > { %7920 = vmatpush1.bf16.msra.mxu1 %v11768_v52 }
 0x836   : > { %7921 = vmatprep.subr.bf16.mxu1 %v11773_v36  ;;  %v11849_v36 = vld [vmem:[#allocation17 + $0x48] ss:$16 sps:$4 sm:$0xff]  }
 0x839   : > { %7922 = vmatpush1.bf16.msra.mxu1 %v11771_v32  ;;  %v11854_v32 = vld [vmem:[#allocation17 + $0x6c] ss:$16 sps:$4 sm:$0xff]  }
 0x83a   : > { %7923 = vmatprep.subr.bf16.mxu1 %v11776_v33  ;;  %v11852_v33 = vld [vmem:[#allocation17 + $0x68] ss:$16 sps:$4 sm:$0xff]  }
 0x83d   : > { %7924 = vmatpush1.bf16.msra.mxu1 %v11774_v34  ;;  %v11857_v34 = vld [vmem:[#allocation17 + $0x8c] ss:$16 sps:$4 sm:$0xff]  }
 0x83e   : > { %7925 = vmatprep.subr.bf16.mxu1 %v11779_v31  ;;  %v11855_v31 = vld [vmem:[#allocation17 + $0x88] ss:$16 sps:$4 sm:$0xff]  }
 0x841   : > { %7926 = vmatpush1.bf16.msra.mxu1 %v11777_v45  ;;  %v11860_v45 = vld [vmem:[#allocation17 + $0xac] ss:$16 sps:$4 sm:$0xff]  }
 0x842   : > { %7927 = vmatprep.subr.bf16.mxu1 %v11782_v46  ;;  %v11858_v46 = vld [vmem:[#allocation17 + $0xa8] ss:$16 sps:$4 sm:$0xff]  }
 0x845   : > { %7928 = vmatpush1.bf16.msra.mxu1 %v11780_v50  ;;  %v11863_v50 = vld [vmem:[#allocation17 + $0xcc] ss:$16 sps:$4 sm:$0xff]  }
 0x846   : > { %7929 = vmatprep.subr.bf16.mxu1 %v11785_v51  ;;  %v11861_v51 = vld [vmem:[#allocation17 + $0xc8] ss:$16 sps:$4 sm:$0xff]  }
 0x849   : > { %7930 = vmatpush1.bf16.msra.mxu1 %v11783_v53  ;;  %v11866_v53 = vld [vmem:[#allocation17 + $0xec] ss:$16 sps:$4 sm:$0xff]  }
 0x84a   : > { %7931 = vmatprep.subr.bf16.mxu1 %v11788_v60  ;;  %v11864_v60 = vld [vmem:[#allocation17 + $0xe8] ss:$16 sps:$4 sm:$0xff]  }
 0x84d   : > { %7932 = vmatpush1.bf16.msra.mxu1 %v11786_v43  ;;  %v11869_v43 = vld [vmem:[#allocation17 + $0x10c] ss:$16 sps:$4 sm:$0xff]  }
 0x84e   : > { %7933 = vmatprep.subr.bf16.mxu1 %v11791_v38  ;;  %v11867_v38 = vld [vmem:[#allocation17 + $0x108] ss:$16 sps:$4 sm:$0xff]  }
 0x851   : > { %7934 = vmatpush1.bf16.msra.mxu1 %v11789_v25  ;;  %v11872_v25 = vld [vmem:[#allocation17 + $0x12c] ss:$16 sps:$4 sm:$0xff]  }
 0x852   : > { %7935 = vmatprep.subr.bf16.mxu1 %v11794_v15  ;;  %v11870_v15 = vld [vmem:[#allocation17 + $0x128] ss:$16 sps:$4 sm:$0xff]  }
 0x855   : > { %7936 = vmatpush1.bf16.msra.mxu1 %v11792_v4  ;;  %v11875_v4 = vld [vmem:[#allocation17 + $0x14c] ss:$16 sps:$4 sm:$0xff]  }
 0x858   : > { %7938 = vmatmul.mubr.bf16.vlgmr.msra.gmra.mrb[56].mxu1 %v13464_v62  ;;  %v11845_v62 = vld [vmem:[#allocation17 + $0xc] ss:$16 sps:$4 sm:$0xff]  }
 0x859   : > { %7947 = vmatprep.mubr.bf16.mxu1 %v6965_v47  ;;  %8437 = vmatprep.subr.bf16.mxu0 %v11845_v62  ;;  %v11885_v62 = vld [vmem:[#allocation17 + $0x1c8] ss:$16 sps:$4 sm:$0xff]  }
 0x860   : > { %7948 = vmatmul.mubr.bf16.gmra.mrb[60].mxu1 %v13468_v20 }
 0x92b   : > { %v7939_v42 = vpop.f32.mrb[56].mxu1 }
 0x92c   : > { %v10759_v63 = vadd.f32 %v7939_v42, %v7099_v6  ;;  %v7941_v7 = vpop.f32.mrb[57].mxu1  ;;  %v11891_v42 = vld [vmem:[#allocation19] ss:$8 sps:$4 sm:$0xff]  }
 0x92d   : > { %v10760_v9 = vadd.f32 %v7941_v7, %v7103_v59  ;;  %v7943_v10 = vpop.f32.mrb[58].mxu1  ;;  %v11894_v7 = vld [vmem:[#allocation19 + $0x10] ss:$8 sps:$4 sm:$0xff]  }
 0x92e   : > { %12011 = vtanh.f32 %v10759_v63  ;;  %v10761_v24 = vadd.f32 %v7943_v10, %v7099_v6  ;;  %v7945_v11 = vpop.f32.mrb[59].mxu1  ;;  %v11896_v63 = vld [vmem:[#allocation19 + $0x14] ss:$8 sps:$4 sm:$0xff]   ;;  %v11897_v10 = vld [vmem:[#allocation19 + $0x20] ss:$8 sps:$4 sm:$0xff]  }
 0x92f   : > { %12013 = vtanh.f32 %v10760_v9  ;;  %v10762_v61 = vadd.f32 %v7945_v11, %v7103_v59  ;;  %v11899_v9 = vld [vmem:[#allocation19 + $0x24] ss:$8 sps:$4 sm:$0xff]   ;;  %v11900_v11 = vld [vmem:[#allocation19 + $0x30] ss:$8 sps:$4 sm:$0xff]  }
 0x930   : > { %12015 = vtanh.f32 %v10761_v24  ;;  %v11902_v24 = vld [vmem:[#allocation19 + $0x34] ss:$8 sps:$4 sm:$0xff]  }
 0x931   : > { %12017 = vtanh.f32 %v10762_v61  ;;  %v11905_v61 = vld [vmem:[#allocation19 + $0x44] ss:$8 sps:$4 sm:$0xff]  }
 0x933   : > { %v7949_v57 = vpop.f32.mrb[60].mxu1 }
 0x934   : > { %v10763_v22 = vadd.f32 %v7949_v57, %v7099_v6  ;;  %v7951_v39 = vpop.f32.mrb[61].mxu1  ;;  %v11903_v57 = vld [vmem:[#allocation19 + $0x40] ss:$8 sps:$4 sm:$0xff]  }
 0x935   : > { %v10764_v13 = vadd.f32 %v7951_v39, %v7103_v59  ;;  %v7953_v41 = vpop.f32.mrb[62].mxu1  ;;  %v11906_v39 = vld [vmem:[#allocation19 + $0x50] ss:$8 sps:$4 sm:$0xff]  }
 0x936   : > { %12019 = vtanh.f32 %v10763_v22  ;;  %v10765_v35 = vadd.f32 %v7953_v41, %v7099_v6  ;;  %v7955_v12 = vpop.f32.mrb[63].mxu1  ;;  %v11888_v6 = vld [vmem:[#allocation17 + $0x1e8] ss:$16 sps:$4 sm:$0xff]   ;;  %v11908_v22 = vld [vmem:[#allocation19 + $0x54] ss:$8 sps:$4 sm:$0xff]  }
 0x937   : > { %12021 = vtanh.f32 %v10764_v13  ;;  %v10766_v17 = vadd.f32 %v7955_v12, %v7103_v59  ;;  %v11893_v59 = vld [vmem:[#allocation19 + $0x4] ss:$8 sps:$4 sm:$0xff]   ;;  %v11909_v41 = vld [vmem:[#allocation19 + $0x60] ss:$8 sps:$4 sm:$0xff]   ;;  %v11912_v12 = vld [vmem:[#allocation19 + $0x70] ss:$8 sps:$4 sm:$0xff]  }
 0x938   : > { %v12012_v44 = vpop.eup %12011  ;;  %12023 = vtanh.f32 %v10765_v35  ;;  %v11911_v13 = vld [vmem:[#allocation19 + $0x64] ss:$8 sps:$4 sm:$0xff]   ;;  %v11914_v35 = vld [vmem:[#allocation19 + $0x74] ss:$8 sps:$4 sm:$0xff]  }
 0x939   : > { %v12014_v16 = vpop.eup %12013  ;;  %7966 = vst [vmem:[%s13479_s28] sm:$0xff] %v12012_v44  ;;  %12025 = vtanh.f32 %v10766_v17  ;;  %v11917_v17 = vld [vmem:[#allocation19 + $0x84] ss:$8 sps:$4 sm:$0xff]  }
 0x93a   : > { %v12016_v20 = vpop.eup %12015  ;;  %7967 = vst [vmem:[%s13479_s28 + $0x8] sm:$0xff] %v12014_v16 }
 0x93b   : > { %v12018_v49 = vpop.eup %12017  ;;  %7968 = vst [vmem:[%s13479_s28 + $0x10] sm:$0xff] %v12016_v20  ;;  %v13484_v14 = vpack.c.bf16 %v12016_v20, %v12012_v44  ;;  %v11915_v44 = vld [vmem:[#allocation19 + $0x80] ss:$8 sps:$4 sm:$0xff]   ;;  %v11918_v20 = vld [vmem:[#allocation19 + $0x90] ss:$8 sps:$4 sm:$0xff]  }
 0x93c   : > { %7969 = vst [vmem:[%s13479_s28 + $0x18] sm:$0xff] %v12018_v49  ;;  %v7975_v47 = vpack.c.bf16 %v12018_v49, %v12014_v16  ;;  %v11920_v16 = vld [vmem:[#allocation19 + $0x94] ss:$8 sps:$4 sm:$0xff]   ;;  %v11923_v49 = vld [vmem:[#allocation19 + $0xa4] ss:$8 sps:$4 sm:$0xff]  }
 0x93e   : > { %8416 = vmatprep.mubr.bf16.mxu0 %v7975_v47 }
 0x93f   : > { %8417 = vmatmul.mubr.bf16.vlgmr.msra.gmra.mrb[48].mxu0 %v13484_v14 }
 0x940   : > { %v12020_v5 = vpop.eup %12019  ;;  %8438 = vmatpush1.bf16.msra.mxu0 %v11843_v27  ;;  %v11924_v27 = vld [vmem:[#allocation19 + $0xb0] ss:$8 sps:$4 sm:$0xff]  }
 0x941   : > { %v12022_v18 = vpop.eup %12021  ;;  %7970 = vst [vmem:[%s13479_s28 + $0x20] sm:$0xff] %v12020_v5  ;;  %8439 = vmatprep.subr.bf16.mxu0 %v11848_v19  ;;  %v11929_v19 = vld [vmem:[#allocation19 + $0xc4] ss:$8 sps:$4 sm:$0xff]  }
 0x942   : > { %v12024_v30 = vpop.eup %12023  ;;  %7971 = vst [vmem:[%s13479_s28 + $0x28] sm:$0xff] %v12022_v18 }
 0x943   : > { %v12026_v21 = vpop.eup %12025  ;;  %7972 = vst [vmem:[%s13479_s28 + $0x30] sm:$0xff] %v12024_v30  ;;  %v13491_v28 = vpack.c.bf16 %v12024_v30, %v12020_v5  ;;  %v11927_v5 = vld [vmem:[#allocation19 + $0xc0] ss:$8 sps:$4 sm:$0xff]  }
 0x944   : > { %7973 = vst [vmem:[%s13479_s28 + $0x38] sm:$0xff] %v12026_v21  ;;  %8440 = vmatpush1.bf16.msra.mxu0 %v11846_v29  ;;  %v13494_v52 = vpack.c.bf16 %v12026_v21, %v12022_v18  ;;  %v11932_v29 = vld [vmem:[#allocation19 + $0xd4] ss:$8 sps:$4 sm:$0xff]   ;;  %v11930_v18 = vld [vmem:[#allocation19 + $0xd0] ss:$8 sps:$4 sm:$0xff]  }
 0x945   : > { %8441 = vmatprep.subr.bf16.mxu0 %v11851_v8  ;;  %v11935_v8 = vld [vmem:[#allocation19 + $0xe4] ss:$8 sps:$4 sm:$0xff]   ;;  %v11933_v30 = vld [vmem:[#allocation19 + $0xe0] ss:$8 sps:$4 sm:$0xff]   ;;  %v11938_v21 = vld [vmem:[#allocation19 + $0xf4] ss:$8 sps:$4 sm:$0xff]  }
 0x946   : > { %8426 = vmatprep.mubr.bf16.mxu0 %v13494_v52 }
 0x947   : > { %8427 = vmatmul.mubr.bf16.gmra.mrb[52].mxu0 %v13491_v28 }
 0x948   : > { %8442 = vmatpush1.bf16.msra.mxu0 %v11849_v36  ;;  %8469 = vmatprep.mubr.bf16.mxu0 %v7975_v47  ;;  %v11926_v47 = vld [vmem:[#allocation19 + $0xb4] ss:$8 sps:$4 sm:$0xff]   ;;  %v11987_v36 = vld [vmem:[#allocation20 + $0x40] sm:$0xff]  }
 0x949   : > { %8443 = vmatprep.subr.bf16.mxu0 %v11854_v32  ;;  %v11988_v32 = vld [vmem:[#allocation20] sm:$0xff]   ;;  %10675 = vmatprep.subr.bf16.mxu1 %v11987_v36  ;;  %v11966_v36 = vld [vmem:[#allocation19 + $0x190] ss:$8 sps:$4 sm:$0xff]  }
 0x94a   : > { %10676 = vmatpush3.bf16.msra.mxu1 %v11988_v32  ;;  %v11971_v32 = vld [vmem:[#allocation19 + $0x1a4] ss:$8 sps:$4 sm:$0xff]  }
 0x94c   : > { %8444 = vmatpush1.bf16.msra.mxu0 %v11852_v33  ;;  %v11989_v33 = vld [vmem:[#allocation20 + $0x48] sm:$0xff]  }
 0x94d   : > { %8445 = vmatprep.subr.bf16.mxu0 %v11857_v34  ;;  %v11990_v34 = vld [vmem:[#allocation20 + $0x8] sm:$0xff]   ;;  %10677 = vmatprep.subr.bf16.mxu1 %v11989_v33 }
 0x94e   : > { %10678 = vmatpush3.bf16.msra.mxu1 %v11990_v34  ;;  %v11969_v33 = vld [vmem:[#allocation19 + $0x1a0] ss:$8 sps:$4 sm:$0xff]   ;;  %v11974_v34 = vld [vmem:[#allocation19 + $0x1b4] ss:$8 sps:$4 sm:$0xff]  }
 0x950   : > { %8446 = vmatpush1.bf16.msra.mxu0 %v11855_v31  ;;  %v11991_v31 = vld [vmem:[#allocation20 + $0x50] sm:$0xff]  }
 0x951   : > { %8447 = vmatprep.subr.bf16.mxu0 %v11860_v45  ;;  %v11992_v45 = vld [vmem:[#allocation20 + $0x10] sm:$0xff]   ;;  %10679 = vmatprep.subr.bf16.mxu1 %v11991_v31 }
 0x952   : > { %10680 = vmatpush3.bf16.msra.mxu1 %v11992_v45  ;;  %v11972_v31 = vld [vmem:[#allocation19 + $0x1b0] ss:$8 sps:$4 sm:$0xff]   ;;  %v11977_v45 = vld [vmem:[#allocation19 + $0x1c4] ss:$8 sps:$4 sm:$0xff]  }
 0x954   : > { %8448 = vmatpush1.bf16.msra.mxu0 %v11858_v46  ;;  %v11993_v46 = vld [vmem:[#allocation20 + $0x58] sm:$0xff]  }
 0x955   : > { %8449 = vmatprep.subr.bf16.mxu0 %v11863_v50  ;;  %v11994_v50 = vld [vmem:[#allocation20 + $0x18] sm:$0xff]   ;;  %10681 = vmatprep.subr.bf16.mxu1 %v11993_v46  ;;  %v11975_v46 = vld [vmem:[#allocation19 + $0x1c0] ss:$8 sps:$4 sm:$0xff]  }
 0x956   : > { %10682 = vmatpush3.bf16.msra.mxu1 %v11994_v50  ;;  %v11980_v50 = vld [vmem:[#allocation19 + $0x1d4] ss:$8 sps:$4 sm:$0xff]  }
 0x958   : > { %8450 = vmatpush1.bf16.msra.mxu0 %v11861_v51  ;;  %v11995_v51 = vld [vmem:[#allocation20 + $0x60] sm:$0xff]  }
 0x959   : > { %8451 = vmatprep.subr.bf16.mxu0 %v11866_v53  ;;  %v11996_v53 = vld [vmem:[#allocation20 + $0x20] sm:$0xff]   ;;  %10683 = vmatprep.subr.bf16.mxu1 %v11995_v51  ;;  %v11978_v51 = vld [vmem:[#allocation19 + $0x1d0] ss:$8 sps:$4 sm:$0xff]  }
 0x95a   : > { %10684 = vmatpush3.bf16.msra.mxu1 %v11996_v53 }
 0x95c   : > { %8452 = vmatpush1.bf16.msra.mxu0 %v11864_v60  ;;  %v11997_v60 = vld [vmem:[#allocation20 + $0x68] sm:$0xff]  }
 0x95d   : > { %8453 = vmatprep.subr.bf16.mxu0 %v11869_v43  ;;  %10685 = vmatprep.subr.bf16.mxu1 %v11997_v60  ;;  %v13504_v43 = vld [vmem:[%s13810_s9] sm:$0xf]  ;;  %v11983_v60 = vld [vmem:[#allocation19 + $0x1e4] ss:$8 sps:$4 sm:$0xff]   ;;  %s12592_s9 = smov [#allocation23]  }
 0x95e   : > { %v8055_v53 = vrot.slane %v13504_v43, %v13217_v37  ;;  %s12387_s14 = sshll.u32 %s12592_s9, 4  ;;  %s12388_s14 = int_to_ptr.vmem [resolvable:$false] %s12387_s14 }
 0x95f   : > { %s12389_s3 = scalar_lea.vmem %s12388_s14, 1024  ;;  %p12390_p10 = scmp.lt.s32.totalorder %s13521_s11, %s12388_s14 }
 0x960   : > { %8454 = vmatpush1.bf16.msra.mxu0 %v11867_v38  ;;  %v8047_v38 = vrot.slane %v13504_v43, %v13207_v23  ;;  %p12391_p1 = scmp.lt.s32.totalorder %s12389_s3, %s12383_s23 }
 0x961   : > { %8455 = vmatprep.subr.bf16.mxu0 %v11872_v25  ;;  %v8051_v25 = vrot.slane %v13504_v43, %v13210_v26 }
 0x962   : > { %p12392_p11 = por %p12391_p1, %p12390_p10 }
 0x964   : > { %8456 = vmatpush1.bf16.msra.mxu0 %v11870_v15  ;;  %p12393_p12 = pnand %p12392_p11, %p12386_p3 }
 0x965   : > { %8457 = vmatprep.subr.bf16.mxu0 %v11875_v4 }
 0x968   : > { %8458 = vmatpush1.bf16.msra.mxu0 %v11873_v0 }
 0x969   : > { %8459 = vmatprep.subr.bf16.mxu0 %v11878_v1 }
 0x96c   : > { %8460 = vmatpush1.bf16.msra.mxu0 %v11876_v2 }
 0x96d   : > { %8461 = vmatprep.subr.bf16.mxu0 %v11881_v48 }
 0x970   : > { %8462 = vmatpush1.bf16.msra.mxu0 %v11879_v54 }
 0x971   : > { %8463 = vmatprep.subr.bf16.mxu0 %v11884_v3 }
 0x974   : > { %8464 = vmatpush1.bf16.msra.mxu0 %v11882_v55 }
 0x975   : > { %8465 = vmatprep.subr.bf16.mxu0 %v11887_v56 }
 0x978   : > { %8466 = vmatpush1.bf16.msra.mxu0 %v11885_v62 }
 0x979   : > { %8467 = vmatprep.subr.bf16.mxu0 %v11890_v58 }
 0x97c   : > { %8468 = vmatpush1.bf16.msra.mxu0 %v11888_v6 }
 0x97d   : > { %8910 = vmatprep.subr.bf16.mxu0 %v11893_v59 }
 0x97f   : > { %8470 = vmatmul.mubr.bf16.vlgmr.msra.gmra.mrb[56].mxu0 %v13484_v14  ;;  %v11921_v14 = vld [vmem:[#allocation19 + $0xa0] ss:$8 sps:$4 sm:$0xff]  }
 0x980   : > { %8479 = vmatprep.mubr.bf16.mxu0 %v13494_v52  ;;  %8911 = vmatpush1.bf16.msra.mxu0 %v11891_v42  ;;  %v11941_v52 = vld [vmem:[#allocation19 + $0x104] ss:$8 sps:$4 sm:$0xff]  }
 0x981   : > { %8912 = vmatprep.subr.bf16.mxu0 %v11896_v63  ;;  %v11939_v63 = vld [vmem:[#allocation19 + $0x100] ss:$8 sps:$4 sm:$0xff]  }
 0x984   : > { %8913 = vmatpush1.bf16.msra.mxu0 %v11894_v7 }
 0x985   : > { %8914 = vmatprep.subr.bf16.mxu0 %v11899_v9 }
 0x987   : > { %8480 = vmatmul.mubr.bf16.gmra.mrb[60].mxu0 %v13491_v28  ;;  %v11936_v28 = vld [vmem:[#allocation19 + $0xf0] ss:$8 sps:$4 sm:$0xff]  }
 0x988   : > { %8915 = vmatpush1.bf16.msra.mxu0 %v11897_v10  ;;  %v11944_v10 = vld [vmem:[#allocation19 + $0x114] ss:$8 sps:$4 sm:$0xff]  }
 0x989   : > { %8916 = vmatprep.subr.bf16.mxu0 %v11902_v24 }
 0x98c   : > { %8917 = vmatpush1.bf16.msra.mxu0 %v11900_v11 }
 0x98d   : > { %8918 = vmatprep.subr.bf16.mxu0 %v11905_v61 }
 0x990   : > { %8919 = vmatpush1.bf16.msra.mxu0 %v11903_v57 }
 0x991   : > { %8920 = vmatprep.subr.bf16.mxu0 %v11908_v22 }
 0x994   : > { %8921 = vmatpush1.bf16.msra.mxu0 %v11906_v39  ;;  %v11942_v39 = vld [vmem:[#allocation19 + $0x110] ss:$8 sps:$4 sm:$0xff]  }
 0x995   : > { %8922 = vmatprep.subr.bf16.mxu0 %v11911_v13 }
 0x998   : > { %8923 = vmatpush1.bf16.msra.mxu0 %v11909_v41 }
 0x999   : > { %8924 = vmatprep.subr.bf16.mxu0 %v11914_v35  ;;  %v11947_v35 = vld [vmem:[#allocation19 + $0x124] ss:$8 sps:$4 sm:$0xff]  }
 0x99c   : > { %8925 = vmatpush1.bf16.msra.mxu0 %v11912_v12 }
 0x99d   : > { %8926 = vmatprep.subr.bf16.mxu0 %v11917_v17 }
 0x9a0   : > { %8927 = vmatpush1.bf16.msra.mxu0 %v11915_v44 }
 0x9a1   : > { %8928 = vmatprep.subr.bf16.mxu0 %v11920_v16 }
 0x9a4   : > { %8929 = vmatpush1.bf16.msra.mxu0 %v11918_v20  ;;  %v11945_v20 = vld [vmem:[#allocation19 + $0x120] ss:$8 sps:$4 sm:$0xff]  }
 0x9a5   : > { %8930 = vmatprep.subr.bf16.mxu0 %v11923_v49  ;;  %v11950_v49 = vld [vmem:[#allocation19 + $0x134] ss:$8 sps:$4 sm:$0xff]  }
 0x9a8   : > { %8931 = vmatpush1.bf16.msra.mxu0 %v11921_v14  ;;  %v11948_v14 = vld [vmem:[#allocation19 + $0x130] ss:$8 sps:$4 sm:$0xff]  }
 0x9a9   : > { %8932 = vmatprep.subr.bf16.mxu0 %v11926_v47  ;;  %v11953_v47 = vld [vmem:[#allocation19 + $0x144] ss:$8 sps:$4 sm:$0xff]  }
 0x9ac   : > { %8933 = vmatpush1.bf16.msra.mxu0 %v11924_v27  ;;  %v11951_v27 = vld [vmem:[#allocation19 + $0x140] ss:$8 sps:$4 sm:$0xff]  }
 0x9ad   : > { %8934 = vmatprep.subr.bf16.mxu0 %v11929_v19  ;;  %v11956_v19 = vld [vmem:[#allocation19 + $0x154] ss:$8 sps:$4 sm:$0xff]  }
 0x9b0   : > { %8935 = vmatpush1.bf16.msra.mxu0 %v11927_v5  ;;  %v11954_v5 = vld [vmem:[#allocation19 + $0x150] ss:$8 sps:$4 sm:$0xff]  }
 0x9b1   : > { %8936 = vmatprep.subr.bf16.mxu0 %v11932_v29  ;;  %v11959_v29 = vld [vmem:[#allocation19 + $0x164] ss:$8 sps:$4 sm:$0xff]  }
 0x9b4   : > { %8937 = vmatpush1.bf16.msra.mxu0 %v11930_v18  ;;  %v11957_v18 = vld [vmem:[#allocation19 + $0x160] ss:$8 sps:$4 sm:$0xff]  }
 0x9b5   : > { %8938 = vmatprep.subr.bf16.mxu0 %v11935_v8  ;;  %v11962_v8 = vld [vmem:[#allocation19 + $0x174] ss:$8 sps:$4 sm:$0xff]  }
 0x9b8   : > { %8939 = vmatpush1.bf16.msra.mxu0 %v11933_v30  ;;  %v11960_v30 = vld [vmem:[#allocation19 + $0x170] ss:$8 sps:$4 sm:$0xff]  }
 0x9b9   : > { %8940 = vmatprep.subr.bf16.mxu0 %v11938_v21  ;;  %v11965_v21 = vld [vmem:[#allocation19 + $0x184] ss:$8 sps:$4 sm:$0xff]  }
 0x9bc   : > { %8941 = vmatpush1.bf16.msra.mxu0 %v11936_v28  ;;  %v11963_v28 = vld [vmem:[#allocation19 + $0x180] ss:$8 sps:$4 sm:$0xff]  }
 0x9bd   : > { %8963 = vmatprep.subr.bf16.mxu0 %v11941_v52  ;;  %v11968_v52 = vld [vmem:[#allocation19 + $0x194] ss:$8 sps:$4 sm:$0xff]  }
 0xa12   : > { %v8418_v15 = vpop.f32.mrb[48].mxu0 }
 0xa13   : > { %v8419_v4 = vadd.f32 %v8418_v15, %v8047_v38  ;;  %v8420_v0 = vpop.f32.mrb[49].mxu0  ;;  %v11981_v15 = vld [vmem:[#allocation19 + $0x1e0] ss:$8 sps:$4 sm:$0xff]  }
 0xa14   : > { %v8421_v1 = vadd.f32 %v8420_v0, %v8051_v25  ;;  %v8422_v2 = vpop.f32.mrb[50].mxu0 }
 0xa15   : > { %v8423_v48 = vadd.f32 %v8422_v2, %v8047_v38  ;;  %v8424_v54 = vpop.f32.mrb[51].mxu0  ;;  %v8490_v55 = vmax.f32 %v8419_v4, 0.0 }
 0xa16   : > { %v8425_v3 = vadd.f32 %v8424_v54, %v8051_v25  ;;  %v8491_v62 = vmax.f32 %v8421_v1, 0.0  ;;  %v11986_v1 = vld [vmem:[#allocation19 + $0x1f4] ss:$8 sps:$4 sm:$0xff]  }
 0xa17   : > { %v8494_v56 = vmax.f32 %v8423_v48, 0.0 }
 0xa18   : > { %v8495_v58 = vmax.f32 %v8425_v3, 0.0 }
 0xa19   : > { %v8506_v6 = vpack.c.bf16 %v8494_v56, %v8490_v55  ;;  %v11984_v56 = vld [vmem:[#allocation19 + $0x1f0] ss:$8 sps:$4 sm:$0xff]  }
 0xa1a   : > { %v8507_v59 = vpack.c.bf16 %v8495_v58, %v8491_v62  ;;  %v8428_v42 = vpop.f32.mrb[52].mxu0 }
 0xa1b   : > { %v8429_v7 = vadd.f32 %v8428_v42, %v8047_v38  ;;  %v8430_v9 = vpop.f32.mrb[53].mxu0 }
 0xa1c   : > { %v8431_v24 = vadd.f32 %v8430_v9, %v8051_v25  ;;  %v8432_v11 = vpop.f32.mrb[54].mxu0  ;;  %8942 = vmatprep.mubr.bf16.mxu0 %v8507_v59 }
 0xa1d   : > { %v8433_v61 = vadd.f32 %v8432_v11, %v8047_v38  ;;  %v8434_v57 = vpop.f32.mrb[55].mxu0  ;;  %8943 = vmatmul.mubr.bf16.vlgmr.msra.gmra.mrb[64].mxu0 %v8506_v6  ;;  %v8498_v13 = vmax.f32 %v8429_v7, 0.0  ;;  %v8059_v38 = vrot.slane %v13504_v43, %v13220_v40 }
 0xa1e   : > { %v8435_v22 = vadd.f32 %v8434_v57, %v8051_v25  ;;  %8964 = vmatpush1.bf16.msra.mxu0 %v11939_v63  ;;  %v8499_v12 = vmax.f32 %v8431_v24, 0.0 }
 0xa1f   : > { %v8502_v41 = vmax.f32 %v8433_v61, 0.0  ;;  %8965 = vmatprep.subr.bf16.mxu0 %v11944_v10 }
 0xa20   : > { %v8503_v17 = vmax.f32 %v8435_v22, 0.0 }
 0xa21   : > { %v8510_v44 = vpack.c.bf16 %v8502_v41, %v8498_v13 }
 0xa22   : > { %v8511_v16 = vpack.c.bf16 %v8503_v17, %v8499_v12  ;;  %8966 = vmatpush1.bf16.msra.mxu0 %v11942_v39  ;;  %v11999_v12 = vld [vmem:[#allocation20 + $0x70] sm:$0xff]  }
 0xa23   : > { %8967 = vmatprep.subr.bf16.mxu0 %v11947_v35  ;;  %v11998_v35 = vld [vmem:[#allocation20 + $0x28] sm:$0xff]   ;;  %v12000_v17 = vld [vmem:[#allocation20 + $0x30] sm:$0xff]  }
 0xa24   : > { %8952 = vmatprep.mubr.bf16.mxu0 %v8511_v16  ;;  %10686 = vmatpush3.bf16.msra.mxu1 %v11998_v35  ;;  %v12002_v16 = vld [vmem:[#allocation20 + $0x38] sm:$0xff]  }
 0xa25   : > { %8953 = vmatmul.mubr.bf16.gmra.mrb[68].mxu0 %v8510_v44  ;;  %10687 = vmatprep.subr.bf16.mxu1 %v11999_v12  ;;  %v12001_v44 = vld [vmem:[#allocation20 + $0x78] sm:$0xff]  }
 0xa26   : > { %8968 = vmatpush1.bf16.msra.mxu0 %v11945_v20  ;;  %v8578_v20 = vld [vmem:[%s13811_s5] sm:$0x3] }
 0xa27   : > { %8969 = vmatprep.subr.bf16.mxu0 %v11950_v49  ;;  %v8583_v49 = vrot.slane %v8578_v20, %v13207_v23 }
 0xa28   : > { %10688 = vmatpush3.bf16.msra.mxu1 %v12000_v17 }
 0xa29   : > { %10689 = vmatprep.subr.bf16.mxu1 %v12001_v44 }
 0xa2a   : > { %8970 = vmatpush1.bf16.msra.mxu0 %v11948_v14  ;;  %v8587_v14 = vrot.slane %v8578_v20, %v13210_v26 }
 0xa2b   : > { %8971 = vmatprep.subr.bf16.mxu0 %v11953_v47 }
 0xa2c   : > { %10690 = vmatpush3.bf16.msra.mxu1 %v12002_v16 }
 0xa2e   : > { %8972 = vmatpush1.bf16.msra.mxu0 %v11951_v27 }
 0xa2f   : > { %8973 = vmatprep.subr.bf16.mxu0 %v11956_v19 }
 0xa32   : > { %8974 = vmatpush1.bf16.msra.mxu0 %v11954_v5 }
 0xa33   : > { %8975 = vmatprep.subr.bf16.mxu0 %v11959_v29 }
 0xa36   : > { %8976 = vmatpush1.bf16.msra.mxu0 %v11957_v18 }
 0xa37   : > { %8977 = vmatprep.subr.bf16.mxu0 %v11962_v8 }
 0xa3a   : > { %8978 = vmatpush1.bf16.msra.mxu0 %v11960_v30 }
 0xa3b   : > { %8979 = vmatprep.subr.bf16.mxu0 %v11965_v21 }
 0xa3e   : > { %8980 = vmatpush1.bf16.msra.mxu0 %v11963_v28 }
 0xa3f   : > { %8981 = vmatprep.subr.bf16.mxu0 %v11968_v52 }
 0xa42   : > { %8982 = vmatpush1.bf16.msra.mxu0 %v11966_v36 }
 0xa43   : > { %8983 = vmatprep.subr.bf16.mxu0 %v11971_v32 }
 0xa46   : > { %8984 = vmatpush1.bf16.msra.mxu0 %v11969_v33 }
 0xa47   : > { %8985 = vmatprep.subr.bf16.mxu0 %v11974_v34 }
 0xa4a   : > { %8986 = vmatpush1.bf16.msra.mxu0 %v11972_v31 }
 0xa4b   : > { %8987 = vmatprep.subr.bf16.mxu0 %v11977_v45 }
 0xa4e   : > { %8988 = vmatpush1.bf16.msra.mxu0 %v11975_v46 }
 0xa4f   : > { %8989 = vmatprep.subr.bf16.mxu0 %v11980_v50 }
 0xa52   : > { %v8471_v25 = vpop.f32.mrb[56].mxu0  ;;  %8990 = vmatpush1.bf16.msra.mxu0 %v11978_v51 }
 0xa53   : > { %v8472_v4 = vadd.f32 %v8471_v25, %v8055_v53  ;;  %v8473_v0 = vpop.f32.mrb[57].mxu0  ;;  %8991 = vmatprep.subr.bf16.mxu0 %v11983_v60 }
 0xa54   : > { %v8474_v2 = vadd.f32 %v8473_v0, %v8059_v38  ;;  %v8475_v48 = vpop.f32.mrb[58].mxu0 }
 0xa55   : > { %v8476_v54 = vadd.f32 %v8475_v48, %v8055_v53  ;;  %v8477_v3 = vpop.f32.mrb[59].mxu0  ;;  %v8492_v62 = vmax.f32 %v8472_v4, 0.0 }
 0xa56   : > { %v8478_v55 = vadd.f32 %v8477_v3, %v8059_v38  ;;  %8992 = vmatpush1.bf16.msra.mxu0 %v11981_v15  ;;  %v8493_v58 = vmax.f32 %v8474_v2, 0.0 }
 0xa57   : > { %v8496_v37 = vmax.f32 %v8476_v54, 0.0  ;;  %8993 = vmatprep.subr.bf16.mxu0 %v11986_v1 }
 0xa58   : > { %v8497_v6 = vmax.f32 %v8478_v55, 0.0 }
 0xa59   : > { %v8508_v40 = vpack.c.bf16 %v8496_v37, %v8492_v62 }
 0xa5a   : > { %v8509_v43 = vpack.c.bf16 %v8497_v6, %v8493_v58  ;;  %v8481_v59 = vpop.f32.mrb[60].mxu0  ;;  %8994 = vmatpush1.bf16.msra.mxu0 %v11984_v56 }
 0xa5b   : > { %v8482_v42 = vadd.f32 %v8481_v59, %v8055_v53  ;;  %v8483_v63 = vpop.f32.mrb[61].mxu0 }
 0xa5c   : > { %v8484_v7 = vadd.f32 %v8483_v63, %v8059_v38  ;;  %v8485_v9 = vpop.f32.mrb[62].mxu0  ;;  %8995 = vmatprep.mubr.bf16.mxu0 %v8509_v43 }
 0xa5d   : > { %v8486_v10 = vadd.f32 %v8485_v9, %v8055_v53  ;;  %v8487_v24 = vpop.f32.mrb[63].mxu0  ;;  %8996 = vmatmul.mubr.bf16.vlgmr.msra.gmra.mrb[64].mxu0 %v8508_v40  ;;  %v8500_v61 = vmax.f32 %v8482_v42, 0.0 }
 0xa5e   : > { %v8488_v11 = vadd.f32 %v8487_v24, %v8059_v38  ;;  %v8501_v22 = vmax.f32 %v8484_v7, 0.0 }
 0xa5f   : > { %v8504_v57 = vmax.f32 %v8486_v10, 0.0 }
 0xa60   : > { %v8505_v39 = vmax.f32 %v8488_v11, 0.0 }
 0xa61   : > { %v8512_v13 = vpack.c.bf16 %v8504_v57, %v8500_v61 }
 0xa62   : > { %v8513_v41 = vpack.c.bf16 %v8505_v39, %v8501_v22 }
 0xa64   : > { %9005 = vmatprep.mubr.bf16.mxu0 %v8513_v41 }
 0xa65   : > { %9006 = vmatmul.mubr.bf16.gmra.mrb[68].mxu0 %v8512_v13 }
 0xb30   : > { %v8997_v47 = vpop.f32.mrb[64].mxu0 }
 0xb31   : > { %v10767_v27 = vadd.f32 %v8997_v47, %v8583_v49  ;;  %v8999_v19 = vpop.f32.mrb[65].mxu0 }
 0xb32   : > { %v10768_v5 = vadd.f32 %v8999_v19, %v8587_v14  ;;  %v9001_v29 = vpop.f32.mrb[66].mxu0 }
 0xb33   : > { %v10769_v18 = vadd.f32 %v9001_v29, %v8583_v49  ;;  %v9003_v8 = vpop.f32.mrb[67].mxu0  ;;  %v9016_v21 = vmax.f32 %v10767_v27, 0.0 }
 0xb34   : > { %v10770_v30 = vadd.f32 %v9003_v8, %v8587_v14  ;;  %v9017_v52 = vmax.f32 %v10768_v5, 0.0 }
 0xb35   : > { %v9018_v28 = vmax.f32 %v10769_v18, 0.0 }
 0xb36   : > { %v9019_v36 = vmax.f32 %v10770_v30, 0.0 }
 0xb37   : > { %v9024_v32 = vpack.c.bf16 %v9018_v28, %v9016_v21 }
 0xb38   : > { %v9025_v33 = vpack.c.bf16 %v9019_v36, %v9017_v52  ;;  %v9007_v34 = vpop.f32.mrb[68].mxu0 }
 0xb39   : > { %v10771_v31 = vadd.f32 %v9007_v34, %v8583_v49  ;;  %v9009_v45 = vpop.f32.mrb[69].mxu0 }
 0xb3a   : > { %v10772_v23 = vadd.f32 %v9009_v45, %v8587_v14  ;;  %v9011_v26 = vpop.f32.mrb[70].mxu0  ;;  %9195 = vmatprep.mubr.bf16.mxu1 %v9025_v33 }
 0xb3b   : > { %v10773_v46 = vadd.f32 %v9011_v26, %v8583_v49  ;;  %v9013_v50 = vpop.f32.mrb[71].mxu0  ;;  %9196 = vmatmul.mubr.bf16.vlgmr.msra.gmra.mrb[64].mxu1 %v9024_v32  ;;  %v9020_v53 = vmax.f32 %v10771_v31, 0.0 }
 0xb3c   : > { %v10774_v51 = vadd.f32 %v9013_v50, %v8587_v14  ;;  %v9021_v38 = vmax.f32 %v10772_v23, 0.0 }
 0xb3d   : > { %v9022_v60 = vmax.f32 %v10773_v46, 0.0 }
 0xb3e   : > { %v9023_v25 = vmax.f32 %v10774_v51, 0.0 }
 0xb3f   : > { %v9026_v15 = vpack.c.bf16 %v9022_v60, %v9020_v53 }
 0xb40   : > { %v9027_v4 = vpack.c.bf16 %v9023_v25, %v9021_v38 }
 0xb42   : > { %9203 = vmatprep.mubr.bf16.mxu1 %v9027_v4 }
 0xb43   : > { %9204 = vmatmul.mubr.bf16.gmra.mrb[68].mxu1 %v9026_v15 }
 0xb44   : > { %12396 = shalt.err (!%p12393_p12)
}
 0xb45   : > { %s12397_s18 = scalar_lea.hbm %s13532_s8, 512  ;;  %s12401_s6 = scalar_lea.hbm %s13812_s10, 1024 }
 0xb46   : > { %p12398_p6 = scmp.ne.s32.totalorder %s13532_s8, %s12397_s18  ;;  %p12402_p9 = scmp.lt.u32.totalorder %s13532_s8, %s13812_s10 }
 0xb47   : > { %p12403_p0 = scmp.lt.u32.totalorder %s12401_s6, %s12397_s18  ;;  %p12405_p5 = scmp.lt.u32.totalorder %s12397_s18, %s13532_s8 }
 0xb48   : > { %p12399_p13 = pnand %p12398_p6, %p13814_p8 }
 0xb49   : > { %p12404_p2 = por %p12403_p0, %p12402_p9 }
 0xb4a   : > { %p12400_p7 = pneg %p12399_p13 }
 0xb4b   : > { %p12406_p4 = por %p12405_p5, %p12404_p2 }
 0xb4d   : > { %p12407_p3 = pnand %p12406_p4, %p12400_p7 }
 0xb4f   : > { %12410 = shalt.err (!%p12407_p3)
}
 0xb50   : > { %s12593_s23 = smov 128   ;;  %s12594_s9 = smov 8  }
 0xb51   : > { %10940 = dma.vmem_to_hbm [thread:$0]  (%p13814_p8), %s13521_s11, 512, %s13532_s8, %s13542_s7, %s12593_s23, %s12593_s23, %s12594_s9  }
 0xb52   : > { %s10671_s14 = sshll.u32 %s12741_s26, 10  ;;  %s13815_s5 = sld [smem:[#allocation59_spill]] }
 0xb53   : > { %s9270_s6 = sshll.u32 %s13479_s28, 4  ;;  %s9241_s19 = scalar_lea.sflag [#allocation4], %s13118_s29  ;;  %s13576_s6 = int_to_ptr.vmem [resolvable:$true] %s9270_s6 }
 0xb54   : > { %s12411_s27 = scalar_lea.vmem %s13576_s6, 1024  ;;  %s12595_s10 = smov [#allocation22]  }
 0xb55   : > { %p12412_p10 = scmp.ne.s32.totalorder %s13576_s6, %s12411_s27  ;;  %s12415_s11 = sshll.u32 %s12595_s10, 4  ;;  %s12416_s11 = int_to_ptr.vmem [resolvable:$false] %s12415_s11 }
 0xb56   : > { %s12417_s26 = scalar_lea.vmem %s12416_s11, 2048  ;;  %p12418_p12 = scmp.lt.s32.totalorder %s13576_s6, %s12416_s11 }
 0xb57   : > { %p12413_p1 = pnand %p12412_p10, %p13814_p8  ;;  %p12419_p6 = scmp.lt.s32.totalorder %s12417_s26, %s12411_s27 }
 0xb58   : > { %s13573_s0 = scalar_lea.hbm %s13815_s5, %s10671_s14 }
 0xb59   : > { %p12414_p11 = pneg %p12413_p1  ;;  %p12420_p13 = por %p12419_p6, %p12418_p12 }
 0xb5b   : > { %p12421_p7 = pnand %p12420_p13, %p12414_p11 }
 0xb5d   : > { %12424 = shalt.err (!%p12421_p7)
}
 0xb5e   : > { %s12425_s28 = scalar_lea.hbm %s13573_s0, 1024  ;;  %s12429_s10 = scalar_lea.hbm %s13815_s5, 2048 }
 0xb5f   : > { %p12426_p9 = scmp.ne.s32.totalorder %s13573_s0, %s12425_s28  ;;  %p12430_p5 = scmp.lt.u32.totalorder %s13573_s0, %s13815_s5 }
 0xb60   : > { %p12431_p4 = scmp.lt.u32.totalorder %s12429_s10, %s12425_s28  ;;  %p12433_p10 = scmp.lt.u32.totalorder %s12425_s28, %s13573_s0 }
 0xb61   : > { %p12427_p0 = pnand %p12426_p9, %p13814_p8 }
 0xb62   : > { %p12432_p3 = por %p12431_p4, %p12430_p5 }
 0xb63   : > { %p12428_p2 = pneg %p12427_p0 }
 0xb64   : > { %p12434_p1 = por %p12433_p10, %p12432_p3 }
 0xb66   : > { %p12435_p11 = pnand %p12434_p1, %p12428_p2 }
 0xb68   : > { %12438 = shalt.err (!%p12435_p11)
}
 0xb69   : > { %s12596_s27 = smov 256   ;;  %s12597_s11 = smov 16  }
 0xb6a   : > { %10939 = dma.vmem_to_hbm [thread:$0]  (%p13814_p8), %s13576_s6, 1024, %s13573_s0, %s9241_s19, %s12596_s27, %s12596_s27, %s12597_s11  }
 0xb6b   : > { %s12439_s26 = scalar_lea.vmem %s13523_s12, 512  ;;  %s12598_s28 = smov [#allocation25]  }
 0xb6c   : > { %p12440_p12 = scmp.ne.s32.totalorder %s13523_s12, %s12439_s26  ;;  %s12443_s8 = sshll.u32 %s12598_s28, 4  ;;  %s12444_s8 = int_to_ptr.vmem [resolvable:$false] %s12443_s8 }
 0xb6d   : > { %s12445_s14 = scalar_lea.vmem %s12444_s8, 1024  ;;  %p12446_p7 = scmp.lt.s32.totalorder %s13523_s12, %s12444_s8 }
 0xb6e   : > { %p12441_p6 = pnand %p12440_p12, %p13814_p8  ;;  %p12447_p9 = scmp.lt.s32.totalorder %s12445_s14, %s12439_s26 }
 0xb70   : > { %p12442_p13 = pneg %p12441_p6  ;;  %p12448_p0 = por %p12447_p9, %p12446_p7 }
 0xb72   : > { %p12449_p2 = pnand %p12448_p0, %p12442_p13 }
 0xb74   : > { %12452 = shalt.err (!%p12449_p2)
}
 0xb75   : > { %s12453_s0 = scalar_lea.hbm %s13538_s22, 512  ;;  %s12457_s10 = scalar_lea.hbm %s13813_s1, 1024 }
 0xb76   : > { %p12454_p5 = scmp.ne.s32.totalorder %s13538_s22, %s12453_s0  ;;  %p12458_p10 = scmp.lt.u32.totalorder %s13538_s22, %s13813_s1 }
 0xb77   : > { %p12459_p1 = scmp.lt.u32.totalorder %s12457_s10, %s12453_s0  ;;  %p12461_p12 = scmp.lt.u32.totalorder %s12453_s0, %s13538_s22 }
 0xb78   : > { %p12455_p4 = pnand %p12454_p5, %p13814_p8 }
 0xb79   : > { %p12460_p11 = por %p12459_p1, %p12458_p10 }
 0xb7a   : > { %p12456_p3 = pneg %p12455_p4 }
 0xb7b   : > { %p12462_p6 = por %p12461_p12, %p12460_p11 }
 0xb7d   : > { %p12463_p13 = pnand %p12462_p6, %p12456_p3 }
 0xb7f   : > { %12466 = shalt.err (!%p12463_p13)
}
 0xb80   : > { %10941 = dma.vmem_to_hbm [thread:$0]  (%p13814_p8), %s13523_s12, 512, %s13538_s22, %s13542_s7, %s12593_s23, %s12593_s23, %s12594_s9  }
 0xb81   : > { %s13816_s26 = sld [smem:[#allocation58_spill]]  ;;  %s940_s12 = scalar_lea.vmem [#allocation26], %s13132_s2 }
 0xb82   : > { %s9318_s22 = sshll.u32 %s940_s12, 4  ;;  %s13817_s8 = sld [smem:[#allocation62_spill]]  ;;  %s13637_s22 = int_to_ptr.vmem [resolvable:$true] %s9318_s22 }
 0xb83   : > { %s9256_s0 = scalar_lea.sflag [#allocation27], %s13118_s29  ;;  %s12467_s2 = scalar_lea.vmem %s13637_s22, 512 }
 0xb84   : > { %p12468_p7 = scmp.ne.s32.totalorder %s13637_s22, %s12467_s2  ;;  %s12599_s6 = smov [#allocation26]  }
 0xb85   : > { %s12471_s19 = sshll.u32 %s12599_s6, 4  ;;  %s12472_s19 = int_to_ptr.vmem [resolvable:$false] %s12471_s19 }
 0xb86   : > { %p12469_p9 = pnand %p12468_p7, %p13814_p8  ;;  %s12473_s10 = scalar_lea.vmem %s12472_s19, 1024 }
 0xb87   : > { %v10631_v1 = vld [vmem:[%s13816_s26] ss:$0 sm:$0xff]  ;;  %p12474_p2 = scmp.lt.s32.totalorder %s13637_s22, %s12472_s19  ;;  %p12475_p5 = scmp.lt.s32.totalorder %s12473_s10, %s12467_s2 }
 0xb88   : > { %s13635_s14 = scalar_lea.hbm %s13817_s8, %s13526_s16  ;;  %p12470_p0 = pneg %p12469_p9 }
 0xb89   : > { %p12476_p4 = por %p12475_p5, %p12474_p2 }
 0xb8b   : > { %p12477_p3 = pnand %p12476_p4, %p12470_p0 }
 0xc0e   : > { %v10691_v0 = vpop.f32.mrb[64].mxu1 }
 0xc0f   : > { %v10692_v2 = vpop.f32.mrb[65].mxu1 }
 0xc10   : > { %v10693_v48 = vadd.f32 %v10692_v2, %v10691_v0  ;;  %v10694_v54 = vpop.f32.mrb[66].mxu1 }
 0xc11   : > { %v10695_v3 = vpop.f32.mrb[67].mxu1 }
 0xc12   : > { %v9198_v55 = vadd.f32 %v10693_v48, %v10631_v1  ;;  %v10696_v56 = vadd.f32 %v10695_v3, %v10694_v54 }
 0xc14   : > { %v10648_v62 = vmul.f32 -1.442695, %v9198_v55  ;;  %v9201_v37 = vadd.f32 %v10696_v56, %v10631_v1 }
 0xc16   : > { %12027 = vpow2.f32 %v10648_v62  ;;  %v10649_v58 = vmul.f32 -1.442695, %v9201_v37  ;;  %v10697_v6 = vpop.f32.mrb[68].mxu1 }
 0xc17   : > { %v10698_v40 = vpop.f32.mrb[69].mxu1 }
 0xc18   : > { %12029 = vpow2.f32 %v10649_v58  ;;  %v10699_v43 = vadd.f32 %v10698_v40, %v10697_v6  ;;  %v10700_v59 = vpop.f32.mrb[70].mxu1 }
 0xc19   : > { %v10701_v42 = vpop.f32.mrb[71].mxu1 }
 0xc1a   : > { %v9206_v63 = vadd.f32 %v10699_v43, %v10631_v1  ;;  %v10702_v7 = vadd.f32 %v10701_v42, %v10700_v59 }
 0xc1c   : > { %v10650_v9 = vmul.f32 -1.442695, %v9206_v63  ;;  %v9209_v10 = vadd.f32 %v10702_v7, %v10631_v1 }
 0xc1e   : > { %12031 = vpow2.f32 %v10650_v9  ;;  %v10651_v24 = vmul.f32 -1.442695, %v9209_v10 }
 0xc20   : > { %v12028_v11 = vpop.eup %12027  ;;  %12033 = vpow2.f32 %v10651_v24 }
 0xc21   : > { %v9224_v61 = vadd.f32 1.0, %v12028_v11 }
 0xc22   : > { %v12030_v57 = vpop.eup %12029 }
 0xc23   : > { %12035 = vrcp.f32 %v9224_v61  ;;  %v9225_v22 = vadd.f32 1.0, %v12030_v57 }
 0xc25   : > { %12037 = vrcp.f32 %v9225_v22 }
 0xc28   : > { %v12032_v39 = vpop.eup %12031 }
 0xc29   : > { %v9226_v13 = vadd.f32 1.0, %v12032_v39 }
 0xc2a   : > { %v12034_v41 = vpop.eup %12033 }
 0xc2b   : > { %12039 = vrcp.f32 %v9226_v13  ;;  %v9227_v35 = vadd.f32 1.0, %v12034_v41 }
 0xc2d   : > { %v12036_v12 = vpop.eup %12035  ;;  %12041 = vrcp.f32 %v9227_v35 }
 0xc2e   : > { %9236 = vst [vmem:[%s940_s12] sm:$0xff] %v12036_v12 }
 0xc2f   : > { %v12038_v17 = vpop.eup %12037 }
 0xc30   : > { %9237 = vst [vmem:[%s940_s12 + $0x8] sm:$0xff] %v12038_v17 }
 0xc35   : > { %v12040_v44 = vpop.eup %12039 }
 0xc36   : > { %9238 = vst [vmem:[%s940_s12 + $0x10] sm:$0xff] %v12040_v44 }
 0xc37   : > { %v12042_v16 = vpop.eup %12041 }
 0xc38   : > { %9239 = vst [vmem:[%s940_s12 + $0x18] sm:$0xff] %v12042_v16 }
 0xc39   : > { %12480 = shalt.err (!%p12477_p3)
}
 0xc3a   : > { %s12481_s16 = scalar_lea.hbm %s13635_s14, 512  ;;  %s12485_s27 = scalar_lea.hbm %s13817_s8, 1024 }
 0xc3b   : > { %p12482_p10 = scmp.ne.s32.totalorder %s13635_s14, %s12481_s16  ;;  %p12486_p12 = scmp.lt.u32.totalorder %s13635_s14, %s13817_s8 }
 0xc3c   : > { %p12487_p6 = scmp.lt.u32.totalorder %s12485_s27, %s12481_s16  ;;  %p12489_p7 = scmp.lt.u32.totalorder %s12481_s16, %s13635_s14 }
 0xc3d   : > { %p12483_p1 = pnand %p12482_p10, %p13814_p8 }
 0xc3e   : > { %p12488_p13 = por %p12487_p6, %p12486_p12 }
 0xc3f   : > { %p12484_p11 = pneg %p12483_p1 }
 0xc40   : > { %p12490_p9 = por %p12489_p7, %p12488_p13 }
 0xc42   : > { %p12491_p0 = pnand %p12490_p9, %p12484_p11 }
 0xc44   : > { %12494 = shalt.err (!%p12491_p0)
}
 0xc45   : > { %10942 = dma.vmem_to_hbm [thread:$0]  (%p13814_p8), %s13637_s22, 512, %s13635_s14, %s9256_s0, %s12593_s23, %s12593_s23, %s12594_s9  }
 0xc46 PF: > { %s9333_s12 = sand.u32 1, %s12557_s4   ;;  %p13818_p2 = scmp.ne.s32.totalorder %s13787_s21, 0 }
 0xc47   : > { %p13819_p5 = scmp.ge.s32.totalorder %s12569_s25, 2  ;;  %s9334_s7 = scalar_lea.sflag [#allocation4], %s9333_s12 }
 0xc49   : > { %p10986_p4 = pnand %p13819_p5, %p13818_p2 }
 0xc4b   : > { %12544 = dma.done.wait (!%p10986_p4), %s9334_s7, 1024  }
 0xc4c   : > { %12546 = vsyncadd (!%p10986_p4), %s9334_s7, 4294966272  ;;  %s13820_s17 = sadd.s32 4294967294, %s12569_s25  }
 0xc4d   : > { %s9342_s28 = sand.u32 1, %s13820_s17  }
 0xc4e   : > { %s9343_s2 = scalar_lea.sflag [#allocation24], %s9342_s28 }
 0xc4f   : > { %12548 = dma.done.wait (!%p10986_p4), %s9343_s2, 1024  }
 0xc50   : > { %12550 = vsyncadd (!%p10986_p4), %s9343_s2, 4294966272  ;;  %s9361_s29 = scalar_lea.sflag [#allocation27], %s9333_s12 }
 0xc51   : > { %12552 = dma.done.wait (!%p10986_p4), %s9361_s29, 512  }
 0xc52   : > { %12554 = vsyncadd (!%p10986_p4), %s9361_s29, 4294966784  ;;  %p51_p8 = scmp.ge.s32.totalorder %s12988_s13, 4   ;;  %s13821_s4 = smov %s12561_s30 }
 0xc53   : > { %s13822_s30 = smov %s12565_s24  ;;  %s13823_s24 = smov %s12999_s15 }
 0xc54   : > { %s13824_s25 = smov %s12988_s13  ;;  %53 = sbr.rel (!%p51_p8) target bundleno = 41 (0x29), region = 247 }
 0xc5b   :  { %9366 = vsyncpa [#allocation3], 1 }
 0xc5c   :  { %9368 = vsyncpa [#allocation3 + $0x1], 1 }
 0xc5d   :  { %9369 = vsyncpa [#allocation6], 1 }
 0xc5e   :  { %9371 = vsyncpa [#allocation6 + $0x1], 1 }
 0xc5f   :  { %9372 = vsyncpa [#allocation9], 1 }
 0xc60   :  { %9373 = vsyncpa [#allocation12], 1 }
 0xc61   :  { %9374 = vsyncpa [#allocation15], 1 }
 0xc62   :  { %9375 = vsyncpa [#allocation18], 1 }
 0xc63   :  { %9376 = vsyncpa [#allocation21], 1 }
 0xc64   :  { %9377 = vsyncpa [#allocation4], 1 }
 0xc65   :  { %9379 = vsyncpa [#allocation4 + $0x1], 1 }
 0xc66   :  { %9380 = vsyncpa [#allocation24], 1 }
 0xc67   :  { %9382 = vsyncpa [#allocation24 + $0x1], 1 }
 0xc68   :  { %9383 = vsyncpa [#allocation27], 1 }
 0xc69   :  { %9385 = vsyncpa [#allocation27 + $0x1], 1 }

</bundles_post_ra>
